<compile_context>
chip_gen: v7x
topology: tpu7x:2x2x1
jax: 0.10.0
libtpu: 0.0.40
codegen_flags: <defaults>
</compile_context>

<pallas_src>
import functools

import jax
import jax.numpy as jnp
from jax import lax
from jax.experimental import pallas as pl
from jax.experimental.pallas import tpu as pltpu

LRELU_SLOPE = 0.2
IN_EPS = 1e-5                    # nn.InstanceNorm2d default eps (affine=False)
VMEM_LIMIT = 48 * 1024 * 1024    # safe on v5e/v6e (128 MiB) and v7x (64 MiB)
TP_TARGET = 128                  # target spatial rows (P) per grid step

# Static per-block normalization flags (kept OUT of the jitted pytree so they
# stay Python bools — this fixes the TracerBoolConversionError).
BLOCK_NORM = (False, True, True, True)


def _leaky_relu(y):
    return jnp.where(y >= 0.0, y, LRELU_SLOPE * y)


def _choose_tp(P, target=TP_TARGET):
    """Largest P-tile <= target that divides P and is a multiple of 8."""
    if P <= target:
        return P
    for tp in range(target, 7, -1):
        if P % tp == 0 and tp % 8 == 0:
            return tp
    return P


# ---------------------------------------------------------------------------
# Pallas kernel: fused (conv-as-GEMM) [+ bias] [+ InstanceNorm] [+ LeakyReLU]
# grid = (batch, num_p_tiles)
#   x_ref : (1, tp, K)    bf16 im2col patches of one P-tile of one sample
#   w_ref : (K, Cout)     bf16 weight matrix (grid-invariant)
#   b_ref : (1, Cout)     f32 bias (present only when add_bias)
#   o_ref : (1, tp, Cout) per-tile output            (norm=False)
#           (1, P,  Cout) resident per-sample output (norm=True, num_p > 1)
#   sum_ref / sumsq_ref : (1, Cout) f32 VMEM scratch (norm=True, num_p > 1)
# ---------------------------------------------------------------------------
def _conv_block_kernel(*refs, norm, act, add_bias, tp, num_p):
    it = iter(refs)
    x_ref = next(it)
    w_ref = next(it)
    b_ref = next(it) if add_bias else None
    o_ref = next(it)
    if norm and num_p > 1:
        sum_ref = next(it)
        sumsq_ref = next(it)

    # MXU: bf16 x bf16 with f32 accumulation.
    y = jnp.dot(x_ref[0], w_ref[...], preferred_element_type=jnp.float32)
    if add_bias:
        y = y + b_ref[...].astype(jnp.float32)

    if not norm:
        if act:
            y = _leaky_relu(y)
        o_ref[0] = y.astype(o_ref.dtype)
        return

    if num_p == 1:
        # Whole sample in one tile: one-pass InstanceNorm fully in f32.
        n_pos = y.shape[0]
        mean = jnp.sum(y, axis=0, keepdims=True) / n_pos
        var = jnp.sum(y * y, axis=0, keepdims=True) / n_pos - mean * mean
        y = (y - mean) * lax.rsqrt(var + IN_EPS)
        if act:
            y = _leaky_relu(y)
        o_ref[0] = y.astype(o_ref.dtype)
        return

    # Multi-tile InstanceNorm: accumulate per-channel sum / sum-of-squares
    # across the (arbitrary) P axis, stash raw GEMM rows into the resident
    # output block, normalize the whole block on the last P step.
    p = pl.program_id(1)

    @pl.when(p == 0)
    def _():
        sum_ref[...] = jnp.zeros_like(sum_ref)
        sumsq_ref[...] = jnp.zeros_like(sumsq_ref)

    sum_ref[...] += jnp.sum(y, axis=0, keepdims=True)
    sumsq_ref[...] += jnp.sum(y * y, axis=0, keepdims=True)
    row0 = pl.multiple_of(p * tp, tp)
    o_ref[0, pl.ds(row0, tp), :] = y.astype(o_ref.dtype)

    @pl.when(p == pl.num_programs(1) - 1)
    def _():
        z = o_ref[0].astype(jnp.float32)             # (P, Cout)
        n_pos = z.shape[0]
        mean = sum_ref[...] / n_pos                  # (1, Cout)
        var = sumsq_ref[...] / n_pos - mean * mean
        z = (z - mean) * lax.rsqrt(var + IN_EPS)
        if act:
            z = _leaky_relu(z)
        o_ref[0] = z.astype(o_ref.dtype)


def conv_block(patches, w_mat, bias, *, norm, act, out_dtype):
    N, P, K = patches.shape
    Cout = w_mat.shape[1]
    add_bias = bias is not None

    tp = _choose_tp(P)
    num_p = P // tp

    inputs = [patches, w_mat]
    in_specs = [
        pl.BlockSpec((1, tp, K), lambda n, p: (n, p, 0)),
        pl.BlockSpec((K, Cout), lambda n, p: (0, 0)),
    ]
    if add_bias:
        inputs.append(bias.reshape(1, Cout).astype(jnp.float32))
        in_specs.append(pl.BlockSpec((1, Cout), lambda n, p: (0, 0)))

    if norm and num_p > 1:
        out_spec = pl.BlockSpec((1, P, Cout), lambda n, p: (n, 0, 0))
        scratch = [pltpu.VMEM((1, Cout), jnp.float32),
                   pltpu.VMEM((1, Cout), jnp.float32)]
        semantics = ("parallel", "arbitrary")
    else:
        out_spec = pl.BlockSpec((1, tp, Cout), lambda n, p: (n, p, 0))
        scratch = []
        semantics = ("parallel", "parallel")

    kernel = functools.partial(_conv_block_kernel, norm=norm, act=act,
                               add_bias=add_bias, tp=tp, num_p=num_p)
    return pl.pallas_call(
        kernel,
        out_shape=jax.ShapeDtypeStruct((N, P, Cout), out_dtype),
        grid=(N, num_p),
        in_specs=in_specs,
        out_specs=out_spec,
        scratch_shapes=scratch,
        compiler_params=pltpu.CompilerParams(
            dimension_semantics=semantics,
            vmem_limit_bytes=VMEM_LIMIT,
        ),
    )(*inputs)


# ---------------------------------------------------------------------------
# Plain-JAX glue: im2col patch extraction (bf16) + weight reshaping.
# ---------------------------------------------------------------------------
def im2col(x_nhwc, kh, kw, stride, pad_h, pad_w):
    x = jnp.pad(x_nhwc, ((0, 0), pad_h, pad_w, (0, 0)))
    N, H, W, C = x.shape
    oh = (H - kh) // stride + 1
    ow = (W - kw) // stride + 1
    cols = []
    for i in range(kh):
        for j in range(kw):
            cols.append(
                x[:, i:i + (oh - 1) * stride + 1:stride,
                     j:j + (ow - 1) * stride + 1:stride, :]
            )
    p = jnp.stack(cols, axis=3)            # (N, oh, ow, kh*kw, C)
    return p.reshape(N, oh * ow, kh * kw * C), oh, ow


def w_to_mat(w_oihw):
    # (Cout, Cin, kh, kw) -> (kh*kw*Cin, Cout), matching im2col feature order.
    Cout, Cin, kh, kw = w_oihw.shape
    return jnp.transpose(w_oihw, (2, 3, 1, 0)).reshape(kh * kw * Cin, Cout)


def apply_layer(x_nhwc, w, b, *, stride, pad_h, pad_w, norm, act, out_dtype):
    patches, oh, ow = im2col(x_nhwc.astype(jnp.bfloat16),
                             w.shape[2], w.shape[3], stride, pad_h, pad_w)
    w_mat = w_to_mat(w).astype(jnp.bfloat16)
    # Bias before InstanceNorm is mathematically a no-op (mean is subtracted),
    # so it is skipped for normalized layers.
    bias = b if ((b is not None) and (not norm)) else None
    out = conv_block(patches, w_mat, bias, norm=norm, act=act, out_dtype=out_dtype)
    return out.reshape(x_nhwc.shape[0], oh, ow, w.shape[0])


# ---------------------------------------------------------------------------
# Discriminator: params + forward
# ---------------------------------------------------------------------------
def init_params(key, in_channels=3):
    blocks = [
        (in_channels * 2, 64),
        (64, 128),
        (128, 256),
        (256, 512),
    ]
    keys = jax.random.split(key, len(blocks) + 1)
    params = []
    for k, (cin, cout) in zip(keys[:-1], blocks):
        kw_, kb_ = jax.random.split(k)
        w = 0.05 * jax.random.normal(kw_, (cout, cin, 4, 4), jnp.float32)
        b = 0.05 * jax.random.normal(kb_, (cout,), jnp.float32)
        params.append((w, b))
    w_final = 0.05 * jax.random.normal(keys[-1], (1, 512, 4, 4), jnp.float32)  # bias=False
    return params, w_final


def discriminator_forward(img_A, img_B, params, w_final):
    # img_A, img_B: NCHW  ->  torch.cat((A, B), dim=1)
    x = jnp.concatenate([img_A, img_B], axis=1)
    x = jnp.transpose(x, (0, 2, 3, 1))  # -> NHWC
    for (w, b), norm in zip(params, BLOCK_NORM):
        x = apply_layer(x, w, b, stride=2, pad_h=(1, 1), pad_w=(1, 1),
                        norm=norm, act=True, out_dtype=jnp.bfloat16)
    # nn.ZeroPad2d((1, 0, 1, 0)): left=1, right=0, top=1, bottom=0
    x = jnp.pad(x, ((0, 0), (1, 0), (1, 0), (0, 0)))
    # final Conv2d(512, 1, kernel_size=4, padding=1, bias=False)
    x = apply_layer(x, w_final, None, stride=1, pad_h=(1, 1), pad_w=(1, 1),
                    norm=False, act=False, out_dtype=jnp.float32)
    return jnp.transpose(x, (0, 3, 1, 2))  # -> NCHW


# Pure-JAX reference with the same dtype policy (bf16 matmul inputs / bf16
# layer boundaries, f32 accumulation) so it can be compared tightly.
def reference_forward(img_A, img_B, params, w_final):
    x = jnp.concatenate([img_A, img_B], axis=1).astype(jnp.float32)
    for (w, b), norm in zip(params, BLOCK_NORM):
        x = lax.conv_general_dilated(
            x.astype(jnp.bfloat16), w.astype(jnp.bfloat16), (2, 2),
            ((1, 1), (1, 1)), dimension_numbers=("NCHW", "OIHW", "NCHW"),
            preferred_element_type=jnp.float32)
        if norm:
            mean = jnp.mean(x, axis=(2, 3), keepdims=True)
            var = jnp.mean(jnp.square(x - mean), axis=(2, 3), keepdims=True)
            x = (x - mean) * lax.rsqrt(var + IN_EPS)
        else:
            x = x + b.reshape(1, -1, 1, 1)
        x = jnp.where(x >= 0.0, x, LRELU_SLOPE * x)
        x = x.astype(jnp.bfloat16).astype(jnp.float32)   # mirror bf16 boundary
    x = jnp.pad(x, ((0, 0), (0, 0), (1, 0), (1, 0)))
    x = lax.conv_general_dilated(
        x.astype(jnp.bfloat16), w_final.astype(jnp.bfloat16), (1, 1),
        ((1, 1), (1, 1)), dimension_numbers=("NCHW", "OIHW", "NCHW"),
        preferred_element_type=jnp.float32)
    return x


if __name__ == "__main__":
    key = jax.random.PRNGKey(0)
    k_params, k_a, k_b = jax.random.split(key, 3)

    batch, in_channels, spatial = 2, 3, 32
    img_A = jax.random.normal(k_a, (batch, in_channels, spatial, spatial), jnp.float32)
    img_B = jax.random.normal(k_b, (batch, in_channels, spatial, spatial), jnp.float32)

    params, w_final = init_params(k_params, in_channels=in_channels)

    out = jax.jit(discriminator_forward)(img_A, img_B, params, w_final)
    out = jax.block_until_ready(out)

    ref = jax.block_until_ready(reference_forward(img_A, img_B, params, w_final))
    assert out.shape == ref.shape == (batch, 1, spatial // 16, spatial // 16), out.shape
    max_err = float(jnp.max(jnp.abs(out - ref)))
    assert jnp.allclose(out, ref, atol=1e-1, rtol=1e-1), max_err

    print("KERNEL_OK")
</pallas_src>

<mosaic_0001>
module attributes {stable_mosaic.version = 11 : i64} {
  func.func @_conv_block_kernel(%arg0: i32, %arg1: i32, %arg2: memref<1x128x96xbf16, #tpu.memory_space<vmem>>, %arg3: memref<96x64xbf16, #tpu.memory_space<vmem>>, %arg4: memref<1x64xf32, #tpu.memory_space<vmem>>, %arg5: memref<1x128x64xbf16, #tpu.memory_space<vmem>>) attributes {dimension_semantics = [#tpu.dimension_semantics<parallel>, #tpu.dimension_semantics<parallel>], iteration_bounds = array<i64: 2, 2>, scalar_prefetch = 0 : i64, scratch_operands = 0 : i64, tpu.core_type = #tpu.core_type<tc>, window_params = [{transform_indices = @transform_0, window_bounds = array<i64: 1, 128, 96>}, {pipeline_mode = #tpu.pipeline_mode<synchronous>, transform_indices = @transform_1, window_bounds = array<i64: 96, 64>}, {pipeline_mode = #tpu.pipeline_mode<synchronous>, transform_indices = @transform_2, window_bounds = array<i64: 1, 64>}, {transform_indices = @transform_3, window_bounds = array<i64: 1, 128, 64>}]} {
    %c0 = arith.constant 0 : index
    %c0_0 = arith.constant 0 : index
    %c0_1 = arith.constant 0 : index
    %0 = vector.load %arg2[%c0, %c0_0, %c0_1] : memref<1x128x96xbf16, #tpu.memory_space<vmem>>, vector<1x128x96xbf16>
    %1 = vector.shape_cast %0 : vector<1x128x96xbf16> to vector<128x96xbf16>
    %c0_2 = arith.constant 0 : index
    %c0_3 = arith.constant 0 : index
    %2 = vector.load %arg3[%c0_2, %c0_3] : memref<96x64xbf16, #tpu.memory_space<vmem>>, vector<96x64xbf16>
    %cst = arith.constant dense<0.000000e+00> : vector<128x64xf32>
    %3 = tpu.matmul %1, %2, %cst {dimension_numbers = #tpu.dot_dimension_numbers<[1], [0], [0], [1], [0, 0, 1, 1], [], []>} : vector<128x96xbf16>, vector<96x64xbf16>, vector<128x64xf32> -> vector<128x64xf32>
    %c0_4 = arith.constant 0 : index
    %c0_5 = arith.constant 0 : index
    %4 = vector.load %arg4[%c0_4, %c0_5] : memref<1x64xf32, #tpu.memory_space<vmem>>, vector<1x64xf32>
    %5 = vector.broadcast %4 : vector<1x64xf32> to vector<128x64xf32>
    %6 = arith.addf %3, %5 : vector<128x64xf32>
    %cst_6 = arith.constant 0.000000e+00 : f32
    %7 = vector.broadcast %cst_6 : f32 to vector<128x64xf32>
    %8 = arith.cmpf oge, %6, %7 : vector<128x64xf32>
    %cst_7 = arith.constant 2.000000e-01 : f32
    %9 = vector.broadcast %cst_7 : f32 to vector<128x64xf32>
    %10 = arith.mulf %9, %6 : vector<128x64xf32>
    %11 = arith.select %8, %6, %10 : vector<128x64xi1>, vector<128x64xf32>
    %12 = arith.truncf %11 : vector<128x64xf32> to vector<128x64xbf16>
    %c0_8 = arith.constant 0 : index
    %c0_9 = arith.constant 0 : index
    %c0_10 = arith.constant 0 : index
    %13 = vector.load %arg5[%c0_8, %c0_9, %c0_10] : memref<1x128x64xbf16, #tpu.memory_space<vmem>>, vector<1x128x64xbf16>
    %14 = vector.shape_cast %13 : vector<1x128x64xbf16> to vector<128x64xbf16>
    %15 = vector.shape_cast %12 : vector<128x64xbf16> to vector<1x128x64xbf16>
    tpu.vector_store %arg5[%c0_8, %c0_9, %c0_10], %15 {strides = array<i32>} : memref<1x128x64xbf16, #tpu.memory_space<vmem>>, vector<1x128x64xbf16>,
    return
  }
  func.func @transform_0(%arg0: i32, %arg1: i32) -> (i32, i32, i32) {
    %c0_i32 = arith.constant 0 : i32
    %c0_i32_0 = arith.constant 0 : i32
    return %arg0, %arg1, %c0_i32 : i32, i32, i32
  }
  func.func @transform_1(%arg0: i32, %arg1: i32) -> (i32, i32) {
    %c0_i32 = arith.constant 0 : i32
    %c0_i32_0 = arith.constant 0 : i32
    %c0_i32_1 = arith.constant 0 : i32
    return %c0_i32, %c0_i32_0 : i32, i32
  }
  func.func @transform_2(%arg0: i32, %arg1: i32) -> (i32, i32) {
    %c0_i32 = arith.constant 0 : i32
    %c0_i32_0 = arith.constant 0 : i32
    %c0_i32_1 = arith.constant 0 : i32
    return %c0_i32, %c0_i32_0 : i32, i32
  }
  func.func @transform_3(%arg0: i32, %arg1: i32) -> (i32, i32, i32) {
    %c0_i32 = arith.constant 0 : i32
    %c0_i32_0 = arith.constant 0 : i32
    return %arg0, %arg1, %c0_i32 : i32, i32, i32
  }
}

module attributes {stable_mosaic.version = 11 : i64} {
  func.func @_conv_block_kernel(%arg0: i32, %arg1: i32, %arg2: memref<1x64x1024xbf16, #tpu.memory_space<vmem>>, %arg3: memref<1024x128xbf16, #tpu.memory_space<vmem>>, %arg4: memref<1x64x128xbf16, #tpu.memory_space<vmem>>) attributes {dimension_semantics = [#tpu.dimension_semantics<parallel>, #tpu.dimension_semantics<parallel>], iteration_bounds = array<i64: 2, 1>, scalar_prefetch = 0 : i64, scratch_operands = 0 : i64, tpu.core_type = #tpu.core_type<tc>, window_params = [{transform_indices = @transform_0, window_bounds = array<i64: 1, 64, 1024>}, {pipeline_mode = #tpu.pipeline_mode<synchronous>, transform_indices = @transform_1, window_bounds = array<i64: 1024, 128>}, {transform_indices = @transform_2, window_bounds = array<i64: 1, 64, 128>}]} {
    %c0 = arith.constant 0 : index
    %c0_0 = arith.constant 0 : index
    %c0_1 = arith.constant 0 : index
    %0 = vector.load %arg2[%c0, %c0_0, %c0_1] : memref<1x64x1024xbf16, #tpu.memory_space<vmem>>, vector<1x64x1024xbf16>
    %1 = vector.shape_cast %0 : vector<1x64x1024xbf16> to vector<64x1024xbf16>
    %c0_2 = arith.constant 0 : index
    %c0_3 = arith.constant 0 : index
    %2 = vector.load %arg3[%c0_2, %c0_3] : memref<1024x128xbf16, #tpu.memory_space<vmem>>, vector<1024x128xbf16>
    %cst = arith.constant dense<0.000000e+00> : vector<64x128xf32>
    %3 = tpu.matmul %1, %2, %cst {dimension_numbers = #tpu.dot_dimension_numbers<[1], [0], [0], [1], [0, 0, 1, 1], [], []>} : vector<64x1024xbf16>, vector<1024x128xbf16>, vector<64x128xf32> -> vector<64x128xf32>
    %cst_4 = arith.constant dense<0.000000e+00> : vector<128xf32>
    %4 = vector.multi_reduction <add>, %3, %cst_4 [0] : vector<64x128xf32> to vector<128xf32>
    %5 = vector.shape_cast %4 : vector<128xf32> to vector<1x128xf32>
    %cst_5 = arith.constant 6.400000e+01 : f32
    %6 = vector.broadcast %cst_5 : f32 to vector<1x128xf32>
    %7 = arith.divf %5, %6 : vector<1x128xf32>
    %8 = arith.mulf %3, %3 : vector<64x128xf32>
    %cst_6 = arith.constant dense<0.000000e+00> : vector<128xf32>
    %9 = vector.multi_reduction <add>, %8, %cst_6 [0] : vector<64x128xf32> to vector<128xf32>
    %10 = vector.shape_cast %9 : vector<128xf32> to vector<1x128xf32>
    %cst_7 = arith.constant 6.400000e+01 : f32
    %11 = vector.broadcast %cst_7 : f32 to vector<1x128xf32>
    %12 = arith.divf %10, %11 : vector<1x128xf32>
    %13 = arith.mulf %7, %7 : vector<1x128xf32>
    %14 = arith.subf %12, %13 : vector<1x128xf32>
    %15 = vector.broadcast %7 : vector<1x128xf32> to vector<64x128xf32>
    %16 = arith.subf %3, %15 : vector<64x128xf32>
    %cst_8 = arith.constant 9.99999974E-6 : f32
    %17 = vector.broadcast %cst_8 : f32 to vector<1x128xf32>
    %18 = arith.addf %14, %17 : vector<1x128xf32>
    %19 = math.rsqrt %18 : vector<1x128xf32>
    %20 = vector.broadcast %19 : vector<1x128xf32> to vector<64x128xf32>
    %21 = arith.mulf %16, %20 : vector<64x128xf32>
    %cst_9 = arith.constant 0.000000e+00 : f32
    %22 = vector.broadcast %cst_9 : f32 to vector<64x128xf32>
    %23 = arith.cmpf oge, %21, %22 : vector<64x128xf32>
    %cst_10 = arith.constant 2.000000e-01 : f32
    %24 = vector.broadcast %cst_10 : f32 to vector<64x128xf32>
    %25 = arith.mulf %24, %21 : vector<64x128xf32>
    %26 = arith.select %23, %21, %25 : vector<64x128xi1>, vector<64x128xf32>
    %27 = arith.truncf %26 : vector<64x128xf32> to vector<64x128xbf16>
    %c0_11 = arith.constant 0 : index
    %c0_12 = arith.constant 0 : index
    %c0_13 = arith.constant 0 : index
    %28 = vector.load %arg4[%c0_11, %c0_12, %c0_13] : memref<1x64x128xbf16, #tpu.memory_space<vmem>>, vector<1x64x128xbf16>
    %29 = vector.shape_cast %28 : vector<1x64x128xbf16> to vector<64x128xbf16>
    %30 = vector.shape_cast %27 : vector<64x128xbf16> to vector<1x64x128xbf16>
    tpu.vector_store %arg4[%c0_11, %c0_12, %c0_13], %30 {strides = array<i32>} : memref<1x64x128xbf16, #tpu.memory_space<vmem>>, vector<1x64x128xbf16>,
    return
  }
  func.func @transform_0(%arg0: i32, %arg1: i32) -> (i32, i32, i32) {
    %c0_i32 = arith.constant 0 : i32
    %c0_i32_0 = arith.constant 0 : i32
    return %arg0, %arg1, %c0_i32 : i32, i32, i32
  }
  func.func @transform_1(%arg0: i32, %arg1: i32) -> (i32, i32) {
    %c0_i32 = arith.constant 0 : i32
    %c0_i32_0 = arith.constant 0 : i32
    %c0_i32_1 = arith.constant 0 : i32
    return %c0_i32, %c0_i32_0 : i32, i32
  }
  func.func @transform_2(%arg0: i32, %arg1: i32) -> (i32, i32, i32) {
    %c0_i32 = arith.constant 0 : i32
    %c0_i32_0 = arith.constant 0 : i32
    return %arg0, %arg1, %c0_i32 : i32, i32, i32
  }
}

module attributes {stable_mosaic.version = 11 : i64} {
  func.func @_conv_block_kernel(%arg0: i32, %arg1: i32, %arg2: memref<1x16x2048xbf16, #tpu.memory_space<vmem>>, %arg3: memref<2048x256xbf16, #tpu.memory_space<vmem>>, %arg4: memref<1x16x256xbf16, #tpu.memory_space<vmem>>) attributes {dimension_semantics = [#tpu.dimension_semantics<parallel>, #tpu.dimension_semantics<parallel>], iteration_bounds = array<i64: 2, 1>, scalar_prefetch = 0 : i64, scratch_operands = 0 : i64, tpu.core_type = #tpu.core_type<tc>, window_params = [{transform_indices = @transform_0, window_bounds = array<i64: 1, 16, 2048>}, {pipeline_mode = #tpu.pipeline_mode<synchronous>, transform_indices = @transform_1, window_bounds = array<i64: 2048, 256>}, {transform_indices = @transform_2, window_bounds = array<i64: 1, 16, 256>}]} {
    %c0 = arith.constant 0 : index
    %c0_0 = arith.constant 0 : index
    %c0_1 = arith.constant 0 : index
    %0 = vector.load %arg2[%c0, %c0_0, %c0_1] : memref<1x16x2048xbf16, #tpu.memory_space<vmem>>, vector<1x16x2048xbf16>
    %1 = vector.shape_cast %0 : vector<1x16x2048xbf16> to vector<16x2048xbf16>
    %c0_2 = arith.constant 0 : index
    %c0_3 = arith.constant 0 : index
    %2 = vector.load %arg3[%c0_2, %c0_3] : memref<2048x256xbf16, #tpu.memory_space<vmem>>, vector<2048x256xbf16>
    %cst = arith.constant dense<0.000000e+00> : vector<16x256xf32>
    %3 = tpu.matmul %1, %2, %cst {dimension_numbers = #tpu.dot_dimension_numbers<[1], [0], [0], [1], [0, 0, 1, 1], [], []>} : vector<16x2048xbf16>, vector<2048x256xbf16>, vector<16x256xf32> -> vector<16x256xf32>
    %cst_4 = arith.constant dense<0.000000e+00> : vector<256xf32>
    %4 = vector.multi_reduction <add>, %3, %cst_4 [0] : vector<16x256xf32> to vector<256xf32>
    %5 = vector.shape_cast %4 : vector<256xf32> to vector<1x256xf32>
    %cst_5 = arith.constant 1.600000e+01 : f32
    %6 = vector.broadcast %cst_5 : f32 to vector<1x256xf32>
    %7 = arith.divf %5, %6 : vector<1x256xf32>
    %8 = arith.mulf %3, %3 : vector<16x256xf32>
    %cst_6 = arith.constant dense<0.000000e+00> : vector<256xf32>
    %9 = vector.multi_reduction <add>, %8, %cst_6 [0] : vector<16x256xf32> to vector<256xf32>
    %10 = vector.shape_cast %9 : vector<256xf32> to vector<1x256xf32>
    %cst_7 = arith.constant 1.600000e+01 : f32
    %11 = vector.broadcast %cst_7 : f32 to vector<1x256xf32>
    %12 = arith.divf %10, %11 : vector<1x256xf32>
    %13 = arith.mulf %7, %7 : vector<1x256xf32>
    %14 = arith.subf %12, %13 : vector<1x256xf32>
    %15 = vector.broadcast %7 : vector<1x256xf32> to vector<16x256xf32>
    %16 = arith.subf %3, %15 : vector<16x256xf32>
    %cst_8 = arith.constant 9.99999974E-6 : f32
    %17 = vector.broadcast %cst_8 : f32 to vector<1x256xf32>
    %18 = arith.addf %14, %17 : vector<1x256xf32>
    %19 = math.rsqrt %18 : vector<1x256xf32>
    %20 = vector.broadcast %19 : vector<1x256xf32> to vector<16x256xf32>
    %21 = arith.mulf %16, %20 : vector<16x256xf32>
    %cst_9 = arith.constant 0.000000e+00 : f32
    %22 = vector.broadcast %cst_9 : f32 to vector<16x256xf32>
    %23 = arith.cmpf oge, %21, %22 : vector<16x256xf32>
    %cst_10 = arith.constant 2.000000e-01 : f32
    %24 = vector.broadcast %cst_10 : f32 to vector<16x256xf32>
    %25 = arith.mulf %24, %21 : vector<16x256xf32>
    %26 = arith.select %23, %21, %25 : vector<16x256xi1>, vector<16x256xf32>
    %27 = arith.truncf %26 : vector<16x256xf32> to vector<16x256xbf16>
    %c0_11 = arith.constant 0 : index
    %c0_12 = arith.constant 0 : index
    %c0_13 = arith.constant 0 : index
    %28 = vector.load %arg4[%c0_11, %c0_12, %c0_13] : memref<1x16x256xbf16, #tpu.memory_space<vmem>>, vector<1x16x256xbf16>
    %29 = vector.shape_cast %28 : vector<1x16x256xbf16> to vector<16x256xbf16>
    %30 = vector.shape_cast %27 : vector<16x256xbf16> to vector<1x16x256xbf16>
    tpu.vector_store %arg4[%c0_11, %c0_12, %c0_13], %30 {strides = array<i32>} : memref<1x16x256xbf16, #tpu.memory_space<vmem>>, vector<1x16x256xbf16>,
    return
  }
  func.func @transform_0(%arg0: i32, %arg1: i32) -> (i32, i32, i32) {
    %c0_i32 = arith.constant 0 : i32
    %c0_i32_0 = arith.constant 0 : i32
    return %arg0, %arg1, %c0_i32 : i32, i32, i32
  }
  func.func @transform_1(%arg0: i32, %arg1: i32) -> (i32, i32) {
    %c0_i32 = arith.constant 0 : i32
    %c0_i32_0 = arith.constant 0 : i32
    %c0_i32_1 = arith.constant 0 : i32
    return %c0_i32, %c0_i32_0 : i32, i32
  }
  func.func @transform_2(%arg0: i32, %arg1: i32) -> (i32, i32, i32) {
    %c0_i32 = arith.constant 0 : i32
    %c0_i32_0 = arith.constant 0 : i32
    return %arg0, %arg1, %c0_i32 : i32, i32, i32
  }
}

module attributes {stable_mosaic.version = 11 : i64} {
  func.func @_conv_block_kernel(%arg0: i32, %arg1: i32, %arg2: memref<1x4x4096xbf16, #tpu.memory_space<vmem>>, %arg3: memref<4096x512xbf16, #tpu.memory_space<vmem>>, %arg4: memref<1x4x512xbf16, #tpu.memory_space<vmem>>) attributes {dimension_semantics = [#tpu.dimension_semantics<parallel>, #tpu.dimension_semantics<parallel>], iteration_bounds = array<i64: 2, 1>, scalar_prefetch = 0 : i64, scratch_operands = 0 : i64, tpu.core_type = #tpu.core_type<tc>, window_params = [{transform_indices = @transform_0, window_bounds = array<i64: 1, 4, 4096>}, {pipeline_mode = #tpu.pipeline_mode<synchronous>, transform_indices = @transform_1, window_bounds = array<i64: 4096, 512>}, {transform_indices = @transform_2, window_bounds = array<i64: 1, 4, 512>}]} {
    %c0 = arith.constant 0 : index
    %c0_0 = arith.constant 0 : index
    %c0_1 = arith.constant 0 : index
    %0 = vector.load %arg2[%c0, %c0_0, %c0_1] : memref<1x4x4096xbf16, #tpu.memory_space<vmem>>, vector<1x4x4096xbf16>
    %1 = vector.shape_cast %0 : vector<1x4x4096xbf16> to vector<4x4096xbf16>
    %c0_2 = arith.constant 0 : index
    %c0_3 = arith.constant 0 : index
    %2 = vector.load %arg3[%c0_2, %c0_3] : memref<4096x512xbf16, #tpu.memory_space<vmem>>, vector<4096x512xbf16>
    %cst = arith.constant dense<0.000000e+00> : vector<4x512xf32>
    %3 = tpu.matmul %1, %2, %cst {dimension_numbers = #tpu.dot_dimension_numbers<[1], [0], [0], [1], [0, 0, 1, 1], [], []>} : vector<4x4096xbf16>, vector<4096x512xbf16>, vector<4x512xf32> -> vector<4x512xf32>
    %cst_4 = arith.constant dense<0.000000e+00> : vector<512xf32>
    %4 = vector.multi_reduction <add>, %3, %cst_4 [0] : vector<4x512xf32> to vector<512xf32>
    %5 = vector.shape_cast %4 : vector<512xf32> to vector<1x512xf32>
    %cst_5 = arith.constant 4.000000e+00 : f32
    %6 = vector.broadcast %cst_5 : f32 to vector<1x512xf32>
    %7 = arith.divf %5, %6 : vector<1x512xf32>
    %8 = arith.mulf %3, %3 : vector<4x512xf32>
    %cst_6 = arith.constant dense<0.000000e+00> : vector<512xf32>
    %9 = vector.multi_reduction <add>, %8, %cst_6 [0] : vector<4x512xf32> to vector<512xf32>
    %10 = vector.shape_cast %9 : vector<512xf32> to vector<1x512xf32>
    %cst_7 = arith.constant 4.000000e+00 : f32
    %11 = vector.broadcast %cst_7 : f32 to vector<1x512xf32>
    %12 = arith.divf %10, %11 : vector<1x512xf32>
    %13 = arith.mulf %7, %7 : vector<1x512xf32>
    %14 = arith.subf %12, %13 : vector<1x512xf32>
    %15 = vector.broadcast %7 : vector<1x512xf32> to vector<4x512xf32>
    %16 = arith.subf %3, %15 : vector<4x512xf32>
    %cst_8 = arith.constant 9.99999974E-6 : f32
    %17 = vector.broadcast %cst_8 : f32 to vector<1x512xf32>
    %18 = arith.addf %14, %17 : vector<1x512xf32>
    %19 = math.rsqrt %18 : vector<1x512xf32>
    %20 = vector.broadcast %19 : vector<1x512xf32> to vector<4x512xf32>
    %21 = arith.mulf %16, %20 : vector<4x512xf32>
    %cst_9 = arith.constant 0.000000e+00 : f32
    %22 = vector.broadcast %cst_9 : f32 to vector<4x512xf32>
    %23 = arith.cmpf oge, %21, %22 : vector<4x512xf32>
    %cst_10 = arith.constant 2.000000e-01 : f32
    %24 = vector.broadcast %cst_10 : f32 to vector<4x512xf32>
    %25 = arith.mulf %24, %21 : vector<4x512xf32>
    %26 = arith.select %23, %21, %25 : vector<4x512xi1>, vector<4x512xf32>
    %27 = arith.truncf %26 : vector<4x512xf32> to vector<4x512xbf16>
    %c0_11 = arith.constant 0 : index
    %c0_12 = arith.constant 0 : index
    %c0_13 = arith.constant 0 : index
    %28 = vector.load %arg4[%c0_11, %c0_12, %c0_13] : memref<1x4x512xbf16, #tpu.memory_space<vmem>>, vector<1x4x512xbf16>
    %29 = vector.shape_cast %28 : vector<1x4x512xbf16> to vector<4x512xbf16>
    %30 = vector.shape_cast %27 : vector<4x512xbf16> to vector<1x4x512xbf16>
    tpu.vector_store %arg4[%c0_11, %c0_12, %c0_13], %30 {strides = array<i32>} : memref<1x4x512xbf16, #tpu.memory_space<vmem>>, vector<1x4x512xbf16>,
    return
  }
  func.func @transform_0(%arg0: i32, %arg1: i32) -> (i32, i32, i32) {
    %c0_i32 = arith.constant 0 : i32
    %c0_i32_0 = arith.constant 0 : i32
    return %arg0, %arg1, %c0_i32 : i32, i32, i32
  }
  func.func @transform_1(%arg0: i32, %arg1: i32) -> (i32, i32) {
    %c0_i32 = arith.constant 0 : i32
    %c0_i32_0 = arith.constant 0 : i32
    %c0_i32_1 = arith.constant 0 : i32
    return %c0_i32, %c0_i32_0 : i32, i32
  }
  func.func @transform_2(%arg0: i32, %arg1: i32) -> (i32, i32, i32) {
    %c0_i32 = arith.constant 0 : i32
    %c0_i32_0 = arith.constant 0 : i32
    return %arg0, %arg1, %c0_i32 : i32, i32, i32
  }
}

module attributes {stable_mosaic.version = 11 : i64} {
  func.func @_conv_block_kernel(%arg0: i32, %arg1: i32, %arg2: memref<1x4x8192xbf16, #tpu.memory_space<vmem>>, %arg3: memref<8192x1xbf16, #tpu.memory_space<vmem>>, %arg4: memref<1x4x1xf32, #tpu.memory_space<vmem>>) attributes {dimension_semantics = [#tpu.dimension_semantics<parallel>, #tpu.dimension_semantics<parallel>], iteration_bounds = array<i64: 2, 1>, scalar_prefetch = 0 : i64, scratch_operands = 0 : i64, tpu.core_type = #tpu.core_type<tc>, window_params = [{transform_indices = @transform_0, window_bounds = array<i64: 1, 4, 8192>}, {pipeline_mode = #tpu.pipeline_mode<synchronous>, transform_indices = @transform_1, window_bounds = array<i64: 8192, 1>}, {transform_indices = @transform_2, window_bounds = array<i64: 1, 4, 1>}]} {
    %c0 = arith.constant 0 : index
    %c0_0 = arith.constant 0 : index
    %c0_1 = arith.constant 0 : index
    %0 = vector.load %arg2[%c0, %c0_0, %c0_1] : memref<1x4x8192xbf16, #tpu.memory_space<vmem>>, vector<1x4x8192xbf16>
    %1 = vector.shape_cast %0 : vector<1x4x8192xbf16> to vector<4x8192xbf16>
    %c0_2 = arith.constant 0 : index
    %c0_3 = arith.constant 0 : index
    %2 = vector.load %arg3[%c0_2, %c0_3] : memref<8192x1xbf16, #tpu.memory_space<vmem>>, vector<8192x1xbf16>
    %cst = arith.constant dense<0.000000e+00> : vector<4x1xf32>
    %3 = tpu.matmul %1, %2, %cst {dimension_numbers = #tpu.dot_dimension_numbers<[1], [0], [0], [1], [0, 0, 1, 1], [], []>} : vector<4x8192xbf16>, vector<8192x1xbf16>, vector<4x1xf32> -> vector<4x1xf32>
    %c0_4 = arith.constant 0 : index
    %c0_5 = arith.constant 0 : index
    %c0_6 = arith.constant 0 : index
    %4 = vector.load %arg4[%c0_4, %c0_5, %c0_6] : memref<1x4x1xf32, #tpu.memory_space<vmem>>, vector<1x4x1xf32>
    %5 = vector.shape_cast %4 : vector<1x4x1xf32> to vector<4x1xf32>
    %6 = vector.shape_cast %3 : vector<4x1xf32> to vector<1x4x1xf32>
    tpu.vector_store %arg4[%c0_4, %c0_5, %c0_6], %6 {strides = array<i32>} : memref<1x4x1xf32, #tpu.memory_space<vmem>>, vector<1x4x1xf32>,
    return
  }
  func.func @transform_0(%arg0: i32, %arg1: i32) -> (i32, i32, i32) {
    %c0_i32 = arith.constant 0 : i32
    %c0_i32_0 = arith.constant 0 : i32
    return %arg0, %arg1, %c0_i32 : i32, i32, i32
  }
  func.func @transform_1(%arg0: i32, %arg1: i32) -> (i32, i32) {
    %c0_i32 = arith.constant 0 : i32
    %c0_i32_0 = arith.constant 0 : i32
    %c0_i32_1 = arith.constant 0 : i32
    return %c0_i32, %c0_i32_0 : i32, i32
  }
  func.func @transform_2(%arg0: i32, %arg1: i32) -> (i32, i32, i32) {
    %c0_i32 = arith.constant 0 : i32
    %c0_i32_0 = arith.constant 0 : i32
    return %arg0, %arg1, %c0_i32 : i32, i32, i32
  }
}

</mosaic_0001>

<bundles_post_ra>
// kernel: discriminator_forward.5
= control target key start
LH: loop header
LB: loop body
LE: loop exit
PB: predicated region body
PF: predicated region fallthrough
CT: control target
= control target key end

     0   :  { %s899_s12 = smov 0   ;;  %s901_s13 = smov 0   ;;  %s1051_s0 = inlined_call_operand.vmem [shape: bf16[2,256,96], index: 0, kind: input, shape index: {}]   ;;  %s1052_s1 = inlined_call_operand.vmem [shape: bf16[96,64], index: 1, kind: input, shape index: {}]   ;;  %s1053_s2 = inlined_call_operand.vmem [shape: f32[1,64], index: 2, kind: input, shape index: {}]   ;;  %s1054_s3 = inlined_call_operand.vmem [shape: bf16[2,256,64], index: 3, kind: output, shape index: {}]  }
   0x1   :  { %s903_s14 = smov 0   ;;  %s905_s15 = smov 0  }
   0x2   :  { %s907_s16 = smov 0  }
   0x3 LB: > { %s22_s17 = sadd.s32 1, %s869_s14  ;;  %s25_s18 = sadd.s32 1, %s873_s15  ;;  %s877_s16 = sphi %s907_s16, %s13_s16   ;;  %s873_s15 = sphi %s905_s15, %s1058_s15   ;;  %s869_s14 = sphi %s903_s14, %s1057_s14   ;;  %s865_s13 = sphi %s901_s13, %s1056_s13   ;;  %s861_s12 = sphi %s899_s12, %s1055_s12  }
   0x4   : > { %p23_p0 = scmp.ge.s32.totalorder %s22_s17, 2  ;;  %p667_p1 = scmp.ge.s32.totalorder %s877_s16, 1 }
   0x5   : > { %p158_p2 = scmp.lt.s32.totalorder %s877_s16, 5 }
   0x6   : > { %s1060_s17 = smov (%p23_p0, %s22_s17), 0  ;;  %s1062_s18 = smov (!%p23_p0, %s25_s18), %s873_s15 }
   0x7   : > { %p159_p3 = pnand %p667_p1, %p158_p2  ;;  %p27_p4 = scmp.ge.s32.totalorder %s1062_s18, 2 }
   0x8   : > { %v825_v0 = vld [vmem:[%s1052_s1] sm:$0xff] (!%p159_p3)   ;;  %s668_s21 = sshll.u32 (!%p159_p3), %s861_s12, 4  ;;  %v826_v1 = vld [vmem:[%s1052_s1 + $0x8] sm:$0xff] (!%p159_p3)   ;;  %p191_p5 = scmp.lt.s32.totalorder (!%p159_p3), %s865_s13, 1  ;;  %v827_v2 = vld [vmem:[%s1052_s1 + $0x10] sm:$0xff] (!%p159_p3)   ;;  %vm322_vm0 = vcmask (!%p159_p3), 785408  }
   0x9   : > { %s1064_s18 = smov (%p27_p4, %s1062_s18), 0  ;;  %162 = sbr.rel (%p159_p3) target bundleno = 272 (0x110), region = 32 }
   0xa   : > { %745 = vmatprep.subr.bf16.mxu0 (!%p159_p3), %v825_v0  ;;  %773 = vmatprep.subr.bf16.mxu1 (!%p159_p3), %v825_v0  ;;  %p193_p6 = scmp.lt.s32.totalorder (!%p159_p3), %s668_s21, 31  ;;  %v828_v3 = vld [vmem:[%s1052_s1 + $0x18] sm:$0xff] (!%p159_p3)   ;;  %v829_v6 = vld [vmem:[%s1052_s1 + $0x20] sm:$0xff] (!%p159_p3)   ;;  %v830_v7 = vld [vmem:[%s1052_s1 + $0x28] sm:$0xff] (!%p159_p3)   ;;  %vm556_vm1 = vcmask (!%p159_p3), 519168  }
   0xb   : > { %746 = vmatpush3.bf16.msra.mxu0 (!%p159_p3), %v825_v0  ;;  %779 = vmatpush3.bf16.msra.mxu1 (!%p159_p3), %v825_v0  ;;  %v979_v14 = vld [vmem:[%s1053_s2] ss:$0 sm:$0xff] (!%p159_p3) }
   0xc   : > { %747 = vmatprep.subr.bf16.mxu0 (!%p159_p3), %v826_v1  ;;  %774 = vmatprep.subr.bf16.mxu1 (!%p159_p3), %v826_v1 }
   0xf   : > { %748 = vmatpush3.bf16.msra.mxu0 (!%p159_p3), %v826_v1  ;;  %780 = vmatpush3.bf16.msra.mxu1 (!%p159_p3), %v826_v1 }
  0x10   : > { %s1066_s13 = smov (!%p191_p5, %s865_s13), 1  ;;  %s1068_s21 = smov (!%p193_p6, %s668_s21), 31  ;;  %749 = vmatprep.subr.bf16.mxu0 %v827_v2  ;;  %775 = vmatprep.subr.bf16.mxu1 %v827_v2 }
  0x11   : > { %s669_s26 = sshll.u32 %s1066_s13, 5 }
  0x12   : > { %s941_s27 = sadd.s32 %s669_s26, %s1068_s21 }
  0x13   : > { %s670_s28 = sshll.u32 %s941_s27, 2  ;;  %750 = vmatpush3.bf16.msra.mxu0 %v827_v2  ;;  %781 = vmatpush3.bf16.msra.mxu1 %v827_v2 }
  0x14   : > { %s952_s6 = scalar_lea.vmem %s1051_s0, %s670_s28  ;;  %751 = vmatprep.subr.bf16.mxu0 %v828_v3  ;;  %776 = vmatprep.subr.bf16.mxu1 %v828_v3  ;;  %s990_s20 = scalar_lea.vmem %s1054_s3, %s670_s28 }
  0x15   : > { %v831_v4 = vld [vmem:[%s952_s6] sm:$0xff]   ;;  %v833_v8 = vld [vmem:[%s952_s6 + $0x8] sm:$0xff]   ;;  %v835_v10 = vld [vmem:[%s952_s6 + $0x10] sm:$0xff]  }
  0x16   : > { %v832_v5 = vld [vmem:[%s952_s6 + $0x20] sm:$0xff]   ;;  %757 = vmatprep.mubr.msk.bf16.mxu0 %vm322_vm0, %v831_v4  ;;  %v834_v9 = vld [vmem:[%s952_s6 + $0x28] sm:$0xff]   ;;  %v836_v11 = vld [vmem:[%s952_s6 + $0x30] sm:$0xff]  }
  0x17   : > { %765 = vmatprep.mubr.msk.bf16.mxu1 %vm322_vm0, %v832_v5  ;;  %752 = vmatpush3.bf16.msra.mxu0 %v828_v3  ;;  %v837_v12 = vld [vmem:[%s952_s6 + $0x18] sm:$0xff]  }
  0x18   : > { %782 = vmatpush3.bf16.msra.mxu1 %v828_v3  ;;  %753 = vmatprep.subr.bf16.mxu0 %v829_v6  ;;  %v838_v13 = vld [vmem:[%s952_s6 + $0x38] sm:$0xff]  }
  0x19   : > { %777 = vmatprep.subr.bf16.mxu1 %v829_v6 }
  0x1b   : > { %754 = vmatpush3.bf16.msra.mxu0 %v829_v6 }
  0x1c   : > { %783 = vmatpush3.bf16.msra.mxu1 %v829_v6  ;;  %755 = vmatprep.subr.bf16.mxu0 %v830_v7 }
  0x1d   : > { %778 = vmatprep.subr.bf16.mxu1 %v830_v7 }
  0x1f   : > { %756 = vmatpush3.bf16.msra.mxu0 %v830_v7 }
  0x20   : > { %784 = vmatpush3.bf16.msra.mxu1 %v830_v7 }
  0x22   : > { %758 = vmatmul.mubr.msk.bf16.vlgmr.msra.gmra.mrb[0].mxu0 %vm322_vm0, %v833_v8 }
  0x23   : > { %766 = vmatmul.mubr.msk.bf16.vlgmr.msra.gmra.mrb[0].mxu1 %vm322_vm0, %v834_v9  ;;  %761 = vmatprep.mubr.msk.bf16.mxu0 %vm322_vm0, %v835_v10 }
  0x24   : > { %769 = vmatprep.mubr.msk.bf16.mxu1 %vm322_vm0, %v836_v11 }
  0x2a   : > { %762 = vmatmul.mubr.msk.bf16.gmra.mrb[4].mxu0 %vm322_vm0, %v837_v12 }
  0x2b   : > { %770 = vmatmul.mubr.msk.bf16.gmra.mrb[4].mxu1 %vm322_vm0, %v838_v13 }
  0xf5   : > { %v759_v15 = vpop.f32.mrb[0].mxu0 }
  0xf6   : > { %v767_v16 = vpop.f32.mrb[0].mxu1  ;;  %v390_v17 = vadd.f32 %v759_v15, %v979_v14  ;;  %v381_v19 = vpop.f32.mrb[1].mxu0 }
  0xf7   : > { %v422_v18 = vadd.f32 %v767_v16, %v979_v14  ;;  %v413_v20 = vpop.f32.mrb[1].mxu1  ;;  %v382_v21 = vadd.f32 %v979_v14, %v381_v19  ;;  %v760_v23 = vpop.f32.mrb[2].mxu0 }
  0xf8   : > { %v414_v22 = vadd.f32 %v979_v14, %v413_v20  ;;  %v768_v24 = vpop.f32.mrb[2].mxu1  ;;  %vm446_vm2 = vcmp.ge.f32.partialorder %v390_v17, 0.0  ;;  %v462_v25 = vmul.f32 0.2, %v390_v17  ;;  %v393_v31 = vadd.f32 %v760_v23, %v979_v14  ;;  %v384_v33 = vpop.f32.mrb[3].mxu0 }
  0xf9   : > { %vm454_vm3 = vcmp.ge.f32.partialorder %v422_v18, 0.0  ;;  %v470_v26 = vmul.f32 0.2, %v422_v18  ;;  %vm444_vm4 = vcmp.ge.f32.partialorder %v382_v21, 0.0  ;;  %v460_v27 = vmul.f32 0.2, %v382_v21 }
  0xfa   : > { %vm452_vm5 = vcmp.ge.f32.partialorder %v414_v22, 0.0  ;;  %v468_v28 = vmul.f32 0.2, %v414_v22  ;;  %v478_v29 = vsel %vm446_vm2, %v390_v17, %v462_v25  ;;  %v425_v32 = vadd.f32 %v768_v24, %v979_v14  ;;  %v416_v34 = vpop.f32.mrb[3].mxu1 }
  0xfb   : > { %v486_v30 = vsel %vm454_vm3, %v422_v18, %v470_v26  ;;  %v717_v35 = vpack.c.bf16 %v478_v29, %v478_v29  ;;  %v476_v37 = vsel %vm444_vm4, %v382_v21, %v460_v27  ;;  %vm447_vm6 = vcmp.ge.f32.partialorder %v393_v31, 0.0 }
  0xfc   : > { %v725_v36 = vpack.c.bf16 %v486_v30, %v486_v30  ;;  %v484_v38 = vsel %vm452_vm5, %v414_v22, %v468_v28  ;;  %v715_v39 = vpack.c.bf16 %v476_v37, %v476_v37  ;;  %v463_v41 = vmul.f32 0.2, %v393_v31 }
  0xfd   : > { %v723_v40 = vpack.c.bf16 %v484_v38, %v484_v38  ;;  %559 = vst.msk [vmem:[%s990_s20 + $0x8] sm:$0xf] %vm556_vm1, %v717_v35  ;;  %vm455_vm7 = vcmp.ge.f32.partialorder %v425_v32, 0.0  ;;  %v471_v42 = vmul.f32 0.2, %v425_v32  ;;  %v385_v43 = vadd.f32 %v979_v14, %v384_v33  ;;  %v763_v45 = vpop.f32.mrb[4].mxu0 }
  0xfe   : > { %567 = vst.msk [vmem:[%s990_s20 + $0x28] sm:$0xf] %vm556_vm1, %v725_v36  ;;  %v417_v44 = vadd.f32 %v979_v14, %v416_v34  ;;  %v771_v46 = vpop.f32.mrb[4].mxu1  ;;  %557 = vst.msk [vmem:[%s990_s20] sm:$0xf] %vm556_vm1, %v715_v39  ;;  %v479_v47 = vsel %vm447_vm6, %v393_v31, %v463_v41  ;;  %v406_v48 = vadd.f32 %v763_v45, %v979_v14  ;;  %v397_v50 = vpop.f32.mrb[5].mxu0 }
  0xff   : > { %565 = vst.msk [vmem:[%s990_s20 + $0x20] sm:$0xf] %vm556_vm1, %v723_v40  ;;  %v438_v49 = vadd.f32 %v771_v46, %v979_v14  ;;  %v429_v51 = vpop.f32.mrb[5].mxu1  ;;  %v718_v52 = vpack.c.bf16 %v479_v47, %v479_v47  ;;  %v487_v53 = vsel %vm455_vm7, %v425_v32, %v471_v42  ;;  %vm445_vm8 = vcmp.ge.f32.partialorder %v385_v43, 0.0  ;;  %v764_v55 = vpop.f32.mrb[6].mxu0 }
 0x100   : > { %v461_v54 = vmul.f32 0.2, %v385_v43  ;;  %v772_v56 = vpop.f32.mrb[6].mxu1  ;;  %v726_v57 = vpack.c.bf16 %v487_v53, %v487_v53  ;;  %vm453_vm9 = vcmp.ge.f32.partialorder %v417_v44, 0.0  ;;  %v469_v58 = vmul.f32 0.2, %v417_v44 }
 0x101   : > { %vm450_vm10 = vcmp.ge.f32.partialorder %v406_v48, 0.0  ;;  %v400_v59 = vpop.f32.mrb[7].mxu0  ;;  %v432_v60 = vpop.f32.mrb[7].mxu1  ;;  %560 = vst.msk [vmem:[%s990_s20 + $0xc] sm:$0xf] %vm556_vm1, %v718_v52  ;;  %vm458_vm11 = vcmp.ge.f32.partialorder %v438_v49, 0.0  ;;  %v398_v2 = vadd.f32 %v979_v14, %v397_v50  ;;  %v430_v3 = vadd.f32 %v979_v14, %v429_v51 }
 0x102   : > { %v477_v61 = vsel %vm445_vm8, %v385_v43, %v461_v54  ;;  %v466_v62 = vmul.f32 0.2, %v406_v48  ;;  %v474_v63 = vmul.f32 0.2, %v438_v49  ;;  %568 = vst.msk [vmem:[%s990_s20 + $0x2c] sm:$0xf] %vm556_vm1, %v726_v57  ;;  %v485_v1 = vsel %vm453_vm9, %v417_v44, %v469_v58 }
 0x103   : > { %v716_v0 = vpack.c.bf16 %v477_v61, %v477_v61  ;;  %v724_v4 = vpack.c.bf16 %v485_v1, %v485_v1  ;;  %v409_v7 = vadd.f32 %v764_v55, %v979_v14  ;;  %vm448_vm12 = vcmp.ge.f32.partialorder %v398_v2, 0.0 }
 0x104   : > { %v482_v5 = vsel %vm450_vm10, %v406_v48, %v466_v62  ;;  %v490_v6 = vsel %vm458_vm11, %v438_v49, %v474_v63  ;;  %v464_v10 = vmul.f32 0.2, %v398_v2  ;;  %vm456_vm13 = vcmp.ge.f32.partialorder %v430_v3, 0.0 }
 0x105   : > { %558 = vst.msk [vmem:[%s990_s20 + $0x4] sm:$0xf] %vm556_vm1, %v716_v0  ;;  %v721_v8 = vpack.c.bf16 %v482_v5, %v482_v5  ;;  %v729_v9 = vpack.c.bf16 %v490_v6, %v490_v6  ;;  %566 = vst.msk [vmem:[%s990_s20 + $0x24] sm:$0xf] %vm556_vm1, %v724_v4  ;;  %v472_v11 = vmul.f32 0.2, %v430_v3  ;;  %v441_v15 = vadd.f32 %v772_v56, %v979_v14 }
 0x106   : > { %vm451_vm14 = vcmp.ge.f32.partialorder %v409_v7, 0.0  ;;  %v467_v12 = vmul.f32 0.2, %v409_v7  ;;  %v480_v13 = vsel %vm448_vm12, %v398_v2, %v464_v10  ;;  %v401_v16 = vadd.f32 %v979_v14, %v400_v59 }
 0x107   : > { %563 = vst.msk [vmem:[%s990_s20 + $0x18] sm:$0xf] %vm556_vm1, %v721_v8  ;;  %571 = vst.msk [vmem:[%s990_s20 + $0x38] sm:$0xf] %vm556_vm1, %v729_v9  ;;  %v433_v17 = vadd.f32 %v979_v14, %v432_v60  ;;  %v719_v18 = vpack.c.bf16 %v480_v13, %v480_v13  ;;  %v488_v19 = vsel %vm456_vm13, %v430_v3, %v472_v11  ;;  %vm459_vm15 = vcmp.ge.f32.partialorder %v441_v15, 0.0 }
 0x108   : > { %v483_v20 = vsel %vm451_vm14, %v409_v7, %v467_v12  ;;  %v727_v21 = vpack.c.bf16 %v488_v19, %v488_v19  ;;  %v475_v23 = vmul.f32 0.2, %v441_v15  ;;  %vm449_vm0 = vcmp.ge.f32.partialorder %v401_v16, 0.0 }
 0x109   : > { %v722_v22 = vpack.c.bf16 %v483_v20, %v483_v20  ;;  %561 = vst.msk [vmem:[%s990_s20 + $0x10] sm:$0xf] %vm556_vm1, %v719_v18  ;;  %v465_v24 = vmul.f32 0.2, %v401_v16  ;;  %vm457_vm2 = vcmp.ge.f32.partialorder %v433_v17, 0.0 }
 0x10a   : > { %v473_v25 = vmul.f32 0.2, %v433_v17  ;;  %569 = vst.msk [vmem:[%s990_s20 + $0x30] sm:$0xf] %vm556_vm1, %v727_v21  ;;  %v491_v14 = vsel %vm459_vm15, %v441_v15, %v475_v23 }
 0x10b   : > { %564 = vst.msk [vmem:[%s990_s20 + $0x1c] sm:$0xf] %vm556_vm1, %v722_v22  ;;  %v730_v26 = vpack.c.bf16 %v491_v14, %v491_v14  ;;  %v481_v27 = vsel %vm449_vm0, %v401_v16, %v465_v24 }
 0x10c   : > { %v489_v28 = vsel %vm457_vm2, %v433_v17, %v473_v25  ;;  %v720_v29 = vpack.c.bf16 %v481_v27, %v481_v27 }
 0x10d   : > { %v728_v30 = vpack.c.bf16 %v489_v28, %v489_v28  ;;  %572 = vst.msk [vmem:[%s990_s20 + $0x3c] sm:$0xf] %vm556_vm1, %v730_v26 }
 0x10e   : > { %562 = vst.msk [vmem:[%s990_s20 + $0x14] sm:$0xf] %vm556_vm1, %v720_v29 }
 0x10f   : > { %570 = vst.msk [vmem:[%s990_s20 + $0x34] sm:$0xf] %vm556_vm1, %v728_v30 }
 0x110 PF: > { %s13_s16 = sadd.s32 1, %s877_s16   ;;  %s1055_s12 = smov %s869_s14 }
 0x111   : > { %p10_p7 = scmp.ge.s32.totalorder %s13_s16, 6   ;;  %s1056_s13 = smov %s873_s15 }
 0x112   : > { %s1057_s14 = smov %s1060_s17  ;;  %s1058_s15 = smov %s1064_s18 }
 0x113   :  { %12 = sbr.rel (!%p10_p7) target bundleno = 3 (0x3), region = 62 }

// kernel: discriminator_forward.6
= control target key start
LH: loop header
LB: loop body
LE: loop exit
PB: predicated region body
PF: predicated region fallthrough
CT: control target
= control target key end

     0   :  { %s1799_s9 = smov 0   ;;  %s1801_s10 = smov 0   ;;  %s2119_s0 = inlined_call_operand.vmem [shape: bf16[2,64,1024], index: 0, kind: input, shape index: {}]   ;;  %s2120_s1 = inlined_call_operand.vmem [shape: bf16[1024,128], index: 1, kind: input, shape index: {}]   ;;  %s2121_s2 = inlined_call_operand.vmem [shape: bf16[2,64,128], index: 2, kind: output, shape index: {}]  }
   0x1   :  { %s1803_s11 = smov 0  }
   0x2 LB: > { %s24_s12 = sadd.s32 1, %s1778_s10  ;;  %p1366_p0 = scmp.ge.s32.totalorder %s1782_s11, 1  ;;  %s1782_s11 = sphi %s1803_s11, %s12_s11   ;;  %s1778_s10 = sphi %s1801_s10, %s2123_s10   ;;  %s1774_s9 = sphi %s1799_s9, %s2122_s9  }
   0x3   : > { %p26_p1 = scmp.ge.s32.totalorder %s24_s12, 2  ;;  %p134_p2 = scmp.lt.s32.totalorder %s1782_s11, 3 }
   0x5   : > { %s2125_s12 = smov (%p26_p1, %s24_s12), 0  ;;  %p135_p3 = pnand %p1366_p0, %p134_p2 }
   0x6   : > { %v1694_v0 = vld [vmem:[%s2120_s1 + $0x40] sm:$0xff] (!%p135_p3)   ;;  %v1698_v4 = vld [vmem:[%s2120_s1 + $0x48] sm:$0xff] (!%p135_p3)   ;;  %v1702_v8 = vld [vmem:[%s2120_s1 + $0x50] sm:$0xff] (!%p135_p3)   ;;  %p166_p4 = scmp.lt.s32.totalorder (!%p135_p3), %s1774_s9, 1 }
   0x7   : > { %138 = sbr.rel (%p135_p3) target bundleno = 362 (0x16a), region = 28  ;;  %v1695_v1 = vld [vmem:[%s2120_s1 + $0xc0] sm:$0xff] (!%p135_p3)   ;;  %1510 = vmatprep.subr.bf16.mxu0 (!%p135_p3), %v1694_v0  ;;  %v1699_v5 = vld [vmem:[%s2120_s1 + $0xc8] sm:$0xff] (!%p135_p3)   ;;  %v1703_v9 = vld [vmem:[%s2120_s1 + $0xd0] sm:$0xff] (!%p135_p3)  }
   0x8   : > { %v1696_v2 = vld [vmem:[%s2120_s1] sm:$0xff] (!%p135_p3)   ;;  %1550 = vmatprep.subr.bf16.mxu1 (!%p135_p3), %v1695_v1  ;;  %v1700_v6 = vld [vmem:[%s2120_s1 + $0x8] sm:$0xff] (!%p135_p3)   ;;  %v1704_v10 = vld [vmem:[%s2120_s1 + $0x10] sm:$0xff] (!%p135_p3)  }
   0x9   : > { %v1697_v3 = vld [vmem:[%s2120_s1 + $0x80] sm:$0xff] (!%p135_p3)   ;;  %1511 = vmatpush3.bf16.msra.mxu0 (!%p135_p3), %v1696_v2  ;;  %v1701_v7 = vld [vmem:[%s2120_s1 + $0x88] sm:$0xff] (!%p135_p3)   ;;  %v1705_v11 = vld [vmem:[%s2120_s1 + $0x90] sm:$0xff] (!%p135_p3)  }
   0xa   : > { %1551 = vmatpush3.bf16.msra.mxu1 (!%p135_p3), %v1697_v3  ;;  %1512 = vmatprep.subr.bf16.mxu0 (!%p135_p3), %v1698_v4  ;;  %v1706_v12 = vld [vmem:[%s2120_s1 + $0x58] sm:$0xff] (!%p135_p3)   ;;  %v1710_v16 = vld [vmem:[%s2120_s1 + $0x60] sm:$0xff] (!%p135_p3)   ;;  %v1714_v20 = vld [vmem:[%s2120_s1 + $0x68] sm:$0xff] (!%p135_p3)  }
   0xb   : > { %1552 = vmatprep.subr.bf16.mxu1 (!%p135_p3), %v1699_v5  ;;  %v1707_v13 = vld [vmem:[%s2120_s1 + $0xd8] sm:$0xff] (!%p135_p3)   ;;  %v1711_v17 = vld [vmem:[%s2120_s1 + $0xe0] sm:$0xff] (!%p135_p3)   ;;  %v1715_v21 = vld [vmem:[%s2120_s1 + $0xe8] sm:$0xff] (!%p135_p3)  }
   0xc   : > { %v1708_v14 = vld [vmem:[%s2120_s1 + $0x18] sm:$0xff] (!%p135_p3)   ;;  %v1712_v18 = vld [vmem:[%s2120_s1 + $0x20] sm:$0xff] (!%p135_p3)   ;;  %v1716_v22 = vld [vmem:[%s2120_s1 + $0x28] sm:$0xff] (!%p135_p3)  }
   0xd   : > { %1513 = vmatpush3.bf16.msra.mxu0 (!%p135_p3), %v1700_v6  ;;  %v1709_v15 = vld [vmem:[%s2120_s1 + $0x98] sm:$0xff] (!%p135_p3)   ;;  %v1713_v19 = vld [vmem:[%s2120_s1 + $0xa0] sm:$0xff] (!%p135_p3)   ;;  %v1717_v23 = vld [vmem:[%s2120_s1 + $0xa8] sm:$0xff] (!%p135_p3)  }
   0xe   : > { %1553 = vmatpush3.bf16.msra.mxu1 %v1701_v7  ;;  %1514 = vmatprep.subr.bf16.mxu0 %v1702_v8  ;;  %s2127_s9 = smov (!%p166_p4, %s1774_s9), 1  ;;  %v1718_v24 = vld [vmem:[%s2120_s1 + $0x70] sm:$0xff]   ;;  %v1722_v28 = vld [vmem:[%s2120_s1 + $0x78] sm:$0xff]   ;;  %v1726_v40 = vld [vmem:[%s2120_s1 + $0x140] sm:$0xff]  }
   0xf   : > { %1554 = vmatprep.subr.bf16.mxu1 %v1703_v9  ;;  %v1719_v25 = vld [vmem:[%s2120_s1 + $0xf0] sm:$0xff]   ;;  %s1477_s19 = sshll.u32 %s2127_s9, 8  ;;  %v1723_v29 = vld [vmem:[%s2120_s1 + $0xf8] sm:$0xff]   ;;  %v1727_v41 = vld [vmem:[%s2120_s1 + $0x1c0] sm:$0xff]  }
  0x10   : > { %v1720_v26 = vld [vmem:[%s2120_s1 + $0x30] sm:$0xff]   ;;  %s1917_s28 = scalar_lea.vmem %s2119_s0, %s1477_s19  ;;  %v1724_v30 = vld [vmem:[%s2120_s1 + $0x38] sm:$0xff]   ;;  %v1728_v42 = vld [vmem:[%s2120_s1 + $0x100] sm:$0xff]  }
  0x11   : > { %1515 = vmatpush3.bf16.msra.mxu0 %v1704_v10  ;;  %v1721_v27 = vld [vmem:[%s2120_s1 + $0xb0] sm:$0xff]   ;;  %v1725_v31 = vld [vmem:[%s2120_s1 + $0xb8] sm:$0xff]   ;;  %v187_v32 = vld [vmem:[%s1917_s28] sm:$0xff] }
  0x12   : > { %1555 = vmatpush3.bf16.msra.mxu1 %v1705_v11  ;;  %1516 = vmatprep.subr.bf16.mxu0 %v1706_v12  ;;  %v191_v33 = vld [vmem:[%s1917_s28 + $0x20] sm:$0xff]  ;;  %v188_v34 = vld [vmem:[%s1917_s28 + $0x8] sm:$0xff]  ;;  %v1734_v56 = vld [vmem:[%s2120_s1 + $0x150] sm:$0xff]  }
  0x13   : > { %1556 = vmatprep.subr.bf16.mxu1 %v1707_v13  ;;  %v1371_v35 = vcombine.low %v187_v32, %v191_v33  ;;  %v1372_v36 = vcombine.high %v187_v32, %v191_v33  ;;  %v192_v37 = vld [vmem:[%s1917_s28 + $0x28] sm:$0xff]  ;;  %v1729_v43 = vld [vmem:[%s2120_s1 + $0x180] sm:$0xff]   ;;  %v1735_v57 = vld [vmem:[%s2120_s1 + $0x1d0] sm:$0xff]  }
  0x14   : > { %v1373_v38 = vcombine.low %v188_v34, %v192_v37  ;;  %v1374_v39 = vcombine.high %v188_v34, %v192_v37  ;;  %v1730_v44 = vld [vmem:[%s2120_s1 + $0x148] sm:$0xff]   ;;  %v195_v48 = vld [vmem:[%s1917_s28 + $0x40] sm:$0xff]  ;;  %v1736_v58 = vld [vmem:[%s2120_s1 + $0x110] sm:$0xff]  }
  0x15   : > { %1517 = vmatpush3.bf16.msra.mxu0 %v1708_v14  ;;  %923 = vmatprep.mubr.bf16.mxu0 %v1372_v36  ;;  %v1731_v45 = vld [vmem:[%s2120_s1 + $0x1c8] sm:$0xff]   ;;  %v199_v49 = vld [vmem:[%s1917_s28 + $0x60] sm:$0xff]  ;;  %v1737_v59 = vld [vmem:[%s2120_s1 + $0x190] sm:$0xff]  }
  0x16   : > { %1557 = vmatpush3.bf16.msra.mxu1 %v1709_v15  ;;  %1518 = vmatprep.subr.bf16.mxu0 %v1710_v16  ;;  %v1732_v46 = vld [vmem:[%s2120_s1 + $0x108] sm:$0xff]   ;;  %v1380_v50 = vcombine.high %v195_v48, %v199_v49  ;;  %v1379_v53 = vcombine.low %v195_v48, %v199_v49  ;;  %v1738_v60 = vld [vmem:[%s2120_s1 + $0x158] sm:$0xff]   ;;  %v203_v0 = vld [vmem:[%s1917_s28 + $0x80] sm:$0xff] }
  0x17   : > { %1558 = vmatprep.subr.bf16.mxu1 %v1711_v17  ;;  %988 = vmatprep.mubr.bf16.mxu1 %v1374_v39  ;;  %v1733_v47 = vld [vmem:[%s2120_s1 + $0x188] sm:$0xff]   ;;  %v1739_v61 = vld [vmem:[%s2120_s1 + $0x1d8] sm:$0xff]   ;;  %v207_v1 = vld [vmem:[%s1917_s28 + $0xa0] sm:$0xff] }
  0x18   : > { %v196_v51 = vld [vmem:[%s1917_s28 + $0x48] sm:$0xff]  ;;  %v1740_v62 = vld [vmem:[%s2120_s1 + $0x118] sm:$0xff]   ;;  %v1388_v4 = vcombine.high %v203_v0, %v207_v1  ;;  %v1387_v6 = vcombine.low %v203_v0, %v207_v1  ;;  %v1742_v8 = vld [vmem:[%s2120_s1 + $0x160] sm:$0xff]  }
  0x19   : > { %1519 = vmatpush3.bf16.msra.mxu0 %v1712_v18  ;;  %v200_v52 = vld [vmem:[%s1917_s28 + $0x68] sm:$0xff]  ;;  %v1741_v63 = vld [vmem:[%s2120_s1 + $0x198] sm:$0xff]   ;;  %v1743_v9 = vld [vmem:[%s2120_s1 + $0x1e0] sm:$0xff]  }
  0x1a   : > { %1559 = vmatpush3.bf16.msra.mxu1 %v1713_v19  ;;  %1520 = vmatprep.subr.bf16.mxu0 %v1714_v20  ;;  %v1382_v54 = vcombine.high %v196_v51, %v200_v52  ;;  %v1381_v55 = vcombine.low %v196_v51, %v200_v52  ;;  %v204_v2 = vld [vmem:[%s1917_s28 + $0x88] sm:$0xff]  ;;  %v1744_v10 = vld [vmem:[%s2120_s1 + $0x120] sm:$0xff]   ;;  %v189_v32 = vld [vmem:[%s1917_s28 + $0x10] sm:$0xff] }
  0x1b   : > { %1560 = vmatprep.subr.bf16.mxu1 %v1715_v21  ;;  %v208_v3 = vld [vmem:[%s1917_s28 + $0xa8] sm:$0xff]  ;;  %v1745_v11 = vld [vmem:[%s2120_s1 + $0x1a0] sm:$0xff]   ;;  %v193_v33 = vld [vmem:[%s1917_s28 + $0x30] sm:$0xff] }
  0x1c   : > { %v1390_v5 = vcombine.high %v204_v2, %v208_v3  ;;  %v1389_v7 = vcombine.low %v204_v2, %v208_v3  ;;  %v1746_v12 = vld [vmem:[%s2120_s1 + $0x168] sm:$0xff]   ;;  %v211_v16 = vld [vmem:[%s1917_s28 + $0xc0] sm:$0xff]  ;;  %v1375_v34 = vcombine.low %v189_v32, %v193_v33  ;;  %v190_v36 = vld [vmem:[%s1917_s28 + $0x18] sm:$0xff] }
  0x1d   : > { %1521 = vmatpush3.bf16.msra.mxu0 %v1716_v22  ;;  %v1747_v13 = vld [vmem:[%s2120_s1 + $0x1e8] sm:$0xff]   ;;  %v215_v17 = vld [vmem:[%s1917_s28 + $0xe0] sm:$0xff]  ;;  %v194_v37 = vld [vmem:[%s1917_s28 + $0x38] sm:$0xff] }
  0x1e   : > { %1561 = vmatpush3.bf16.msra.mxu1 %v1717_v23  ;;  %1522 = vmatprep.subr.bf16.mxu0 %v1718_v24  ;;  %v1748_v14 = vld [vmem:[%s2120_s1 + $0x128] sm:$0xff]   ;;  %v1396_v19 = vcombine.high %v211_v16, %v215_v17  ;;  %v1395_v21 = vcombine.low %v211_v16, %v215_v17  ;;  %v1750_v24 = vld [vmem:[%s2120_s1 + $0x170] sm:$0xff]   ;;  %v1377_v39 = vcombine.low %v190_v36, %v194_v37  ;;  %v206_v48 = vld [vmem:[%s1917_s28 + $0x98] sm:$0xff] }
  0x1f   : > { %1562 = vmatprep.subr.bf16.mxu1 %v1719_v25  ;;  %v1749_v15 = vld [vmem:[%s2120_s1 + $0x1a8] sm:$0xff]   ;;  %v1751_v25 = vld [vmem:[%s2120_s1 + $0x1f0] sm:$0xff]   ;;  %v210_v49 = vld [vmem:[%s1917_s28 + $0xb8] sm:$0xff] }
  0x20   : > { %v212_v18 = vld [vmem:[%s1917_s28 + $0xc8] sm:$0xff] }
  0x21   : > { %1523 = vmatpush3.bf16.msra.mxu0 %v1720_v26  ;;  %v216_v20 = vld [vmem:[%s1917_s28 + $0xe8] sm:$0xff]  ;;  %v1752_v26 = vld [vmem:[%s2120_s1 + $0x130] sm:$0xff]  }
  0x22   : > { %1563 = vmatpush3.bf16.msra.mxu1 %v1721_v27  ;;  %1524 = vmatprep.subr.bf16.mxu0 %v1722_v28  ;;  %v1398_v22 = vcombine.high %v212_v18, %v216_v20  ;;  %v1397_v23 = vcombine.low %v212_v18, %v216_v20  ;;  %v1753_v27 = vld [vmem:[%s2120_s1 + $0x1b0] sm:$0xff]   ;;  %v1754_v28 = vld [vmem:[%s2120_s1 + $0x178] sm:$0xff]  }
  0x23   : > { %1564 = vmatprep.subr.bf16.mxu1 %v1723_v29  ;;  %v1755_v29 = vld [vmem:[%s2120_s1 + $0x1f8] sm:$0xff]  }
  0x25   : > { %1525 = vmatpush3.bf16.msra.mxu0 %v1724_v30  ;;  %v1756_v30 = vld [vmem:[%s2120_s1 + $0x138] sm:$0xff]  }
  0x26   : > { %1565 = vmatpush3.bf16.msra.mxu1 %v1725_v31  ;;  %1590 = vmatprep.subr.bf16.mxu0 %v1726_v40  ;;  %v1757_v31 = vld [vmem:[%s2120_s1 + $0x1b8] sm:$0xff]   ;;  %v1378_v40 = vcombine.high %v190_v36, %v194_v37 }
  0x27   : > { %1630 = vmatprep.subr.bf16.mxu1 %v1727_v41  ;;  %v201_v41 = vld [vmem:[%s1917_s28 + $0x70] sm:$0xff] }
  0x28   : > { %924 = vmatmul.mubr.bf16.vlgmr.msra.gmra.mrb[0].mxu0 %v1371_v35  ;;  %v1376_v35 = vcombine.high %v189_v32, %v193_v33 }
  0x29   : > { %989 = vmatmul.mubr.bf16.vlgmr.msra.gmra.mrb[0].mxu1 %v1373_v38  ;;  %1591 = vmatpush3.bf16.msra.mxu0 %v1728_v42  ;;  %v197_v38 = vld [vmem:[%s1917_s28 + $0x50] sm:$0xff]  ;;  %v198_v42 = vld [vmem:[%s1917_s28 + $0x58] sm:$0xff] }
  0x2a   : > { %1631 = vmatpush3.bf16.msra.mxu1 %v1729_v43  ;;  %1592 = vmatprep.subr.bf16.mxu0 %v1730_v44  ;;  %v202_v43 = vld [vmem:[%s1917_s28 + $0x78] sm:$0xff]  ;;  %v1384_v44 = vcombine.high %v197_v38, %v201_v41 }
  0x2b   : > { %1632 = vmatprep.subr.bf16.mxu1 %v1731_v45  ;;  %931 = vmatprep.mubr.bf16.mxu0 %v1380_v50  ;;  %v1386_v45 = vcombine.high %v198_v42, %v202_v43  ;;  %v1383_v50 = vcombine.low %v197_v38, %v201_v41  ;;  %v1385_v51 = vcombine.low %v198_v42, %v202_v43 }
  0x2c   : > { %996 = vmatprep.mubr.bf16.mxu1 %v1382_v54  ;;  %v213_v54 = vld [vmem:[%s1917_s28 + $0xd0] sm:$0xff] }
  0x2d   : > { %1593 = vmatpush3.bf16.msra.mxu0 %v1732_v46  ;;  %v205_v46 = vld [vmem:[%s1917_s28 + $0x90] sm:$0xff] }
  0x2e   : > { %1633 = vmatpush3.bf16.msra.mxu1 %v1733_v47  ;;  %1594 = vmatprep.subr.bf16.mxu0 %v1734_v56  ;;  %v209_v47 = vld [vmem:[%s1917_s28 + $0xb0] sm:$0xff]  ;;  %v214_v56 = vld [vmem:[%s1917_s28 + $0xd8] sm:$0xff] }
  0x2f   : > { %1634 = vmatprep.subr.bf16.mxu1 %v1735_v57  ;;  %v1392_v52 = vcombine.high %v205_v46, %v209_v47  ;;  %v218_v57 = vld [vmem:[%s1917_s28 + $0xf8] sm:$0xff] }
  0x30   : > { %932 = vmatmul.mubr.bf16.gmra.mrb[4].mxu0 %v1379_v53  ;;  %v1394_v53 = vcombine.high %v206_v48, %v210_v49 }
  0x31   : > { %997 = vmatmul.mubr.bf16.gmra.mrb[4].mxu1 %v1381_v55  ;;  %1595 = vmatpush3.bf16.msra.mxu0 %v1736_v58  ;;  %v217_v55 = vld [vmem:[%s1917_s28 + $0xf0] sm:$0xff]  ;;  %v1391_v58 = vcombine.low %v205_v46, %v209_v47  ;;  %s1478_s28 = sshll.u32 %s2127_s9, 5 }
  0x32   : > { %1635 = vmatpush3.bf16.msra.mxu1 %v1737_v59  ;;  %1596 = vmatprep.subr.bf16.mxu0 %v1738_v60  ;;  %v1393_v59 = vcombine.low %v206_v48, %v210_v49  ;;  %v1400_v60 = vcombine.high %v213_v54, %v217_v55  ;;  %s184_s9 = scalar_lea.vmem %s2121_s2, %s1478_s28 }
  0x33   : > { %1636 = vmatprep.subr.bf16.mxu1 %v1739_v61  ;;  %939 = vmatprep.mubr.bf16.mxu0 %v1388_v4  ;;  %v1402_v61 = vcombine.high %v214_v56, %v218_v57 }
  0x34   : > { %1004 = vmatprep.mubr.bf16.mxu1 %v1390_v5 }
  0x35   : > { %1597 = vmatpush3.bf16.msra.mxu0 %v1740_v62  ;;  %v1399_v62 = vcombine.low %v213_v54, %v217_v55 }
  0x36   : > { %1637 = vmatpush3.bf16.msra.mxu1 %v1741_v63  ;;  %1598 = vmatprep.subr.bf16.mxu0 %v1742_v8  ;;  %v1401_v63 = vcombine.low %v214_v56, %v218_v57 }
  0x37   : > { %1638 = vmatprep.subr.bf16.mxu1 %v1743_v9 }
  0x38   : > { %940 = vmatmul.mubr.bf16.gmra.mrb[8].mxu0 %v1387_v6 }
  0x39   : > { %1005 = vmatmul.mubr.bf16.gmra.mrb[8].mxu1 %v1389_v7  ;;  %1599 = vmatpush3.bf16.msra.mxu0 %v1744_v10 }
  0x3a   : > { %1639 = vmatpush3.bf16.msra.mxu1 %v1745_v11  ;;  %1600 = vmatprep.subr.bf16.mxu0 %v1746_v12 }
  0x3b   : > { %1640 = vmatprep.subr.bf16.mxu1 %v1747_v13  ;;  %947 = vmatprep.mubr.bf16.mxu0 %v1396_v19 }
  0x3c   : > { %1012 = vmatprep.mubr.bf16.mxu1 %v1398_v22 }
  0x3d   : > { %1601 = vmatpush3.bf16.msra.mxu0 %v1748_v14 }
  0x3e   : > { %1641 = vmatpush3.bf16.msra.mxu1 %v1749_v15  ;;  %1602 = vmatprep.subr.bf16.mxu0 %v1750_v24 }
  0x3f   : > { %1642 = vmatprep.subr.bf16.mxu1 %v1751_v25 }
  0x40   : > { %948 = vmatmul.mubr.bf16.gmra.mrb[12].mxu0 %v1395_v21 }
  0x41   : > { %1013 = vmatmul.mubr.bf16.gmra.mrb[12].mxu1 %v1397_v23  ;;  %1603 = vmatpush3.bf16.msra.mxu0 %v1752_v26 }
  0x42   : > { %1643 = vmatpush3.bf16.msra.mxu1 %v1753_v27  ;;  %1604 = vmatprep.subr.bf16.mxu0 %v1754_v28 }
  0x43   : > { %1644 = vmatprep.subr.bf16.mxu1 %v1755_v29  ;;  %1053 = vmatprep.mubr.bf16.mxu0 %v1376_v35 }
  0x44   : > { %1118 = vmatprep.mubr.bf16.mxu1 %v1378_v40 }
  0x45   : > { %1605 = vmatpush3.bf16.msra.mxu0 %v1756_v30 }
  0x46   : > { %1645 = vmatpush3.bf16.msra.mxu1 %v1757_v31 }
  0x48   : > { %1054 = vmatmul.mubr.bf16.vlgmr.msra.gmra.mrb[16].mxu0 %v1375_v34 }
  0x49   : > { %1119 = vmatmul.mubr.bf16.vlgmr.msra.gmra.mrb[16].mxu1 %v1377_v39  ;;  %1061 = vmatprep.mubr.bf16.mxu0 %v1384_v44 }
  0x4a   : > { %1126 = vmatprep.mubr.bf16.mxu1 %v1386_v45 }
  0x50   : > { %1062 = vmatmul.mubr.bf16.gmra.mrb[20].mxu0 %v1383_v50 }
  0x51   : > { %1127 = vmatmul.mubr.bf16.gmra.mrb[20].mxu1 %v1385_v51  ;;  %1069 = vmatprep.mubr.bf16.mxu0 %v1392_v52 }
  0x52   : > { %1134 = vmatprep.mubr.bf16.mxu1 %v1394_v53 }
  0x58   : > { %1070 = vmatmul.mubr.bf16.gmra.mrb[24].mxu0 %v1391_v58 }
  0x59   : > { %1135 = vmatmul.mubr.bf16.gmra.mrb[24].mxu1 %v1393_v59  ;;  %1077 = vmatprep.mubr.bf16.mxu0 %v1400_v60 }
  0x5a   : > { %1142 = vmatprep.mubr.bf16.mxu1 %v1402_v61 }
  0x60   : > { %1078 = vmatmul.mubr.bf16.gmra.mrb[28].mxu0 %v1399_v62 }
  0x61   : > { %1143 = vmatmul.mubr.bf16.gmra.mrb[28].mxu1 %v1401_v63 }
  0xfb   : > { %v1526_v0 = vpop.f32.mrb[0].mxu0 }
  0xfc   : > { %v1566_v1 = vpop.f32.mrb[0].mxu1  ;;  %v1527_v2 = vpop.f32.mrb[1].mxu0 }
  0xfd   : > { %v1528_v3 = vadd.f32 %v1527_v2, %v1526_v0  ;;  %v1567_v4 = vpop.f32.mrb[1].mxu1  ;;  %v1529_v5 = vpop.f32.mrb[2].mxu0 }
  0xfe   : > { %v1568_v6 = vadd.f32 %v1567_v4, %v1566_v1  ;;  %v1569_v7 = vpop.f32.mrb[2].mxu1  ;;  %v1530_v8 = vpop.f32.mrb[3].mxu0 }
  0xff   : > { %v1531_v9 = vadd.f32 %v1530_v8, %v1529_v5  ;;  %v1570_v10 = vpop.f32.mrb[3].mxu1 }
 0x100   : > { %v991_v11 = vadd.f32 %v1568_v6, %v1528_v3  ;;  %v1571_v12 = vadd.f32 %v1570_v10, %v1569_v7 }
 0x102   : > { %v994_v13 = vadd.f32 %v1571_v12, %v1531_v9 }
 0x103   : > { %v1532_v14 = vpop.f32.mrb[4].mxu0 }
 0x104   : > { %v1572_v15 = vpop.f32.mrb[4].mxu1  ;;  %v1533_v16 = vpop.f32.mrb[5].mxu0 }
 0x105   : > { %v1534_v17 = vadd.f32 %v1533_v16, %v1532_v14  ;;  %v1573_v18 = vpop.f32.mrb[5].mxu1  ;;  %v1535_v19 = vpop.f32.mrb[6].mxu0 }
 0x106   : > { %v1574_v20 = vadd.f32 %v1573_v18, %v1572_v15  ;;  %v1575_v21 = vpop.f32.mrb[6].mxu1  ;;  %v1536_v22 = vpop.f32.mrb[7].mxu0 }
 0x107   : > { %v1537_v23 = vadd.f32 %v1536_v22, %v1535_v19  ;;  %v1576_v24 = vpop.f32.mrb[7].mxu1 }
 0x108   : > { %v999_v25 = vadd.f32 %v1574_v20, %v1534_v17  ;;  %v1577_v26 = vadd.f32 %v1576_v24, %v1575_v21 }
 0x10a   : > { %v2053_v27 = vadd.f32 %v1577_v26, %v1537_v23 }
 0x10b   : > { %v1538_v28 = vpop.f32.mrb[8].mxu0 }
 0x10c   : > { %v1578_v29 = vpop.f32.mrb[8].mxu1  ;;  %v1539_v30 = vpop.f32.mrb[9].mxu0 }
 0x10d   : > { %v1579_v31 = vpop.f32.mrb[9].mxu1  ;;  %v1540_v32 = vadd.f32 %v1539_v30, %v1538_v28  ;;  %v1541_v34 = vpop.f32.mrb[10].mxu0 }
 0x10e   : > { %v1580_v33 = vadd.f32 %v1579_v31, %v1578_v29  ;;  %v1581_v35 = vpop.f32.mrb[10].mxu1  ;;  %v1542_v36 = vpop.f32.mrb[11].mxu0 }
 0x10f   : > { %v1582_v37 = vpop.f32.mrb[11].mxu1  ;;  %v1543_v39 = vadd.f32 %v1542_v36, %v1541_v34 }
 0x110   : > { %v2055_v38 = vadd.f32 %v1580_v33, %v1540_v32  ;;  %v1583_v40 = vadd.f32 %v1582_v37, %v1581_v35 }
 0x112   : > { %v2057_v41 = vadd.f32 %v1583_v40, %v1543_v39 }
 0x113   : > { %v1544_v42 = vpop.f32.mrb[12].mxu0 }
 0x114   : > { %v1584_v43 = vpop.f32.mrb[12].mxu1  ;;  %v1545_v44 = vpop.f32.mrb[13].mxu0 }
 0x115   : > { %v1546_v45 = vadd.f32 %v1545_v44, %v1544_v42  ;;  %v1585_v46 = vpop.f32.mrb[13].mxu1  ;;  %v1547_v47 = vpop.f32.mrb[14].mxu0 }
 0x116   : > { %v1586_v48 = vadd.f32 %v1585_v46, %v1584_v43  ;;  %v1587_v49 = vpop.f32.mrb[14].mxu1  ;;  %v1548_v50 = vpop.f32.mrb[15].mxu0 }
 0x117   : > { %v1549_v51 = vadd.f32 %v1548_v50, %v1547_v47  ;;  %v1588_v52 = vpop.f32.mrb[15].mxu1 }
 0x118   : > { %v2059_v53 = vadd.f32 %v1586_v48, %v1546_v45  ;;  %v1589_v54 = vadd.f32 %v1588_v52, %v1587_v49 }
 0x11a   : > { %v2061_v55 = vadd.f32 %v1589_v54, %v1549_v51 }
 0x11b   : > { %v1606_v56 = vpop.f32.mrb[16].mxu0 }
 0x11c   : > { %v1646_v57 = vpop.f32.mrb[16].mxu1  ;;  %v1607_v58 = vpop.f32.mrb[17].mxu0 }
 0x11d   : > { %v1608_v59 = vadd.f32 %v1607_v58, %v1606_v56  ;;  %v1647_v60 = vpop.f32.mrb[17].mxu1  ;;  %v1609_v61 = vpop.f32.mrb[18].mxu0 }
 0x11e   : > { %v1648_v62 = vadd.f32 %v1647_v60, %v1646_v57  ;;  %v1649_v63 = vpop.f32.mrb[18].mxu1  ;;  %v1610_v0 = vpop.f32.mrb[19].mxu0 }
 0x11f   : > { %v1056_v1 = vadd.f32 %v1608_v59, %v991_v11  ;;  %v1611_v2 = vadd.f32 %v1610_v0, %v1609_v61  ;;  %v1650_v3 = vpop.f32.mrb[19].mxu1 }
 0x120   : > { %v1651_v4 = vadd.f32 %v1650_v3, %v1649_v63 }
 0x121   : > { %v2063_v5 = vadd.f32 %v1648_v62, %v1056_v1  ;;  %v1059_v6 = vadd.f32 %v1611_v2, %v994_v13 }
 0x123   : > { %v2065_v7 = vadd.f32 %v1651_v4, %v1059_v6  ;;  %v1612_v8 = vpop.f32.mrb[20].mxu0  ;;  %v1166_v12 = vmul.f32 %v2063_v5, %v2063_v5 }
 0x124   : > { %v1652_v9 = vpop.f32.mrb[20].mxu1  ;;  %v1613_v10 = vpop.f32.mrb[21].mxu0 }
 0x125   : > { %v1151_v14 = vadd.f32 %v2065_v7, %v2063_v5  ;;  %v1167_v11 = vmul.f32 %v2065_v7, %v2065_v7  ;;  %v1614_v15 = vadd.f32 %v1613_v10, %v1612_v8  ;;  %v1653_v16 = vpop.f32.mrb[21].mxu1  ;;  %v1615_v17 = vpop.f32.mrb[22].mxu0 }
 0x126   : > { %v1654_v18 = vadd.f32 %v1653_v16, %v1652_v9  ;;  %v1655_v19 = vpop.f32.mrb[22].mxu1  ;;  %v1616_v13 = vpop.f32.mrb[23].mxu0 }
 0x127   : > { %v1174_v20 = vadd.f32 %v1167_v11, %v1166_v12  ;;  %v1064_v21 = vadd.f32 %v1614_v15, %v999_v25  ;;  %v1617_v22 = vadd.f32 %v1616_v13, %v1615_v17  ;;  %v1656_v23 = vpop.f32.mrb[23].mxu1 }
 0x128   : > { %v1657_v24 = vadd.f32 %v1656_v23, %v1655_v19 }
 0x129   : > { %v2073_v26 = vadd.f32 %v1654_v18, %v1064_v21  ;;  %v1067_v28 = vadd.f32 %v1617_v22, %v2053_v27 }
 0x12b   : > { %v1152_v29 = vadd.f32 %v1151_v14, %v2073_v26  ;;  %v1168_v30 = vmul.f32 %v2073_v26, %v2073_v26  ;;  %v2079_v31 = vadd.f32 %v1657_v24, %v1067_v28  ;;  %v1618_v32 = vpop.f32.mrb[24].mxu0 }
 0x12c   : > { %v1658_v33 = vpop.f32.mrb[24].mxu1  ;;  %v1619_v34 = vpop.f32.mrb[25].mxu0 }
 0x12d   : > { %v1175_v35 = vadd.f32 %v1174_v20, %v1168_v30  ;;  %v1153_v25 = vadd.f32 %v1152_v29, %v2079_v31  ;;  %v1169_v36 = vmul.f32 %v2079_v31, %v2079_v31  ;;  %v1620_v37 = vadd.f32 %v1619_v34, %v1618_v32  ;;  %v1659_v39 = vpop.f32.mrb[25].mxu1  ;;  %v1621_v40 = vpop.f32.mrb[26].mxu0 }
 0x12e   : > { %v1660_v27 = vadd.f32 %v1659_v39, %v1658_v33  ;;  %v1661_v42 = vpop.f32.mrb[26].mxu1  ;;  %v1622_v43 = vpop.f32.mrb[27].mxu0 }
 0x12f   : > { %v1176_v44 = vadd.f32 %v1175_v35, %v1169_v36  ;;  %v1072_v45 = vadd.f32 %v1620_v37, %v2055_v38  ;;  %v1623_v46 = vadd.f32 %v1622_v43, %v1621_v40  ;;  %v1662_v47 = vpop.f32.mrb[27].mxu1 }
 0x130   : > { %v1663_v48 = vadd.f32 %v1662_v47, %v1661_v42 }
 0x131   : > { %v2085_v49 = vadd.f32 %v1660_v27, %v1072_v45  ;;  %v1075_v50 = vadd.f32 %v1623_v46, %v2057_v41 }
 0x133   : > { %v1154_v51 = vadd.f32 %v1153_v25, %v2085_v49  ;;  %v1170_v52 = vmul.f32 %v2085_v49, %v2085_v49  ;;  %v1140_v54 = vadd.f32 %v1663_v48, %v1075_v50  ;;  %v1624_v56 = vpop.f32.mrb[28].mxu0 }
 0x134   : > { %v1664_v57 = vpop.f32.mrb[28].mxu1  ;;  %v1625_v58 = vpop.f32.mrb[29].mxu0 }
 0x135   : > { %v1177_v59 = vadd.f32 %v1176_v44, %v1170_v52  ;;  %v1155_v60 = vadd.f32 %v1154_v51, %v1140_v54  ;;  %v1171_v61 = vmul.f32 %v1140_v54, %v1140_v54  ;;  %v1626_v38 = vadd.f32 %v1625_v58, %v1624_v56  ;;  %v1665_v62 = vpop.f32.mrb[29].mxu1  ;;  %v1627_v63 = vpop.f32.mrb[30].mxu0 }
 0x136   : > { %v1666_v0 = vadd.f32 %v1665_v62, %v1664_v57  ;;  %v1667_v1 = vpop.f32.mrb[30].mxu1  ;;  %v1628_v2 = vpop.f32.mrb[31].mxu0 }
 0x137   : > { %v1178_v3 = vadd.f32 %v1177_v59, %v1171_v61  ;;  %v1080_v41 = vadd.f32 %v1626_v38, %v2059_v53  ;;  %v1629_v4 = vadd.f32 %v1628_v2, %v1627_v63  ;;  %v1668_v6 = vpop.f32.mrb[31].mxu1 }
 0x138   : > { %v1669_v8 = vadd.f32 %v1668_v6, %v1667_v1 }
 0x139   : > { %v1145_v9 = vadd.f32 %v1666_v0, %v1080_v41  ;;  %v1083_v10 = vadd.f32 %v1629_v4, %v2061_v55 }
 0x13b   : > { %v1156_v12 = vadd.f32 %v1155_v60, %v1145_v9  ;;  %v1172_v14 = vmul.f32 %v1145_v9, %v1145_v9  ;;  %v1148_v11 = vadd.f32 %v1669_v8, %v1083_v10 }
 0x13d   : > { %v1179_v15 = vadd.f32 %v1178_v3, %v1172_v14  ;;  %v1157_v16 = vadd.f32 %v1156_v12, %v1148_v11  ;;  %v1173_v17 = vmul.f32 %v1148_v11, %v1148_v11 }
 0x13f   : > { %v1158_v18 = vrot.slane %v1157_v16, 4  ;;  %v1180_v19 = vadd.f32 %v1179_v15, %v1173_v17 }
 0x141   : > { %v1159_v13 = vadd.f32 %v1158_v18, %v1157_v16  ;;  %v1181_v20 = vrot.slane %v1180_v19, 4 }
 0x143   : > { %v1160_v21 = vrot.slane %v1159_v13, 2  ;;  %v1182_v22 = vadd.f32 %v1181_v20, %v1180_v19 }
 0x145   : > { %v1161_v23 = vadd.f32 %v1160_v21, %v1159_v13  ;;  %v1183_v53 = vrot.slane %v1182_v22, 2 }
 0x147   : > { %v1162_v24 = vrot.slane %v1161_v23, 1  ;;  %v1184_v28 = vadd.f32 %v1183_v53, %v1182_v22 }
 0x149   : > { %v1163_v29 = vadd.f32 %v1162_v24, %v1161_v23  ;;  %v1185_v30 = vrot.slane %v1184_v28, 1 }
 0x14b   : > { %v1165_v32 = vmul.f32 0.015625, %v1163_v29  ;;  %v1186_v55 = vadd.f32 %v1185_v30, %v1184_v28 }
 0x14d   : > { %v1187_v33 = vmul.f32 0.015625, %v1186_v55  ;;  %v1188_v34 = vmul.f32 %v1165_v32, %v1165_v32  ;;  %v1190_v35 = vsub.f32 %v2063_v5, %v1165_v32  ;;  %v1191_v25 = vsub.f32 %v2065_v7, %v1165_v32 }
 0x14e   : > { %v1192_v36 = vsub.f32 %v2073_v26, %v1165_v32  ;;  %v1193_v37 = vsub.f32 %v2079_v31, %v1165_v32  ;;  %v1194_v39 = vsub.f32 %v2085_v49, %v1165_v32  ;;  %v1195_v40 = vsub.f32 %v1140_v54, %v1165_v32 }
 0x14f   : > { %v1189_v27 = vsub.f32 %v1187_v33, %v1188_v34  ;;  %v1196_v42 = vsub.f32 %v1145_v9, %v1165_v32  ;;  %v1197_v43 = vsub.f32 %v1148_v11, %v1165_v32 }
 0x151   : > { %v1198_v44 = vadd.f32 1e-05, %v1189_v27 }
 0x153   : > { %1758 = vrsqrt.f32 %v1198_v44 }
 0x15d   : > { %v1759_v45 = vpop.eup %1758 }
 0x15e   : > { %v1200_v46 = vmul.f32 %v1759_v45, %v1190_v35  ;;  %v1201_v47 = vmul.f32 %v1759_v45, %v1191_v25  ;;  %v1202_v48 = vmul.f32 %v1759_v45, %v1192_v36  ;;  %v1203_v5 = vmul.f32 %v1759_v45, %v1193_v37 }
 0x15f   : > { %v1204_v50 = vmul.f32 %v1759_v45, %v1194_v39  ;;  %v1205_v7 = vmul.f32 %v1759_v45, %v1195_v40  ;;  %v1206_v51 = vmul.f32 %v1759_v45, %v1196_v42  ;;  %v1207_v26 = vmul.f32 %v1759_v45, %v1197_v43 }
 0x160   : > { %vm1208_vm0 = vcmp.ge.f32.partialorder %v1200_v46, 0.0  ;;  %vm1209_vm1 = vcmp.ge.f32.partialorder %v1201_v47, 0.0  ;;  %vm1210_vm2 = vcmp.ge.f32.partialorder %v1202_v48, 0.0  ;;  %vm1211_vm3 = vcmp.ge.f32.partialorder %v1203_v5, 0.0 }
 0x161   : > { %vm1212_vm4 = vcmp.ge.f32.partialorder %v1204_v50, 0.0  ;;  %vm1213_vm5 = vcmp.ge.f32.partialorder %v1205_v7, 0.0  ;;  %vm1214_vm6 = vcmp.ge.f32.partialorder %v1206_v51, 0.0  ;;  %vm1215_vm7 = vcmp.ge.f32.partialorder %v1207_v26, 0.0 }
 0x162   : > { %v1216_v31 = vmul.f32 0.2, %v1200_v46  ;;  %v1217_v49 = vmul.f32 0.2, %v1201_v47  ;;  %v1218_v52 = vmul.f32 0.2, %v1202_v48 }
 0x163   : > { %v1219_v54 = vmul.f32 0.2, %v1203_v5  ;;  %v1220_v56 = vmul.f32 0.2, %v1204_v50  ;;  %v1221_v57 = vmul.f32 0.2, %v1205_v7 }
 0x164   : > { %v1222_v58 = vmul.f32 0.2, %v1206_v51  ;;  %v1223_v59 = vmul.f32 0.2, %v1207_v26  ;;  %v1224_v60 = vsel %vm1208_vm0, %v1200_v46, %v1216_v31  ;;  %v1225_v61 = vsel %vm1209_vm1, %v1201_v47, %v1217_v49 }
 0x165   : > { %v1226_v38 = vsel %vm1210_vm2, %v1202_v48, %v1218_v52  ;;  %v1227_v62 = vsel %vm1211_vm3, %v1203_v5, %v1219_v54  ;;  %v1228_v63 = vsel %vm1212_vm4, %v1204_v50, %v1220_v56  ;;  %v1229_v0 = vsel %vm1213_vm5, %v1205_v7, %v1221_v57 }
 0x166   : > { %v1230_v1 = vsel %vm1214_vm6, %v1206_v51, %v1222_v58  ;;  %v1231_v2 = vsel %vm1215_vm7, %v1207_v26, %v1223_v59  ;;  %v1490_v3 = vpack.c.bf16 %v1225_v61, %v1224_v60  ;;  %v1495_v41 = vpack.c.bf16 %v1227_v62, %v1226_v38 }
 0x167   : > { %v1500_v4 = vpack.c.bf16 %v1229_v0, %v1228_v63  ;;  %v1505_v6 = vpack.c.bf16 %v1231_v2, %v1230_v1 }
 0x168   : > { %1491 = vst [vmem:[%s184_s9] sm:$0xff] %v1490_v3   ;;  %1507 = vst [vmem:[%s184_s9 + $0x8] sm:$0xff] %v1495_v41  }
 0x169   : > { %1508 = vst [vmem:[%s184_s9 + $0x10] sm:$0xff] %v1500_v4   ;;  %1509 = vst [vmem:[%s184_s9 + $0x18] sm:$0xff] %v1505_v6  }
 0x16a PF: > { %s12_s11 = sadd.s32 1, %s1782_s11   ;;  %s2122_s9 = smov %s1778_s10 }
 0x16b   : > { %p9_p5 = scmp.ge.s32.totalorder %s12_s11, 4   ;;  %s2123_s10 = smov %s2125_s12 }
 0x16d   :  { %11 = sbr.rel (!%p9_p5) target bundleno = 2 (0x2), region = 58 }

// kernel: discriminator_forward.7
= control target key start
LH: loop header
LB: loop body
LE: loop exit
PB: predicated region body
PF: predicated region fallthrough
CT: control target
= control target key end

     0   :  { %s3107_s9 = smov 0   ;;  %s3109_s10 = smov 0   ;;  %s3982_s0 = inlined_call_operand.vmem [shape: bf16[2,16,2048], index: 0, kind: input, shape index: {}]   ;;  %s3983_s1 = inlined_call_operand.vmem [shape: bf16[2048,256], index: 1, kind: input, shape index: {}]   ;;  %s3984_s2 = inlined_call_operand.vmem [shape: bf16[2,16,256], index: 2, kind: output, shape index: {}]  }
   0x1   :  { %s3111_s11 = smov 0  }
   0x2 LB: > { %s24_s12 = sadd.s32 1, %s3086_s10  ;;  %p2343_p0 = scmp.ge.s32.totalorder %s3090_s11, 1  ;;  %s3090_s11 = sphi %s3111_s11, %s12_s11   ;;  %s3086_s10 = sphi %s3109_s10, %s3986_s10   ;;  %s3082_s9 = sphi %s3107_s9, %s3985_s9  }
   0x3   : > { %p26_p1 = scmp.ge.s32.totalorder %s24_s12, 2  ;;  %p134_p2 = scmp.lt.s32.totalorder %s3090_s11, 3 }
   0x5   : > { %s3988_s12 = smov (%p26_p1, %s24_s12), 0  ;;  %p135_p3 = pnand %p2343_p0, %p134_p2 }
   0x6   : > { %v2680_v0 = vld [vmem:[%s3983_s1 + $0x4] ss:$8 sps:$4 sm:$0xff] (!%p135_p3)   ;;  %v2684_v2 = vld [vmem:[%s3983_s1] ss:$8 sps:$4 sm:$0xff] (!%p135_p3)   ;;  %v2686_v4 = vld [vmem:[%s3983_s1 + $0x14] ss:$8 sps:$4 sm:$0xff] (!%p135_p3)  }
   0x7   : > { %138 = sbr.rel (%p135_p3) target bundleno = 522 (0x20a), region = 28  ;;  %v2682_v1 = vld [vmem:[%s3983_s1 + $0x404] ss:$8 sps:$4 sm:$0xff] (!%p135_p3)   ;;  %1820 = vmatprep.subr.bf16.mxu1 (!%p135_p3), %v2680_v0  ;;  %v2685_v3 = vld [vmem:[%s3983_s1 + $0x400] ss:$8 sps:$4 sm:$0xff] (!%p135_p3)   ;;  %p167_p4 = scmp.lt.s32.totalorder (!%p135_p3), %s3082_s9, 1 }
   0x8   : > { %1992 = vmatprep.subr.bf16.mxu0 (!%p135_p3), %v2682_v1  ;;  %1821 = vmatpush1.bf16.msra.mxu1 (!%p135_p3), %v2684_v2  ;;  %v2688_v5 = vld [vmem:[%s3983_s1 + $0x414] ss:$8 sps:$4 sm:$0xff] (!%p135_p3)   ;;  %v2690_v6 = vld [vmem:[%s3983_s1 + $0x10] ss:$8 sps:$4 sm:$0xff] (!%p135_p3)   ;;  %v2692_v8 = vld [vmem:[%s3983_s1 + $0x24] ss:$8 sps:$4 sm:$0xff] (!%p135_p3)  }
   0x9   : > { %1993 = vmatpush1.bf16.msra.mxu0 (!%p135_p3), %v2685_v3  ;;  %1822 = vmatprep.subr.bf16.mxu1 (!%p135_p3), %v2686_v4  ;;  %v2691_v7 = vld [vmem:[%s3983_s1 + $0x410] ss:$8 sps:$4 sm:$0xff] (!%p135_p3)   ;;  %v2694_v9 = vld [vmem:[%s3983_s1 + $0x424] ss:$8 sps:$4 sm:$0xff] (!%p135_p3)   ;;  %v2696_v10 = vld [vmem:[%s3983_s1 + $0x20] ss:$8 sps:$4 sm:$0xff] (!%p135_p3)  }
   0xa   : > { %1994 = vmatprep.subr.bf16.mxu0 (!%p135_p3), %v2688_v5  ;;  %v2697_v11 = vld [vmem:[%s3983_s1 + $0x420] ss:$8 sps:$4 sm:$0xff] (!%p135_p3)   ;;  %v2698_v12 = vld [vmem:[%s3983_s1 + $0x34] ss:$8 sps:$4 sm:$0xff] (!%p135_p3)   ;;  %v2702_v14 = vld [vmem:[%s3983_s1 + $0x30] ss:$8 sps:$4 sm:$0xff] (!%p135_p3)  }
   0xb   : > { %v2700_v13 = vld [vmem:[%s3983_s1 + $0x434] ss:$8 sps:$4 sm:$0xff] (!%p135_p3)   ;;  %v2703_v15 = vld [vmem:[%s3983_s1 + $0x430] ss:$8 sps:$4 sm:$0xff] (!%p135_p3)   ;;  %v2704_v16 = vld [vmem:[%s3983_s1 + $0x44] ss:$8 sps:$4 sm:$0xff] (!%p135_p3)  }
   0xc   : > { %1823 = vmatpush1.bf16.msra.mxu1 (!%p135_p3), %v2690_v6  ;;  %v2706_v17 = vld [vmem:[%s3983_s1 + $0x444] ss:$8 sps:$4 sm:$0xff] (!%p135_p3)   ;;  %v2708_v18 = vld [vmem:[%s3983_s1 + $0x40] ss:$8 sps:$4 sm:$0xff] (!%p135_p3)   ;;  %v2710_v20 = vld [vmem:[%s3983_s1 + $0x54] ss:$8 sps:$4 sm:$0xff] (!%p135_p3)  }
   0xd   : > { %1995 = vmatpush1.bf16.msra.mxu0 (!%p135_p3), %v2691_v7  ;;  %1824 = vmatprep.subr.bf16.mxu1 (!%p135_p3), %v2692_v8  ;;  %v2709_v19 = vld [vmem:[%s3983_s1 + $0x440] ss:$8 sps:$4 sm:$0xff] (!%p135_p3)   ;;  %v2712_v21 = vld [vmem:[%s3983_s1 + $0x454] ss:$8 sps:$4 sm:$0xff] (!%p135_p3)   ;;  %v2714_v22 = vld [vmem:[%s3983_s1 + $0x50] ss:$8 sps:$4 sm:$0xff] (!%p135_p3)  }
   0xe   : > { %1996 = vmatprep.subr.bf16.mxu0 %v2694_v9  ;;  %v2715_v23 = vld [vmem:[%s3983_s1 + $0x450] ss:$8 sps:$4 sm:$0xff]   ;;  %v2716_v24 = vld [vmem:[%s3983_s1 + $0x64] ss:$8 sps:$4 sm:$0xff]   ;;  %v2720_v26 = vld [vmem:[%s3983_s1 + $0x60] ss:$8 sps:$4 sm:$0xff]  }
   0xf   : > { %v2718_v25 = vld [vmem:[%s3983_s1 + $0x464] ss:$8 sps:$4 sm:$0xff]   ;;  %v2721_v27 = vld [vmem:[%s3983_s1 + $0x460] ss:$8 sps:$4 sm:$0xff]   ;;  %v2722_v28 = vld [vmem:[%s3983_s1 + $0x74] ss:$8 sps:$4 sm:$0xff]  }
  0x10   : > { %1825 = vmatpush1.bf16.msra.mxu1 %v2696_v10  ;;  %v2724_v29 = vld [vmem:[%s3983_s1 + $0x474] ss:$8 sps:$4 sm:$0xff]   ;;  %v2726_v30 = vld [vmem:[%s3983_s1 + $0x70] ss:$8 sps:$4 sm:$0xff]   ;;  %v2728_v32 = vld [vmem:[%s3983_s1 + $0x84] ss:$8 sps:$4 sm:$0xff]  }
  0x11   : > { %1997 = vmatpush1.bf16.msra.mxu0 %v2697_v11  ;;  %1826 = vmatprep.subr.bf16.mxu1 %v2698_v12  ;;  %v2727_v31 = vld [vmem:[%s3983_s1 + $0x470] ss:$8 sps:$4 sm:$0xff]   ;;  %v2730_v33 = vld [vmem:[%s3983_s1 + $0x484] ss:$8 sps:$4 sm:$0xff]   ;;  %v2732_v34 = vld [vmem:[%s3983_s1 + $0x80] ss:$8 sps:$4 sm:$0xff]  }
  0x12   : > { %1998 = vmatprep.subr.bf16.mxu0 %v2700_v13  ;;  %v2733_v35 = vld [vmem:[%s3983_s1 + $0x480] ss:$8 sps:$4 sm:$0xff]   ;;  %v2734_v36 = vld [vmem:[%s3983_s1 + $0x94] ss:$8 sps:$4 sm:$0xff]   ;;  %s3990_s9 = smov (!%p167_p4, %s3082_s9), 1 }
  0x13   : > { %v2736_v37 = vld [vmem:[%s3983_s1 + $0x494] ss:$8 sps:$4 sm:$0xff]   ;;  %v2738_v38 = vld [vmem:[%s3983_s1 + $0x90] ss:$8 sps:$4 sm:$0xff]   ;;  %v2740_v40 = vld [vmem:[%s3983_s1 + $0xa4] ss:$8 sps:$4 sm:$0xff]  }
  0x14   : > { %1827 = vmatpush1.bf16.msra.mxu1 %v2702_v14  ;;  %v2739_v39 = vld [vmem:[%s3983_s1 + $0x490] ss:$8 sps:$4 sm:$0xff]   ;;  %s2624_s23 = sshll.u32 %s3990_s9, 7  ;;  %v2742_v41 = vld [vmem:[%s3983_s1 + $0x4a4] ss:$8 sps:$4 sm:$0xff]   ;;  %s2625_s14 = sshll.u32 %s3990_s9, 4 }
  0x15   : > { %1999 = vmatpush1.bf16.msra.mxu0 %v2703_v15  ;;  %1828 = vmatprep.subr.bf16.mxu1 %v2704_v16  ;;  %v2744_v42 = vld [vmem:[%s3983_s1 + $0xa0] ss:$8 sps:$4 sm:$0xff]   ;;  %s3267_s4 = scalar_lea.vmem %s3982_s0, %s2624_s23  ;;  %v2746_v44 = vld [vmem:[%s3983_s1 + $0xb4] ss:$8 sps:$4 sm:$0xff]   ;;  %v2750_v46 = vld [vmem:[%s3983_s1 + $0xb0] ss:$8 sps:$4 sm:$0xff]   ;;  %s186_s17 = scalar_lea.vmem %s3984_s2, %s2625_s14 }
  0x16   : > { %2000 = vmatprep.subr.bf16.mxu0 %v2706_v17  ;;  %v2745_v43 = vld [vmem:[%s3983_s1 + $0x4a0] ss:$8 sps:$4 sm:$0xff]   ;;  %v2748_v45 = vld [vmem:[%s3983_s1 + $0x4b4] ss:$8 sps:$4 sm:$0xff]   ;;  %v2751_v47 = vld [vmem:[%s3983_s1 + $0x4b0] ss:$8 sps:$4 sm:$0xff]  }
  0x17   : > { %v188_v48 = vld [vmem:[%s3267_s4] sm:$0xff]  ;;  %v2758_v58 = vld [vmem:[%s3983_s1 + $0xd4] ss:$8 sps:$4 sm:$0xff]   ;;  %v2762_v60 = vld [vmem:[%s3983_s1 + $0xd0] ss:$8 sps:$4 sm:$0xff]  }
  0x18   : > { %1829 = vmatpush1.bf16.msra.mxu1 %v2708_v18  ;;  %v196_v49 = vld [vmem:[%s3267_s4 + $0x40] sm:$0xff]  ;;  %v2760_v59 = vld [vmem:[%s3983_s1 + $0x4d4] ss:$8 sps:$4 sm:$0xff]   ;;  %v2763_v61 = vld [vmem:[%s3983_s1 + $0x4d0] ss:$8 sps:$4 sm:$0xff]  }
  0x19   : > { %2001 = vmatpush1.bf16.msra.mxu0 %v2709_v19  ;;  %1830 = vmatprep.subr.bf16.mxu1 %v2710_v20  ;;  %v2752_v50 = vld [vmem:[%s3983_s1 + $0xc4] ss:$8 sps:$4 sm:$0xff]   ;;  %v2349_v52 = vcombine.high %v188_v48, %v196_v49  ;;  %v2756_v56 = vld [vmem:[%s3983_s1 + $0xc0] ss:$8 sps:$4 sm:$0xff]   ;;  %v2770_v2 = vld [vmem:[%s3983_s1 + $0xf4] ss:$8 sps:$4 sm:$0xff]   ;;  %v2348_v8 = vcombine.low %v188_v48, %v196_v49 }
  0x1a   : > { %2002 = vmatprep.subr.bf16.mxu0 %v2712_v21  ;;  %v2754_v51 = vld [vmem:[%s3983_s1 + $0x4c4] ss:$8 sps:$4 sm:$0xff]   ;;  %v2757_v57 = vld [vmem:[%s3983_s1 + $0x4c0] ss:$8 sps:$4 sm:$0xff]   ;;  %v2772_v3 = vld [vmem:[%s3983_s1 + $0x4f4] ss:$8 sps:$4 sm:$0xff]  }
  0x1b   : > { %v192_v53 = vld [vmem:[%s3267_s4 + $0x20] sm:$0xff]  ;;  %1852 = vmatprep.mubr.bf16.mxu1 %v2349_v52  ;;  %v2774_v4 = vld [vmem:[%s3983_s1 + $0xf0] ss:$8 sps:$4 sm:$0xff]   ;;  %v2784_v12 = vld [vmem:[%s3983_s1 + $0x114] ss:$8 sps:$4 sm:$0xff]  }
  0x1c   : > { %1831 = vmatpush1.bf16.msra.mxu1 %v2714_v22  ;;  %v200_v54 = vld [vmem:[%s3267_s4 + $0x60] sm:$0xff]  ;;  %v2775_v5 = vld [vmem:[%s3983_s1 + $0x4f0] ss:$8 sps:$4 sm:$0xff]   ;;  %v2787_v13 = vld [vmem:[%s3983_s1 + $0x514] ss:$8 sps:$4 sm:$0xff]  }
  0x1d   : > { %2003 = vmatpush1.bf16.msra.mxu0 %v2715_v23  ;;  %1832 = vmatprep.subr.bf16.mxu1 %v2716_v24  ;;  %v2357_v55 = vcombine.high %v192_v53, %v200_v54  ;;  %v2764_v62 = vld [vmem:[%s3983_s1 + $0xe4] ss:$8 sps:$4 sm:$0xff]   ;;  %v2768_v0 = vld [vmem:[%s3983_s1 + $0xe0] ss:$8 sps:$4 sm:$0xff]   ;;  %v2356_v10 = vcombine.low %v192_v53, %v200_v54  ;;  %v2782_v14 = vld [vmem:[%s3983_s1 + $0x110] ss:$8 sps:$4 sm:$0xff]  }
  0x1e   : > { %2004 = vmatprep.subr.bf16.mxu0 %v2718_v25  ;;  %v2766_v63 = vld [vmem:[%s3983_s1 + $0x4e4] ss:$8 sps:$4 sm:$0xff]   ;;  %v2769_v1 = vld [vmem:[%s3983_s1 + $0x4e0] ss:$8 sps:$4 sm:$0xff]   ;;  %v2785_v15 = vld [vmem:[%s3983_s1 + $0x510] ss:$8 sps:$4 sm:$0xff]  }
  0x1f   : > { %2024 = vmatprep.mubr.bf16.mxu0 %v2357_v55  ;;  %v2778_v6 = vld [vmem:[%s3983_s1 + $0x104] ss:$8 sps:$4 sm:$0xff]   ;;  %v2776_v9 = vld [vmem:[%s3983_s1 + $0x100] ss:$8 sps:$4 sm:$0xff]   ;;  %v2796_v20 = vld [vmem:[%s3983_s1 + $0x134] ss:$8 sps:$4 sm:$0xff]  }
  0x20   : > { %1833 = vmatpush1.bf16.msra.mxu1 %v2720_v26  ;;  %v2781_v7 = vld [vmem:[%s3983_s1 + $0x504] ss:$8 sps:$4 sm:$0xff]   ;;  %v2779_v11 = vld [vmem:[%s3983_s1 + $0x500] ss:$8 sps:$4 sm:$0xff]   ;;  %v2799_v21 = vld [vmem:[%s3983_s1 + $0x534] ss:$8 sps:$4 sm:$0xff]  }
  0x21   : > { %2005 = vmatpush1.bf16.msra.mxu0 %v2721_v27  ;;  %1834 = vmatprep.subr.bf16.mxu1 %v2722_v28  ;;  %v2790_v16 = vld [vmem:[%s3983_s1 + $0x124] ss:$8 sps:$4 sm:$0xff]   ;;  %v2788_v18 = vld [vmem:[%s3983_s1 + $0x120] ss:$8 sps:$4 sm:$0xff]   ;;  %v2794_v22 = vld [vmem:[%s3983_s1 + $0x130] ss:$8 sps:$4 sm:$0xff]  }
  0x22   : > { %2006 = vmatprep.subr.bf16.mxu0 %v2724_v29  ;;  %v2793_v17 = vld [vmem:[%s3983_s1 + $0x524] ss:$8 sps:$4 sm:$0xff]   ;;  %v2791_v19 = vld [vmem:[%s3983_s1 + $0x520] ss:$8 sps:$4 sm:$0xff]   ;;  %v2797_v23 = vld [vmem:[%s3983_s1 + $0x530] ss:$8 sps:$4 sm:$0xff]  }
  0x23   : > { %v2802_v24 = vld [vmem:[%s3983_s1 + $0x144] ss:$8 sps:$4 sm:$0xff]   ;;  %v2800_v26 = vld [vmem:[%s3983_s1 + $0x140] ss:$8 sps:$4 sm:$0xff]   ;;  %v2808_v28 = vld [vmem:[%s3983_s1 + $0x154] ss:$8 sps:$4 sm:$0xff]  }
  0x24   : > { %1835 = vmatpush1.bf16.msra.mxu1 %v2726_v30  ;;  %v2805_v25 = vld [vmem:[%s3983_s1 + $0x544] ss:$8 sps:$4 sm:$0xff]   ;;  %v2803_v27 = vld [vmem:[%s3983_s1 + $0x540] ss:$8 sps:$4 sm:$0xff]   ;;  %v2811_v29 = vld [vmem:[%s3983_s1 + $0x554] ss:$8 sps:$4 sm:$0xff]  }
  0x25   : > { %2007 = vmatpush1.bf16.msra.mxu0 %v2727_v31  ;;  %1836 = vmatprep.subr.bf16.mxu1 %v2728_v32  ;;  %v2806_v30 = vld [vmem:[%s3983_s1 + $0x150] ss:$8 sps:$4 sm:$0xff]   ;;  %v2814_v32 = vld [vmem:[%s3983_s1 + $0x164] ss:$8 sps:$4 sm:$0xff]   ;;  %v2824_v48 = vld [vmem:[%s3983_s1 + $0x180] ss:$8 sps:$4 sm:$0xff]  }
  0x26   : > { %2008 = vmatprep.subr.bf16.mxu0 %v2730_v33  ;;  %v2809_v31 = vld [vmem:[%s3983_s1 + $0x550] ss:$8 sps:$4 sm:$0xff]   ;;  %v2817_v33 = vld [vmem:[%s3983_s1 + $0x564] ss:$8 sps:$4 sm:$0xff]   ;;  %v2827_v49 = vld [vmem:[%s3983_s1 + $0x580] ss:$8 sps:$4 sm:$0xff]  }
  0x27   : > { %v2830_v52 = vld [vmem:[%s3983_s1 + $0x190] ss:$8 sps:$4 sm:$0xff]   ;;  %v2838_v54 = vld [vmem:[%s3983_s1 + $0x1a4] ss:$8 sps:$4 sm:$0xff]  }
  0x28   : > { %1837 = vmatpush1.bf16.msra.mxu1 %v2732_v34  ;;  %v2812_v34 = vld [vmem:[%s3983_s1 + $0x160] ss:$8 sps:$4 sm:$0xff]   ;;  %v2833_v53 = vld [vmem:[%s3983_s1 + $0x590] ss:$8 sps:$4 sm:$0xff]   ;;  %v2841_v55 = vld [vmem:[%s3983_s1 + $0x5a4] ss:$8 sps:$4 sm:$0xff]  }
  0x29   : > { %2009 = vmatpush1.bf16.msra.mxu0 %v2733_v35  ;;  %1838 = vmatprep.subr.bf16.mxu1 %v2734_v36  ;;  %v2815_v35 = vld [vmem:[%s3983_s1 + $0x560] ss:$8 sps:$4 sm:$0xff]  }
  0x2a   : > { %2010 = vmatprep.subr.bf16.mxu0 %v2736_v37  ;;  %v3418_v36 = vld [vmem:[%s3267_s4 + $0x8] sm:$0xff] }
  0x2b   : > { %v3421_v37 = vld [vmem:[%s3267_s4 + $0x48] sm:$0xff] }
  0x2c   : > { %1839 = vmatpush1.bf16.msra.mxu1 %v2738_v38  ;;  %v2820_v38 = vld [vmem:[%s3983_s1 + $0x174] ss:$8 sps:$4 sm:$0xff]  }
  0x2d   : > { %2011 = vmatpush1.bf16.msra.mxu0 %v2739_v39  ;;  %1840 = vmatprep.subr.bf16.mxu1 %v2740_v40  ;;  %v2823_v39 = vld [vmem:[%s3983_s1 + $0x574] ss:$8 sps:$4 sm:$0xff]   ;;  %v2351_v40 = vcombine.high %v3418_v36, %v3421_v37 }
  0x2e   : > { %2012 = vmatprep.subr.bf16.mxu0 %v2742_v41  ;;  %v3432_v41 = vld [vmem:[%s3267_s4 + $0x28] sm:$0xff] }
  0x30   : > { %1841 = vmatpush1.bf16.msra.mxu1 %v2744_v42  ;;  %v3435_v42 = vld [vmem:[%s3267_s4 + $0x68] sm:$0xff] }
  0x31   : > { %2013 = vmatpush1.bf16.msra.mxu0 %v2745_v43  ;;  %1842 = vmatprep.subr.bf16.mxu1 %v2746_v44  ;;  %v2359_v43 = vcombine.high %v3432_v41, %v3435_v42  ;;  %v2818_v44 = vld [vmem:[%s3983_s1 + $0x170] ss:$8 sps:$4 sm:$0xff]  }
  0x32   : > { %2014 = vmatprep.subr.bf16.mxu0 %v2748_v45  ;;  %v2821_v45 = vld [vmem:[%s3983_s1 + $0x570] ss:$8 sps:$4 sm:$0xff]  }
  0x34   : > { %1843 = vmatpush1.bf16.msra.mxu1 %v2750_v46  ;;  %v2826_v46 = vld [vmem:[%s3983_s1 + $0x184] ss:$8 sps:$4 sm:$0xff]  }
  0x35   : > { %2015 = vmatpush1.bf16.msra.mxu0 %v2751_v47  ;;  %1844 = vmatprep.subr.bf16.mxu1 %v2752_v50  ;;  %v2829_v47 = vld [vmem:[%s3983_s1 + $0x584] ss:$8 sps:$4 sm:$0xff]   ;;  %v2832_v50 = vld [vmem:[%s3983_s1 + $0x194] ss:$8 sps:$4 sm:$0xff]  }
  0x36   : > { %2016 = vmatprep.subr.bf16.mxu0 %v2754_v51  ;;  %v2835_v51 = vld [vmem:[%s3983_s1 + $0x594] ss:$8 sps:$4 sm:$0xff]  }
  0x38   : > { %1845 = vmatpush1.bf16.msra.mxu1 %v2756_v56  ;;  %v2836_v56 = vld [vmem:[%s3983_s1 + $0x1a0] ss:$8 sps:$4 sm:$0xff]  }
  0x39   : > { %2017 = vmatpush1.bf16.msra.mxu0 %v2757_v57  ;;  %1846 = vmatprep.subr.bf16.mxu1 %v2758_v58  ;;  %v2839_v57 = vld [vmem:[%s3983_s1 + $0x5a0] ss:$8 sps:$4 sm:$0xff]   ;;  %v2844_v58 = vld [vmem:[%s3983_s1 + $0x1b4] ss:$8 sps:$4 sm:$0xff]  }
  0x3a   : > { %2018 = vmatprep.subr.bf16.mxu0 %v2760_v59  ;;  %v2847_v59 = vld [vmem:[%s3983_s1 + $0x5b4] ss:$8 sps:$4 sm:$0xff]  }
  0x3c   : > { %1847 = vmatpush1.bf16.msra.mxu1 %v2762_v60  ;;  %v2842_v60 = vld [vmem:[%s3983_s1 + $0x1b0] ss:$8 sps:$4 sm:$0xff]  }
  0x3d   : > { %2019 = vmatpush1.bf16.msra.mxu0 %v2763_v61  ;;  %1848 = vmatprep.subr.bf16.mxu1 %v2764_v62  ;;  %v2845_v61 = vld [vmem:[%s3983_s1 + $0x5b0] ss:$8 sps:$4 sm:$0xff]   ;;  %v2850_v62 = vld [vmem:[%s3983_s1 + $0x1c4] ss:$8 sps:$4 sm:$0xff]  }
  0x3e   : > { %2020 = vmatprep.subr.bf16.mxu0 %v2766_v63  ;;  %v2853_v63 = vld [vmem:[%s3983_s1 + $0x5c4] ss:$8 sps:$4 sm:$0xff]  }
  0x40   : > { %1849 = vmatpush1.bf16.msra.mxu1 %v2768_v0  ;;  %v2848_v0 = vld [vmem:[%s3983_s1 + $0x1c0] ss:$8 sps:$4 sm:$0xff]  }
  0x41   : > { %2021 = vmatpush1.bf16.msra.mxu0 %v2769_v1  ;;  %1850 = vmatprep.subr.bf16.mxu1 %v2770_v2  ;;  %v2851_v1 = vld [vmem:[%s3983_s1 + $0x5c0] ss:$8 sps:$4 sm:$0xff]   ;;  %v2856_v2 = vld [vmem:[%s3983_s1 + $0x1d4] ss:$8 sps:$4 sm:$0xff]  }
  0x42   : > { %2022 = vmatprep.subr.bf16.mxu0 %v2772_v3  ;;  %v2859_v3 = vld [vmem:[%s3983_s1 + $0x5d4] ss:$8 sps:$4 sm:$0xff]  }
  0x44   : > { %1851 = vmatpush1.bf16.msra.mxu1 %v2774_v4  ;;  %v2854_v4 = vld [vmem:[%s3983_s1 + $0x1d0] ss:$8 sps:$4 sm:$0xff]  }
  0x45   : > { %2023 = vmatpush1.bf16.msra.mxu0 %v2775_v5  ;;  %1863 = vmatprep.subr.bf16.mxu1 %v2778_v6  ;;  %v2857_v5 = vld [vmem:[%s3983_s1 + $0x5d0] ss:$8 sps:$4 sm:$0xff]   ;;  %v2862_v6 = vld [vmem:[%s3983_s1 + $0x1e4] ss:$8 sps:$4 sm:$0xff]  }
  0x46   : > { %2035 = vmatprep.subr.bf16.mxu0 %v2781_v7  ;;  %v2865_v7 = vld [vmem:[%s3983_s1 + $0x5e4] ss:$8 sps:$4 sm:$0xff]  }
  0x47   : > { %1853 = vmatmul.mubr.bf16.vlgmr.msra.gmra.mrb[0].mxu1 %v2348_v8  ;;  %v2860_v8 = vld [vmem:[%s3983_s1 + $0x1e0] ss:$8 sps:$4 sm:$0xff]  }
  0x48   : > { %2025 = vmatmul.mubr.bf16.vlgmr.msra.gmra.mrb[0].mxu0 %v2356_v10  ;;  %1864 = vmatpush1.bf16.msra.mxu1 %v2776_v9  ;;  %v2863_v9 = vld [vmem:[%s3983_s1 + $0x5e0] ss:$8 sps:$4 sm:$0xff]   ;;  %v2868_v10 = vld [vmem:[%s3983_s1 + $0x1f4] ss:$8 sps:$4 sm:$0xff]  }
  0x49   : > { %2036 = vmatpush1.bf16.msra.mxu0 %v2779_v11  ;;  %1865 = vmatprep.subr.bf16.mxu1 %v2784_v12  ;;  %v2871_v11 = vld [vmem:[%s3983_s1 + $0x5f4] ss:$8 sps:$4 sm:$0xff]   ;;  %v2866_v12 = vld [vmem:[%s3983_s1 + $0x1f0] ss:$8 sps:$4 sm:$0xff]  }
  0x4a   : > { %2037 = vmatprep.subr.bf16.mxu0 %v2787_v13  ;;  %1895 = vmatprep.mubr.bf16.mxu1 %v2351_v40  ;;  %v2869_v13 = vld [vmem:[%s3983_s1 + $0x5f0] ss:$8 sps:$4 sm:$0xff]   ;;  %v2896_v40 = vld [vmem:[%s3983_s1 + $0x240] ss:$8 sps:$4 sm:$0xff]  }
  0x4b   : > { %2067 = vmatprep.mubr.bf16.mxu0 %v2359_v43  ;;  %v2907_v43 = vld [vmem:[%s3983_s1 + $0x654] ss:$8 sps:$4 sm:$0xff]  }
  0x4c   : > { %1866 = vmatpush1.bf16.msra.mxu1 %v2782_v14  ;;  %v2874_v14 = vld [vmem:[%s3983_s1 + $0x204] ss:$8 sps:$4 sm:$0xff]  }
  0x4d   : > { %2038 = vmatpush1.bf16.msra.mxu0 %v2785_v15  ;;  %1867 = vmatprep.subr.bf16.mxu1 %v2790_v16  ;;  %v2877_v15 = vld [vmem:[%s3983_s1 + $0x604] ss:$8 sps:$4 sm:$0xff]   ;;  %v2350_v16 = vcombine.low %v3418_v36, %v3421_v37  ;;  %v2890_v36 = vld [vmem:[%s3983_s1 + $0x230] ss:$8 sps:$4 sm:$0xff]  }
  0x4e   : > { %2039 = vmatprep.subr.bf16.mxu0 %v2793_v17  ;;  %v2872_v17 = vld [vmem:[%s3983_s1 + $0x200] ss:$8 sps:$4 sm:$0xff]   ;;  %v2893_v37 = vld [vmem:[%s3983_s1 + $0x630] ss:$8 sps:$4 sm:$0xff]  }
  0x50   : > { %1868 = vmatpush1.bf16.msra.mxu1 %v2788_v18  ;;  %v2358_v18 = vcombine.low %v3432_v41, %v3435_v42  ;;  %v2899_v41 = vld [vmem:[%s3983_s1 + $0x640] ss:$8 sps:$4 sm:$0xff]   ;;  %v2904_v42 = vld [vmem:[%s3983_s1 + $0x254] ss:$8 sps:$4 sm:$0xff]  }
  0x51   : > { %2040 = vmatpush1.bf16.msra.mxu0 %v2791_v19  ;;  %1869 = vmatprep.subr.bf16.mxu1 %v2796_v20  ;;  %v2875_v19 = vld [vmem:[%s3983_s1 + $0x600] ss:$8 sps:$4 sm:$0xff]   ;;  %v2880_v20 = vld [vmem:[%s3983_s1 + $0x214] ss:$8 sps:$4 sm:$0xff]  }
  0x52   : > { %2041 = vmatprep.subr.bf16.mxu0 %v2799_v21  ;;  %v2883_v21 = vld [vmem:[%s3983_s1 + $0x614] ss:$8 sps:$4 sm:$0xff]  }
  0x54   : > { %1870 = vmatpush1.bf16.msra.mxu1 %v2794_v22  ;;  %v2878_v22 = vld [vmem:[%s3983_s1 + $0x210] ss:$8 sps:$4 sm:$0xff]  }
  0x55   : > { %2042 = vmatpush1.bf16.msra.mxu0 %v2797_v23  ;;  %1871 = vmatprep.subr.bf16.mxu1 %v2802_v24  ;;  %v2881_v23 = vld [vmem:[%s3983_s1 + $0x610] ss:$8 sps:$4 sm:$0xff]  }
  0x56   : > { %2043 = vmatprep.subr.bf16.mxu0 %v2805_v25  ;;  %v3570_v24 = vld [vmem:[%s3267_s4 + $0x10] sm:$0xff] }
  0x57   : > { %v3573_v25 = vld [vmem:[%s3267_s4 + $0x50] sm:$0xff] }
  0x58   : > { %1872 = vmatpush1.bf16.msra.mxu1 %v2800_v26  ;;  %v2886_v26 = vld [vmem:[%s3983_s1 + $0x224] ss:$8 sps:$4 sm:$0xff]  }
  0x59   : > { %2044 = vmatpush1.bf16.msra.mxu0 %v2803_v27  ;;  %1873 = vmatprep.subr.bf16.mxu1 %v2808_v28  ;;  %v2889_v27 = vld [vmem:[%s3983_s1 + $0x624] ss:$8 sps:$4 sm:$0xff]   ;;  %v2353_v28 = vcombine.high %v3570_v24, %v3573_v25 }
  0x5a   : > { %2045 = vmatprep.subr.bf16.mxu0 %v2811_v29  ;;  %v3584_v29 = vld [vmem:[%s3267_s4 + $0x30] sm:$0xff] }
  0x5c   : > { %1874 = vmatpush1.bf16.msra.mxu1 %v2806_v30  ;;  %v3587_v30 = vld [vmem:[%s3267_s4 + $0x70] sm:$0xff] }
  0x5d   : > { %2046 = vmatpush1.bf16.msra.mxu0 %v2809_v31  ;;  %1875 = vmatprep.subr.bf16.mxu1 %v2814_v32  ;;  %v2361_v31 = vcombine.high %v3584_v29, %v3587_v30  ;;  %v2884_v32 = vld [vmem:[%s3983_s1 + $0x220] ss:$8 sps:$4 sm:$0xff]  }
  0x5e   : > { %2047 = vmatprep.subr.bf16.mxu0 %v2817_v33  ;;  %v2887_v33 = vld [vmem:[%s3983_s1 + $0x620] ss:$8 sps:$4 sm:$0xff]  }
  0x60   : > { %1876 = vmatpush1.bf16.msra.mxu1 %v2812_v34  ;;  %v2892_v34 = vld [vmem:[%s3983_s1 + $0x234] ss:$8 sps:$4 sm:$0xff]  }
  0x61   : > { %2048 = vmatpush1.bf16.msra.mxu0 %v2815_v35  ;;  %1877 = vmatprep.subr.bf16.mxu1 %v2820_v38  ;;  %v2895_v35 = vld [vmem:[%s3983_s1 + $0x634] ss:$8 sps:$4 sm:$0xff]   ;;  %v2898_v38 = vld [vmem:[%s3983_s1 + $0x244] ss:$8 sps:$4 sm:$0xff]  }
  0x62   : > { %2049 = vmatprep.subr.bf16.mxu0 %v2823_v39  ;;  %v2901_v39 = vld [vmem:[%s3983_s1 + $0x644] ss:$8 sps:$4 sm:$0xff]  }
  0x64   : > { %1878 = vmatpush1.bf16.msra.mxu1 %v2818_v44  ;;  %v2902_v44 = vld [vmem:[%s3983_s1 + $0x250] ss:$8 sps:$4 sm:$0xff]  }
  0x65   : > { %2050 = vmatpush1.bf16.msra.mxu0 %v2821_v45  ;;  %1879 = vmatprep.subr.bf16.mxu1 %v2826_v46  ;;  %v2905_v45 = vld [vmem:[%s3983_s1 + $0x650] ss:$8 sps:$4 sm:$0xff]   ;;  %v2910_v46 = vld [vmem:[%s3983_s1 + $0x264] ss:$8 sps:$4 sm:$0xff]  }
  0x66   : > { %2051 = vmatprep.subr.bf16.mxu0 %v2829_v47  ;;  %v2913_v47 = vld [vmem:[%s3983_s1 + $0x664] ss:$8 sps:$4 sm:$0xff]  }
  0x68   : > { %1880 = vmatpush1.bf16.msra.mxu1 %v2824_v48  ;;  %v2908_v48 = vld [vmem:[%s3983_s1 + $0x260] ss:$8 sps:$4 sm:$0xff]  }
  0x69   : > { %2052 = vmatpush1.bf16.msra.mxu0 %v2827_v49  ;;  %1881 = vmatprep.subr.bf16.mxu1 %v2832_v50  ;;  %v2911_v49 = vld [vmem:[%s3983_s1 + $0x660] ss:$8 sps:$4 sm:$0xff]   ;;  %v2916_v50 = vld [vmem:[%s3983_s1 + $0x274] ss:$8 sps:$4 sm:$0xff]  }
  0x6a   : > { %2053 = vmatprep.subr.bf16.mxu0 %v2835_v51  ;;  %v2919_v51 = vld [vmem:[%s3983_s1 + $0x674] ss:$8 sps:$4 sm:$0xff]  }
  0x6c   : > { %1882 = vmatpush1.bf16.msra.mxu1 %v2830_v52  ;;  %v2914_v52 = vld [vmem:[%s3983_s1 + $0x270] ss:$8 sps:$4 sm:$0xff]  }
  0x6d   : > { %2054 = vmatpush1.bf16.msra.mxu0 %v2833_v53  ;;  %1883 = vmatprep.subr.bf16.mxu1 %v2838_v54  ;;  %v2917_v53 = vld [vmem:[%s3983_s1 + $0x670] ss:$8 sps:$4 sm:$0xff]   ;;  %v2922_v54 = vld [vmem:[%s3983_s1 + $0x284] ss:$8 sps:$4 sm:$0xff]  }
  0x6e   : > { %2055 = vmatprep.subr.bf16.mxu0 %v2841_v55  ;;  %v2925_v55 = vld [vmem:[%s3983_s1 + $0x684] ss:$8 sps:$4 sm:$0xff]  }
  0x70   : > { %1884 = vmatpush1.bf16.msra.mxu1 %v2836_v56  ;;  %v2920_v56 = vld [vmem:[%s3983_s1 + $0x280] ss:$8 sps:$4 sm:$0xff]  }
  0x71   : > { %2056 = vmatpush1.bf16.msra.mxu0 %v2839_v57  ;;  %1885 = vmatprep.subr.bf16.mxu1 %v2844_v58  ;;  %v2923_v57 = vld [vmem:[%s3983_s1 + $0x680] ss:$8 sps:$4 sm:$0xff]   ;;  %v2928_v58 = vld [vmem:[%s3983_s1 + $0x294] ss:$8 sps:$4 sm:$0xff]  }
  0x72   : > { %2057 = vmatprep.subr.bf16.mxu0 %v2847_v59  ;;  %v2931_v59 = vld [vmem:[%s3983_s1 + $0x694] ss:$8 sps:$4 sm:$0xff]  }
  0x74   : > { %1886 = vmatpush1.bf16.msra.mxu1 %v2842_v60  ;;  %v2926_v60 = vld [vmem:[%s3983_s1 + $0x290] ss:$8 sps:$4 sm:$0xff]  }
  0x75   : > { %2058 = vmatpush1.bf16.msra.mxu0 %v2845_v61  ;;  %1887 = vmatprep.subr.bf16.mxu1 %v2850_v62  ;;  %v2929_v61 = vld [vmem:[%s3983_s1 + $0x690] ss:$8 sps:$4 sm:$0xff]   ;;  %v2934_v62 = vld [vmem:[%s3983_s1 + $0x2a4] ss:$8 sps:$4 sm:$0xff]  }
  0x76   : > { %2059 = vmatprep.subr.bf16.mxu0 %v2853_v63  ;;  %v2937_v63 = vld [vmem:[%s3983_s1 + $0x6a4] ss:$8 sps:$4 sm:$0xff]  }
  0x78   : > { %1888 = vmatpush1.bf16.msra.mxu1 %v2848_v0  ;;  %v2932_v0 = vld [vmem:[%s3983_s1 + $0x2a0] ss:$8 sps:$4 sm:$0xff]  }
  0x79   : > { %2060 = vmatpush1.bf16.msra.mxu0 %v2851_v1  ;;  %1889 = vmatprep.subr.bf16.mxu1 %v2856_v2  ;;  %v2935_v1 = vld [vmem:[%s3983_s1 + $0x6a0] ss:$8 sps:$4 sm:$0xff]   ;;  %v2940_v2 = vld [vmem:[%s3983_s1 + $0x2b4] ss:$8 sps:$4 sm:$0xff]  }
  0x7a   : > { %2061 = vmatprep.subr.bf16.mxu0 %v2859_v3  ;;  %v2943_v3 = vld [vmem:[%s3983_s1 + $0x6b4] ss:$8 sps:$4 sm:$0xff]  }
  0x7c   : > { %1890 = vmatpush1.bf16.msra.mxu1 %v2854_v4  ;;  %v2938_v4 = vld [vmem:[%s3983_s1 + $0x2b0] ss:$8 sps:$4 sm:$0xff]  }
  0x7d   : > { %2062 = vmatpush1.bf16.msra.mxu0 %v2857_v5  ;;  %1891 = vmatprep.subr.bf16.mxu1 %v2862_v6  ;;  %v2941_v5 = vld [vmem:[%s3983_s1 + $0x6b0] ss:$8 sps:$4 sm:$0xff]   ;;  %v2946_v6 = vld [vmem:[%s3983_s1 + $0x2c4] ss:$8 sps:$4 sm:$0xff]  }
  0x7e   : > { %2063 = vmatprep.subr.bf16.mxu0 %v2865_v7  ;;  %v2949_v7 = vld [vmem:[%s3983_s1 + $0x6c4] ss:$8 sps:$4 sm:$0xff]  }
  0x80   : > { %1892 = vmatpush1.bf16.msra.mxu1 %v2860_v8  ;;  %v2944_v8 = vld [vmem:[%s3983_s1 + $0x2c0] ss:$8 sps:$4 sm:$0xff]  }
  0x81   : > { %2064 = vmatpush1.bf16.msra.mxu0 %v2863_v9  ;;  %1893 = vmatprep.subr.bf16.mxu1 %v2868_v10  ;;  %v2947_v9 = vld [vmem:[%s3983_s1 + $0x6c0] ss:$8 sps:$4 sm:$0xff]   ;;  %v2952_v10 = vld [vmem:[%s3983_s1 + $0x2d4] ss:$8 sps:$4 sm:$0xff]  }
  0x82   : > { %2065 = vmatprep.subr.bf16.mxu0 %v2871_v11  ;;  %v2955_v11 = vld [vmem:[%s3983_s1 + $0x6d4] ss:$8 sps:$4 sm:$0xff]  }
  0x84   : > { %1894 = vmatpush1.bf16.msra.mxu1 %v2866_v12  ;;  %v2950_v12 = vld [vmem:[%s3983_s1 + $0x2d0] ss:$8 sps:$4 sm:$0xff]  }
  0x85   : > { %2066 = vmatpush1.bf16.msra.mxu0 %v2869_v13  ;;  %1906 = vmatprep.subr.bf16.mxu1 %v2874_v14  ;;  %v2953_v13 = vld [vmem:[%s3983_s1 + $0x6d0] ss:$8 sps:$4 sm:$0xff]   ;;  %v2958_v14 = vld [vmem:[%s3983_s1 + $0x2e4] ss:$8 sps:$4 sm:$0xff]  }
  0x86   : > { %2078 = vmatprep.subr.bf16.mxu0 %v2877_v15  ;;  %v2961_v15 = vld [vmem:[%s3983_s1 + $0x6e4] ss:$8 sps:$4 sm:$0xff]  }
  0x87   : > { %1896 = vmatmul.mubr.bf16.vlgmr.msra.gmra.mrb[0].mxu1 %v2350_v16  ;;  %v2956_v16 = vld [vmem:[%s3983_s1 + $0x2e0] ss:$8 sps:$4 sm:$0xff]  }
  0x88   : > { %2068 = vmatmul.mubr.bf16.vlgmr.msra.gmra.mrb[0].mxu0 %v2358_v18  ;;  %1907 = vmatpush1.bf16.msra.mxu1 %v2872_v17  ;;  %v2959_v17 = vld [vmem:[%s3983_s1 + $0x6e0] ss:$8 sps:$4 sm:$0xff]   ;;  %v2964_v18 = vld [vmem:[%s3983_s1 + $0x2f4] ss:$8 sps:$4 sm:$0xff]  }
  0x89   : > { %2079 = vmatpush1.bf16.msra.mxu0 %v2875_v19  ;;  %1908 = vmatprep.subr.bf16.mxu1 %v2880_v20  ;;  %v2967_v19 = vld [vmem:[%s3983_s1 + $0x6f4] ss:$8 sps:$4 sm:$0xff]   ;;  %v2962_v20 = vld [vmem:[%s3983_s1 + $0x2f0] ss:$8 sps:$4 sm:$0xff]  }
  0x8a   : > { %2080 = vmatprep.subr.bf16.mxu0 %v2883_v21  ;;  %1938 = vmatprep.mubr.bf16.mxu1 %v2353_v28  ;;  %v2965_v21 = vld [vmem:[%s3983_s1 + $0x6f0] ss:$8 sps:$4 sm:$0xff]   ;;  %v2360_v28 = vcombine.low %v3584_v29, %v3587_v30 }
  0x8b   : > { %2110 = vmatprep.mubr.bf16.mxu0 %v2361_v31  ;;  %v3767_v31 = vld [vmem:[%s3267_s4 + $0x58] sm:$0xff] }
  0x8c   : > { %1909 = vmatpush1.bf16.msra.mxu1 %v2878_v22  ;;  %v2970_v22 = vld [vmem:[%s3983_s1 + $0x304] ss:$8 sps:$4 sm:$0xff]  }
  0x8d   : > { %2081 = vmatpush1.bf16.msra.mxu0 %v2881_v23  ;;  %1910 = vmatprep.subr.bf16.mxu1 %v2886_v26  ;;  %v2973_v23 = vld [vmem:[%s3983_s1 + $0x704] ss:$8 sps:$4 sm:$0xff]   ;;  %v3760_v26 = vld [vmem:[%s3267_s4 + $0x18] sm:$0xff] }
  0x8e   : > { %2082 = vmatprep.subr.bf16.mxu0 %v2889_v27  ;;  %v2352_v27 = vcombine.low %v3570_v24, %v3573_v25  ;;  %v2976_v24 = vld [vmem:[%s3983_s1 + $0x314] ss:$8 sps:$4 sm:$0xff]   ;;  %v2355_v29 = vcombine.high %v3760_v26, %v3767_v31 }
  0x8f   : > { %v2979_v25 = vld [vmem:[%s3983_s1 + $0x714] ss:$8 sps:$4 sm:$0xff]  }
  0x90   : > { %1911 = vmatpush1.bf16.msra.mxu1 %v2884_v32  ;;  %v3770_v32 = vld [vmem:[%s3267_s4 + $0x38] sm:$0xff] }
  0x91   : > { %2083 = vmatpush1.bf16.msra.mxu0 %v2887_v33  ;;  %1912 = vmatprep.subr.bf16.mxu1 %v2892_v34  ;;  %v3773_v33 = vld [vmem:[%s3267_s4 + $0x78] sm:$0xff]  ;;  %v2968_v34 = vld [vmem:[%s3983_s1 + $0x300] ss:$8 sps:$4 sm:$0xff]  }
  0x92   : > { %2084 = vmatprep.subr.bf16.mxu0 %v2895_v35  ;;  %v2971_v35 = vld [vmem:[%s3983_s1 + $0x700] ss:$8 sps:$4 sm:$0xff]   ;;  %v2363_v30 = vcombine.high %v3770_v32, %v3773_v33 }
  0x94   : > { %1913 = vmatpush1.bf16.msra.mxu1 %v2890_v36  ;;  %v2974_v36 = vld [vmem:[%s3983_s1 + $0x310] ss:$8 sps:$4 sm:$0xff]  }
  0x95   : > { %2085 = vmatpush1.bf16.msra.mxu0 %v2893_v37  ;;  %1914 = vmatprep.subr.bf16.mxu1 %v2898_v38  ;;  %v2977_v37 = vld [vmem:[%s3983_s1 + $0x710] ss:$8 sps:$4 sm:$0xff]   ;;  %v2982_v38 = vld [vmem:[%s3983_s1 + $0x324] ss:$8 sps:$4 sm:$0xff]  }
  0x96   : > { %2086 = vmatprep.subr.bf16.mxu0 %v2901_v39  ;;  %v2985_v39 = vld [vmem:[%s3983_s1 + $0x724] ss:$8 sps:$4 sm:$0xff]  }
  0x98   : > { %1915 = vmatpush1.bf16.msra.mxu1 %v2896_v40  ;;  %v2980_v40 = vld [vmem:[%s3983_s1 + $0x320] ss:$8 sps:$4 sm:$0xff]  }
  0x99   : > { %2087 = vmatpush1.bf16.msra.mxu0 %v2899_v41  ;;  %1916 = vmatprep.subr.bf16.mxu1 %v2904_v42  ;;  %v2983_v41 = vld [vmem:[%s3983_s1 + $0x720] ss:$8 sps:$4 sm:$0xff]   ;;  %v2988_v42 = vld [vmem:[%s3983_s1 + $0x334] ss:$8 sps:$4 sm:$0xff]  }
  0x9a   : > { %2088 = vmatprep.subr.bf16.mxu0 %v2907_v43  ;;  %v2991_v43 = vld [vmem:[%s3983_s1 + $0x734] ss:$8 sps:$4 sm:$0xff]  }
  0x9c   : > { %1917 = vmatpush1.bf16.msra.mxu1 %v2902_v44  ;;  %v2986_v44 = vld [vmem:[%s3983_s1 + $0x330] ss:$8 sps:$4 sm:$0xff]  }
  0x9d   : > { %2089 = vmatpush1.bf16.msra.mxu0 %v2905_v45  ;;  %1918 = vmatprep.subr.bf16.mxu1 %v2910_v46  ;;  %v2989_v45 = vld [vmem:[%s3983_s1 + $0x730] ss:$8 sps:$4 sm:$0xff]   ;;  %v2994_v46 = vld [vmem:[%s3983_s1 + $0x344] ss:$8 sps:$4 sm:$0xff]  }
  0x9e   : > { %2090 = vmatprep.subr.bf16.mxu0 %v2913_v47  ;;  %v2997_v47 = vld [vmem:[%s3983_s1 + $0x744] ss:$8 sps:$4 sm:$0xff]  }
  0xa0   : > { %1919 = vmatpush1.bf16.msra.mxu1 %v2908_v48  ;;  %v2992_v48 = vld [vmem:[%s3983_s1 + $0x340] ss:$8 sps:$4 sm:$0xff]  }
  0xa1   : > { %2091 = vmatpush1.bf16.msra.mxu0 %v2911_v49  ;;  %1920 = vmatprep.subr.bf16.mxu1 %v2916_v50  ;;  %v2995_v49 = vld [vmem:[%s3983_s1 + $0x740] ss:$8 sps:$4 sm:$0xff]   ;;  %v3000_v50 = vld [vmem:[%s3983_s1 + $0x354] ss:$8 sps:$4 sm:$0xff]  }
  0xa2   : > { %2092 = vmatprep.subr.bf16.mxu0 %v2919_v51  ;;  %v3003_v51 = vld [vmem:[%s3983_s1 + $0x754] ss:$8 sps:$4 sm:$0xff]  }
  0xa4   : > { %1921 = vmatpush1.bf16.msra.mxu1 %v2914_v52  ;;  %v2998_v52 = vld [vmem:[%s3983_s1 + $0x350] ss:$8 sps:$4 sm:$0xff]  }
  0xa5   : > { %2093 = vmatpush1.bf16.msra.mxu0 %v2917_v53  ;;  %1922 = vmatprep.subr.bf16.mxu1 %v2922_v54  ;;  %v3001_v53 = vld [vmem:[%s3983_s1 + $0x750] ss:$8 sps:$4 sm:$0xff]   ;;  %v3006_v54 = vld [vmem:[%s3983_s1 + $0x364] ss:$8 sps:$4 sm:$0xff]  }
  0xa6   : > { %2094 = vmatprep.subr.bf16.mxu0 %v2925_v55  ;;  %v3009_v55 = vld [vmem:[%s3983_s1 + $0x764] ss:$8 sps:$4 sm:$0xff]  }
  0xa8   : > { %1923 = vmatpush1.bf16.msra.mxu1 %v2920_v56  ;;  %v3004_v56 = vld [vmem:[%s3983_s1 + $0x360] ss:$8 sps:$4 sm:$0xff]  }
  0xa9   : > { %2095 = vmatpush1.bf16.msra.mxu0 %v2923_v57  ;;  %1924 = vmatprep.subr.bf16.mxu1 %v2928_v58  ;;  %v3007_v57 = vld [vmem:[%s3983_s1 + $0x760] ss:$8 sps:$4 sm:$0xff]   ;;  %v3012_v58 = vld [vmem:[%s3983_s1 + $0x374] ss:$8 sps:$4 sm:$0xff]  }
  0xaa   : > { %2096 = vmatprep.subr.bf16.mxu0 %v2931_v59  ;;  %v3015_v59 = vld [vmem:[%s3983_s1 + $0x774] ss:$8 sps:$4 sm:$0xff]  }
  0xac   : > { %1925 = vmatpush1.bf16.msra.mxu1 %v2926_v60  ;;  %v3010_v60 = vld [vmem:[%s3983_s1 + $0x370] ss:$8 sps:$4 sm:$0xff]  }
  0xad   : > { %2097 = vmatpush1.bf16.msra.mxu0 %v2929_v61  ;;  %1926 = vmatprep.subr.bf16.mxu1 %v2934_v62  ;;  %v3013_v61 = vld [vmem:[%s3983_s1 + $0x770] ss:$8 sps:$4 sm:$0xff]   ;;  %v3018_v62 = vld [vmem:[%s3983_s1 + $0x384] ss:$8 sps:$4 sm:$0xff]  }
  0xae   : > { %2098 = vmatprep.subr.bf16.mxu0 %v2937_v63  ;;  %v3021_v63 = vld [vmem:[%s3983_s1 + $0x784] ss:$8 sps:$4 sm:$0xff]  }
  0xb0   : > { %1927 = vmatpush1.bf16.msra.mxu1 %v2932_v0  ;;  %v3016_v0 = vld [vmem:[%s3983_s1 + $0x380] ss:$8 sps:$4 sm:$0xff]  }
  0xb1   : > { %2099 = vmatpush1.bf16.msra.mxu0 %v2935_v1  ;;  %1928 = vmatprep.subr.bf16.mxu1 %v2940_v2  ;;  %v3019_v1 = vld [vmem:[%s3983_s1 + $0x780] ss:$8 sps:$4 sm:$0xff]   ;;  %v3024_v2 = vld [vmem:[%s3983_s1 + $0x394] ss:$8 sps:$4 sm:$0xff]  }
  0xb2   : > { %2100 = vmatprep.subr.bf16.mxu0 %v2943_v3  ;;  %v3027_v3 = vld [vmem:[%s3983_s1 + $0x794] ss:$8 sps:$4 sm:$0xff]  }
  0xb4   : > { %1929 = vmatpush1.bf16.msra.mxu1 %v2938_v4  ;;  %v3022_v4 = vld [vmem:[%s3983_s1 + $0x390] ss:$8 sps:$4 sm:$0xff]  }
  0xb5   : > { %2101 = vmatpush1.bf16.msra.mxu0 %v2941_v5  ;;  %1930 = vmatprep.subr.bf16.mxu1 %v2946_v6  ;;  %v3025_v5 = vld [vmem:[%s3983_s1 + $0x790] ss:$8 sps:$4 sm:$0xff]   ;;  %v3030_v6 = vld [vmem:[%s3983_s1 + $0x3a4] ss:$8 sps:$4 sm:$0xff]  }
  0xb6   : > { %2102 = vmatprep.subr.bf16.mxu0 %v2949_v7  ;;  %v3033_v7 = vld [vmem:[%s3983_s1 + $0x7a4] ss:$8 sps:$4 sm:$0xff]  }
  0xb8   : > { %1931 = vmatpush1.bf16.msra.mxu1 %v2944_v8  ;;  %v3028_v8 = vld [vmem:[%s3983_s1 + $0x3a0] ss:$8 sps:$4 sm:$0xff]  }
  0xb9   : > { %2103 = vmatpush1.bf16.msra.mxu0 %v2947_v9  ;;  %1932 = vmatprep.subr.bf16.mxu1 %v2952_v10  ;;  %v3031_v9 = vld [vmem:[%s3983_s1 + $0x7a0] ss:$8 sps:$4 sm:$0xff]   ;;  %v3036_v10 = vld [vmem:[%s3983_s1 + $0x3b4] ss:$8 sps:$4 sm:$0xff]  }
  0xba   : > { %2104 = vmatprep.subr.bf16.mxu0 %v2955_v11  ;;  %v3039_v11 = vld [vmem:[%s3983_s1 + $0x7b4] ss:$8 sps:$4 sm:$0xff]  }
  0xbc   : > { %1933 = vmatpush1.bf16.msra.mxu1 %v2950_v12  ;;  %v3034_v12 = vld [vmem:[%s3983_s1 + $0x3b0] ss:$8 sps:$4 sm:$0xff]  }
  0xbd   : > { %2105 = vmatpush1.bf16.msra.mxu0 %v2953_v13  ;;  %1934 = vmatprep.subr.bf16.mxu1 %v2958_v14  ;;  %v3037_v13 = vld [vmem:[%s3983_s1 + $0x7b0] ss:$8 sps:$4 sm:$0xff]   ;;  %v3042_v14 = vld [vmem:[%s3983_s1 + $0x3c4] ss:$8 sps:$4 sm:$0xff]  }
  0xbe   : > { %2106 = vmatprep.subr.bf16.mxu0 %v2961_v15  ;;  %v3045_v15 = vld [vmem:[%s3983_s1 + $0x7c4] ss:$8 sps:$4 sm:$0xff]  }
  0xc0   : > { %1935 = vmatpush1.bf16.msra.mxu1 %v2956_v16  ;;  %v3040_v16 = vld [vmem:[%s3983_s1 + $0x3c0] ss:$8 sps:$4 sm:$0xff]  }
  0xc1   : > { %2107 = vmatpush1.bf16.msra.mxu0 %v2959_v17  ;;  %1936 = vmatprep.subr.bf16.mxu1 %v2964_v18  ;;  %v3043_v17 = vld [vmem:[%s3983_s1 + $0x7c0] ss:$8 sps:$4 sm:$0xff]   ;;  %v3048_v18 = vld [vmem:[%s3983_s1 + $0x3d4] ss:$8 sps:$4 sm:$0xff]  }
  0xc2   : > { %2108 = vmatprep.subr.bf16.mxu0 %v2967_v19  ;;  %v3051_v19 = vld [vmem:[%s3983_s1 + $0x7d4] ss:$8 sps:$4 sm:$0xff]  }
  0xc4   : > { %1937 = vmatpush1.bf16.msra.mxu1 %v2962_v20  ;;  %v3046_v20 = vld [vmem:[%s3983_s1 + $0x3d0] ss:$8 sps:$4 sm:$0xff]  }
  0xc5   : > { %2109 = vmatpush1.bf16.msra.mxu0 %v2965_v21  ;;  %1949 = vmatprep.subr.bf16.mxu1 %v2970_v22  ;;  %v3049_v21 = vld [vmem:[%s3983_s1 + $0x7d0] ss:$8 sps:$4 sm:$0xff]   ;;  %v3054_v22 = vld [vmem:[%s3983_s1 + $0x3e4] ss:$8 sps:$4 sm:$0xff]  }
  0xc6   : > { %2121 = vmatprep.subr.bf16.mxu0 %v2973_v23  ;;  %v3057_v23 = vld [vmem:[%s3983_s1 + $0x7e4] ss:$8 sps:$4 sm:$0xff]  }
  0xc7   : > { %1939 = vmatmul.mubr.bf16.vlgmr.msra.gmra.mrb[0].mxu1 %v2352_v27  ;;  %v3052_v27 = vld [vmem:[%s3983_s1 + $0x3e0] ss:$8 sps:$4 sm:$0xff]  }
  0xc8   : > { %2111 = vmatmul.mubr.bf16.vlgmr.msra.gmra.mrb[0].mxu0 %v2360_v28  ;;  %1950 = vmatpush1.bf16.msra.mxu1 %v2968_v34  ;;  %v3055_v28 = vld [vmem:[%s3983_s1 + $0x7e0] ss:$8 sps:$4 sm:$0xff]   ;;  %v3060_v34 = vld [vmem:[%s3983_s1 + $0x3f4] ss:$8 sps:$4 sm:$0xff]  }
  0xc9   : > { %2122 = vmatpush1.bf16.msra.mxu0 %v2971_v35  ;;  %1951 = vmatprep.subr.bf16.mxu1 %v2976_v24  ;;  %v3063_v35 = vld [vmem:[%s3983_s1 + $0x7f4] ss:$8 sps:$4 sm:$0xff]   ;;  %v3058_v24 = vld [vmem:[%s3983_s1 + $0x3f0] ss:$8 sps:$4 sm:$0xff]  }
  0xca   : > { %2123 = vmatprep.subr.bf16.mxu0 %v2979_v25  ;;  %1981 = vmatprep.mubr.bf16.mxu1 %v2355_v29  ;;  %v3061_v25 = vld [vmem:[%s3983_s1 + $0x7f0] ss:$8 sps:$4 sm:$0xff]   ;;  %v2354_v29 = vcombine.low %v3760_v26, %v3767_v31 }
  0xcb   : > { %2153 = vmatprep.mubr.bf16.mxu0 %v2363_v30  ;;  %v2362_v30 = vcombine.low %v3770_v32, %v3773_v33 }
  0xcc   : > { %1952 = vmatpush1.bf16.msra.mxu1 %v2974_v36 }
  0xcd   : > { %2124 = vmatpush1.bf16.msra.mxu0 %v2977_v37  ;;  %1953 = vmatprep.subr.bf16.mxu1 %v2982_v38 }
  0xce   : > { %2125 = vmatprep.subr.bf16.mxu0 %v2985_v39 }
  0xd0   : > { %1954 = vmatpush1.bf16.msra.mxu1 %v2980_v40 }
  0xd1   : > { %2126 = vmatpush1.bf16.msra.mxu0 %v2983_v41  ;;  %1955 = vmatprep.subr.bf16.mxu1 %v2988_v42 }
  0xd2   : > { %2127 = vmatprep.subr.bf16.mxu0 %v2991_v43 }
  0xd4   : > { %1956 = vmatpush1.bf16.msra.mxu1 %v2986_v44 }
  0xd5   : > { %2128 = vmatpush1.bf16.msra.mxu0 %v2989_v45  ;;  %1957 = vmatprep.subr.bf16.mxu1 %v2994_v46 }
  0xd6   : > { %2129 = vmatprep.subr.bf16.mxu0 %v2997_v47 }
  0xd8   : > { %1958 = vmatpush1.bf16.msra.mxu1 %v2992_v48 }
  0xd9   : > { %2130 = vmatpush1.bf16.msra.mxu0 %v2995_v49  ;;  %1959 = vmatprep.subr.bf16.mxu1 %v3000_v50 }
  0xda   : > { %2131 = vmatprep.subr.bf16.mxu0 %v3003_v51 }
  0xdc   : > { %1960 = vmatpush1.bf16.msra.mxu1 %v2998_v52 }
  0xdd   : > { %2132 = vmatpush1.bf16.msra.mxu0 %v3001_v53  ;;  %1961 = vmatprep.subr.bf16.mxu1 %v3006_v54 }
  0xde   : > { %2133 = vmatprep.subr.bf16.mxu0 %v3009_v55 }
  0xe0   : > { %1962 = vmatpush1.bf16.msra.mxu1 %v3004_v56 }
  0xe1   : > { %2134 = vmatpush1.bf16.msra.mxu0 %v3007_v57  ;;  %1963 = vmatprep.subr.bf16.mxu1 %v3012_v58 }
  0xe2   : > { %2135 = vmatprep.subr.bf16.mxu0 %v3015_v59 }
  0xe4   : > { %1964 = vmatpush1.bf16.msra.mxu1 %v3010_v60 }
  0xe5   : > { %2136 = vmatpush1.bf16.msra.mxu0 %v3013_v61  ;;  %1965 = vmatprep.subr.bf16.mxu1 %v3018_v62 }
  0xe6   : > { %2137 = vmatprep.subr.bf16.mxu0 %v3021_v63 }
  0xe8   : > { %1966 = vmatpush1.bf16.msra.mxu1 %v3016_v0 }
  0xe9   : > { %2138 = vmatpush1.bf16.msra.mxu0 %v3019_v1  ;;  %1967 = vmatprep.subr.bf16.mxu1 %v3024_v2 }
  0xea   : > { %2139 = vmatprep.subr.bf16.mxu0 %v3027_v3 }
  0xec   : > { %1968 = vmatpush1.bf16.msra.mxu1 %v3022_v4 }
  0xed   : > { %2140 = vmatpush1.bf16.msra.mxu0 %v3025_v5  ;;  %1969 = vmatprep.subr.bf16.mxu1 %v3030_v6 }
  0xee   : > { %2141 = vmatprep.subr.bf16.mxu0 %v3033_v7 }
  0xf0   : > { %1970 = vmatpush1.bf16.msra.mxu1 %v3028_v8 }
  0xf1   : > { %2142 = vmatpush1.bf16.msra.mxu0 %v3031_v9  ;;  %1971 = vmatprep.subr.bf16.mxu1 %v3036_v10 }
  0xf2   : > { %2143 = vmatprep.subr.bf16.mxu0 %v3039_v11 }
  0xf4   : > { %1972 = vmatpush1.bf16.msra.mxu1 %v3034_v12 }
  0xf5   : > { %2144 = vmatpush1.bf16.msra.mxu0 %v3037_v13  ;;  %1973 = vmatprep.subr.bf16.mxu1 %v3042_v14 }
  0xf6   : > { %2145 = vmatprep.subr.bf16.mxu0 %v3045_v15 }
  0xf8   : > { %1974 = vmatpush1.bf16.msra.mxu1 %v3040_v16 }
  0xf9   : > { %2146 = vmatpush1.bf16.msra.mxu0 %v3043_v17  ;;  %1975 = vmatprep.subr.bf16.mxu1 %v3048_v18 }
  0xfa   : > { %2147 = vmatprep.subr.bf16.mxu0 %v3051_v19 }
  0xfc   : > { %1976 = vmatpush1.bf16.msra.mxu1 %v3046_v20 }
  0xfd   : > { %2148 = vmatpush1.bf16.msra.mxu0 %v3049_v21  ;;  %1977 = vmatprep.subr.bf16.mxu1 %v3054_v22 }
  0xfe   : > { %2149 = vmatprep.subr.bf16.mxu0 %v3057_v23 }
 0x100   : > { %1978 = vmatpush1.bf16.msra.mxu1 %v3052_v27 }
 0x101   : > { %2150 = vmatpush1.bf16.msra.mxu0 %v3055_v28  ;;  %1979 = vmatprep.subr.bf16.mxu1 %v3060_v34 }
 0x102   : > { %2151 = vmatprep.subr.bf16.mxu0 %v3063_v35 }
 0x104   : > { %1980 = vmatpush1.bf16.msra.mxu1 %v3058_v24 }
 0x105   : > { %2152 = vmatpush1.bf16.msra.mxu0 %v3061_v25 }
 0x107   : > { %1982 = vmatmul.mubr.bf16.vlgmr.msra.gmra.mrb[0].mxu1 %v2354_v29 }
 0x108   : > { %2154 = vmatmul.mubr.bf16.vlgmr.msra.gmra.mrb[0].mxu0 %v2362_v30 }
 0x1da   : > { %v1983_v36 = vpop.f32.mrb[0].mxu1 }
 0x1db   : > { %v2155_v37 = vpop.f32.mrb[0].mxu0  ;;  %v1985_v39 = vpop.f32.mrb[1].mxu1 }
 0x1dc   : > { %v2628_v38 = vadd.f32 %v2155_v37, %v1983_v36  ;;  %v2157_v40 = vpop.f32.mrb[1].mxu0  ;;  %v1987_v42 = vpop.f32.mrb[2].mxu1 }
 0x1dd   : > { %v2629_v41 = vadd.f32 %v2157_v40, %v1985_v39  ;;  %v2159_v43 = vpop.f32.mrb[2].mxu0  ;;  %v1989_v45 = vpop.f32.mrb[3].mxu1 }
 0x1de   : > { %v2630_v44 = vadd.f32 %v2159_v43, %v1987_v42  ;;  %v2161_v46 = vpop.f32.mrb[3].mxu0  ;;  %v2181_v26 = vmul.f32 %v2628_v38, %v2628_v38 }
 0x1df   : > { %v2631_v47 = vadd.f32 %v2161_v46, %v1989_v45  ;;  %v2182_v32 = vmul.f32 %v2629_v41, %v2629_v41 }
 0x1e0   : > { %v2164_v31 = vadd.f32 %v2630_v44, %v2628_v38  ;;  %v2183_v48 = vmul.f32 %v2630_v44, %v2630_v44 }
 0x1e1   : > { %v2171_v33 = vadd.f32 %v2631_v47, %v2629_v41  ;;  %v2184_v49 = vmul.f32 %v2631_v47, %v2631_v47 }
 0x1e2   : > { %v2165_v50 = vrot.slane %v2164_v31, 4  ;;  %v2185_v51 = vadd.f32 %v2183_v48, %v2181_v26 }
 0x1e3   : > { %v2172_v52 = vrot.slane %v2171_v33, 4  ;;  %v2192_v53 = vadd.f32 %v2184_v49, %v2182_v32 }
 0x1e4   : > { %v2166_v54 = vadd.f32 %v2165_v50, %v2164_v31  ;;  %v2186_v55 = vrot.slane %v2185_v51, 4 }
 0x1e5   : > { %v2173_v56 = vadd.f32 %v2172_v52, %v2171_v33  ;;  %v2193_v57 = vrot.slane %v2192_v53, 4 }
 0x1e6   : > { %v2167_v58 = vrot.slane %v2166_v54, 2  ;;  %v2187_v59 = vadd.f32 %v2186_v55, %v2185_v51 }
 0x1e7   : > { %v2174_v60 = vrot.slane %v2173_v56, 2  ;;  %v2194_v61 = vadd.f32 %v2193_v57, %v2192_v53 }
 0x1e8   : > { %v2168_v62 = vadd.f32 %v2167_v58, %v2166_v54  ;;  %v2188_v63 = vrot.slane %v2187_v59, 2 }
 0x1e9   : > { %v2175_v0 = vadd.f32 %v2174_v60, %v2173_v56  ;;  %v2195_v1 = vrot.slane %v2194_v61, 2 }
 0x1ea   : > { %v2169_v2 = vrot.slane %v2168_v62, 1  ;;  %v2189_v3 = vadd.f32 %v2188_v63, %v2187_v59 }
 0x1eb   : > { %v2176_v4 = vrot.slane %v2175_v0, 1  ;;  %v2196_v5 = vadd.f32 %v2195_v1, %v2194_v61 }
 0x1ec   : > { %v2170_v6 = vadd.f32 %v2169_v2, %v2168_v62  ;;  %v2190_v7 = vrot.slane %v2189_v3, 1 }
 0x1ed   : > { %v2177_v8 = vadd.f32 %v2176_v4, %v2175_v0  ;;  %v2197_v9 = vrot.slane %v2196_v5, 1 }
 0x1ee   : > { %v2179_v10 = vmul.f32 0.0625, %v2170_v6  ;;  %v2191_v11 = vadd.f32 %v2190_v7, %v2189_v3 }
 0x1ef   : > { %v2180_v12 = vmul.f32 0.0625, %v2177_v8  ;;  %v2198_v13 = vadd.f32 %v2197_v9, %v2196_v5 }
 0x1f0   : > { %v2199_v14 = vmul.f32 0.0625, %v2191_v11  ;;  %v2201_v15 = vmul.f32 %v2179_v10, %v2179_v10  ;;  %v2205_v16 = vsub.f32 %v2628_v38, %v2179_v10  ;;  %v2207_v17 = vsub.f32 %v2630_v44, %v2179_v10 }
 0x1f1   : > { %v2200_v18 = vmul.f32 0.0625, %v2198_v13  ;;  %v2202_v19 = vmul.f32 %v2180_v12, %v2180_v12  ;;  %v2206_v20 = vsub.f32 %v2629_v41, %v2180_v12  ;;  %v2208_v21 = vsub.f32 %v2631_v47, %v2180_v12 }
 0x1f2   : > { %v2203_v22 = vsub.f32 %v2199_v14, %v2201_v15 }
 0x1f3   : > { %v2204_v23 = vsub.f32 %v2200_v18, %v2202_v19 }
 0x1f4   : > { %v2209_v27 = vadd.f32 1e-05, %v2203_v22 }
 0x1f5   : > { %v2210_v28 = vadd.f32 1e-05, %v2204_v23 }
 0x1f6   : > { %3064 = vrsqrt.f32 %v2209_v27 }
 0x1f7   : > { %3066 = vrsqrt.f32 %v2210_v28 }
 0x200   : > { %v3065_v34 = vpop.eup %3064 }
 0x201   : > { %v3067_v35 = vpop.eup %3066  ;;  %v2213_v24 = vmul.f32 %v3065_v34, %v2205_v16  ;;  %v2215_v25 = vmul.f32 %v3065_v34, %v2207_v17 }
 0x202   : > { %v2214_v29 = vmul.f32 %v3067_v35, %v2206_v20  ;;  %v2216_v30 = vmul.f32 %v3067_v35, %v2208_v21 }
 0x203   : > { %vm2217_vm0 = vcmp.ge.f32.partialorder %v2213_v24, 0.0  ;;  %vm2219_vm1 = vcmp.ge.f32.partialorder %v2215_v25, 0.0  ;;  %v2221_v36 = vmul.f32 0.2, %v2213_v24  ;;  %v2223_v37 = vmul.f32 0.2, %v2215_v25 }
 0x204   : > { %vm2218_vm2 = vcmp.ge.f32.partialorder %v2214_v29, 0.0  ;;  %vm2220_vm3 = vcmp.ge.f32.partialorder %v2216_v30, 0.0  ;;  %v2222_v38 = vmul.f32 0.2, %v2214_v29  ;;  %v2224_v39 = vmul.f32 0.2, %v2216_v30 }
 0x205   : > { %v2227_v40 = vsel %vm2219_vm1, %v2215_v25, %v2223_v37  ;;  %v2225_v41 = vsel %vm2217_vm0, %v2213_v24, %v2221_v36 }
 0x206   : > { %v2226_v42 = vsel %vm2218_vm2, %v2214_v29, %v2222_v38  ;;  %v2228_v43 = vsel %vm2220_vm3, %v2216_v30, %v2224_v39 }
 0x207   : > { %v2626_v44 = vpack.c.bf16 %v2226_v42, %v2225_v41  ;;  %v2627_v45 = vpack.c.bf16 %v2228_v43, %v2227_v40 }
 0x209   : > { %2241 = vst [vmem:[%s186_s17] sm:$0xff] %v2626_v44  ;;  %2242 = vst [vmem:[%s186_s17 + $0x8] sm:$0xff] %v2627_v45 }
 0x20a PF: > { %s12_s11 = sadd.s32 1, %s3090_s11   ;;  %s3985_s9 = smov %s3086_s10 }
 0x20b   : > { %p9_p5 = scmp.ge.s32.totalorder %s12_s11, 4   ;;  %s3986_s10 = smov %s3988_s12 }
 0x20d   :  { %11 = sbr.rel (!%p9_p5) target bundleno = 2 (0x2), region = 58 }

// kernel: discriminator_forward.8
= control target key start
LH: loop header
LB: loop body
LE: loop exit
PB: predicated region body
PF: predicated region fallthrough
CT: control target
= control target key end

     0   :  { %s10821_s9 = smov 0   ;;  %s10823_s10 = smov 0   ;;  %s14121_s0 = inlined_call_operand.vmem [shape: bf16[2,4,4096], index: 0, kind: input, shape index: {}]   ;;  %s14122_s1 = inlined_call_operand.vmem [shape: bf16[4096,512], index: 1, kind: input, shape index: {}]   ;;  %s14123_s2 = inlined_call_operand.vmem [shape: bf16[2,4,512], index: 2, kind: output, shape index: {}]  }
   0x1   :  { %s10825_s11 = smov 0  }
   0x2 LB: > { %s24_s12 = sadd.s32 1, %s10799_s10  ;;  %p8049_p0 = scmp.ge.s32.totalorder %s10803_s11, 1  ;;  %s10803_s11 = sphi %s10825_s11, %s12_s11   ;;  %s10799_s10 = sphi %s10823_s10, %s14125_s10   ;;  %s10795_s9 = sphi %s10821_s9, %s14124_s9  }
   0x3   : > { %p26_p1 = scmp.ge.s32.totalorder %s24_s12, 2  ;;  %p132_p2 = scmp.lt.s32.totalorder %s10803_s11, 3 }
   0x5   : > { %s14127_s12 = smov (%p26_p1, %s24_s12), 0  ;;  %p133_p3 = pnand %p8049_p0, %p132_p2 }
   0x6   : > { %v9229_v0 = vld [vmem:[%s14122_s1 + $0x4] ss:$16 sps:$4 sm:$0xff] (!%p133_p3)   ;;  %v9231_v1 = vld [vmem:[%s14122_s1 + $0xc] ss:$16 sps:$4 sm:$0xff] (!%p133_p3)   ;;  %v9233_v2 = vld [vmem:[%s14122_s1] ss:$16 sps:$4 sm:$0xff] (!%p133_p3)   ;;  %v1224_v38 = vlaneseq (!%p133_p3) }
   0x7   : > { %136 = sbr.rel (%p133_p3) target bundleno = 1292 (0x50c), region = 28  ;;  %6508 = vmatprep.subr.bf16.mxu0 (!%p133_p3), %v9229_v0  ;;  %v9234_v3 = vld [vmem:[%s14122_s1 + $0x8] ss:$16 sps:$4 sm:$0xff] (!%p133_p3)   ;;  %7164 = vmatprep.subr.bf16.mxu1 (!%p133_p3), %v9231_v1  ;;  %v9235_v4 = vld [vmem:[%s14122_s1 + $0x24] ss:$16 sps:$4 sm:$0xff] (!%p133_p3)   ;;  %p162_p4 = scmp.lt.s32.totalorder (!%p133_p3), %s10795_s9, 1 }
   0x8   : > { %6509 = vmatpush1.bf16.msra.mxu0 (!%p133_p3), %v9233_v2  ;;  %7165 = vmatpush1.bf16.msra.mxu1 (!%p133_p3), %v9234_v3  ;;  %v9237_v5 = vld [vmem:[%s14122_s1 + $0x2c] ss:$16 sps:$4 sm:$0xff] (!%p133_p3)   ;;  %v9239_v6 = vld [vmem:[%s14122_s1 + $0x20] ss:$16 sps:$4 sm:$0xff] (!%p133_p3)   ;;  %v9240_v7 = vld [vmem:[%s14122_s1 + $0x28] ss:$16 sps:$4 sm:$0xff] (!%p133_p3)  }
   0x9   : > { %6510 = vmatprep.subr.bf16.mxu0 (!%p133_p3), %v9235_v4  ;;  %7166 = vmatprep.subr.bf16.mxu1 (!%p133_p3), %v9237_v5  ;;  %v9241_v8 = vld [vmem:[%s14122_s1 + $0x44] ss:$16 sps:$4 sm:$0xff] (!%p133_p3)   ;;  %v9243_v9 = vld [vmem:[%s14122_s1 + $0x4c] ss:$16 sps:$4 sm:$0xff] (!%p133_p3)   ;;  %v9245_v10 = vld [vmem:[%s14122_s1 + $0x40] ss:$16 sps:$4 sm:$0xff] (!%p133_p3)  }
   0xa   : > { %v9246_v11 = vld [vmem:[%s14122_s1 + $0x48] ss:$16 sps:$4 sm:$0xff] (!%p133_p3)   ;;  %v9247_v12 = vld [vmem:[%s14122_s1 + $0x64] ss:$16 sps:$4 sm:$0xff] (!%p133_p3)   ;;  %v9249_v13 = vld [vmem:[%s14122_s1 + $0x6c] ss:$16 sps:$4 sm:$0xff] (!%p133_p3)  }
   0xb   : > { %v9251_v14 = vld [vmem:[%s14122_s1 + $0x60] ss:$16 sps:$4 sm:$0xff] (!%p133_p3)   ;;  %v9252_v15 = vld [vmem:[%s14122_s1 + $0x68] ss:$16 sps:$4 sm:$0xff] (!%p133_p3)   ;;  %v9253_v16 = vld [vmem:[%s14122_s1 + $0x84] ss:$16 sps:$4 sm:$0xff] (!%p133_p3)  }
   0xc   : > { %6511 = vmatpush1.bf16.msra.mxu0 (!%p133_p3), %v9239_v6  ;;  %7167 = vmatpush1.bf16.msra.mxu1 (!%p133_p3), %v9240_v7  ;;  %v9255_v17 = vld [vmem:[%s14122_s1 + $0x8c] ss:$16 sps:$4 sm:$0xff] (!%p133_p3)   ;;  %v9257_v18 = vld [vmem:[%s14122_s1 + $0x80] ss:$16 sps:$4 sm:$0xff] (!%p133_p3)   ;;  %v9258_v19 = vld [vmem:[%s14122_s1 + $0x88] ss:$16 sps:$4 sm:$0xff] (!%p133_p3)  }
   0xd   : > { %6512 = vmatprep.subr.bf16.mxu0 (!%p133_p3), %v9241_v8  ;;  %7168 = vmatprep.subr.bf16.mxu1 (!%p133_p3), %v9243_v9  ;;  %v9259_v20 = vld [vmem:[%s14122_s1 + $0xa4] ss:$16 sps:$4 sm:$0xff] (!%p133_p3)   ;;  %v9261_v21 = vld [vmem:[%s14122_s1 + $0xac] ss:$16 sps:$4 sm:$0xff] (!%p133_p3)   ;;  %v9263_v22 = vld [vmem:[%s14122_s1 + $0xa0] ss:$16 sps:$4 sm:$0xff] (!%p133_p3)  }
   0xe   : > { %v9264_v23 = vld [vmem:[%s14122_s1 + $0xa8] ss:$16 sps:$4 sm:$0xff]   ;;  %v9265_v24 = vld [vmem:[%s14122_s1 + $0xc4] ss:$16 sps:$4 sm:$0xff]   ;;  %v9267_v25 = vld [vmem:[%s14122_s1 + $0xcc] ss:$16 sps:$4 sm:$0xff]  }
   0xf   : > { %v9269_v26 = vld [vmem:[%s14122_s1 + $0xc0] ss:$16 sps:$4 sm:$0xff]   ;;  %v9270_v27 = vld [vmem:[%s14122_s1 + $0xc8] ss:$16 sps:$4 sm:$0xff]   ;;  %v9271_v28 = vld [vmem:[%s14122_s1 + $0xe4] ss:$16 sps:$4 sm:$0xff]  }
  0x10   : > { %6513 = vmatpush1.bf16.msra.mxu0 %v9245_v10  ;;  %7169 = vmatpush1.bf16.msra.mxu1 %v9246_v11  ;;  %v9273_v29 = vld [vmem:[%s14122_s1 + $0xec] ss:$16 sps:$4 sm:$0xff]   ;;  %v9275_v30 = vld [vmem:[%s14122_s1 + $0xe0] ss:$16 sps:$4 sm:$0xff]   ;;  %v9276_v31 = vld [vmem:[%s14122_s1 + $0xe8] ss:$16 sps:$4 sm:$0xff]  }
  0x11   : > { %6514 = vmatprep.subr.bf16.mxu0 %v9247_v12  ;;  %7170 = vmatprep.subr.bf16.mxu1 %v9249_v13  ;;  %v9277_v32 = vld [vmem:[%s14122_s1 + $0x104] ss:$16 sps:$4 sm:$0xff]   ;;  %v9279_v33 = vld [vmem:[%s14122_s1 + $0x10c] ss:$16 sps:$4 sm:$0xff]   ;;  %v9281_v34 = vld [vmem:[%s14122_s1 + $0x100] ss:$16 sps:$4 sm:$0xff]  }
  0x12   : > { %v9282_v35 = vld [vmem:[%s14122_s1 + $0x108] ss:$16 sps:$4 sm:$0xff]   ;;  %v10805_v36 = vmov 1983009808   ;;  %v9283_v39 = vld [vmem:[%s14122_s1 + $0x124] ss:$16 sps:$4 sm:$0xff]  }
  0x13   : > { %v1222_v37 = vunpack.c.l.s4 %v10805_v36  ;;  %s14129_s9 = smov (!%p162_p4, %s10795_s9), 1  ;;  %v9285_v40 = vld [vmem:[%s14122_s1 + $0x12c] ss:$16 sps:$4 sm:$0xff]   ;;  %v9287_v41 = vld [vmem:[%s14122_s1 + $0x120] ss:$16 sps:$4 sm:$0xff]   ;;  %v1225_v43 = vshrl.u32 %v1224_v38, 7 }
  0x14   : > { %6515 = vmatpush1.bf16.msra.mxu0 %v9251_v14  ;;  %7171 = vmatpush1.bf16.msra.mxu1 %v9252_v15  ;;  %v9288_v44 = vld [vmem:[%s14122_s1 + $0x128] ss:$16 sps:$4 sm:$0xff]   ;;  %v9289_v45 = vld [vmem:[%s14122_s1 + $0x144] ss:$16 sps:$4 sm:$0xff]   ;;  %s9082_s23 = sshll.u32 %s14129_s9, 6  ;;  %vm7820_vm0 = vcmask 1043456  }
  0x15   : > { %6516 = vmatprep.subr.bf16.mxu0 %v9253_v16  ;;  %7172 = vmatprep.subr.bf16.mxu1 %v9255_v17  ;;  %v1223_v42 = vunpack.c.0.s8 %v1222_v37  ;;  %v9291_v46 = vld [vmem:[%s14122_s1 + $0x14c] ss:$16 sps:$4 sm:$0xff]   ;;  %v9293_v47 = vld [vmem:[%s14122_s1 + $0x140] ss:$16 sps:$4 sm:$0xff]   ;;  %v9294_v48 = vld [vmem:[%s14122_s1 + $0x148] ss:$16 sps:$4 sm:$0xff]   ;;  %s10981_s4 = scalar_lea.vmem %s14121_s0, %s9082_s23 }
  0x16   : > { %v9295_v50 = vld [vmem:[%s14122_s1 + $0x164] ss:$16 sps:$4 sm:$0xff]   ;;  %v9297_v51 = vld [vmem:[%s14122_s1 + $0x16c] ss:$16 sps:$4 sm:$0xff]   ;;  %v9299_v53 = vld [vmem:[%s14122_s1 + $0x160] ss:$16 sps:$4 sm:$0xff]  }
  0x17   : > { %v10983_v49 = vsub.s32 %v1223_v42, %v1225_v43  ;;  %v180_v52 = vld [vmem:[%s10981_s4] sm:$0xff]  ;;  %v9300_v55 = vld [vmem:[%s14122_s1 + $0x168] ss:$16 sps:$4 sm:$0xff]   ;;  %v9303_v57 = vld [vmem:[%s14122_s1 + $0x18c] ss:$16 sps:$4 sm:$0xff]   ;;  %s9083_s26 = sshll.u32 %s14129_s9, 3 }
  0x18   : > { %6517 = vmatpush1.bf16.msra.mxu0 %v9257_v18  ;;  %7173 = vmatpush1.bf16.msra.mxu1 %v9258_v19  ;;  %v9301_v56 = vld [vmem:[%s14122_s1 + $0x184] ss:$16 sps:$4 sm:$0xff]   ;;  %v9305_v59 = vld [vmem:[%s14122_s1 + $0x180] ss:$16 sps:$4 sm:$0xff]   ;;  %v9306_v60 = vld [vmem:[%s14122_s1 + $0x188] ss:$16 sps:$4 sm:$0xff]   ;;  %v1220_v7 = vcombine.high %v180_v52, %v180_v52  ;;  %s179_s29 = scalar_lea.vmem %s14123_s2, %s9083_s26 }
  0x19   : > { %6518 = vmatprep.subr.bf16.mxu0 %v9259_v20  ;;  %7174 = vmatprep.subr.bf16.mxu1 %v9261_v21  ;;  %v1227_v54 = vrot.slane %v180_v52, %v10983_v49  ;;  %v9307_v61 = vld [vmem:[%s14122_s1 + $0x1a4] ss:$16 sps:$4 sm:$0xff]   ;;  %v9309_v62 = vld [vmem:[%s14122_s1 + $0x1ac] ss:$16 sps:$4 sm:$0xff]   ;;  %v9311_v63 = vld [vmem:[%s14122_s1 + $0x1a0] ss:$16 sps:$4 sm:$0xff]  }
  0x1a   : > { %v9312_v0 = vld [vmem:[%s14122_s1 + $0x1a8] ss:$16 sps:$4 sm:$0xff]   ;;  %v9313_v1 = vld [vmem:[%s14122_s1 + $0x1c4] ss:$16 sps:$4 sm:$0xff]   ;;  %v9315_v2 = vld [vmem:[%s14122_s1 + $0x1cc] ss:$16 sps:$4 sm:$0xff]   ;;  %v11054_v12 = vrot.slane %v1220_v7, %v10983_v49 }
  0x1b   : > { %v1235_v58 = vcombine.high %v1227_v54, %v1227_v54  ;;  %v9317_v3 = vld [vmem:[%s14122_s1 + $0x1c0] ss:$16 sps:$4 sm:$0xff]   ;;  %v9318_v4 = vld [vmem:[%s14122_s1 + $0x1c8] ss:$16 sps:$4 sm:$0xff]   ;;  %v9319_v5 = vld [vmem:[%s14122_s1 + $0x1e4] ss:$16 sps:$4 sm:$0xff]  }
  0x1c   : > { %6519 = vmatpush1.bf16.msra.mxu0 %v9263_v22  ;;  %7175 = vmatpush1.bf16.msra.mxu1 %v9264_v23  ;;  %v9321_v6 = vld [vmem:[%s14122_s1 + $0x1ec] ss:$16 sps:$4 sm:$0xff]   ;;  %v9323_v8 = vld [vmem:[%s14122_s1 + $0x1e0] ss:$16 sps:$4 sm:$0xff]   ;;  %v9324_v9 = vld [vmem:[%s14122_s1 + $0x1e8] ss:$16 sps:$4 sm:$0xff]   ;;  %v1236_v17 = vcombine.high %v11054_v12, %v11054_v12 }
  0x1d   : > { %6520 = vmatprep.subr.bf16.mxu0 %v9265_v24  ;;  %7176 = vmatprep.subr.bf16.mxu1 %v9267_v25  ;;  %v9328_v10 = vld [vmem:[%s14122_s1 + $0x204] ss:$16 sps:$4 sm:$0xff]   ;;  %v9331_v11 = vld [vmem:[%s14122_s1 + $0x20c] ss:$16 sps:$4 sm:$0xff]   ;;  %v9326_v13 = vld [vmem:[%s14122_s1 + $0x200] ss:$16 sps:$4 sm:$0xff]  }
  0x1e   : > { %6540 = vmatprep.mubr.bf16.mxu0 %v1235_v58  ;;  %7196 = vmatprep.mubr.bf16.mxu1 %v1235_v58  ;;  %v9329_v14 = vld [vmem:[%s14122_s1 + $0x208] ss:$16 sps:$4 sm:$0xff]   ;;  %v9334_v15 = vld [vmem:[%s14122_s1 + $0x224] ss:$16 sps:$4 sm:$0xff]   ;;  %v9337_v16 = vld [vmem:[%s14122_s1 + $0x22c] ss:$16 sps:$4 sm:$0xff]  }
  0x1f   : > { %v9332_v18 = vld [vmem:[%s14122_s1 + $0x220] ss:$16 sps:$4 sm:$0xff]   ;;  %v9335_v19 = vld [vmem:[%s14122_s1 + $0x228] ss:$16 sps:$4 sm:$0xff]   ;;  %v9340_v20 = vld [vmem:[%s14122_s1 + $0x244] ss:$16 sps:$4 sm:$0xff]  }
  0x20   : > { %6521 = vmatpush1.bf16.msra.mxu0 %v9269_v26  ;;  %7177 = vmatpush1.bf16.msra.mxu1 %v9270_v27  ;;  %v9343_v21 = vld [vmem:[%s14122_s1 + $0x24c] ss:$16 sps:$4 sm:$0xff]   ;;  %v9338_v22 = vld [vmem:[%s14122_s1 + $0x240] ss:$16 sps:$4 sm:$0xff]   ;;  %v9341_v23 = vld [vmem:[%s14122_s1 + $0x248] ss:$16 sps:$4 sm:$0xff]  }
  0x21   : > { %6522 = vmatprep.subr.bf16.mxu0 %v9271_v28  ;;  %7178 = vmatprep.subr.bf16.mxu1 %v9273_v29  ;;  %v9346_v24 = vld [vmem:[%s14122_s1 + $0x264] ss:$16 sps:$4 sm:$0xff]   ;;  %v9349_v25 = vld [vmem:[%s14122_s1 + $0x26c] ss:$16 sps:$4 sm:$0xff]   ;;  %v9344_v26 = vld [vmem:[%s14122_s1 + $0x260] ss:$16 sps:$4 sm:$0xff]  }
  0x22   : > { %v9347_v27 = vld [vmem:[%s14122_s1 + $0x268] ss:$16 sps:$4 sm:$0xff]   ;;  %v9352_v28 = vld [vmem:[%s14122_s1 + $0x284] ss:$16 sps:$4 sm:$0xff]   ;;  %v9355_v29 = vld [vmem:[%s14122_s1 + $0x28c] ss:$16 sps:$4 sm:$0xff]  }
  0x23   : > { %v9364_v36 = vld [vmem:[%s14122_s1 + $0x2c4] ss:$16 sps:$4 sm:$0xff]   ;;  %v9367_v37 = vld [vmem:[%s14122_s1 + $0x2cc] ss:$16 sps:$4 sm:$0xff]   ;;  %v9362_v38 = vld [vmem:[%s14122_s1 + $0x2c0] ss:$16 sps:$4 sm:$0xff]  }
  0x24   : > { %6523 = vmatpush1.bf16.msra.mxu0 %v9275_v30  ;;  %7179 = vmatpush1.bf16.msra.mxu1 %v9276_v31  ;;  %v9350_v30 = vld [vmem:[%s14122_s1 + $0x280] ss:$16 sps:$4 sm:$0xff]   ;;  %v9353_v31 = vld [vmem:[%s14122_s1 + $0x288] ss:$16 sps:$4 sm:$0xff]   ;;  %v9397_v58 = vld [vmem:[%s14122_s1 + $0x36c] ss:$16 sps:$4 sm:$0xff]  }
  0x25   : > { %6524 = vmatprep.subr.bf16.mxu0 %v9277_v32  ;;  %7180 = vmatprep.subr.bf16.mxu1 %v9279_v33  ;;  %v9358_v32 = vld [vmem:[%s14122_s1 + $0x2a4] ss:$16 sps:$4 sm:$0xff]   ;;  %v9361_v33 = vld [vmem:[%s14122_s1 + $0x2ac] ss:$16 sps:$4 sm:$0xff]   ;;  %v9368_v42 = vld [vmem:[%s14122_s1 + $0x2e0] ss:$16 sps:$4 sm:$0xff]  }
  0x26   : > { %v9371_v43 = vld [vmem:[%s14122_s1 + $0x2e8] ss:$16 sps:$4 sm:$0xff]   ;;  %v9410_v7 = vld [vmem:[%s14122_s1 + $0x3c0] ss:$16 sps:$4 sm:$0xff]  }
  0x27   : > { %v9383_v52 = vld [vmem:[%s14122_s1 + $0x328] ss:$16 sps:$4 sm:$0xff]  }
  0x28   : > { %6525 = vmatpush1.bf16.msra.mxu0 %v9281_v34  ;;  %7181 = vmatpush1.bf16.msra.mxu1 %v9282_v35  ;;  %v9356_v34 = vld [vmem:[%s14122_s1 + $0x2a0] ss:$16 sps:$4 sm:$0xff]   ;;  %v9359_v35 = vld [vmem:[%s14122_s1 + $0x2a8] ss:$16 sps:$4 sm:$0xff]  }
  0x29   : > { %6526 = vmatprep.subr.bf16.mxu0 %v9283_v39  ;;  %7182 = vmatprep.subr.bf16.mxu1 %v9285_v40  ;;  %v9365_v39 = vld [vmem:[%s14122_s1 + $0x2c8] ss:$16 sps:$4 sm:$0xff]   ;;  %v9370_v40 = vld [vmem:[%s14122_s1 + $0x2e4] ss:$16 sps:$4 sm:$0xff]  }
  0x2c   : > { %6527 = vmatpush1.bf16.msra.mxu0 %v9287_v41  ;;  %7183 = vmatpush1.bf16.msra.mxu1 %v9288_v44  ;;  %v9373_v41 = vld [vmem:[%s14122_s1 + $0x2ec] ss:$16 sps:$4 sm:$0xff]   ;;  %v9376_v44 = vld [vmem:[%s14122_s1 + $0x304] ss:$16 sps:$4 sm:$0xff]  }
  0x2d   : > { %6528 = vmatprep.subr.bf16.mxu0 %v9289_v45  ;;  %7184 = vmatprep.subr.bf16.mxu1 %v9291_v46  ;;  %v9379_v45 = vld [vmem:[%s14122_s1 + $0x30c] ss:$16 sps:$4 sm:$0xff]   ;;  %v9374_v46 = vld [vmem:[%s14122_s1 + $0x300] ss:$16 sps:$4 sm:$0xff]  }
  0x30   : > { %6529 = vmatpush1.bf16.msra.mxu0 %v9293_v47  ;;  %7185 = vmatpush1.bf16.msra.mxu1 %v9294_v48  ;;  %v9377_v47 = vld [vmem:[%s14122_s1 + $0x308] ss:$16 sps:$4 sm:$0xff]   ;;  %v9382_v48 = vld [vmem:[%s14122_s1 + $0x324] ss:$16 sps:$4 sm:$0xff]  }
  0x31   : > { %6530 = vmatprep.subr.bf16.mxu0 %v9295_v50  ;;  %7186 = vmatprep.subr.bf16.mxu1 %v9297_v51  ;;  %v9385_v50 = vld [vmem:[%s14122_s1 + $0x32c] ss:$16 sps:$4 sm:$0xff]   ;;  %v9380_v51 = vld [vmem:[%s14122_s1 + $0x320] ss:$16 sps:$4 sm:$0xff]  }
  0x34   : > { %6531 = vmatpush1.bf16.msra.mxu0 %v9299_v53  ;;  %7187 = vmatpush1.bf16.msra.mxu1 %v9300_v55  ;;  %v9388_v53 = vld [vmem:[%s14122_s1 + $0x344] ss:$16 sps:$4 sm:$0xff]   ;;  %v9386_v55 = vld [vmem:[%s14122_s1 + $0x340] ss:$16 sps:$4 sm:$0xff]  }
  0x35   : > { %6532 = vmatprep.subr.bf16.mxu0 %v9301_v56  ;;  %7188 = vmatprep.subr.bf16.mxu1 %v9303_v57  ;;  %v9389_v56 = vld [vmem:[%s14122_s1 + $0x348] ss:$16 sps:$4 sm:$0xff]   ;;  %v9394_v57 = vld [vmem:[%s14122_s1 + $0x364] ss:$16 sps:$4 sm:$0xff]  }
  0x38   : > { %6533 = vmatpush1.bf16.msra.mxu0 %v9305_v59  ;;  %7189 = vmatpush1.bf16.msra.mxu1 %v9306_v60  ;;  %v9392_v59 = vld [vmem:[%s14122_s1 + $0x360] ss:$16 sps:$4 sm:$0xff]   ;;  %v9395_v60 = vld [vmem:[%s14122_s1 + $0x368] ss:$16 sps:$4 sm:$0xff]  }
  0x39   : > { %6534 = vmatprep.subr.bf16.mxu0 %v9307_v61  ;;  %7190 = vmatprep.subr.bf16.mxu1 %v9309_v62  ;;  %v9400_v61 = vld [vmem:[%s14122_s1 + $0x384] ss:$16 sps:$4 sm:$0xff]   ;;  %v9403_v62 = vld [vmem:[%s14122_s1 + $0x38c] ss:$16 sps:$4 sm:$0xff]  }
  0x3c   : > { %6535 = vmatpush1.bf16.msra.mxu0 %v9311_v63  ;;  %7191 = vmatpush1.bf16.msra.mxu1 %v9312_v0  ;;  %v9398_v63 = vld [vmem:[%s14122_s1 + $0x380] ss:$16 sps:$4 sm:$0xff]   ;;  %v9401_v0 = vld [vmem:[%s14122_s1 + $0x388] ss:$16 sps:$4 sm:$0xff]  }
  0x3d   : > { %6536 = vmatprep.subr.bf16.mxu0 %v9313_v1  ;;  %7192 = vmatprep.subr.bf16.mxu1 %v9315_v2  ;;  %v9406_v1 = vld [vmem:[%s14122_s1 + $0x3a4] ss:$16 sps:$4 sm:$0xff]   ;;  %v9409_v2 = vld [vmem:[%s14122_s1 + $0x3ac] ss:$16 sps:$4 sm:$0xff]  }
  0x40   : > { %6537 = vmatpush1.bf16.msra.mxu0 %v9317_v3  ;;  %7193 = vmatpush1.bf16.msra.mxu1 %v9318_v4  ;;  %v9404_v3 = vld [vmem:[%s14122_s1 + $0x3a0] ss:$16 sps:$4 sm:$0xff]   ;;  %v9407_v4 = vld [vmem:[%s14122_s1 + $0x3a8] ss:$16 sps:$4 sm:$0xff]  }
  0x41   : > { %6538 = vmatprep.subr.bf16.mxu0 %v9319_v5  ;;  %7194 = vmatprep.subr.bf16.mxu1 %v9321_v6  ;;  %v9412_v5 = vld [vmem:[%s14122_s1 + $0x3c4] ss:$16 sps:$4 sm:$0xff]   ;;  %v9415_v6 = vld [vmem:[%s14122_s1 + $0x3cc] ss:$16 sps:$4 sm:$0xff]  }
  0x44   : > { %6539 = vmatpush1.bf16.msra.mxu0 %v9323_v8  ;;  %7195 = vmatpush1.bf16.msra.mxu1 %v9324_v9  ;;  %v9413_v8 = vld [vmem:[%s14122_s1 + $0x3c8] ss:$16 sps:$4 sm:$0xff]   ;;  %v9418_v9 = vld [vmem:[%s14122_s1 + $0x3e4] ss:$16 sps:$4 sm:$0xff]  }
  0x45   : > { %6549 = vmatprep.subr.bf16.mxu0 %v9328_v10  ;;  %7205 = vmatprep.subr.bf16.mxu1 %v9331_v11  ;;  %v9421_v10 = vld [vmem:[%s14122_s1 + $0x3ec] ss:$16 sps:$4 sm:$0xff]   ;;  %v9416_v11 = vld [vmem:[%s14122_s1 + $0x3e0] ss:$16 sps:$4 sm:$0xff]  }
  0x47   : > { %6541 = vmatmul.mubr.bf16.vlgmr.msra.gmra.mrb[0].mxu0 %v1227_v54  ;;  %7197 = vmatmul.mubr.bf16.vlgmr.msra.gmra.mrb[0].mxu1 %v1227_v54  ;;  %v9391_v54 = vld [vmem:[%s14122_s1 + $0x34c] ss:$16 sps:$4 sm:$0xff]  }
  0x48   : > { %6550 = vmatpush1.bf16.msra.mxu0 %v9326_v13  ;;  %7206 = vmatpush1.bf16.msra.mxu1 %v9329_v14  ;;  %v9419_v13 = vld [vmem:[%s14122_s1 + $0x3e8] ss:$16 sps:$4 sm:$0xff]   ;;  %v9424_v14 = vld [vmem:[%s14122_s1 + $0x404] ss:$16 sps:$4 sm:$0xff]  }
  0x49   : > { %6551 = vmatprep.subr.bf16.mxu0 %v9334_v15  ;;  %7207 = vmatprep.subr.bf16.mxu1 %v9337_v16  ;;  %v9427_v15 = vld [vmem:[%s14122_s1 + $0x40c] ss:$16 sps:$4 sm:$0xff]   ;;  %v9422_v16 = vld [vmem:[%s14122_s1 + $0x400] ss:$16 sps:$4 sm:$0xff]  }
  0x4a   : > { %6581 = vmatprep.mubr.bf16.mxu0 %v1236_v17  ;;  %7237 = vmatprep.mubr.bf16.mxu1 %v1236_v17  ;;  %v9425_v17 = vld [vmem:[%s14122_s1 + $0x408] ss:$16 sps:$4 sm:$0xff]  }
  0x4c   : > { %6552 = vmatpush1.bf16.msra.mxu0 %v9332_v18  ;;  %7208 = vmatpush1.bf16.msra.mxu1 %v9335_v19  ;;  %v11257_v18 = vld [vmem:[%s10981_s4 + $0x8] sm:$0xff]  ;;  %v9430_v19 = vld [vmem:[%s14122_s1 + $0x424] ss:$16 sps:$4 sm:$0xff]  }
  0x4d   : > { %6553 = vmatprep.subr.bf16.mxu0 %v9340_v20  ;;  %7209 = vmatprep.subr.bf16.mxu1 %v9343_v21  ;;  %v9433_v20 = vld [vmem:[%s14122_s1 + $0x42c] ss:$16 sps:$4 sm:$0xff]   ;;  %v11267_v21 = vrot.slane %v11257_v18, %v10983_v49 }
  0x50   : > { %6554 = vmatpush1.bf16.msra.mxu0 %v9338_v22  ;;  %7210 = vmatpush1.bf16.msra.mxu1 %v9341_v23  ;;  %v1252_v22 = vcombine.high %v11267_v21, %v11267_v21  ;;  %v9428_v23 = vld [vmem:[%s14122_s1 + $0x420] ss:$16 sps:$4 sm:$0xff]  }
  0x51   : > { %6555 = vmatprep.subr.bf16.mxu0 %v9346_v24  ;;  %7211 = vmatprep.subr.bf16.mxu1 %v9349_v25  ;;  %v9431_v24 = vld [vmem:[%s14122_s1 + $0x428] ss:$16 sps:$4 sm:$0xff]   ;;  %v9436_v25 = vld [vmem:[%s14122_s1 + $0x444] ss:$16 sps:$4 sm:$0xff]  }
  0x54   : > { %6556 = vmatpush1.bf16.msra.mxu0 %v9344_v26  ;;  %7212 = vmatpush1.bf16.msra.mxu1 %v9347_v27  ;;  %v9434_v26 = vld [vmem:[%s14122_s1 + $0x440] ss:$16 sps:$4 sm:$0xff]   ;;  %v9437_v27 = vld [vmem:[%s14122_s1 + $0x448] ss:$16 sps:$4 sm:$0xff]  }
  0x55   : > { %6557 = vmatprep.subr.bf16.mxu0 %v9352_v28  ;;  %7213 = vmatprep.subr.bf16.mxu1 %v9355_v29  ;;  %v9442_v28 = vld [vmem:[%s14122_s1 + $0x464] ss:$16 sps:$4 sm:$0xff]   ;;  %v9445_v29 = vld [vmem:[%s14122_s1 + $0x46c] ss:$16 sps:$4 sm:$0xff]  }
  0x58   : > { %6558 = vmatpush1.bf16.msra.mxu0 %v9350_v30  ;;  %7214 = vmatpush1.bf16.msra.mxu1 %v9353_v31  ;;  %v9440_v30 = vld [vmem:[%s14122_s1 + $0x460] ss:$16 sps:$4 sm:$0xff]   ;;  %v9443_v31 = vld [vmem:[%s14122_s1 + $0x468] ss:$16 sps:$4 sm:$0xff]  }
  0x59   : > { %6559 = vmatprep.subr.bf16.mxu0 %v9358_v32  ;;  %7215 = vmatprep.subr.bf16.mxu1 %v9361_v33  ;;  %v9448_v32 = vld [vmem:[%s14122_s1 + $0x484] ss:$16 sps:$4 sm:$0xff]   ;;  %v9451_v33 = vld [vmem:[%s14122_s1 + $0x48c] ss:$16 sps:$4 sm:$0xff]  }
  0x5c   : > { %6560 = vmatpush1.bf16.msra.mxu0 %v9356_v34  ;;  %7216 = vmatpush1.bf16.msra.mxu1 %v9359_v35  ;;  %v9446_v34 = vld [vmem:[%s14122_s1 + $0x480] ss:$16 sps:$4 sm:$0xff]   ;;  %v9449_v35 = vld [vmem:[%s14122_s1 + $0x488] ss:$16 sps:$4 sm:$0xff]  }
  0x5d   : > { %6561 = vmatprep.subr.bf16.mxu0 %v9364_v36  ;;  %7217 = vmatprep.subr.bf16.mxu1 %v9367_v37  ;;  %v9454_v36 = vld [vmem:[%s14122_s1 + $0x4a4] ss:$16 sps:$4 sm:$0xff]   ;;  %v9457_v37 = vld [vmem:[%s14122_s1 + $0x4ac] ss:$16 sps:$4 sm:$0xff]  }
  0x60   : > { %6562 = vmatpush1.bf16.msra.mxu0 %v9362_v38  ;;  %7218 = vmatpush1.bf16.msra.mxu1 %v9365_v39  ;;  %v9452_v38 = vld [vmem:[%s14122_s1 + $0x4a0] ss:$16 sps:$4 sm:$0xff]   ;;  %v9455_v39 = vld [vmem:[%s14122_s1 + $0x4a8] ss:$16 sps:$4 sm:$0xff]  }
  0x61   : > { %6563 = vmatprep.subr.bf16.mxu0 %v9370_v40  ;;  %7219 = vmatprep.subr.bf16.mxu1 %v9373_v41  ;;  %v9460_v40 = vld [vmem:[%s14122_s1 + $0x4c4] ss:$16 sps:$4 sm:$0xff]   ;;  %v9463_v41 = vld [vmem:[%s14122_s1 + $0x4cc] ss:$16 sps:$4 sm:$0xff]  }
  0x64   : > { %6564 = vmatpush1.bf16.msra.mxu0 %v9368_v42  ;;  %7220 = vmatpush1.bf16.msra.mxu1 %v9371_v43  ;;  %v9458_v42 = vld [vmem:[%s14122_s1 + $0x4c0] ss:$16 sps:$4 sm:$0xff]   ;;  %v9461_v43 = vld [vmem:[%s14122_s1 + $0x4c8] ss:$16 sps:$4 sm:$0xff]  }
  0x65   : > { %6565 = vmatprep.subr.bf16.mxu0 %v9376_v44  ;;  %7221 = vmatprep.subr.bf16.mxu1 %v9379_v45  ;;  %v9466_v44 = vld [vmem:[%s14122_s1 + $0x4e4] ss:$16 sps:$4 sm:$0xff]   ;;  %v9469_v45 = vld [vmem:[%s14122_s1 + $0x4ec] ss:$16 sps:$4 sm:$0xff]  }
  0x68   : > { %6566 = vmatpush1.bf16.msra.mxu0 %v9374_v46  ;;  %7222 = vmatpush1.bf16.msra.mxu1 %v9377_v47  ;;  %v9464_v46 = vld [vmem:[%s14122_s1 + $0x4e0] ss:$16 sps:$4 sm:$0xff]   ;;  %v9467_v47 = vld [vmem:[%s14122_s1 + $0x4e8] ss:$16 sps:$4 sm:$0xff]  }
  0x69   : > { %6567 = vmatprep.subr.bf16.mxu0 %v9382_v48  ;;  %7223 = vmatprep.subr.bf16.mxu1 %v9385_v50  ;;  %v9472_v48 = vld [vmem:[%s14122_s1 + $0x504] ss:$16 sps:$4 sm:$0xff]   ;;  %v9475_v50 = vld [vmem:[%s14122_s1 + $0x50c] ss:$16 sps:$4 sm:$0xff]  }
  0x6c   : > { %6568 = vmatpush1.bf16.msra.mxu0 %v9380_v51  ;;  %7224 = vmatpush1.bf16.msra.mxu1 %v9383_v52  ;;  %v9470_v51 = vld [vmem:[%s14122_s1 + $0x500] ss:$16 sps:$4 sm:$0xff]   ;;  %v9473_v52 = vld [vmem:[%s14122_s1 + $0x508] ss:$16 sps:$4 sm:$0xff]  }
  0x6d   : > { %6569 = vmatprep.subr.bf16.mxu0 %v9388_v53  ;;  %7225 = vmatprep.subr.bf16.mxu1 %v9391_v54  ;;  %v9478_v53 = vld [vmem:[%s14122_s1 + $0x524] ss:$16 sps:$4 sm:$0xff]   ;;  %v9481_v54 = vld [vmem:[%s14122_s1 + $0x52c] ss:$16 sps:$4 sm:$0xff]  }
  0x70   : > { %6570 = vmatpush1.bf16.msra.mxu0 %v9386_v55  ;;  %7226 = vmatpush1.bf16.msra.mxu1 %v9389_v56  ;;  %v9476_v55 = vld [vmem:[%s14122_s1 + $0x520] ss:$16 sps:$4 sm:$0xff]   ;;  %v9479_v56 = vld [vmem:[%s14122_s1 + $0x528] ss:$16 sps:$4 sm:$0xff]  }
  0x71   : > { %6571 = vmatprep.subr.bf16.mxu0 %v9394_v57  ;;  %7227 = vmatprep.subr.bf16.mxu1 %v9397_v58  ;;  %v9484_v57 = vld [vmem:[%s14122_s1 + $0x544] ss:$16 sps:$4 sm:$0xff]   ;;  %v9487_v58 = vld [vmem:[%s14122_s1 + $0x54c] ss:$16 sps:$4 sm:$0xff]  }
  0x74   : > { %6572 = vmatpush1.bf16.msra.mxu0 %v9392_v59  ;;  %7228 = vmatpush1.bf16.msra.mxu1 %v9395_v60  ;;  %v9482_v59 = vld [vmem:[%s14122_s1 + $0x540] ss:$16 sps:$4 sm:$0xff]   ;;  %v9485_v60 = vld [vmem:[%s14122_s1 + $0x548] ss:$16 sps:$4 sm:$0xff]  }
  0x75   : > { %6573 = vmatprep.subr.bf16.mxu0 %v9400_v61  ;;  %7229 = vmatprep.subr.bf16.mxu1 %v9403_v62  ;;  %v9490_v61 = vld [vmem:[%s14122_s1 + $0x564] ss:$16 sps:$4 sm:$0xff]   ;;  %v9493_v62 = vld [vmem:[%s14122_s1 + $0x56c] ss:$16 sps:$4 sm:$0xff]  }
  0x78   : > { %6574 = vmatpush1.bf16.msra.mxu0 %v9398_v63  ;;  %7230 = vmatpush1.bf16.msra.mxu1 %v9401_v0  ;;  %v9488_v63 = vld [vmem:[%s14122_s1 + $0x560] ss:$16 sps:$4 sm:$0xff]   ;;  %v9491_v0 = vld [vmem:[%s14122_s1 + $0x568] ss:$16 sps:$4 sm:$0xff]  }
  0x79   : > { %6575 = vmatprep.subr.bf16.mxu0 %v9406_v1  ;;  %7231 = vmatprep.subr.bf16.mxu1 %v9409_v2  ;;  %v9496_v1 = vld [vmem:[%s14122_s1 + $0x584] ss:$16 sps:$4 sm:$0xff]   ;;  %v9499_v2 = vld [vmem:[%s14122_s1 + $0x58c] ss:$16 sps:$4 sm:$0xff]  }
  0x7c   : > { %6576 = vmatpush1.bf16.msra.mxu0 %v9404_v3  ;;  %7232 = vmatpush1.bf16.msra.mxu1 %v9407_v4  ;;  %v9494_v3 = vld [vmem:[%s14122_s1 + $0x580] ss:$16 sps:$4 sm:$0xff]   ;;  %v9497_v4 = vld [vmem:[%s14122_s1 + $0x588] ss:$16 sps:$4 sm:$0xff]  }
  0x7d   : > { %6577 = vmatprep.subr.bf16.mxu0 %v9412_v5  ;;  %7233 = vmatprep.subr.bf16.mxu1 %v9415_v6  ;;  %v9502_v5 = vld [vmem:[%s14122_s1 + $0x5a4] ss:$16 sps:$4 sm:$0xff]   ;;  %v9505_v6 = vld [vmem:[%s14122_s1 + $0x5ac] ss:$16 sps:$4 sm:$0xff]  }
  0x80   : > { %6578 = vmatpush1.bf16.msra.mxu0 %v9410_v7  ;;  %7234 = vmatpush1.bf16.msra.mxu1 %v9413_v8  ;;  %v9500_v7 = vld [vmem:[%s14122_s1 + $0x5a0] ss:$16 sps:$4 sm:$0xff]   ;;  %v9503_v8 = vld [vmem:[%s14122_s1 + $0x5a8] ss:$16 sps:$4 sm:$0xff]  }
  0x81   : > { %6579 = vmatprep.subr.bf16.mxu0 %v9418_v9  ;;  %7235 = vmatprep.subr.bf16.mxu1 %v9421_v10  ;;  %v9508_v9 = vld [vmem:[%s14122_s1 + $0x5c4] ss:$16 sps:$4 sm:$0xff]   ;;  %v9511_v10 = vld [vmem:[%s14122_s1 + $0x5cc] ss:$16 sps:$4 sm:$0xff]  }
  0x84   : > { %6580 = vmatpush1.bf16.msra.mxu0 %v9416_v11  ;;  %7236 = vmatpush1.bf16.msra.mxu1 %v9419_v13  ;;  %v9506_v11 = vld [vmem:[%s14122_s1 + $0x5c0] ss:$16 sps:$4 sm:$0xff]   ;;  %v9509_v13 = vld [vmem:[%s14122_s1 + $0x5c8] ss:$16 sps:$4 sm:$0xff]  }
  0x85   : > { %6590 = vmatprep.subr.bf16.mxu0 %v9424_v14  ;;  %7246 = vmatprep.subr.bf16.mxu1 %v9427_v15  ;;  %v9514_v14 = vld [vmem:[%s14122_s1 + $0x5e4] ss:$16 sps:$4 sm:$0xff]   ;;  %v9517_v15 = vld [vmem:[%s14122_s1 + $0x5ec] ss:$16 sps:$4 sm:$0xff]  }
  0x87   : > { %6582 = vmatmul.mubr.bf16.vlgmr.msra.gmra.mrb[0].mxu0 %v11054_v12  ;;  %7238 = vmatmul.mubr.bf16.vlgmr.msra.gmra.mrb[0].mxu1 %v11054_v12  ;;  %v9439_v12 = vld [vmem:[%s14122_s1 + $0x44c] ss:$16 sps:$4 sm:$0xff]  }
  0x88   : > { %6591 = vmatpush1.bf16.msra.mxu0 %v9422_v16  ;;  %7247 = vmatpush1.bf16.msra.mxu1 %v9425_v17  ;;  %v1237_v16 = vcombine.high %v11257_v18, %v11257_v18  ;;  %v9512_v17 = vld [vmem:[%s14122_s1 + $0x5e0] ss:$16 sps:$4 sm:$0xff]   ;;  %v9523_v18 = vld [vmem:[%s14122_s1 + $0x60c] ss:$16 sps:$4 sm:$0xff]  }
  0x89   : > { %6592 = vmatprep.subr.bf16.mxu0 %v9430_v19  ;;  %7248 = vmatprep.subr.bf16.mxu1 %v9433_v20  ;;  %v9515_v19 = vld [vmem:[%s14122_s1 + $0x5e8] ss:$16 sps:$4 sm:$0xff]   ;;  %v9520_v20 = vld [vmem:[%s14122_s1 + $0x604] ss:$16 sps:$4 sm:$0xff]  }
  0x8a   : > { %6622 = vmatprep.mubr.bf16.mxu0 %v1252_v22  ;;  %7278 = vmatprep.mubr.bf16.mxu1 %v1252_v22  ;;  %v11456_v22 = vrot.slane %v1237_v16, %v10983_v49  ;;  %v9602_v16 = vld [vmem:[%s14122_s1 + $0x7c0] ss:$16 sps:$4 sm:$0xff]  }
  0x8c   : > { %6593 = vmatpush1.bf16.msra.mxu0 %v9428_v23  ;;  %7249 = vmatpush1.bf16.msra.mxu1 %v9431_v24  ;;  %v9518_v23 = vld [vmem:[%s14122_s1 + $0x600] ss:$16 sps:$4 sm:$0xff]   ;;  %v9521_v24 = vld [vmem:[%s14122_s1 + $0x608] ss:$16 sps:$4 sm:$0xff]  }
  0x8d   : > { %6594 = vmatprep.subr.bf16.mxu0 %v9436_v25  ;;  %7250 = vmatprep.subr.bf16.mxu1 %v9439_v12  ;;  %v9526_v25 = vld [vmem:[%s14122_s1 + $0x624] ss:$16 sps:$4 sm:$0xff]   ;;  %v9529_v12 = vld [vmem:[%s14122_s1 + $0x62c] ss:$16 sps:$4 sm:$0xff]  }
  0x90   : > { %6595 = vmatpush1.bf16.msra.mxu0 %v9434_v26  ;;  %7251 = vmatpush1.bf16.msra.mxu1 %v9437_v27  ;;  %v1253_v26 = vcombine.high %v11456_v22, %v11456_v22  ;;  %v9524_v27 = vld [vmem:[%s14122_s1 + $0x620] ss:$16 sps:$4 sm:$0xff]  }
  0x91   : > { %6596 = vmatprep.subr.bf16.mxu0 %v9442_v28  ;;  %7252 = vmatprep.subr.bf16.mxu1 %v9445_v29  ;;  %v9527_v28 = vld [vmem:[%s14122_s1 + $0x628] ss:$16 sps:$4 sm:$0xff]   ;;  %v9532_v29 = vld [vmem:[%s14122_s1 + $0x644] ss:$16 sps:$4 sm:$0xff]  }
  0x94   : > { %6597 = vmatpush1.bf16.msra.mxu0 %v9440_v30  ;;  %7253 = vmatpush1.bf16.msra.mxu1 %v9443_v31  ;;  %v9530_v30 = vld [vmem:[%s14122_s1 + $0x640] ss:$16 sps:$4 sm:$0xff]   ;;  %v9533_v31 = vld [vmem:[%s14122_s1 + $0x648] ss:$16 sps:$4 sm:$0xff]  }
  0x95   : > { %6598 = vmatprep.subr.bf16.mxu0 %v9448_v32  ;;  %7254 = vmatprep.subr.bf16.mxu1 %v9451_v33  ;;  %v9538_v32 = vld [vmem:[%s14122_s1 + $0x664] ss:$16 sps:$4 sm:$0xff]   ;;  %v9541_v33 = vld [vmem:[%s14122_s1 + $0x66c] ss:$16 sps:$4 sm:$0xff]  }
  0x98   : > { %6599 = vmatpush1.bf16.msra.mxu0 %v9446_v34  ;;  %7255 = vmatpush1.bf16.msra.mxu1 %v9449_v35  ;;  %v9536_v34 = vld [vmem:[%s14122_s1 + $0x660] ss:$16 sps:$4 sm:$0xff]   ;;  %v9539_v35 = vld [vmem:[%s14122_s1 + $0x668] ss:$16 sps:$4 sm:$0xff]  }
  0x99   : > { %6600 = vmatprep.subr.bf16.mxu0 %v9454_v36  ;;  %7256 = vmatprep.subr.bf16.mxu1 %v9457_v37  ;;  %v9544_v36 = vld [vmem:[%s14122_s1 + $0x684] ss:$16 sps:$4 sm:$0xff]   ;;  %v9547_v37 = vld [vmem:[%s14122_s1 + $0x68c] ss:$16 sps:$4 sm:$0xff]  }
  0x9c   : > { %6601 = vmatpush1.bf16.msra.mxu0 %v9452_v38  ;;  %7257 = vmatpush1.bf16.msra.mxu1 %v9455_v39  ;;  %v9542_v38 = vld [vmem:[%s14122_s1 + $0x680] ss:$16 sps:$4 sm:$0xff]   ;;  %v9545_v39 = vld [vmem:[%s14122_s1 + $0x688] ss:$16 sps:$4 sm:$0xff]  }
  0x9d   : > { %6602 = vmatprep.subr.bf16.mxu0 %v9460_v40  ;;  %7258 = vmatprep.subr.bf16.mxu1 %v9463_v41  ;;  %v9550_v40 = vld [vmem:[%s14122_s1 + $0x6a4] ss:$16 sps:$4 sm:$0xff]   ;;  %v9553_v41 = vld [vmem:[%s14122_s1 + $0x6ac] ss:$16 sps:$4 sm:$0xff]  }
  0xa0   : > { %6603 = vmatpush1.bf16.msra.mxu0 %v9458_v42  ;;  %7259 = vmatpush1.bf16.msra.mxu1 %v9461_v43  ;;  %v9548_v42 = vld [vmem:[%s14122_s1 + $0x6a0] ss:$16 sps:$4 sm:$0xff]   ;;  %v9551_v43 = vld [vmem:[%s14122_s1 + $0x6a8] ss:$16 sps:$4 sm:$0xff]  }
  0xa1   : > { %6604 = vmatprep.subr.bf16.mxu0 %v9466_v44  ;;  %7260 = vmatprep.subr.bf16.mxu1 %v9469_v45  ;;  %v9556_v44 = vld [vmem:[%s14122_s1 + $0x6c4] ss:$16 sps:$4 sm:$0xff]   ;;  %v9559_v45 = vld [vmem:[%s14122_s1 + $0x6cc] ss:$16 sps:$4 sm:$0xff]  }
  0xa4   : > { %6605 = vmatpush1.bf16.msra.mxu0 %v9464_v46  ;;  %7261 = vmatpush1.bf16.msra.mxu1 %v9467_v47  ;;  %v9554_v46 = vld [vmem:[%s14122_s1 + $0x6c0] ss:$16 sps:$4 sm:$0xff]   ;;  %v9557_v47 = vld [vmem:[%s14122_s1 + $0x6c8] ss:$16 sps:$4 sm:$0xff]  }
  0xa5   : > { %6606 = vmatprep.subr.bf16.mxu0 %v9472_v48  ;;  %7262 = vmatprep.subr.bf16.mxu1 %v9475_v50  ;;  %v9562_v48 = vld [vmem:[%s14122_s1 + $0x6e4] ss:$16 sps:$4 sm:$0xff]   ;;  %v9565_v50 = vld [vmem:[%s14122_s1 + $0x6ec] ss:$16 sps:$4 sm:$0xff]  }
  0xa8   : > { %6607 = vmatpush1.bf16.msra.mxu0 %v9470_v51  ;;  %7263 = vmatpush1.bf16.msra.mxu1 %v9473_v52  ;;  %v9560_v51 = vld [vmem:[%s14122_s1 + $0x6e0] ss:$16 sps:$4 sm:$0xff]   ;;  %v9563_v52 = vld [vmem:[%s14122_s1 + $0x6e8] ss:$16 sps:$4 sm:$0xff]  }
  0xa9   : > { %6608 = vmatprep.subr.bf16.mxu0 %v9478_v53  ;;  %7264 = vmatprep.subr.bf16.mxu1 %v9481_v54  ;;  %v9568_v53 = vld [vmem:[%s14122_s1 + $0x704] ss:$16 sps:$4 sm:$0xff]   ;;  %v9571_v54 = vld [vmem:[%s14122_s1 + $0x70c] ss:$16 sps:$4 sm:$0xff]  }
  0xac   : > { %6609 = vmatpush1.bf16.msra.mxu0 %v9476_v55  ;;  %7265 = vmatpush1.bf16.msra.mxu1 %v9479_v56  ;;  %v9566_v55 = vld [vmem:[%s14122_s1 + $0x700] ss:$16 sps:$4 sm:$0xff]   ;;  %v9569_v56 = vld [vmem:[%s14122_s1 + $0x708] ss:$16 sps:$4 sm:$0xff]  }
  0xad   : > { %6610 = vmatprep.subr.bf16.mxu0 %v9484_v57  ;;  %7266 = vmatprep.subr.bf16.mxu1 %v9487_v58  ;;  %v9574_v57 = vld [vmem:[%s14122_s1 + $0x724] ss:$16 sps:$4 sm:$0xff]   ;;  %v9577_v58 = vld [vmem:[%s14122_s1 + $0x72c] ss:$16 sps:$4 sm:$0xff]  }
  0xb0   : > { %6611 = vmatpush1.bf16.msra.mxu0 %v9482_v59  ;;  %7267 = vmatpush1.bf16.msra.mxu1 %v9485_v60  ;;  %v9572_v59 = vld [vmem:[%s14122_s1 + $0x720] ss:$16 sps:$4 sm:$0xff]   ;;  %v9575_v60 = vld [vmem:[%s14122_s1 + $0x728] ss:$16 sps:$4 sm:$0xff]  }
  0xb1   : > { %6612 = vmatprep.subr.bf16.mxu0 %v9490_v61  ;;  %7268 = vmatprep.subr.bf16.mxu1 %v9493_v62  ;;  %v9580_v61 = vld [vmem:[%s14122_s1 + $0x744] ss:$16 sps:$4 sm:$0xff]   ;;  %v9583_v62 = vld [vmem:[%s14122_s1 + $0x74c] ss:$16 sps:$4 sm:$0xff]  }
  0xb4   : > { %6613 = vmatpush1.bf16.msra.mxu0 %v9488_v63  ;;  %7269 = vmatpush1.bf16.msra.mxu1 %v9491_v0  ;;  %v9578_v63 = vld [vmem:[%s14122_s1 + $0x740] ss:$16 sps:$4 sm:$0xff]   ;;  %v9581_v0 = vld [vmem:[%s14122_s1 + $0x748] ss:$16 sps:$4 sm:$0xff]  }
  0xb5   : > { %6614 = vmatprep.subr.bf16.mxu0 %v9496_v1  ;;  %7270 = vmatprep.subr.bf16.mxu1 %v9499_v2  ;;  %v9586_v1 = vld [vmem:[%s14122_s1 + $0x764] ss:$16 sps:$4 sm:$0xff]   ;;  %v9589_v2 = vld [vmem:[%s14122_s1 + $0x76c] ss:$16 sps:$4 sm:$0xff]  }
  0xb8   : > { %6615 = vmatpush1.bf16.msra.mxu0 %v9494_v3  ;;  %7271 = vmatpush1.bf16.msra.mxu1 %v9497_v4  ;;  %v9584_v3 = vld [vmem:[%s14122_s1 + $0x760] ss:$16 sps:$4 sm:$0xff]   ;;  %v9587_v4 = vld [vmem:[%s14122_s1 + $0x768] ss:$16 sps:$4 sm:$0xff]  }
  0xb9   : > { %6616 = vmatprep.subr.bf16.mxu0 %v9502_v5  ;;  %7272 = vmatprep.subr.bf16.mxu1 %v9505_v6  ;;  %v9592_v5 = vld [vmem:[%s14122_s1 + $0x784] ss:$16 sps:$4 sm:$0xff]   ;;  %v9595_v6 = vld [vmem:[%s14122_s1 + $0x78c] ss:$16 sps:$4 sm:$0xff]  }
  0xbc   : > { %6617 = vmatpush1.bf16.msra.mxu0 %v9500_v7  ;;  %7273 = vmatpush1.bf16.msra.mxu1 %v9503_v8  ;;  %v9590_v7 = vld [vmem:[%s14122_s1 + $0x780] ss:$16 sps:$4 sm:$0xff]   ;;  %v9593_v8 = vld [vmem:[%s14122_s1 + $0x788] ss:$16 sps:$4 sm:$0xff]  }
  0xbd   : > { %6618 = vmatprep.subr.bf16.mxu0 %v9508_v9  ;;  %7274 = vmatprep.subr.bf16.mxu1 %v9511_v10  ;;  %v9598_v9 = vld [vmem:[%s14122_s1 + $0x7a4] ss:$16 sps:$4 sm:$0xff]   ;;  %v9601_v10 = vld [vmem:[%s14122_s1 + $0x7ac] ss:$16 sps:$4 sm:$0xff]  }
  0xc0   : > { %6619 = vmatpush1.bf16.msra.mxu0 %v9506_v11  ;;  %7275 = vmatpush1.bf16.msra.mxu1 %v9509_v13  ;;  %v9596_v11 = vld [vmem:[%s14122_s1 + $0x7a0] ss:$16 sps:$4 sm:$0xff]   ;;  %v9599_v13 = vld [vmem:[%s14122_s1 + $0x7a8] ss:$16 sps:$4 sm:$0xff]  }
  0xc1   : > { %6620 = vmatprep.subr.bf16.mxu0 %v9514_v14  ;;  %7276 = vmatprep.subr.bf16.mxu1 %v9517_v15  ;;  %v9604_v14 = vld [vmem:[%s14122_s1 + $0x7c4] ss:$16 sps:$4 sm:$0xff]   ;;  %v9607_v15 = vld [vmem:[%s14122_s1 + $0x7cc] ss:$16 sps:$4 sm:$0xff]  }
  0xc4   : > { %6621 = vmatpush1.bf16.msra.mxu0 %v9512_v17  ;;  %7277 = vmatpush1.bf16.msra.mxu1 %v9515_v19  ;;  %v9605_v17 = vld [vmem:[%s14122_s1 + $0x7c8] ss:$16 sps:$4 sm:$0xff]   ;;  %v9610_v19 = vld [vmem:[%s14122_s1 + $0x7e4] ss:$16 sps:$4 sm:$0xff]  }
  0xc5   : > { %6631 = vmatprep.subr.bf16.mxu0 %v9520_v20  ;;  %7287 = vmatprep.subr.bf16.mxu1 %v9523_v18  ;;  %v9613_v20 = vld [vmem:[%s14122_s1 + $0x7ec] ss:$16 sps:$4 sm:$0xff]   ;;  %v9608_v18 = vld [vmem:[%s14122_s1 + $0x7e0] ss:$16 sps:$4 sm:$0xff]  }
  0xc7   : > { %6623 = vmatmul.mubr.bf16.vlgmr.msra.gmra.mrb[0].mxu0 %v11267_v21  ;;  %7279 = vmatmul.mubr.bf16.vlgmr.msra.gmra.mrb[0].mxu1 %v11267_v21  ;;  %v9535_v21 = vld [vmem:[%s14122_s1 + $0x64c] ss:$16 sps:$4 sm:$0xff]  }
  0xc8   : > { %6632 = vmatpush1.bf16.msra.mxu0 %v9518_v23  ;;  %7288 = vmatpush1.bf16.msra.mxu1 %v9521_v24  ;;  %v11646_v23 = vld [vmem:[%s10981_s4 + $0x10] sm:$0xff]  ;;  %v9611_v24 = vld [vmem:[%s14122_s1 + $0x7e8] ss:$16 sps:$4 sm:$0xff]  }
  0xc9   : > { %6633 = vmatprep.subr.bf16.mxu0 %v9526_v25  ;;  %7289 = vmatprep.subr.bf16.mxu1 %v9529_v12  ;;  %v9617_v25 = vld [vmem:[%s14122_s1 + $0x804] ss:$16 sps:$4 sm:$0xff]   ;;  %v9620_v12 = vld [vmem:[%s14122_s1 + $0x80c] ss:$16 sps:$4 sm:$0xff]  }
  0xca   : > { %6663 = vmatprep.mubr.bf16.mxu0 %v1253_v26  ;;  %7319 = vmatprep.mubr.bf16.mxu1 %v1253_v26  ;;  %v11659_v26 = vrot.slane %v11646_v23, %v10983_v49 }
  0xcc   : > { %6634 = vmatpush1.bf16.msra.mxu0 %v9524_v27  ;;  %7290 = vmatpush1.bf16.msra.mxu1 %v9527_v28  ;;  %v9615_v27 = vld [vmem:[%s14122_s1 + $0x800] ss:$16 sps:$4 sm:$0xff]   ;;  %v9618_v28 = vld [vmem:[%s14122_s1 + $0x808] ss:$16 sps:$4 sm:$0xff]  }
  0xcd   : > { %6635 = vmatprep.subr.bf16.mxu0 %v9532_v29  ;;  %7291 = vmatprep.subr.bf16.mxu1 %v9535_v21  ;;  %v9623_v29 = vld [vmem:[%s14122_s1 + $0x824] ss:$16 sps:$4 sm:$0xff]   ;;  %v9626_v21 = vld [vmem:[%s14122_s1 + $0x82c] ss:$16 sps:$4 sm:$0xff]  }
  0xd0   : > { %6636 = vmatpush1.bf16.msra.mxu0 %v9530_v30  ;;  %7292 = vmatpush1.bf16.msra.mxu1 %v9533_v31  ;;  %v1269_v30 = vcombine.high %v11659_v26, %v11659_v26  ;;  %v9621_v31 = vld [vmem:[%s14122_s1 + $0x820] ss:$16 sps:$4 sm:$0xff]  }
  0xd1   : > { %6637 = vmatprep.subr.bf16.mxu0 %v9538_v32  ;;  %7293 = vmatprep.subr.bf16.mxu1 %v9541_v33  ;;  %v9624_v32 = vld [vmem:[%s14122_s1 + $0x828] ss:$16 sps:$4 sm:$0xff]   ;;  %v9629_v33 = vld [vmem:[%s14122_s1 + $0x844] ss:$16 sps:$4 sm:$0xff]  }
  0xd4   : > { %6638 = vmatpush1.bf16.msra.mxu0 %v9536_v34  ;;  %7294 = vmatpush1.bf16.msra.mxu1 %v9539_v35  ;;  %v9627_v34 = vld [vmem:[%s14122_s1 + $0x840] ss:$16 sps:$4 sm:$0xff]   ;;  %v9630_v35 = vld [vmem:[%s14122_s1 + $0x848] ss:$16 sps:$4 sm:$0xff]  }
  0xd5   : > { %6639 = vmatprep.subr.bf16.mxu0 %v9544_v36  ;;  %7295 = vmatprep.subr.bf16.mxu1 %v9547_v37  ;;  %v9635_v36 = vld [vmem:[%s14122_s1 + $0x864] ss:$16 sps:$4 sm:$0xff]   ;;  %v9638_v37 = vld [vmem:[%s14122_s1 + $0x86c] ss:$16 sps:$4 sm:$0xff]  }
  0xd8   : > { %6640 = vmatpush1.bf16.msra.mxu0 %v9542_v38  ;;  %7296 = vmatpush1.bf16.msra.mxu1 %v9545_v39  ;;  %v9633_v38 = vld [vmem:[%s14122_s1 + $0x860] ss:$16 sps:$4 sm:$0xff]   ;;  %v9636_v39 = vld [vmem:[%s14122_s1 + $0x868] ss:$16 sps:$4 sm:$0xff]  }
  0xd9   : > { %6641 = vmatprep.subr.bf16.mxu0 %v9550_v40  ;;  %7297 = vmatprep.subr.bf16.mxu1 %v9553_v41  ;;  %v9641_v40 = vld [vmem:[%s14122_s1 + $0x884] ss:$16 sps:$4 sm:$0xff]   ;;  %v9644_v41 = vld [vmem:[%s14122_s1 + $0x88c] ss:$16 sps:$4 sm:$0xff]  }
  0xdc   : > { %6642 = vmatpush1.bf16.msra.mxu0 %v9548_v42  ;;  %7298 = vmatpush1.bf16.msra.mxu1 %v9551_v43  ;;  %v9639_v42 = vld [vmem:[%s14122_s1 + $0x880] ss:$16 sps:$4 sm:$0xff]   ;;  %v9642_v43 = vld [vmem:[%s14122_s1 + $0x888] ss:$16 sps:$4 sm:$0xff]  }
  0xdd   : > { %6643 = vmatprep.subr.bf16.mxu0 %v9556_v44  ;;  %7299 = vmatprep.subr.bf16.mxu1 %v9559_v45  ;;  %v9647_v44 = vld [vmem:[%s14122_s1 + $0x8a4] ss:$16 sps:$4 sm:$0xff]   ;;  %v9650_v45 = vld [vmem:[%s14122_s1 + $0x8ac] ss:$16 sps:$4 sm:$0xff]  }
  0xe0   : > { %6644 = vmatpush1.bf16.msra.mxu0 %v9554_v46  ;;  %7300 = vmatpush1.bf16.msra.mxu1 %v9557_v47  ;;  %v9645_v46 = vld [vmem:[%s14122_s1 + $0x8a0] ss:$16 sps:$4 sm:$0xff]   ;;  %v9648_v47 = vld [vmem:[%s14122_s1 + $0x8a8] ss:$16 sps:$4 sm:$0xff]  }
  0xe1   : > { %6645 = vmatprep.subr.bf16.mxu0 %v9562_v48  ;;  %7301 = vmatprep.subr.bf16.mxu1 %v9565_v50  ;;  %v9653_v48 = vld [vmem:[%s14122_s1 + $0x8c4] ss:$16 sps:$4 sm:$0xff]   ;;  %v9656_v50 = vld [vmem:[%s14122_s1 + $0x8cc] ss:$16 sps:$4 sm:$0xff]  }
  0xe4   : > { %6646 = vmatpush1.bf16.msra.mxu0 %v9560_v51  ;;  %7302 = vmatpush1.bf16.msra.mxu1 %v9563_v52  ;;  %v9651_v51 = vld [vmem:[%s14122_s1 + $0x8c0] ss:$16 sps:$4 sm:$0xff]   ;;  %v9654_v52 = vld [vmem:[%s14122_s1 + $0x8c8] ss:$16 sps:$4 sm:$0xff]  }
  0xe5   : > { %6647 = vmatprep.subr.bf16.mxu0 %v9568_v53  ;;  %7303 = vmatprep.subr.bf16.mxu1 %v9571_v54  ;;  %v9659_v53 = vld [vmem:[%s14122_s1 + $0x8e4] ss:$16 sps:$4 sm:$0xff]   ;;  %v9662_v54 = vld [vmem:[%s14122_s1 + $0x8ec] ss:$16 sps:$4 sm:$0xff]  }
  0xe8   : > { %6648 = vmatpush1.bf16.msra.mxu0 %v9566_v55  ;;  %7304 = vmatpush1.bf16.msra.mxu1 %v9569_v56  ;;  %v9657_v55 = vld [vmem:[%s14122_s1 + $0x8e0] ss:$16 sps:$4 sm:$0xff]   ;;  %v9660_v56 = vld [vmem:[%s14122_s1 + $0x8e8] ss:$16 sps:$4 sm:$0xff]  }
  0xe9   : > { %6649 = vmatprep.subr.bf16.mxu0 %v9574_v57  ;;  %7305 = vmatprep.subr.bf16.mxu1 %v9577_v58  ;;  %v9665_v57 = vld [vmem:[%s14122_s1 + $0x904] ss:$16 sps:$4 sm:$0xff]   ;;  %v9668_v58 = vld [vmem:[%s14122_s1 + $0x90c] ss:$16 sps:$4 sm:$0xff]  }
  0xec   : > { %6650 = vmatpush1.bf16.msra.mxu0 %v9572_v59  ;;  %7306 = vmatpush1.bf16.msra.mxu1 %v9575_v60  ;;  %v9663_v59 = vld [vmem:[%s14122_s1 + $0x900] ss:$16 sps:$4 sm:$0xff]   ;;  %v9666_v60 = vld [vmem:[%s14122_s1 + $0x908] ss:$16 sps:$4 sm:$0xff]  }
  0xed   : > { %6651 = vmatprep.subr.bf16.mxu0 %v9580_v61  ;;  %7307 = vmatprep.subr.bf16.mxu1 %v9583_v62  ;;  %v9671_v61 = vld [vmem:[%s14122_s1 + $0x924] ss:$16 sps:$4 sm:$0xff]   ;;  %v9674_v62 = vld [vmem:[%s14122_s1 + $0x92c] ss:$16 sps:$4 sm:$0xff]  }
  0xf0   : > { %6652 = vmatpush1.bf16.msra.mxu0 %v9578_v63  ;;  %7308 = vmatpush1.bf16.msra.mxu1 %v9581_v0  ;;  %v9669_v63 = vld [vmem:[%s14122_s1 + $0x920] ss:$16 sps:$4 sm:$0xff]   ;;  %v9672_v0 = vld [vmem:[%s14122_s1 + $0x928] ss:$16 sps:$4 sm:$0xff]  }
  0xf1   : > { %6653 = vmatprep.subr.bf16.mxu0 %v9586_v1  ;;  %7309 = vmatprep.subr.bf16.mxu1 %v9589_v2  ;;  %v9677_v1 = vld [vmem:[%s14122_s1 + $0x944] ss:$16 sps:$4 sm:$0xff]   ;;  %v9680_v2 = vld [vmem:[%s14122_s1 + $0x94c] ss:$16 sps:$4 sm:$0xff]  }
  0xf4   : > { %6654 = vmatpush1.bf16.msra.mxu0 %v9584_v3  ;;  %7310 = vmatpush1.bf16.msra.mxu1 %v9587_v4  ;;  %v9675_v3 = vld [vmem:[%s14122_s1 + $0x940] ss:$16 sps:$4 sm:$0xff]   ;;  %v9678_v4 = vld [vmem:[%s14122_s1 + $0x948] ss:$16 sps:$4 sm:$0xff]  }
  0xf5   : > { %6655 = vmatprep.subr.bf16.mxu0 %v9592_v5  ;;  %7311 = vmatprep.subr.bf16.mxu1 %v9595_v6  ;;  %v9683_v5 = vld [vmem:[%s14122_s1 + $0x964] ss:$16 sps:$4 sm:$0xff]   ;;  %v9686_v6 = vld [vmem:[%s14122_s1 + $0x96c] ss:$16 sps:$4 sm:$0xff]  }
  0xf8   : > { %6656 = vmatpush1.bf16.msra.mxu0 %v9590_v7  ;;  %7312 = vmatpush1.bf16.msra.mxu1 %v9593_v8  ;;  %v9681_v7 = vld [vmem:[%s14122_s1 + $0x960] ss:$16 sps:$4 sm:$0xff]   ;;  %v9684_v8 = vld [vmem:[%s14122_s1 + $0x968] ss:$16 sps:$4 sm:$0xff]  }
  0xf9   : > { %6657 = vmatprep.subr.bf16.mxu0 %v9598_v9  ;;  %7313 = vmatprep.subr.bf16.mxu1 %v9601_v10  ;;  %v9689_v9 = vld [vmem:[%s14122_s1 + $0x984] ss:$16 sps:$4 sm:$0xff]   ;;  %v9692_v10 = vld [vmem:[%s14122_s1 + $0x98c] ss:$16 sps:$4 sm:$0xff]  }
  0xfc   : > { %6658 = vmatpush1.bf16.msra.mxu0 %v9596_v11  ;;  %7314 = vmatpush1.bf16.msra.mxu1 %v9599_v13  ;;  %v9687_v11 = vld [vmem:[%s14122_s1 + $0x980] ss:$16 sps:$4 sm:$0xff]   ;;  %v9690_v13 = vld [vmem:[%s14122_s1 + $0x988] ss:$16 sps:$4 sm:$0xff]  }
  0xfd   : > { %6659 = vmatprep.subr.bf16.mxu0 %v9604_v14  ;;  %7315 = vmatprep.subr.bf16.mxu1 %v9607_v15  ;;  %v9695_v14 = vld [vmem:[%s14122_s1 + $0x9a4] ss:$16 sps:$4 sm:$0xff]   ;;  %v9698_v15 = vld [vmem:[%s14122_s1 + $0x9ac] ss:$16 sps:$4 sm:$0xff]  }
 0x100   : > { %6660 = vmatpush1.bf16.msra.mxu0 %v9602_v16  ;;  %7316 = vmatpush1.bf16.msra.mxu1 %v9605_v17  ;;  %v9693_v16 = vld [vmem:[%s14122_s1 + $0x9a0] ss:$16 sps:$4 sm:$0xff]   ;;  %v9696_v17 = vld [vmem:[%s14122_s1 + $0x9a8] ss:$16 sps:$4 sm:$0xff]  }
 0x101   : > { %6661 = vmatprep.subr.bf16.mxu0 %v9610_v19  ;;  %7317 = vmatprep.subr.bf16.mxu1 %v9613_v20  ;;  %v9701_v19 = vld [vmem:[%s14122_s1 + $0x9c4] ss:$16 sps:$4 sm:$0xff]   ;;  %v9704_v20 = vld [vmem:[%s14122_s1 + $0x9cc] ss:$16 sps:$4 sm:$0xff]  }
 0x104   : > { %6662 = vmatpush1.bf16.msra.mxu0 %v9608_v18  ;;  %7318 = vmatpush1.bf16.msra.mxu1 %v9611_v24  ;;  %v9699_v18 = vld [vmem:[%s14122_s1 + $0x9c0] ss:$16 sps:$4 sm:$0xff]   ;;  %v9702_v24 = vld [vmem:[%s14122_s1 + $0x9c8] ss:$16 sps:$4 sm:$0xff]  }
 0x105   : > { %6672 = vmatprep.subr.bf16.mxu0 %v9617_v25  ;;  %7328 = vmatprep.subr.bf16.mxu1 %v9620_v12  ;;  %v9707_v25 = vld [vmem:[%s14122_s1 + $0x9e4] ss:$16 sps:$4 sm:$0xff]   ;;  %v9710_v12 = vld [vmem:[%s14122_s1 + $0x9ec] ss:$16 sps:$4 sm:$0xff]  }
 0x107   : > { %6664 = vmatmul.mubr.bf16.vlgmr.msra.gmra.mrb[0].mxu0 %v11456_v22  ;;  %7320 = vmatmul.mubr.bf16.vlgmr.msra.gmra.mrb[0].mxu1 %v11456_v22  ;;  %v9632_v22 = vld [vmem:[%s14122_s1 + $0x84c] ss:$16 sps:$4 sm:$0xff]  }
 0x108   : > { %6673 = vmatpush1.bf16.msra.mxu0 %v9615_v27  ;;  %7329 = vmatpush1.bf16.msra.mxu1 %v9618_v28  ;;  %v1254_v27 = vcombine.high %v11646_v23, %v11646_v23  ;;  %v9705_v28 = vld [vmem:[%s14122_s1 + $0x9e0] ss:$16 sps:$4 sm:$0xff]   ;;  %v9716_v23 = vld [vmem:[%s14122_s1 + $0xa0c] ss:$16 sps:$4 sm:$0xff]  }
 0x109   : > { %6674 = vmatprep.subr.bf16.mxu0 %v9623_v29  ;;  %7330 = vmatprep.subr.bf16.mxu1 %v9626_v21  ;;  %v9708_v29 = vld [vmem:[%s14122_s1 + $0x9e8] ss:$16 sps:$4 sm:$0xff]   ;;  %v9713_v21 = vld [vmem:[%s14122_s1 + $0xa04] ss:$16 sps:$4 sm:$0xff]  }
 0x10a   : > { %6704 = vmatprep.mubr.bf16.mxu0 %v1269_v30  ;;  %7360 = vmatprep.mubr.bf16.mxu1 %v1269_v30  ;;  %v11860_v30 = vrot.slane %v1254_v27, %v10983_v49  ;;  %v9795_v27 = vld [vmem:[%s14122_s1 + $0xbc0] ss:$16 sps:$4 sm:$0xff]  }
 0x10c   : > { %6675 = vmatpush1.bf16.msra.mxu0 %v9621_v31  ;;  %7331 = vmatpush1.bf16.msra.mxu1 %v9624_v32  ;;  %v9711_v31 = vld [vmem:[%s14122_s1 + $0xa00] ss:$16 sps:$4 sm:$0xff]   ;;  %v9714_v32 = vld [vmem:[%s14122_s1 + $0xa08] ss:$16 sps:$4 sm:$0xff]  }
 0x10d   : > { %6676 = vmatprep.subr.bf16.mxu0 %v9629_v33  ;;  %7332 = vmatprep.subr.bf16.mxu1 %v9632_v22  ;;  %v9719_v33 = vld [vmem:[%s14122_s1 + $0xa24] ss:$16 sps:$4 sm:$0xff]   ;;  %v9722_v22 = vld [vmem:[%s14122_s1 + $0xa2c] ss:$16 sps:$4 sm:$0xff]  }
 0x110   : > { %6677 = vmatpush1.bf16.msra.mxu0 %v9627_v34  ;;  %7333 = vmatpush1.bf16.msra.mxu1 %v9630_v35  ;;  %v1270_v34 = vcombine.high %v11860_v30, %v11860_v30  ;;  %v9717_v35 = vld [vmem:[%s14122_s1 + $0xa20] ss:$16 sps:$4 sm:$0xff]  }
 0x111   : > { %6678 = vmatprep.subr.bf16.mxu0 %v9635_v36  ;;  %7334 = vmatprep.subr.bf16.mxu1 %v9638_v37  ;;  %v9720_v36 = vld [vmem:[%s14122_s1 + $0xa28] ss:$16 sps:$4 sm:$0xff]   ;;  %v9725_v37 = vld [vmem:[%s14122_s1 + $0xa44] ss:$16 sps:$4 sm:$0xff]  }
 0x114   : > { %6679 = vmatpush1.bf16.msra.mxu0 %v9633_v38  ;;  %7335 = vmatpush1.bf16.msra.mxu1 %v9636_v39  ;;  %v9723_v38 = vld [vmem:[%s14122_s1 + $0xa40] ss:$16 sps:$4 sm:$0xff]   ;;  %v9726_v39 = vld [vmem:[%s14122_s1 + $0xa48] ss:$16 sps:$4 sm:$0xff]  }
 0x115   : > { %6680 = vmatprep.subr.bf16.mxu0 %v9641_v40  ;;  %7336 = vmatprep.subr.bf16.mxu1 %v9644_v41  ;;  %v9731_v40 = vld [vmem:[%s14122_s1 + $0xa64] ss:$16 sps:$4 sm:$0xff]   ;;  %v9734_v41 = vld [vmem:[%s14122_s1 + $0xa6c] ss:$16 sps:$4 sm:$0xff]  }
 0x118   : > { %6681 = vmatpush1.bf16.msra.mxu0 %v9639_v42  ;;  %7337 = vmatpush1.bf16.msra.mxu1 %v9642_v43  ;;  %v9729_v42 = vld [vmem:[%s14122_s1 + $0xa60] ss:$16 sps:$4 sm:$0xff]   ;;  %v9732_v43 = vld [vmem:[%s14122_s1 + $0xa68] ss:$16 sps:$4 sm:$0xff]  }
 0x119   : > { %6682 = vmatprep.subr.bf16.mxu0 %v9647_v44  ;;  %7338 = vmatprep.subr.bf16.mxu1 %v9650_v45  ;;  %v9737_v44 = vld [vmem:[%s14122_s1 + $0xa84] ss:$16 sps:$4 sm:$0xff]   ;;  %v9740_v45 = vld [vmem:[%s14122_s1 + $0xa8c] ss:$16 sps:$4 sm:$0xff]  }
 0x11c   : > { %6683 = vmatpush1.bf16.msra.mxu0 %v9645_v46  ;;  %7339 = vmatpush1.bf16.msra.mxu1 %v9648_v47  ;;  %v9735_v46 = vld [vmem:[%s14122_s1 + $0xa80] ss:$16 sps:$4 sm:$0xff]   ;;  %v9738_v47 = vld [vmem:[%s14122_s1 + $0xa88] ss:$16 sps:$4 sm:$0xff]  }
 0x11d   : > { %6684 = vmatprep.subr.bf16.mxu0 %v9653_v48  ;;  %7340 = vmatprep.subr.bf16.mxu1 %v9656_v50  ;;  %v9743_v48 = vld [vmem:[%s14122_s1 + $0xaa4] ss:$16 sps:$4 sm:$0xff]   ;;  %v9746_v50 = vld [vmem:[%s14122_s1 + $0xaac] ss:$16 sps:$4 sm:$0xff]  }
 0x120   : > { %6685 = vmatpush1.bf16.msra.mxu0 %v9651_v51  ;;  %7341 = vmatpush1.bf16.msra.mxu1 %v9654_v52  ;;  %v9741_v51 = vld [vmem:[%s14122_s1 + $0xaa0] ss:$16 sps:$4 sm:$0xff]   ;;  %v9744_v52 = vld [vmem:[%s14122_s1 + $0xaa8] ss:$16 sps:$4 sm:$0xff]  }
 0x121   : > { %6686 = vmatprep.subr.bf16.mxu0 %v9659_v53  ;;  %7342 = vmatprep.subr.bf16.mxu1 %v9662_v54  ;;  %v9749_v53 = vld [vmem:[%s14122_s1 + $0xac4] ss:$16 sps:$4 sm:$0xff]   ;;  %v9752_v54 = vld [vmem:[%s14122_s1 + $0xacc] ss:$16 sps:$4 sm:$0xff]  }
 0x124   : > { %6687 = vmatpush1.bf16.msra.mxu0 %v9657_v55  ;;  %7343 = vmatpush1.bf16.msra.mxu1 %v9660_v56  ;;  %v9747_v55 = vld [vmem:[%s14122_s1 + $0xac0] ss:$16 sps:$4 sm:$0xff]   ;;  %v9750_v56 = vld [vmem:[%s14122_s1 + $0xac8] ss:$16 sps:$4 sm:$0xff]  }
 0x125   : > { %6688 = vmatprep.subr.bf16.mxu0 %v9665_v57  ;;  %7344 = vmatprep.subr.bf16.mxu1 %v9668_v58  ;;  %v9755_v57 = vld [vmem:[%s14122_s1 + $0xae4] ss:$16 sps:$4 sm:$0xff]   ;;  %v9758_v58 = vld [vmem:[%s14122_s1 + $0xaec] ss:$16 sps:$4 sm:$0xff]  }
 0x128   : > { %6689 = vmatpush1.bf16.msra.mxu0 %v9663_v59  ;;  %7345 = vmatpush1.bf16.msra.mxu1 %v9666_v60  ;;  %v9753_v59 = vld [vmem:[%s14122_s1 + $0xae0] ss:$16 sps:$4 sm:$0xff]   ;;  %v9756_v60 = vld [vmem:[%s14122_s1 + $0xae8] ss:$16 sps:$4 sm:$0xff]  }
 0x129   : > { %6690 = vmatprep.subr.bf16.mxu0 %v9671_v61  ;;  %7346 = vmatprep.subr.bf16.mxu1 %v9674_v62  ;;  %v9761_v61 = vld [vmem:[%s14122_s1 + $0xb04] ss:$16 sps:$4 sm:$0xff]   ;;  %v9764_v62 = vld [vmem:[%s14122_s1 + $0xb0c] ss:$16 sps:$4 sm:$0xff]  }
 0x12c   : > { %6691 = vmatpush1.bf16.msra.mxu0 %v9669_v63  ;;  %7347 = vmatpush1.bf16.msra.mxu1 %v9672_v0  ;;  %v9759_v63 = vld [vmem:[%s14122_s1 + $0xb00] ss:$16 sps:$4 sm:$0xff]   ;;  %v9762_v0 = vld [vmem:[%s14122_s1 + $0xb08] ss:$16 sps:$4 sm:$0xff]  }
 0x12d   : > { %6692 = vmatprep.subr.bf16.mxu0 %v9677_v1  ;;  %7348 = vmatprep.subr.bf16.mxu1 %v9680_v2  ;;  %v9767_v1 = vld [vmem:[%s14122_s1 + $0xb24] ss:$16 sps:$4 sm:$0xff]   ;;  %v9770_v2 = vld [vmem:[%s14122_s1 + $0xb2c] ss:$16 sps:$4 sm:$0xff]  }
 0x130   : > { %6693 = vmatpush1.bf16.msra.mxu0 %v9675_v3  ;;  %7349 = vmatpush1.bf16.msra.mxu1 %v9678_v4  ;;  %v9765_v3 = vld [vmem:[%s14122_s1 + $0xb20] ss:$16 sps:$4 sm:$0xff]   ;;  %v9768_v4 = vld [vmem:[%s14122_s1 + $0xb28] ss:$16 sps:$4 sm:$0xff]  }
 0x131   : > { %6694 = vmatprep.subr.bf16.mxu0 %v9683_v5  ;;  %7350 = vmatprep.subr.bf16.mxu1 %v9686_v6  ;;  %v9773_v5 = vld [vmem:[%s14122_s1 + $0xb44] ss:$16 sps:$4 sm:$0xff]   ;;  %v9776_v6 = vld [vmem:[%s14122_s1 + $0xb4c] ss:$16 sps:$4 sm:$0xff]  }
 0x134   : > { %6695 = vmatpush1.bf16.msra.mxu0 %v9681_v7  ;;  %7351 = vmatpush1.bf16.msra.mxu1 %v9684_v8  ;;  %v9771_v7 = vld [vmem:[%s14122_s1 + $0xb40] ss:$16 sps:$4 sm:$0xff]   ;;  %v9774_v8 = vld [vmem:[%s14122_s1 + $0xb48] ss:$16 sps:$4 sm:$0xff]  }
 0x135   : > { %6696 = vmatprep.subr.bf16.mxu0 %v9689_v9  ;;  %7352 = vmatprep.subr.bf16.mxu1 %v9692_v10  ;;  %v9779_v9 = vld [vmem:[%s14122_s1 + $0xb64] ss:$16 sps:$4 sm:$0xff]   ;;  %v9782_v10 = vld [vmem:[%s14122_s1 + $0xb6c] ss:$16 sps:$4 sm:$0xff]  }
 0x138   : > { %6697 = vmatpush1.bf16.msra.mxu0 %v9687_v11  ;;  %7353 = vmatpush1.bf16.msra.mxu1 %v9690_v13  ;;  %v9777_v11 = vld [vmem:[%s14122_s1 + $0xb60] ss:$16 sps:$4 sm:$0xff]   ;;  %v9780_v13 = vld [vmem:[%s14122_s1 + $0xb68] ss:$16 sps:$4 sm:$0xff]  }
 0x139   : > { %6698 = vmatprep.subr.bf16.mxu0 %v9695_v14  ;;  %7354 = vmatprep.subr.bf16.mxu1 %v9698_v15  ;;  %v9785_v14 = vld [vmem:[%s14122_s1 + $0xb84] ss:$16 sps:$4 sm:$0xff]   ;;  %v9788_v15 = vld [vmem:[%s14122_s1 + $0xb8c] ss:$16 sps:$4 sm:$0xff]  }
 0x13c   : > { %6699 = vmatpush1.bf16.msra.mxu0 %v9693_v16  ;;  %7355 = vmatpush1.bf16.msra.mxu1 %v9696_v17  ;;  %v9783_v16 = vld [vmem:[%s14122_s1 + $0xb80] ss:$16 sps:$4 sm:$0xff]   ;;  %v9786_v17 = vld [vmem:[%s14122_s1 + $0xb88] ss:$16 sps:$4 sm:$0xff]  }
 0x13d   : > { %6700 = vmatprep.subr.bf16.mxu0 %v9701_v19  ;;  %7356 = vmatprep.subr.bf16.mxu1 %v9704_v20  ;;  %v9791_v19 = vld [vmem:[%s14122_s1 + $0xba4] ss:$16 sps:$4 sm:$0xff]   ;;  %v9794_v20 = vld [vmem:[%s14122_s1 + $0xbac] ss:$16 sps:$4 sm:$0xff]  }
 0x140   : > { %6701 = vmatpush1.bf16.msra.mxu0 %v9699_v18  ;;  %7357 = vmatpush1.bf16.msra.mxu1 %v9702_v24  ;;  %v9789_v18 = vld [vmem:[%s14122_s1 + $0xba0] ss:$16 sps:$4 sm:$0xff]   ;;  %v9792_v24 = vld [vmem:[%s14122_s1 + $0xba8] ss:$16 sps:$4 sm:$0xff]  }
 0x141   : > { %6702 = vmatprep.subr.bf16.mxu0 %v9707_v25  ;;  %7358 = vmatprep.subr.bf16.mxu1 %v9710_v12  ;;  %v9797_v25 = vld [vmem:[%s14122_s1 + $0xbc4] ss:$16 sps:$4 sm:$0xff]   ;;  %v9800_v12 = vld [vmem:[%s14122_s1 + $0xbcc] ss:$16 sps:$4 sm:$0xff]  }
 0x144   : > { %6703 = vmatpush1.bf16.msra.mxu0 %v9705_v28  ;;  %7359 = vmatpush1.bf16.msra.mxu1 %v9708_v29  ;;  %v9798_v28 = vld [vmem:[%s14122_s1 + $0xbc8] ss:$16 sps:$4 sm:$0xff]   ;;  %v9803_v29 = vld [vmem:[%s14122_s1 + $0xbe4] ss:$16 sps:$4 sm:$0xff]  }
 0x145   : > { %6713 = vmatprep.subr.bf16.mxu0 %v9713_v21  ;;  %7369 = vmatprep.subr.bf16.mxu1 %v9716_v23  ;;  %v9806_v21 = vld [vmem:[%s14122_s1 + $0xbec] ss:$16 sps:$4 sm:$0xff]  }
 0x146   : > { %v12047_v23 = vld [vmem:[%s10981_s4 + $0x18] sm:$0xff] }
 0x147   : > { %6705 = vmatmul.mubr.bf16.vlgmr.msra.gmra.mrb[0].mxu0 %v11659_v26  ;;  %7361 = vmatmul.mubr.bf16.vlgmr.msra.gmra.mrb[0].mxu1 %v11659_v26  ;;  %v9728_v26 = vld [vmem:[%s14122_s1 + $0xa4c] ss:$16 sps:$4 sm:$0xff]  }
 0x148   : > { %6714 = vmatpush1.bf16.msra.mxu0 %v9711_v31  ;;  %7370 = vmatpush1.bf16.msra.mxu1 %v9714_v32  ;;  %v9801_v31 = vld [vmem:[%s14122_s1 + $0xbe0] ss:$16 sps:$4 sm:$0xff]   ;;  %v9804_v32 = vld [vmem:[%s14122_s1 + $0xbe8] ss:$16 sps:$4 sm:$0xff]  }
 0x149   : > { %6715 = vmatprep.subr.bf16.mxu0 %v9719_v33  ;;  %7371 = vmatprep.subr.bf16.mxu1 %v9722_v22  ;;  %v9810_v33 = vld [vmem:[%s14122_s1 + $0xc04] ss:$16 sps:$4 sm:$0xff]   ;;  %v9813_v22 = vld [vmem:[%s14122_s1 + $0xc0c] ss:$16 sps:$4 sm:$0xff]  }
 0x14a   : > { %6745 = vmatprep.mubr.bf16.mxu0 %v1270_v34  ;;  %7401 = vmatprep.mubr.bf16.mxu1 %v1270_v34  ;;  %v12063_v34 = vrot.slane %v12047_v23, %v10983_v49 }
 0x14c   : > { %6716 = vmatpush1.bf16.msra.mxu0 %v9717_v35  ;;  %7372 = vmatpush1.bf16.msra.mxu1 %v9720_v36  ;;  %v9808_v35 = vld [vmem:[%s14122_s1 + $0xc00] ss:$16 sps:$4 sm:$0xff]   ;;  %v9811_v36 = vld [vmem:[%s14122_s1 + $0xc08] ss:$16 sps:$4 sm:$0xff]  }
 0x14d   : > { %6717 = vmatprep.subr.bf16.mxu0 %v9725_v37  ;;  %7373 = vmatprep.subr.bf16.mxu1 %v9728_v26  ;;  %v9816_v37 = vld [vmem:[%s14122_s1 + $0xc24] ss:$16 sps:$4 sm:$0xff]   ;;  %v9819_v26 = vld [vmem:[%s14122_s1 + $0xc2c] ss:$16 sps:$4 sm:$0xff]  }
 0x150   : > { %6718 = vmatpush1.bf16.msra.mxu0 %v9723_v38  ;;  %7374 = vmatpush1.bf16.msra.mxu1 %v9726_v39  ;;  %v1286_v38 = vcombine.high %v12063_v34, %v12063_v34  ;;  %v9814_v39 = vld [vmem:[%s14122_s1 + $0xc20] ss:$16 sps:$4 sm:$0xff]  }
 0x151   : > { %6719 = vmatprep.subr.bf16.mxu0 %v9731_v40  ;;  %7375 = vmatprep.subr.bf16.mxu1 %v9734_v41  ;;  %v9817_v40 = vld [vmem:[%s14122_s1 + $0xc28] ss:$16 sps:$4 sm:$0xff]   ;;  %v9822_v41 = vld [vmem:[%s14122_s1 + $0xc44] ss:$16 sps:$4 sm:$0xff]  }
 0x154   : > { %6720 = vmatpush1.bf16.msra.mxu0 %v9729_v42  ;;  %7376 = vmatpush1.bf16.msra.mxu1 %v9732_v43  ;;  %v9820_v42 = vld [vmem:[%s14122_s1 + $0xc40] ss:$16 sps:$4 sm:$0xff]   ;;  %v9823_v43 = vld [vmem:[%s14122_s1 + $0xc48] ss:$16 sps:$4 sm:$0xff]  }
 0x155   : > { %6721 = vmatprep.subr.bf16.mxu0 %v9737_v44  ;;  %7377 = vmatprep.subr.bf16.mxu1 %v9740_v45  ;;  %v9828_v44 = vld [vmem:[%s14122_s1 + $0xc64] ss:$16 sps:$4 sm:$0xff]   ;;  %v9831_v45 = vld [vmem:[%s14122_s1 + $0xc6c] ss:$16 sps:$4 sm:$0xff]  }
 0x158   : > { %6722 = vmatpush1.bf16.msra.mxu0 %v9735_v46  ;;  %7378 = vmatpush1.bf16.msra.mxu1 %v9738_v47  ;;  %v9826_v46 = vld [vmem:[%s14122_s1 + $0xc60] ss:$16 sps:$4 sm:$0xff]   ;;  %v9829_v47 = vld [vmem:[%s14122_s1 + $0xc68] ss:$16 sps:$4 sm:$0xff]  }
 0x159   : > { %6723 = vmatprep.subr.bf16.mxu0 %v9743_v48  ;;  %7379 = vmatprep.subr.bf16.mxu1 %v9746_v50  ;;  %v9834_v48 = vld [vmem:[%s14122_s1 + $0xc84] ss:$16 sps:$4 sm:$0xff]   ;;  %v9837_v50 = vld [vmem:[%s14122_s1 + $0xc8c] ss:$16 sps:$4 sm:$0xff]  }
 0x15c   : > { %6724 = vmatpush1.bf16.msra.mxu0 %v9741_v51  ;;  %7380 = vmatpush1.bf16.msra.mxu1 %v9744_v52  ;;  %v9832_v51 = vld [vmem:[%s14122_s1 + $0xc80] ss:$16 sps:$4 sm:$0xff]   ;;  %v9835_v52 = vld [vmem:[%s14122_s1 + $0xc88] ss:$16 sps:$4 sm:$0xff]  }
 0x15d   : > { %6725 = vmatprep.subr.bf16.mxu0 %v9749_v53  ;;  %7381 = vmatprep.subr.bf16.mxu1 %v9752_v54  ;;  %v9840_v53 = vld [vmem:[%s14122_s1 + $0xca4] ss:$16 sps:$4 sm:$0xff]   ;;  %v9843_v54 = vld [vmem:[%s14122_s1 + $0xcac] ss:$16 sps:$4 sm:$0xff]  }
 0x160   : > { %6726 = vmatpush1.bf16.msra.mxu0 %v9747_v55  ;;  %7382 = vmatpush1.bf16.msra.mxu1 %v9750_v56  ;;  %v9838_v55 = vld [vmem:[%s14122_s1 + $0xca0] ss:$16 sps:$4 sm:$0xff]   ;;  %v9841_v56 = vld [vmem:[%s14122_s1 + $0xca8] ss:$16 sps:$4 sm:$0xff]  }
 0x161   : > { %6727 = vmatprep.subr.bf16.mxu0 %v9755_v57  ;;  %7383 = vmatprep.subr.bf16.mxu1 %v9758_v58  ;;  %v9846_v57 = vld [vmem:[%s14122_s1 + $0xcc4] ss:$16 sps:$4 sm:$0xff]   ;;  %v9849_v58 = vld [vmem:[%s14122_s1 + $0xccc] ss:$16 sps:$4 sm:$0xff]  }
 0x164   : > { %6728 = vmatpush1.bf16.msra.mxu0 %v9753_v59  ;;  %7384 = vmatpush1.bf16.msra.mxu1 %v9756_v60  ;;  %v9844_v59 = vld [vmem:[%s14122_s1 + $0xcc0] ss:$16 sps:$4 sm:$0xff]   ;;  %v9847_v60 = vld [vmem:[%s14122_s1 + $0xcc8] ss:$16 sps:$4 sm:$0xff]  }
 0x165   : > { %6729 = vmatprep.subr.bf16.mxu0 %v9761_v61  ;;  %7385 = vmatprep.subr.bf16.mxu1 %v9764_v62  ;;  %v9852_v61 = vld [vmem:[%s14122_s1 + $0xce4] ss:$16 sps:$4 sm:$0xff]   ;;  %v9855_v62 = vld [vmem:[%s14122_s1 + $0xcec] ss:$16 sps:$4 sm:$0xff]  }
 0x168   : > { %6730 = vmatpush1.bf16.msra.mxu0 %v9759_v63  ;;  %7386 = vmatpush1.bf16.msra.mxu1 %v9762_v0  ;;  %v9850_v63 = vld [vmem:[%s14122_s1 + $0xce0] ss:$16 sps:$4 sm:$0xff]   ;;  %v9853_v0 = vld [vmem:[%s14122_s1 + $0xce8] ss:$16 sps:$4 sm:$0xff]  }
 0x169   : > { %6731 = vmatprep.subr.bf16.mxu0 %v9767_v1  ;;  %7387 = vmatprep.subr.bf16.mxu1 %v9770_v2  ;;  %v9858_v1 = vld [vmem:[%s14122_s1 + $0xd04] ss:$16 sps:$4 sm:$0xff]   ;;  %v9861_v2 = vld [vmem:[%s14122_s1 + $0xd0c] ss:$16 sps:$4 sm:$0xff]  }
 0x16c   : > { %6732 = vmatpush1.bf16.msra.mxu0 %v9765_v3  ;;  %7388 = vmatpush1.bf16.msra.mxu1 %v9768_v4  ;;  %v9856_v3 = vld [vmem:[%s14122_s1 + $0xd00] ss:$16 sps:$4 sm:$0xff]   ;;  %v9859_v4 = vld [vmem:[%s14122_s1 + $0xd08] ss:$16 sps:$4 sm:$0xff]  }
 0x16d   : > { %6733 = vmatprep.subr.bf16.mxu0 %v9773_v5  ;;  %7389 = vmatprep.subr.bf16.mxu1 %v9776_v6  ;;  %v9864_v5 = vld [vmem:[%s14122_s1 + $0xd24] ss:$16 sps:$4 sm:$0xff]   ;;  %v9867_v6 = vld [vmem:[%s14122_s1 + $0xd2c] ss:$16 sps:$4 sm:$0xff]  }
 0x170   : > { %6734 = vmatpush1.bf16.msra.mxu0 %v9771_v7  ;;  %7390 = vmatpush1.bf16.msra.mxu1 %v9774_v8  ;;  %v9862_v7 = vld [vmem:[%s14122_s1 + $0xd20] ss:$16 sps:$4 sm:$0xff]   ;;  %v9865_v8 = vld [vmem:[%s14122_s1 + $0xd28] ss:$16 sps:$4 sm:$0xff]  }
 0x171   : > { %6735 = vmatprep.subr.bf16.mxu0 %v9779_v9  ;;  %7391 = vmatprep.subr.bf16.mxu1 %v9782_v10  ;;  %v9870_v9 = vld [vmem:[%s14122_s1 + $0xd44] ss:$16 sps:$4 sm:$0xff]   ;;  %v9873_v10 = vld [vmem:[%s14122_s1 + $0xd4c] ss:$16 sps:$4 sm:$0xff]  }
 0x174   : > { %6736 = vmatpush1.bf16.msra.mxu0 %v9777_v11  ;;  %7392 = vmatpush1.bf16.msra.mxu1 %v9780_v13  ;;  %v9868_v11 = vld [vmem:[%s14122_s1 + $0xd40] ss:$16 sps:$4 sm:$0xff]   ;;  %v9871_v13 = vld [vmem:[%s14122_s1 + $0xd48] ss:$16 sps:$4 sm:$0xff]  }
 0x175   : > { %6737 = vmatprep.subr.bf16.mxu0 %v9785_v14  ;;  %7393 = vmatprep.subr.bf16.mxu1 %v9788_v15  ;;  %v9876_v14 = vld [vmem:[%s14122_s1 + $0xd64] ss:$16 sps:$4 sm:$0xff]   ;;  %v9879_v15 = vld [vmem:[%s14122_s1 + $0xd6c] ss:$16 sps:$4 sm:$0xff]  }
 0x178   : > { %6738 = vmatpush1.bf16.msra.mxu0 %v9783_v16  ;;  %7394 = vmatpush1.bf16.msra.mxu1 %v9786_v17  ;;  %v9874_v16 = vld [vmem:[%s14122_s1 + $0xd60] ss:$16 sps:$4 sm:$0xff]   ;;  %v9877_v17 = vld [vmem:[%s14122_s1 + $0xd68] ss:$16 sps:$4 sm:$0xff]  }
 0x179   : > { %6739 = vmatprep.subr.bf16.mxu0 %v9791_v19  ;;  %7395 = vmatprep.subr.bf16.mxu1 %v9794_v20  ;;  %v9882_v19 = vld [vmem:[%s14122_s1 + $0xd84] ss:$16 sps:$4 sm:$0xff]   ;;  %v9885_v20 = vld [vmem:[%s14122_s1 + $0xd8c] ss:$16 sps:$4 sm:$0xff]  }
 0x17c   : > { %6740 = vmatpush1.bf16.msra.mxu0 %v9789_v18  ;;  %7396 = vmatpush1.bf16.msra.mxu1 %v9792_v24  ;;  %v9880_v18 = vld [vmem:[%s14122_s1 + $0xd80] ss:$16 sps:$4 sm:$0xff]   ;;  %v9883_v24 = vld [vmem:[%s14122_s1 + $0xd88] ss:$16 sps:$4 sm:$0xff]  }
 0x17d   : > { %6741 = vmatprep.subr.bf16.mxu0 %v9797_v25  ;;  %7397 = vmatprep.subr.bf16.mxu1 %v9800_v12  ;;  %v9888_v25 = vld [vmem:[%s14122_s1 + $0xda4] ss:$16 sps:$4 sm:$0xff]   ;;  %v9891_v12 = vld [vmem:[%s14122_s1 + $0xdac] ss:$16 sps:$4 sm:$0xff]  }
 0x180   : > { %6742 = vmatpush1.bf16.msra.mxu0 %v9795_v27  ;;  %7398 = vmatpush1.bf16.msra.mxu1 %v9798_v28  ;;  %v9886_v27 = vld [vmem:[%s14122_s1 + $0xda0] ss:$16 sps:$4 sm:$0xff]   ;;  %v9889_v28 = vld [vmem:[%s14122_s1 + $0xda8] ss:$16 sps:$4 sm:$0xff]  }
 0x181   : > { %6743 = vmatprep.subr.bf16.mxu0 %v9803_v29  ;;  %7399 = vmatprep.subr.bf16.mxu1 %v9806_v21  ;;  %v9894_v29 = vld [vmem:[%s14122_s1 + $0xdc4] ss:$16 sps:$4 sm:$0xff]   ;;  %v9897_v21 = vld [vmem:[%s14122_s1 + $0xdcc] ss:$16 sps:$4 sm:$0xff]  }
 0x184   : > { %6744 = vmatpush1.bf16.msra.mxu0 %v9801_v31  ;;  %7400 = vmatpush1.bf16.msra.mxu1 %v9804_v32  ;;  %v9892_v31 = vld [vmem:[%s14122_s1 + $0xdc0] ss:$16 sps:$4 sm:$0xff]   ;;  %v9895_v32 = vld [vmem:[%s14122_s1 + $0xdc8] ss:$16 sps:$4 sm:$0xff]  }
 0x185   : > { %6754 = vmatprep.subr.bf16.mxu0 %v9810_v33  ;;  %7410 = vmatprep.subr.bf16.mxu1 %v9813_v22  ;;  %v9900_v33 = vld [vmem:[%s14122_s1 + $0xde4] ss:$16 sps:$4 sm:$0xff]   ;;  %v9903_v22 = vld [vmem:[%s14122_s1 + $0xdec] ss:$16 sps:$4 sm:$0xff]  }
 0x187   : > { %6746 = vmatmul.mubr.bf16.vlgmr.msra.gmra.mrb[0].mxu0 %v11860_v30  ;;  %7402 = vmatmul.mubr.bf16.vlgmr.msra.gmra.mrb[0].mxu1 %v11860_v30  ;;  %v9825_v30 = vld [vmem:[%s14122_s1 + $0xc4c] ss:$16 sps:$4 sm:$0xff]  }
 0x188   : > { %6755 = vmatpush1.bf16.msra.mxu0 %v9808_v35  ;;  %7411 = vmatpush1.bf16.msra.mxu1 %v9811_v36  ;;  %v1271_v35 = vcombine.high %v12047_v23, %v12047_v23  ;;  %v9898_v36 = vld [vmem:[%s14122_s1 + $0xde0] ss:$16 sps:$4 sm:$0xff]   ;;  %v9909_v23 = vld [vmem:[%s14122_s1 + $0xe0c] ss:$16 sps:$4 sm:$0xff]  }
 0x189   : > { %6756 = vmatprep.subr.bf16.mxu0 %v9816_v37  ;;  %7412 = vmatprep.subr.bf16.mxu1 %v9819_v26  ;;  %v9901_v37 = vld [vmem:[%s14122_s1 + $0xde8] ss:$16 sps:$4 sm:$0xff]   ;;  %v9906_v26 = vld [vmem:[%s14122_s1 + $0xe04] ss:$16 sps:$4 sm:$0xff]  }
 0x18a   : > { %6786 = vmatprep.mubr.bf16.mxu0 %v1286_v38  ;;  %7442 = vmatprep.mubr.bf16.mxu1 %v1286_v38  ;;  %v12264_v38 = vrot.slane %v1271_v35, %v10983_v49  ;;  %v9988_v35 = vld [vmem:[%s14122_s1 + $0xfc0] ss:$16 sps:$4 sm:$0xff]  }
 0x18c   : > { %6757 = vmatpush1.bf16.msra.mxu0 %v9814_v39  ;;  %7413 = vmatpush1.bf16.msra.mxu1 %v9817_v40  ;;  %v9904_v39 = vld [vmem:[%s14122_s1 + $0xe00] ss:$16 sps:$4 sm:$0xff]   ;;  %v9907_v40 = vld [vmem:[%s14122_s1 + $0xe08] ss:$16 sps:$4 sm:$0xff]  }
 0x18d   : > { %6758 = vmatprep.subr.bf16.mxu0 %v9822_v41  ;;  %7414 = vmatprep.subr.bf16.mxu1 %v9825_v30  ;;  %v9912_v41 = vld [vmem:[%s14122_s1 + $0xe24] ss:$16 sps:$4 sm:$0xff]   ;;  %v9915_v30 = vld [vmem:[%s14122_s1 + $0xe2c] ss:$16 sps:$4 sm:$0xff]  }
 0x190   : > { %6759 = vmatpush1.bf16.msra.mxu0 %v9820_v42  ;;  %7415 = vmatpush1.bf16.msra.mxu1 %v9823_v43  ;;  %v1287_v42 = vcombine.high %v12264_v38, %v12264_v38  ;;  %v9910_v43 = vld [vmem:[%s14122_s1 + $0xe20] ss:$16 sps:$4 sm:$0xff]  }
 0x191   : > { %6760 = vmatprep.subr.bf16.mxu0 %v9828_v44  ;;  %7416 = vmatprep.subr.bf16.mxu1 %v9831_v45  ;;  %v9913_v44 = vld [vmem:[%s14122_s1 + $0xe28] ss:$16 sps:$4 sm:$0xff]   ;;  %v9918_v45 = vld [vmem:[%s14122_s1 + $0xe44] ss:$16 sps:$4 sm:$0xff]  }
 0x194   : > { %6761 = vmatpush1.bf16.msra.mxu0 %v9826_v46  ;;  %7417 = vmatpush1.bf16.msra.mxu1 %v9829_v47  ;;  %v9916_v46 = vld [vmem:[%s14122_s1 + $0xe40] ss:$16 sps:$4 sm:$0xff]   ;;  %v9919_v47 = vld [vmem:[%s14122_s1 + $0xe48] ss:$16 sps:$4 sm:$0xff]  }
 0x195   : > { %6762 = vmatprep.subr.bf16.mxu0 %v9834_v48  ;;  %7418 = vmatprep.subr.bf16.mxu1 %v9837_v50  ;;  %v9924_v48 = vld [vmem:[%s14122_s1 + $0xe64] ss:$16 sps:$4 sm:$0xff]   ;;  %v9927_v50 = vld [vmem:[%s14122_s1 + $0xe6c] ss:$16 sps:$4 sm:$0xff]  }
 0x198   : > { %6763 = vmatpush1.bf16.msra.mxu0 %v9832_v51  ;;  %7419 = vmatpush1.bf16.msra.mxu1 %v9835_v52  ;;  %v9922_v51 = vld [vmem:[%s14122_s1 + $0xe60] ss:$16 sps:$4 sm:$0xff]   ;;  %v9925_v52 = vld [vmem:[%s14122_s1 + $0xe68] ss:$16 sps:$4 sm:$0xff]  }
 0x199   : > { %6764 = vmatprep.subr.bf16.mxu0 %v9840_v53  ;;  %7420 = vmatprep.subr.bf16.mxu1 %v9843_v54  ;;  %v9930_v53 = vld [vmem:[%s14122_s1 + $0xe84] ss:$16 sps:$4 sm:$0xff]   ;;  %v9933_v54 = vld [vmem:[%s14122_s1 + $0xe8c] ss:$16 sps:$4 sm:$0xff]  }
 0x19c   : > { %6765 = vmatpush1.bf16.msra.mxu0 %v9838_v55  ;;  %7421 = vmatpush1.bf16.msra.mxu1 %v9841_v56  ;;  %v9928_v55 = vld [vmem:[%s14122_s1 + $0xe80] ss:$16 sps:$4 sm:$0xff]   ;;  %v9931_v56 = vld [vmem:[%s14122_s1 + $0xe88] ss:$16 sps:$4 sm:$0xff]  }
 0x19d   : > { %6766 = vmatprep.subr.bf16.mxu0 %v9846_v57  ;;  %7422 = vmatprep.subr.bf16.mxu1 %v9849_v58  ;;  %v9936_v57 = vld [vmem:[%s14122_s1 + $0xea4] ss:$16 sps:$4 sm:$0xff]   ;;  %v9939_v58 = vld [vmem:[%s14122_s1 + $0xeac] ss:$16 sps:$4 sm:$0xff]  }
 0x1a0   : > { %6767 = vmatpush1.bf16.msra.mxu0 %v9844_v59  ;;  %7423 = vmatpush1.bf16.msra.mxu1 %v9847_v60  ;;  %v9934_v59 = vld [vmem:[%s14122_s1 + $0xea0] ss:$16 sps:$4 sm:$0xff]   ;;  %v9937_v60 = vld [vmem:[%s14122_s1 + $0xea8] ss:$16 sps:$4 sm:$0xff]  }
 0x1a1   : > { %6768 = vmatprep.subr.bf16.mxu0 %v9852_v61  ;;  %7424 = vmatprep.subr.bf16.mxu1 %v9855_v62  ;;  %v9942_v61 = vld [vmem:[%s14122_s1 + $0xec4] ss:$16 sps:$4 sm:$0xff]   ;;  %v9945_v62 = vld [vmem:[%s14122_s1 + $0xecc] ss:$16 sps:$4 sm:$0xff]  }
 0x1a4   : > { %6769 = vmatpush1.bf16.msra.mxu0 %v9850_v63  ;;  %7425 = vmatpush1.bf16.msra.mxu1 %v9853_v0  ;;  %v9940_v63 = vld [vmem:[%s14122_s1 + $0xec0] ss:$16 sps:$4 sm:$0xff]   ;;  %v9943_v0 = vld [vmem:[%s14122_s1 + $0xec8] ss:$16 sps:$4 sm:$0xff]  }
 0x1a5   : > { %6770 = vmatprep.subr.bf16.mxu0 %v9858_v1  ;;  %7426 = vmatprep.subr.bf16.mxu1 %v9861_v2  ;;  %v9948_v1 = vld [vmem:[%s14122_s1 + $0xee4] ss:$16 sps:$4 sm:$0xff]   ;;  %v9951_v2 = vld [vmem:[%s14122_s1 + $0xeec] ss:$16 sps:$4 sm:$0xff]  }
 0x1a8   : > { %6771 = vmatpush1.bf16.msra.mxu0 %v9856_v3  ;;  %7427 = vmatpush1.bf16.msra.mxu1 %v9859_v4  ;;  %v9946_v3 = vld [vmem:[%s14122_s1 + $0xee0] ss:$16 sps:$4 sm:$0xff]   ;;  %v9949_v4 = vld [vmem:[%s14122_s1 + $0xee8] ss:$16 sps:$4 sm:$0xff]  }
 0x1a9   : > { %6772 = vmatprep.subr.bf16.mxu0 %v9864_v5  ;;  %7428 = vmatprep.subr.bf16.mxu1 %v9867_v6  ;;  %v9954_v5 = vld [vmem:[%s14122_s1 + $0xf04] ss:$16 sps:$4 sm:$0xff]   ;;  %v9957_v6 = vld [vmem:[%s14122_s1 + $0xf0c] ss:$16 sps:$4 sm:$0xff]  }
 0x1ac   : > { %6773 = vmatpush1.bf16.msra.mxu0 %v9862_v7  ;;  %7429 = vmatpush1.bf16.msra.mxu1 %v9865_v8  ;;  %v9952_v7 = vld [vmem:[%s14122_s1 + $0xf00] ss:$16 sps:$4 sm:$0xff]   ;;  %v9955_v8 = vld [vmem:[%s14122_s1 + $0xf08] ss:$16 sps:$4 sm:$0xff]  }
 0x1ad   : > { %6774 = vmatprep.subr.bf16.mxu0 %v9870_v9  ;;  %7430 = vmatprep.subr.bf16.mxu1 %v9873_v10  ;;  %v9960_v9 = vld [vmem:[%s14122_s1 + $0xf24] ss:$16 sps:$4 sm:$0xff]   ;;  %v9963_v10 = vld [vmem:[%s14122_s1 + $0xf2c] ss:$16 sps:$4 sm:$0xff]  }
 0x1b0   : > { %6775 = vmatpush1.bf16.msra.mxu0 %v9868_v11  ;;  %7431 = vmatpush1.bf16.msra.mxu1 %v9871_v13  ;;  %v9958_v11 = vld [vmem:[%s14122_s1 + $0xf20] ss:$16 sps:$4 sm:$0xff]   ;;  %v9961_v13 = vld [vmem:[%s14122_s1 + $0xf28] ss:$16 sps:$4 sm:$0xff]  }
 0x1b1   : > { %6776 = vmatprep.subr.bf16.mxu0 %v9876_v14  ;;  %7432 = vmatprep.subr.bf16.mxu1 %v9879_v15  ;;  %v9966_v14 = vld [vmem:[%s14122_s1 + $0xf44] ss:$16 sps:$4 sm:$0xff]   ;;  %v9969_v15 = vld [vmem:[%s14122_s1 + $0xf4c] ss:$16 sps:$4 sm:$0xff]  }
 0x1b4   : > { %6777 = vmatpush1.bf16.msra.mxu0 %v9874_v16  ;;  %7433 = vmatpush1.bf16.msra.mxu1 %v9877_v17  ;;  %v9964_v16 = vld [vmem:[%s14122_s1 + $0xf40] ss:$16 sps:$4 sm:$0xff]   ;;  %v9967_v17 = vld [vmem:[%s14122_s1 + $0xf48] ss:$16 sps:$4 sm:$0xff]  }
 0x1b5   : > { %6778 = vmatprep.subr.bf16.mxu0 %v9882_v19  ;;  %7434 = vmatprep.subr.bf16.mxu1 %v9885_v20  ;;  %v9972_v19 = vld [vmem:[%s14122_s1 + $0xf64] ss:$16 sps:$4 sm:$0xff]   ;;  %v9975_v20 = vld [vmem:[%s14122_s1 + $0xf6c] ss:$16 sps:$4 sm:$0xff]  }
 0x1b8   : > { %6779 = vmatpush1.bf16.msra.mxu0 %v9880_v18  ;;  %7435 = vmatpush1.bf16.msra.mxu1 %v9883_v24  ;;  %v9970_v18 = vld [vmem:[%s14122_s1 + $0xf60] ss:$16 sps:$4 sm:$0xff]   ;;  %v9973_v24 = vld [vmem:[%s14122_s1 + $0xf68] ss:$16 sps:$4 sm:$0xff]  }
 0x1b9   : > { %6780 = vmatprep.subr.bf16.mxu0 %v9888_v25  ;;  %7436 = vmatprep.subr.bf16.mxu1 %v9891_v12  ;;  %v9978_v25 = vld [vmem:[%s14122_s1 + $0xf84] ss:$16 sps:$4 sm:$0xff]   ;;  %v9981_v12 = vld [vmem:[%s14122_s1 + $0xf8c] ss:$16 sps:$4 sm:$0xff]  }
 0x1bc   : > { %6781 = vmatpush1.bf16.msra.mxu0 %v9886_v27  ;;  %7437 = vmatpush1.bf16.msra.mxu1 %v9889_v28  ;;  %v9976_v27 = vld [vmem:[%s14122_s1 + $0xf80] ss:$16 sps:$4 sm:$0xff]   ;;  %v9979_v28 = vld [vmem:[%s14122_s1 + $0xf88] ss:$16 sps:$4 sm:$0xff]  }
 0x1bd   : > { %6782 = vmatprep.subr.bf16.mxu0 %v9894_v29  ;;  %7438 = vmatprep.subr.bf16.mxu1 %v9897_v21  ;;  %v9984_v29 = vld [vmem:[%s14122_s1 + $0xfa4] ss:$16 sps:$4 sm:$0xff]   ;;  %v9987_v21 = vld [vmem:[%s14122_s1 + $0xfac] ss:$16 sps:$4 sm:$0xff]  }
 0x1c0   : > { %6783 = vmatpush1.bf16.msra.mxu0 %v9892_v31  ;;  %7439 = vmatpush1.bf16.msra.mxu1 %v9895_v32  ;;  %v9982_v31 = vld [vmem:[%s14122_s1 + $0xfa0] ss:$16 sps:$4 sm:$0xff]   ;;  %v9985_v32 = vld [vmem:[%s14122_s1 + $0xfa8] ss:$16 sps:$4 sm:$0xff]  }
 0x1c1   : > { %6784 = vmatprep.subr.bf16.mxu0 %v9900_v33  ;;  %7440 = vmatprep.subr.bf16.mxu1 %v9903_v22  ;;  %v9990_v33 = vld [vmem:[%s14122_s1 + $0xfc4] ss:$16 sps:$4 sm:$0xff]   ;;  %v9993_v22 = vld [vmem:[%s14122_s1 + $0xfcc] ss:$16 sps:$4 sm:$0xff]  }
 0x1c4   : > { %6785 = vmatpush1.bf16.msra.mxu0 %v9898_v36  ;;  %7441 = vmatpush1.bf16.msra.mxu1 %v9901_v37  ;;  %v9991_v36 = vld [vmem:[%s14122_s1 + $0xfc8] ss:$16 sps:$4 sm:$0xff]   ;;  %v9996_v37 = vld [vmem:[%s14122_s1 + $0xfe4] ss:$16 sps:$4 sm:$0xff]  }
 0x1c5   : > { %6795 = vmatprep.subr.bf16.mxu0 %v9906_v26  ;;  %7451 = vmatprep.subr.bf16.mxu1 %v9909_v23  ;;  %v9999_v26 = vld [vmem:[%s14122_s1 + $0xfec] ss:$16 sps:$4 sm:$0xff]   ;;  %v12451_v23 = vld [vmem:[%s10981_s4 + $0x20] sm:$0xff] }
 0x1c7   : > { %6787 = vmatmul.mubr.bf16.vlgmr.msra.gmra.mrb[0].mxu0 %v12063_v34  ;;  %7443 = vmatmul.mubr.bf16.vlgmr.msra.gmra.mrb[0].mxu1 %v12063_v34  ;;  %v9921_v34 = vld [vmem:[%s14122_s1 + $0xe4c] ss:$16 sps:$4 sm:$0xff]  }
 0x1c8   : > { %6796 = vmatpush1.bf16.msra.mxu0 %v9904_v39  ;;  %7452 = vmatpush1.bf16.msra.mxu1 %v9907_v40  ;;  %v9994_v39 = vld [vmem:[%s14122_s1 + $0xfe0] ss:$16 sps:$4 sm:$0xff]   ;;  %v9997_v40 = vld [vmem:[%s14122_s1 + $0xfe8] ss:$16 sps:$4 sm:$0xff]  }
 0x1c9   : > { %6797 = vmatprep.subr.bf16.mxu0 %v9912_v41  ;;  %7453 = vmatprep.subr.bf16.mxu1 %v9915_v30  ;;  %v10003_v41 = vld [vmem:[%s14122_s1 + $0x1004] ss:$16 sps:$4 sm:$0xff]   ;;  %v10006_v30 = vld [vmem:[%s14122_s1 + $0x100c] ss:$16 sps:$4 sm:$0xff]  }
 0x1ca   : > { %6827 = vmatprep.mubr.bf16.mxu0 %v1287_v42  ;;  %7483 = vmatprep.mubr.bf16.mxu1 %v1287_v42  ;;  %v12467_v42 = vrot.slane %v12451_v23, %v10983_v49 }
 0x1cc   : > { %6798 = vmatpush1.bf16.msra.mxu0 %v9910_v43  ;;  %7454 = vmatpush1.bf16.msra.mxu1 %v9913_v44  ;;  %v10001_v43 = vld [vmem:[%s14122_s1 + $0x1000] ss:$16 sps:$4 sm:$0xff]   ;;  %v10004_v44 = vld [vmem:[%s14122_s1 + $0x1008] ss:$16 sps:$4 sm:$0xff]  }
 0x1cd   : > { %6799 = vmatprep.subr.bf16.mxu0 %v9918_v45  ;;  %7455 = vmatprep.subr.bf16.mxu1 %v9921_v34  ;;  %v10009_v45 = vld [vmem:[%s14122_s1 + $0x1024] ss:$16 sps:$4 sm:$0xff]   ;;  %v10012_v34 = vld [vmem:[%s14122_s1 + $0x102c] ss:$16 sps:$4 sm:$0xff]  }
 0x1d0   : > { %6800 = vmatpush1.bf16.msra.mxu0 %v9916_v46  ;;  %7456 = vmatpush1.bf16.msra.mxu1 %v9919_v47  ;;  %v1303_v46 = vcombine.high %v12467_v42, %v12467_v42  ;;  %v10007_v47 = vld [vmem:[%s14122_s1 + $0x1020] ss:$16 sps:$4 sm:$0xff]  }
 0x1d1   : > { %6801 = vmatprep.subr.bf16.mxu0 %v9924_v48  ;;  %7457 = vmatprep.subr.bf16.mxu1 %v9927_v50  ;;  %v10010_v48 = vld [vmem:[%s14122_s1 + $0x1028] ss:$16 sps:$4 sm:$0xff]   ;;  %v10015_v50 = vld [vmem:[%s14122_s1 + $0x1044] ss:$16 sps:$4 sm:$0xff]  }
 0x1d4   : > { %6802 = vmatpush1.bf16.msra.mxu0 %v9922_v51  ;;  %7458 = vmatpush1.bf16.msra.mxu1 %v9925_v52  ;;  %v10013_v51 = vld [vmem:[%s14122_s1 + $0x1040] ss:$16 sps:$4 sm:$0xff]   ;;  %v10016_v52 = vld [vmem:[%s14122_s1 + $0x1048] ss:$16 sps:$4 sm:$0xff]  }
 0x1d5   : > { %6803 = vmatprep.subr.bf16.mxu0 %v9930_v53  ;;  %7459 = vmatprep.subr.bf16.mxu1 %v9933_v54  ;;  %v10021_v53 = vld [vmem:[%s14122_s1 + $0x1064] ss:$16 sps:$4 sm:$0xff]   ;;  %v10024_v54 = vld [vmem:[%s14122_s1 + $0x106c] ss:$16 sps:$4 sm:$0xff]  }
 0x1d8   : > { %6804 = vmatpush1.bf16.msra.mxu0 %v9928_v55  ;;  %7460 = vmatpush1.bf16.msra.mxu1 %v9931_v56  ;;  %v10019_v55 = vld [vmem:[%s14122_s1 + $0x1060] ss:$16 sps:$4 sm:$0xff]   ;;  %v10022_v56 = vld [vmem:[%s14122_s1 + $0x1068] ss:$16 sps:$4 sm:$0xff]  }
 0x1d9   : > { %6805 = vmatprep.subr.bf16.mxu0 %v9936_v57  ;;  %7461 = vmatprep.subr.bf16.mxu1 %v9939_v58  ;;  %v10027_v57 = vld [vmem:[%s14122_s1 + $0x1084] ss:$16 sps:$4 sm:$0xff]   ;;  %v10030_v58 = vld [vmem:[%s14122_s1 + $0x108c] ss:$16 sps:$4 sm:$0xff]  }
 0x1dc   : > { %6806 = vmatpush1.bf16.msra.mxu0 %v9934_v59  ;;  %7462 = vmatpush1.bf16.msra.mxu1 %v9937_v60  ;;  %v10025_v59 = vld [vmem:[%s14122_s1 + $0x1080] ss:$16 sps:$4 sm:$0xff]   ;;  %v10028_v60 = vld [vmem:[%s14122_s1 + $0x1088] ss:$16 sps:$4 sm:$0xff]  }
 0x1dd   : > { %6807 = vmatprep.subr.bf16.mxu0 %v9942_v61  ;;  %7463 = vmatprep.subr.bf16.mxu1 %v9945_v62  ;;  %v10033_v61 = vld [vmem:[%s14122_s1 + $0x10a4] ss:$16 sps:$4 sm:$0xff]   ;;  %v10036_v62 = vld [vmem:[%s14122_s1 + $0x10ac] ss:$16 sps:$4 sm:$0xff]  }
 0x1e0   : > { %6808 = vmatpush1.bf16.msra.mxu0 %v9940_v63  ;;  %7464 = vmatpush1.bf16.msra.mxu1 %v9943_v0  ;;  %v10031_v63 = vld [vmem:[%s14122_s1 + $0x10a0] ss:$16 sps:$4 sm:$0xff]   ;;  %v10034_v0 = vld [vmem:[%s14122_s1 + $0x10a8] ss:$16 sps:$4 sm:$0xff]  }
 0x1e1   : > { %6809 = vmatprep.subr.bf16.mxu0 %v9948_v1  ;;  %7465 = vmatprep.subr.bf16.mxu1 %v9951_v2  ;;  %v10039_v1 = vld [vmem:[%s14122_s1 + $0x10c4] ss:$16 sps:$4 sm:$0xff]   ;;  %v10042_v2 = vld [vmem:[%s14122_s1 + $0x10cc] ss:$16 sps:$4 sm:$0xff]  }
 0x1e4   : > { %6810 = vmatpush1.bf16.msra.mxu0 %v9946_v3  ;;  %7466 = vmatpush1.bf16.msra.mxu1 %v9949_v4  ;;  %v10037_v3 = vld [vmem:[%s14122_s1 + $0x10c0] ss:$16 sps:$4 sm:$0xff]   ;;  %v10040_v4 = vld [vmem:[%s14122_s1 + $0x10c8] ss:$16 sps:$4 sm:$0xff]  }
 0x1e5   : > { %6811 = vmatprep.subr.bf16.mxu0 %v9954_v5  ;;  %7467 = vmatprep.subr.bf16.mxu1 %v9957_v6  ;;  %v10045_v5 = vld [vmem:[%s14122_s1 + $0x10e4] ss:$16 sps:$4 sm:$0xff]   ;;  %v10048_v6 = vld [vmem:[%s14122_s1 + $0x10ec] ss:$16 sps:$4 sm:$0xff]  }
 0x1e8   : > { %6812 = vmatpush1.bf16.msra.mxu0 %v9952_v7  ;;  %7468 = vmatpush1.bf16.msra.mxu1 %v9955_v8  ;;  %v10043_v7 = vld [vmem:[%s14122_s1 + $0x10e0] ss:$16 sps:$4 sm:$0xff]   ;;  %v10046_v8 = vld [vmem:[%s14122_s1 + $0x10e8] ss:$16 sps:$4 sm:$0xff]  }
 0x1e9   : > { %6813 = vmatprep.subr.bf16.mxu0 %v9960_v9  ;;  %7469 = vmatprep.subr.bf16.mxu1 %v9963_v10  ;;  %v10051_v9 = vld [vmem:[%s14122_s1 + $0x1104] ss:$16 sps:$4 sm:$0xff]   ;;  %v10054_v10 = vld [vmem:[%s14122_s1 + $0x110c] ss:$16 sps:$4 sm:$0xff]  }
 0x1ec   : > { %6814 = vmatpush1.bf16.msra.mxu0 %v9958_v11  ;;  %7470 = vmatpush1.bf16.msra.mxu1 %v9961_v13  ;;  %v10049_v11 = vld [vmem:[%s14122_s1 + $0x1100] ss:$16 sps:$4 sm:$0xff]   ;;  %v10052_v13 = vld [vmem:[%s14122_s1 + $0x1108] ss:$16 sps:$4 sm:$0xff]  }
 0x1ed   : > { %6815 = vmatprep.subr.bf16.mxu0 %v9966_v14  ;;  %7471 = vmatprep.subr.bf16.mxu1 %v9969_v15  ;;  %v10057_v14 = vld [vmem:[%s14122_s1 + $0x1124] ss:$16 sps:$4 sm:$0xff]   ;;  %v10060_v15 = vld [vmem:[%s14122_s1 + $0x112c] ss:$16 sps:$4 sm:$0xff]  }
 0x1f0   : > { %6816 = vmatpush1.bf16.msra.mxu0 %v9964_v16  ;;  %7472 = vmatpush1.bf16.msra.mxu1 %v9967_v17  ;;  %v10055_v16 = vld [vmem:[%s14122_s1 + $0x1120] ss:$16 sps:$4 sm:$0xff]   ;;  %v10058_v17 = vld [vmem:[%s14122_s1 + $0x1128] ss:$16 sps:$4 sm:$0xff]  }
 0x1f1   : > { %6817 = vmatprep.subr.bf16.mxu0 %v9972_v19  ;;  %7473 = vmatprep.subr.bf16.mxu1 %v9975_v20  ;;  %v10063_v19 = vld [vmem:[%s14122_s1 + $0x1144] ss:$16 sps:$4 sm:$0xff]   ;;  %v10066_v20 = vld [vmem:[%s14122_s1 + $0x114c] ss:$16 sps:$4 sm:$0xff]  }
 0x1f4   : > { %6818 = vmatpush1.bf16.msra.mxu0 %v9970_v18  ;;  %7474 = vmatpush1.bf16.msra.mxu1 %v9973_v24  ;;  %v10061_v18 = vld [vmem:[%s14122_s1 + $0x1140] ss:$16 sps:$4 sm:$0xff]   ;;  %v10064_v24 = vld [vmem:[%s14122_s1 + $0x1148] ss:$16 sps:$4 sm:$0xff]  }
 0x1f5   : > { %6819 = vmatprep.subr.bf16.mxu0 %v9978_v25  ;;  %7475 = vmatprep.subr.bf16.mxu1 %v9981_v12  ;;  %v10069_v25 = vld [vmem:[%s14122_s1 + $0x1164] ss:$16 sps:$4 sm:$0xff]   ;;  %v10072_v12 = vld [vmem:[%s14122_s1 + $0x116c] ss:$16 sps:$4 sm:$0xff]  }
 0x1f8   : > { %6820 = vmatpush1.bf16.msra.mxu0 %v9976_v27  ;;  %7476 = vmatpush1.bf16.msra.mxu1 %v9979_v28  ;;  %v10067_v27 = vld [vmem:[%s14122_s1 + $0x1160] ss:$16 sps:$4 sm:$0xff]   ;;  %v10070_v28 = vld [vmem:[%s14122_s1 + $0x1168] ss:$16 sps:$4 sm:$0xff]  }
 0x1f9   : > { %6821 = vmatprep.subr.bf16.mxu0 %v9984_v29  ;;  %7477 = vmatprep.subr.bf16.mxu1 %v9987_v21  ;;  %v10075_v29 = vld [vmem:[%s14122_s1 + $0x1184] ss:$16 sps:$4 sm:$0xff]   ;;  %v10078_v21 = vld [vmem:[%s14122_s1 + $0x118c] ss:$16 sps:$4 sm:$0xff]  }
 0x1fc   : > { %6822 = vmatpush1.bf16.msra.mxu0 %v9982_v31  ;;  %7478 = vmatpush1.bf16.msra.mxu1 %v9985_v32  ;;  %v10073_v31 = vld [vmem:[%s14122_s1 + $0x1180] ss:$16 sps:$4 sm:$0xff]   ;;  %v10076_v32 = vld [vmem:[%s14122_s1 + $0x1188] ss:$16 sps:$4 sm:$0xff]  }
 0x1fd   : > { %6823 = vmatprep.subr.bf16.mxu0 %v9990_v33  ;;  %7479 = vmatprep.subr.bf16.mxu1 %v9993_v22  ;;  %v10081_v33 = vld [vmem:[%s14122_s1 + $0x11a4] ss:$16 sps:$4 sm:$0xff]   ;;  %v10084_v22 = vld [vmem:[%s14122_s1 + $0x11ac] ss:$16 sps:$4 sm:$0xff]  }
 0x200   : > { %6824 = vmatpush1.bf16.msra.mxu0 %v9988_v35  ;;  %7480 = vmatpush1.bf16.msra.mxu1 %v9991_v36  ;;  %v10079_v35 = vld [vmem:[%s14122_s1 + $0x11a0] ss:$16 sps:$4 sm:$0xff]   ;;  %v10082_v36 = vld [vmem:[%s14122_s1 + $0x11a8] ss:$16 sps:$4 sm:$0xff]  }
 0x201   : > { %6825 = vmatprep.subr.bf16.mxu0 %v9996_v37  ;;  %7481 = vmatprep.subr.bf16.mxu1 %v9999_v26  ;;  %v10087_v37 = vld [vmem:[%s14122_s1 + $0x11c4] ss:$16 sps:$4 sm:$0xff]   ;;  %v10090_v26 = vld [vmem:[%s14122_s1 + $0x11cc] ss:$16 sps:$4 sm:$0xff]  }
 0x204   : > { %6826 = vmatpush1.bf16.msra.mxu0 %v9994_v39  ;;  %7482 = vmatpush1.bf16.msra.mxu1 %v9997_v40  ;;  %v10085_v39 = vld [vmem:[%s14122_s1 + $0x11c0] ss:$16 sps:$4 sm:$0xff]   ;;  %v10088_v40 = vld [vmem:[%s14122_s1 + $0x11c8] ss:$16 sps:$4 sm:$0xff]  }
 0x205   : > { %6836 = vmatprep.subr.bf16.mxu0 %v10003_v41  ;;  %7492 = vmatprep.subr.bf16.mxu1 %v10006_v30  ;;  %v10093_v41 = vld [vmem:[%s14122_s1 + $0x11e4] ss:$16 sps:$4 sm:$0xff]   ;;  %v10096_v30 = vld [vmem:[%s14122_s1 + $0x11ec] ss:$16 sps:$4 sm:$0xff]  }
 0x207   : > { %6828 = vmatmul.mubr.bf16.vlgmr.msra.gmra.mrb[0].mxu0 %v12264_v38  ;;  %7484 = vmatmul.mubr.bf16.vlgmr.msra.gmra.mrb[0].mxu1 %v12264_v38  ;;  %v10018_v38 = vld [vmem:[%s14122_s1 + $0x104c] ss:$16 sps:$4 sm:$0xff]  }
 0x208   : > { %6837 = vmatpush1.bf16.msra.mxu0 %v10001_v43  ;;  %7493 = vmatpush1.bf16.msra.mxu1 %v10004_v44  ;;  %v1288_v43 = vcombine.high %v12451_v23, %v12451_v23  ;;  %v10091_v44 = vld [vmem:[%s14122_s1 + $0x11e0] ss:$16 sps:$4 sm:$0xff]   ;;  %v10102_v23 = vld [vmem:[%s14122_s1 + $0x120c] ss:$16 sps:$4 sm:$0xff]  }
 0x209   : > { %6838 = vmatprep.subr.bf16.mxu0 %v10009_v45  ;;  %7494 = vmatprep.subr.bf16.mxu1 %v10012_v34  ;;  %v10094_v45 = vld [vmem:[%s14122_s1 + $0x11e8] ss:$16 sps:$4 sm:$0xff]   ;;  %v10099_v34 = vld [vmem:[%s14122_s1 + $0x1204] ss:$16 sps:$4 sm:$0xff]  }
 0x20a   : > { %6868 = vmatprep.mubr.bf16.mxu0 %v1303_v46  ;;  %7524 = vmatprep.mubr.bf16.mxu1 %v1303_v46  ;;  %v12668_v46 = vrot.slane %v1288_v43, %v10983_v49  ;;  %v10181_v43 = vld [vmem:[%s14122_s1 + $0x13c0] ss:$16 sps:$4 sm:$0xff]  }
 0x20c   : > { %6839 = vmatpush1.bf16.msra.mxu0 %v10007_v47  ;;  %7495 = vmatpush1.bf16.msra.mxu1 %v10010_v48  ;;  %v10097_v47 = vld [vmem:[%s14122_s1 + $0x1200] ss:$16 sps:$4 sm:$0xff]   ;;  %v10100_v48 = vld [vmem:[%s14122_s1 + $0x1208] ss:$16 sps:$4 sm:$0xff]  }
 0x20d   : > { %6840 = vmatprep.subr.bf16.mxu0 %v10015_v50  ;;  %7496 = vmatprep.subr.bf16.mxu1 %v10018_v38  ;;  %v10105_v50 = vld [vmem:[%s14122_s1 + $0x1224] ss:$16 sps:$4 sm:$0xff]   ;;  %v10108_v38 = vld [vmem:[%s14122_s1 + $0x122c] ss:$16 sps:$4 sm:$0xff]  }
 0x210   : > { %6841 = vmatpush1.bf16.msra.mxu0 %v10013_v51  ;;  %7497 = vmatpush1.bf16.msra.mxu1 %v10016_v52  ;;  %v1304_v51 = vcombine.high %v12668_v46, %v12668_v46  ;;  %v10103_v52 = vld [vmem:[%s14122_s1 + $0x1220] ss:$16 sps:$4 sm:$0xff]  }
 0x211   : > { %6842 = vmatprep.subr.bf16.mxu0 %v10021_v53  ;;  %7498 = vmatprep.subr.bf16.mxu1 %v10024_v54  ;;  %v10106_v53 = vld [vmem:[%s14122_s1 + $0x1228] ss:$16 sps:$4 sm:$0xff]   ;;  %v10111_v54 = vld [vmem:[%s14122_s1 + $0x1244] ss:$16 sps:$4 sm:$0xff]  }
 0x214   : > { %6843 = vmatpush1.bf16.msra.mxu0 %v10019_v55  ;;  %7499 = vmatpush1.bf16.msra.mxu1 %v10022_v56  ;;  %v10109_v55 = vld [vmem:[%s14122_s1 + $0x1240] ss:$16 sps:$4 sm:$0xff]   ;;  %v10112_v56 = vld [vmem:[%s14122_s1 + $0x1248] ss:$16 sps:$4 sm:$0xff]  }
 0x215   : > { %6844 = vmatprep.subr.bf16.mxu0 %v10027_v57  ;;  %7500 = vmatprep.subr.bf16.mxu1 %v10030_v58  ;;  %v10117_v57 = vld [vmem:[%s14122_s1 + $0x1264] ss:$16 sps:$4 sm:$0xff]   ;;  %v10120_v58 = vld [vmem:[%s14122_s1 + $0x126c] ss:$16 sps:$4 sm:$0xff]  }
 0x218   : > { %6845 = vmatpush1.bf16.msra.mxu0 %v10025_v59  ;;  %7501 = vmatpush1.bf16.msra.mxu1 %v10028_v60  ;;  %v10115_v59 = vld [vmem:[%s14122_s1 + $0x1260] ss:$16 sps:$4 sm:$0xff]   ;;  %v10118_v60 = vld [vmem:[%s14122_s1 + $0x1268] ss:$16 sps:$4 sm:$0xff]  }
 0x219   : > { %6846 = vmatprep.subr.bf16.mxu0 %v10033_v61  ;;  %7502 = vmatprep.subr.bf16.mxu1 %v10036_v62  ;;  %v10123_v61 = vld [vmem:[%s14122_s1 + $0x1284] ss:$16 sps:$4 sm:$0xff]   ;;  %v10126_v62 = vld [vmem:[%s14122_s1 + $0x128c] ss:$16 sps:$4 sm:$0xff]  }
 0x21c   : > { %6847 = vmatpush1.bf16.msra.mxu0 %v10031_v63  ;;  %7503 = vmatpush1.bf16.msra.mxu1 %v10034_v0  ;;  %v10121_v63 = vld [vmem:[%s14122_s1 + $0x1280] ss:$16 sps:$4 sm:$0xff]   ;;  %v10124_v0 = vld [vmem:[%s14122_s1 + $0x1288] ss:$16 sps:$4 sm:$0xff]  }
 0x21d   : > { %6848 = vmatprep.subr.bf16.mxu0 %v10039_v1  ;;  %7504 = vmatprep.subr.bf16.mxu1 %v10042_v2  ;;  %v10129_v1 = vld [vmem:[%s14122_s1 + $0x12a4] ss:$16 sps:$4 sm:$0xff]   ;;  %v10132_v2 = vld [vmem:[%s14122_s1 + $0x12ac] ss:$16 sps:$4 sm:$0xff]  }
 0x220   : > { %6849 = vmatpush1.bf16.msra.mxu0 %v10037_v3  ;;  %7505 = vmatpush1.bf16.msra.mxu1 %v10040_v4  ;;  %v10127_v3 = vld [vmem:[%s14122_s1 + $0x12a0] ss:$16 sps:$4 sm:$0xff]   ;;  %v10130_v4 = vld [vmem:[%s14122_s1 + $0x12a8] ss:$16 sps:$4 sm:$0xff]  }
 0x221   : > { %6850 = vmatprep.subr.bf16.mxu0 %v10045_v5  ;;  %7506 = vmatprep.subr.bf16.mxu1 %v10048_v6  ;;  %v10135_v5 = vld [vmem:[%s14122_s1 + $0x12c4] ss:$16 sps:$4 sm:$0xff]   ;;  %v10138_v6 = vld [vmem:[%s14122_s1 + $0x12cc] ss:$16 sps:$4 sm:$0xff]  }
 0x224   : > { %6851 = vmatpush1.bf16.msra.mxu0 %v10043_v7  ;;  %7507 = vmatpush1.bf16.msra.mxu1 %v10046_v8  ;;  %v10133_v7 = vld [vmem:[%s14122_s1 + $0x12c0] ss:$16 sps:$4 sm:$0xff]   ;;  %v10136_v8 = vld [vmem:[%s14122_s1 + $0x12c8] ss:$16 sps:$4 sm:$0xff]  }
 0x225   : > { %6852 = vmatprep.subr.bf16.mxu0 %v10051_v9  ;;  %7508 = vmatprep.subr.bf16.mxu1 %v10054_v10  ;;  %v10141_v9 = vld [vmem:[%s14122_s1 + $0x12e4] ss:$16 sps:$4 sm:$0xff]   ;;  %v10144_v10 = vld [vmem:[%s14122_s1 + $0x12ec] ss:$16 sps:$4 sm:$0xff]  }
 0x228   : > { %6853 = vmatpush1.bf16.msra.mxu0 %v10049_v11  ;;  %7509 = vmatpush1.bf16.msra.mxu1 %v10052_v13  ;;  %v10139_v11 = vld [vmem:[%s14122_s1 + $0x12e0] ss:$16 sps:$4 sm:$0xff]   ;;  %v10142_v13 = vld [vmem:[%s14122_s1 + $0x12e8] ss:$16 sps:$4 sm:$0xff]  }
 0x229   : > { %6854 = vmatprep.subr.bf16.mxu0 %v10057_v14  ;;  %7510 = vmatprep.subr.bf16.mxu1 %v10060_v15  ;;  %v10147_v14 = vld [vmem:[%s14122_s1 + $0x1304] ss:$16 sps:$4 sm:$0xff]   ;;  %v10150_v15 = vld [vmem:[%s14122_s1 + $0x130c] ss:$16 sps:$4 sm:$0xff]  }
 0x22c   : > { %6855 = vmatpush1.bf16.msra.mxu0 %v10055_v16  ;;  %7511 = vmatpush1.bf16.msra.mxu1 %v10058_v17  ;;  %v10145_v16 = vld [vmem:[%s14122_s1 + $0x1300] ss:$16 sps:$4 sm:$0xff]   ;;  %v10148_v17 = vld [vmem:[%s14122_s1 + $0x1308] ss:$16 sps:$4 sm:$0xff]  }
 0x22d   : > { %6856 = vmatprep.subr.bf16.mxu0 %v10063_v19  ;;  %7512 = vmatprep.subr.bf16.mxu1 %v10066_v20  ;;  %v10153_v19 = vld [vmem:[%s14122_s1 + $0x1324] ss:$16 sps:$4 sm:$0xff]   ;;  %v10156_v20 = vld [vmem:[%s14122_s1 + $0x132c] ss:$16 sps:$4 sm:$0xff]  }
 0x230   : > { %6857 = vmatpush1.bf16.msra.mxu0 %v10061_v18  ;;  %7513 = vmatpush1.bf16.msra.mxu1 %v10064_v24  ;;  %v10151_v18 = vld [vmem:[%s14122_s1 + $0x1320] ss:$16 sps:$4 sm:$0xff]   ;;  %v10154_v24 = vld [vmem:[%s14122_s1 + $0x1328] ss:$16 sps:$4 sm:$0xff]  }
 0x231   : > { %6858 = vmatprep.subr.bf16.mxu0 %v10069_v25  ;;  %7514 = vmatprep.subr.bf16.mxu1 %v10072_v12  ;;  %v10159_v25 = vld [vmem:[%s14122_s1 + $0x1344] ss:$16 sps:$4 sm:$0xff]   ;;  %v10162_v12 = vld [vmem:[%s14122_s1 + $0x134c] ss:$16 sps:$4 sm:$0xff]  }
 0x234   : > { %6859 = vmatpush1.bf16.msra.mxu0 %v10067_v27  ;;  %7515 = vmatpush1.bf16.msra.mxu1 %v10070_v28  ;;  %v10157_v27 = vld [vmem:[%s14122_s1 + $0x1340] ss:$16 sps:$4 sm:$0xff]   ;;  %v10160_v28 = vld [vmem:[%s14122_s1 + $0x1348] ss:$16 sps:$4 sm:$0xff]  }
 0x235   : > { %6860 = vmatprep.subr.bf16.mxu0 %v10075_v29  ;;  %7516 = vmatprep.subr.bf16.mxu1 %v10078_v21  ;;  %v10165_v29 = vld [vmem:[%s14122_s1 + $0x1364] ss:$16 sps:$4 sm:$0xff]   ;;  %v10168_v21 = vld [vmem:[%s14122_s1 + $0x136c] ss:$16 sps:$4 sm:$0xff]  }
 0x238   : > { %6861 = vmatpush1.bf16.msra.mxu0 %v10073_v31  ;;  %7517 = vmatpush1.bf16.msra.mxu1 %v10076_v32  ;;  %v10163_v31 = vld [vmem:[%s14122_s1 + $0x1360] ss:$16 sps:$4 sm:$0xff]   ;;  %v10166_v32 = vld [vmem:[%s14122_s1 + $0x1368] ss:$16 sps:$4 sm:$0xff]  }
 0x239   : > { %6862 = vmatprep.subr.bf16.mxu0 %v10081_v33  ;;  %7518 = vmatprep.subr.bf16.mxu1 %v10084_v22  ;;  %v10171_v33 = vld [vmem:[%s14122_s1 + $0x1384] ss:$16 sps:$4 sm:$0xff]   ;;  %v10174_v22 = vld [vmem:[%s14122_s1 + $0x138c] ss:$16 sps:$4 sm:$0xff]  }
 0x23c   : > { %6863 = vmatpush1.bf16.msra.mxu0 %v10079_v35  ;;  %7519 = vmatpush1.bf16.msra.mxu1 %v10082_v36  ;;  %v10169_v35 = vld [vmem:[%s14122_s1 + $0x1380] ss:$16 sps:$4 sm:$0xff]   ;;  %v10172_v36 = vld [vmem:[%s14122_s1 + $0x1388] ss:$16 sps:$4 sm:$0xff]  }
 0x23d   : > { %6864 = vmatprep.subr.bf16.mxu0 %v10087_v37  ;;  %7520 = vmatprep.subr.bf16.mxu1 %v10090_v26  ;;  %v10177_v37 = vld [vmem:[%s14122_s1 + $0x13a4] ss:$16 sps:$4 sm:$0xff]   ;;  %v10180_v26 = vld [vmem:[%s14122_s1 + $0x13ac] ss:$16 sps:$4 sm:$0xff]  }
 0x240   : > { %6865 = vmatpush1.bf16.msra.mxu0 %v10085_v39  ;;  %7521 = vmatpush1.bf16.msra.mxu1 %v10088_v40  ;;  %v10175_v39 = vld [vmem:[%s14122_s1 + $0x13a0] ss:$16 sps:$4 sm:$0xff]   ;;  %v10178_v40 = vld [vmem:[%s14122_s1 + $0x13a8] ss:$16 sps:$4 sm:$0xff]  }
 0x241   : > { %6866 = vmatprep.subr.bf16.mxu0 %v10093_v41  ;;  %7522 = vmatprep.subr.bf16.mxu1 %v10096_v30  ;;  %v10183_v41 = vld [vmem:[%s14122_s1 + $0x13c4] ss:$16 sps:$4 sm:$0xff]   ;;  %v10186_v30 = vld [vmem:[%s14122_s1 + $0x13cc] ss:$16 sps:$4 sm:$0xff]  }
 0x244   : > { %6867 = vmatpush1.bf16.msra.mxu0 %v10091_v44  ;;  %7523 = vmatpush1.bf16.msra.mxu1 %v10094_v45  ;;  %v10184_v44 = vld [vmem:[%s14122_s1 + $0x13c8] ss:$16 sps:$4 sm:$0xff]   ;;  %v10189_v45 = vld [vmem:[%s14122_s1 + $0x13e4] ss:$16 sps:$4 sm:$0xff]  }
 0x245   : > { %6877 = vmatprep.subr.bf16.mxu0 %v10099_v34  ;;  %7533 = vmatprep.subr.bf16.mxu1 %v10102_v23  ;;  %v10192_v34 = vld [vmem:[%s14122_s1 + $0x13ec] ss:$16 sps:$4 sm:$0xff]  }
 0x246   : > { %v12855_v23 = vld [vmem:[%s10981_s4 + $0x28] sm:$0xff] }
 0x247   : > { %6869 = vmatmul.mubr.bf16.vlgmr.msra.gmra.mrb[0].mxu0 %v12467_v42  ;;  %7525 = vmatmul.mubr.bf16.vlgmr.msra.gmra.mrb[0].mxu1 %v12467_v42  ;;  %v10114_v42 = vld [vmem:[%s14122_s1 + $0x124c] ss:$16 sps:$4 sm:$0xff]  }
 0x248   : > { %6878 = vmatpush1.bf16.msra.mxu0 %v10097_v47  ;;  %7534 = vmatpush1.bf16.msra.mxu1 %v10100_v48  ;;  %v10187_v47 = vld [vmem:[%s14122_s1 + $0x13e0] ss:$16 sps:$4 sm:$0xff]   ;;  %v10190_v48 = vld [vmem:[%s14122_s1 + $0x13e8] ss:$16 sps:$4 sm:$0xff]  }
 0x249   : > { %6879 = vmatprep.subr.bf16.mxu0 %v10105_v50  ;;  %7535 = vmatprep.subr.bf16.mxu1 %v10108_v38  ;;  %v10196_v50 = vld [vmem:[%s14122_s1 + $0x1404] ss:$16 sps:$4 sm:$0xff]   ;;  %v10199_v38 = vld [vmem:[%s14122_s1 + $0x140c] ss:$16 sps:$4 sm:$0xff]  }
 0x24a   : > { %6909 = vmatprep.mubr.bf16.mxu0 %v1304_v51  ;;  %7565 = vmatprep.mubr.bf16.mxu1 %v1304_v51  ;;  %v12871_v51 = vrot.slane %v12855_v23, %v10983_v49 }
 0x24c   : > { %6880 = vmatpush1.bf16.msra.mxu0 %v10103_v52  ;;  %7536 = vmatpush1.bf16.msra.mxu1 %v10106_v53  ;;  %v10194_v52 = vld [vmem:[%s14122_s1 + $0x1400] ss:$16 sps:$4 sm:$0xff]   ;;  %v10197_v53 = vld [vmem:[%s14122_s1 + $0x1408] ss:$16 sps:$4 sm:$0xff]  }
 0x24d   : > { %6881 = vmatprep.subr.bf16.mxu0 %v10111_v54  ;;  %7537 = vmatprep.subr.bf16.mxu1 %v10114_v42  ;;  %v10202_v54 = vld [vmem:[%s14122_s1 + $0x1424] ss:$16 sps:$4 sm:$0xff]   ;;  %v10205_v42 = vld [vmem:[%s14122_s1 + $0x142c] ss:$16 sps:$4 sm:$0xff]  }
 0x250   : > { %6882 = vmatpush1.bf16.msra.mxu0 %v10109_v55  ;;  %7538 = vmatpush1.bf16.msra.mxu1 %v10112_v56  ;;  %v1320_v55 = vcombine.high %v12871_v51, %v12871_v51  ;;  %v10200_v56 = vld [vmem:[%s14122_s1 + $0x1420] ss:$16 sps:$4 sm:$0xff]  }
 0x251   : > { %6883 = vmatprep.subr.bf16.mxu0 %v10117_v57  ;;  %7539 = vmatprep.subr.bf16.mxu1 %v10120_v58  ;;  %v10203_v57 = vld [vmem:[%s14122_s1 + $0x1428] ss:$16 sps:$4 sm:$0xff]   ;;  %v10208_v58 = vld [vmem:[%s14122_s1 + $0x1444] ss:$16 sps:$4 sm:$0xff]  }
 0x254   : > { %6884 = vmatpush1.bf16.msra.mxu0 %v10115_v59  ;;  %7540 = vmatpush1.bf16.msra.mxu1 %v10118_v60  ;;  %v10206_v59 = vld [vmem:[%s14122_s1 + $0x1440] ss:$16 sps:$4 sm:$0xff]   ;;  %v10209_v60 = vld [vmem:[%s14122_s1 + $0x1448] ss:$16 sps:$4 sm:$0xff]  }
 0x255   : > { %6885 = vmatprep.subr.bf16.mxu0 %v10123_v61  ;;  %7541 = vmatprep.subr.bf16.mxu1 %v10126_v62  ;;  %v10214_v61 = vld [vmem:[%s14122_s1 + $0x1464] ss:$16 sps:$4 sm:$0xff]   ;;  %v10217_v62 = vld [vmem:[%s14122_s1 + $0x146c] ss:$16 sps:$4 sm:$0xff]  }
 0x258   : > { %6886 = vmatpush1.bf16.msra.mxu0 %v10121_v63  ;;  %7542 = vmatpush1.bf16.msra.mxu1 %v10124_v0  ;;  %v10212_v63 = vld [vmem:[%s14122_s1 + $0x1460] ss:$16 sps:$4 sm:$0xff]   ;;  %v10215_v0 = vld [vmem:[%s14122_s1 + $0x1468] ss:$16 sps:$4 sm:$0xff]  }
 0x259   : > { %6887 = vmatprep.subr.bf16.mxu0 %v10129_v1  ;;  %7543 = vmatprep.subr.bf16.mxu1 %v10132_v2  ;;  %v10220_v1 = vld [vmem:[%s14122_s1 + $0x1484] ss:$16 sps:$4 sm:$0xff]   ;;  %v10223_v2 = vld [vmem:[%s14122_s1 + $0x148c] ss:$16 sps:$4 sm:$0xff]  }
 0x25c   : > { %6888 = vmatpush1.bf16.msra.mxu0 %v10127_v3  ;;  %7544 = vmatpush1.bf16.msra.mxu1 %v10130_v4  ;;  %v10218_v3 = vld [vmem:[%s14122_s1 + $0x1480] ss:$16 sps:$4 sm:$0xff]   ;;  %v10221_v4 = vld [vmem:[%s14122_s1 + $0x1488] ss:$16 sps:$4 sm:$0xff]  }
 0x25d   : > { %6889 = vmatprep.subr.bf16.mxu0 %v10135_v5  ;;  %7545 = vmatprep.subr.bf16.mxu1 %v10138_v6  ;;  %v10226_v5 = vld [vmem:[%s14122_s1 + $0x14a4] ss:$16 sps:$4 sm:$0xff]   ;;  %v10229_v6 = vld [vmem:[%s14122_s1 + $0x14ac] ss:$16 sps:$4 sm:$0xff]  }
 0x260   : > { %6890 = vmatpush1.bf16.msra.mxu0 %v10133_v7  ;;  %7546 = vmatpush1.bf16.msra.mxu1 %v10136_v8  ;;  %v10224_v7 = vld [vmem:[%s14122_s1 + $0x14a0] ss:$16 sps:$4 sm:$0xff]   ;;  %v10227_v8 = vld [vmem:[%s14122_s1 + $0x14a8] ss:$16 sps:$4 sm:$0xff]  }
 0x261   : > { %6891 = vmatprep.subr.bf16.mxu0 %v10141_v9  ;;  %7547 = vmatprep.subr.bf16.mxu1 %v10144_v10  ;;  %v10232_v9 = vld [vmem:[%s14122_s1 + $0x14c4] ss:$16 sps:$4 sm:$0xff]   ;;  %v10235_v10 = vld [vmem:[%s14122_s1 + $0x14cc] ss:$16 sps:$4 sm:$0xff]  }
 0x264   : > { %6892 = vmatpush1.bf16.msra.mxu0 %v10139_v11  ;;  %7548 = vmatpush1.bf16.msra.mxu1 %v10142_v13  ;;  %v10230_v11 = vld [vmem:[%s14122_s1 + $0x14c0] ss:$16 sps:$4 sm:$0xff]   ;;  %v10233_v13 = vld [vmem:[%s14122_s1 + $0x14c8] ss:$16 sps:$4 sm:$0xff]  }
 0x265   : > { %6893 = vmatprep.subr.bf16.mxu0 %v10147_v14  ;;  %7549 = vmatprep.subr.bf16.mxu1 %v10150_v15  ;;  %v10238_v14 = vld [vmem:[%s14122_s1 + $0x14e4] ss:$16 sps:$4 sm:$0xff]   ;;  %v10241_v15 = vld [vmem:[%s14122_s1 + $0x14ec] ss:$16 sps:$4 sm:$0xff]  }
 0x268   : > { %6894 = vmatpush1.bf16.msra.mxu0 %v10145_v16  ;;  %7550 = vmatpush1.bf16.msra.mxu1 %v10148_v17  ;;  %v10236_v16 = vld [vmem:[%s14122_s1 + $0x14e0] ss:$16 sps:$4 sm:$0xff]   ;;  %v10239_v17 = vld [vmem:[%s14122_s1 + $0x14e8] ss:$16 sps:$4 sm:$0xff]  }
 0x269   : > { %6895 = vmatprep.subr.bf16.mxu0 %v10153_v19  ;;  %7551 = vmatprep.subr.bf16.mxu1 %v10156_v20  ;;  %v10244_v19 = vld [vmem:[%s14122_s1 + $0x1504] ss:$16 sps:$4 sm:$0xff]   ;;  %v10247_v20 = vld [vmem:[%s14122_s1 + $0x150c] ss:$16 sps:$4 sm:$0xff]  }
 0x26c   : > { %6896 = vmatpush1.bf16.msra.mxu0 %v10151_v18  ;;  %7552 = vmatpush1.bf16.msra.mxu1 %v10154_v24  ;;  %v10242_v18 = vld [vmem:[%s14122_s1 + $0x1500] ss:$16 sps:$4 sm:$0xff]   ;;  %v10245_v24 = vld [vmem:[%s14122_s1 + $0x1508] ss:$16 sps:$4 sm:$0xff]  }
 0x26d   : > { %6897 = vmatprep.subr.bf16.mxu0 %v10159_v25  ;;  %7553 = vmatprep.subr.bf16.mxu1 %v10162_v12  ;;  %v10250_v25 = vld [vmem:[%s14122_s1 + $0x1524] ss:$16 sps:$4 sm:$0xff]   ;;  %v10253_v12 = vld [vmem:[%s14122_s1 + $0x152c] ss:$16 sps:$4 sm:$0xff]  }
 0x270   : > { %6898 = vmatpush1.bf16.msra.mxu0 %v10157_v27  ;;  %7554 = vmatpush1.bf16.msra.mxu1 %v10160_v28  ;;  %v10248_v27 = vld [vmem:[%s14122_s1 + $0x1520] ss:$16 sps:$4 sm:$0xff]   ;;  %v10251_v28 = vld [vmem:[%s14122_s1 + $0x1528] ss:$16 sps:$4 sm:$0xff]  }
 0x271   : > { %6899 = vmatprep.subr.bf16.mxu0 %v10165_v29  ;;  %7555 = vmatprep.subr.bf16.mxu1 %v10168_v21  ;;  %v10256_v29 = vld [vmem:[%s14122_s1 + $0x1544] ss:$16 sps:$4 sm:$0xff]   ;;  %v10259_v21 = vld [vmem:[%s14122_s1 + $0x154c] ss:$16 sps:$4 sm:$0xff]  }
 0x274   : > { %6900 = vmatpush1.bf16.msra.mxu0 %v10163_v31  ;;  %7556 = vmatpush1.bf16.msra.mxu1 %v10166_v32  ;;  %v10254_v31 = vld [vmem:[%s14122_s1 + $0x1540] ss:$16 sps:$4 sm:$0xff]   ;;  %v10257_v32 = vld [vmem:[%s14122_s1 + $0x1548] ss:$16 sps:$4 sm:$0xff]  }
 0x275   : > { %6901 = vmatprep.subr.bf16.mxu0 %v10171_v33  ;;  %7557 = vmatprep.subr.bf16.mxu1 %v10174_v22  ;;  %v10262_v33 = vld [vmem:[%s14122_s1 + $0x1564] ss:$16 sps:$4 sm:$0xff]   ;;  %v10265_v22 = vld [vmem:[%s14122_s1 + $0x156c] ss:$16 sps:$4 sm:$0xff]  }
 0x278   : > { %6902 = vmatpush1.bf16.msra.mxu0 %v10169_v35  ;;  %7558 = vmatpush1.bf16.msra.mxu1 %v10172_v36  ;;  %v10260_v35 = vld [vmem:[%s14122_s1 + $0x1560] ss:$16 sps:$4 sm:$0xff]   ;;  %v10263_v36 = vld [vmem:[%s14122_s1 + $0x1568] ss:$16 sps:$4 sm:$0xff]  }
 0x279   : > { %6903 = vmatprep.subr.bf16.mxu0 %v10177_v37  ;;  %7559 = vmatprep.subr.bf16.mxu1 %v10180_v26  ;;  %v10268_v37 = vld [vmem:[%s14122_s1 + $0x1584] ss:$16 sps:$4 sm:$0xff]   ;;  %v10271_v26 = vld [vmem:[%s14122_s1 + $0x158c] ss:$16 sps:$4 sm:$0xff]  }
 0x27c   : > { %6904 = vmatpush1.bf16.msra.mxu0 %v10175_v39  ;;  %7560 = vmatpush1.bf16.msra.mxu1 %v10178_v40  ;;  %v10266_v39 = vld [vmem:[%s14122_s1 + $0x1580] ss:$16 sps:$4 sm:$0xff]   ;;  %v10269_v40 = vld [vmem:[%s14122_s1 + $0x1588] ss:$16 sps:$4 sm:$0xff]  }
 0x27d   : > { %6905 = vmatprep.subr.bf16.mxu0 %v10183_v41  ;;  %7561 = vmatprep.subr.bf16.mxu1 %v10186_v30  ;;  %v10274_v41 = vld [vmem:[%s14122_s1 + $0x15a4] ss:$16 sps:$4 sm:$0xff]   ;;  %v10277_v30 = vld [vmem:[%s14122_s1 + $0x15ac] ss:$16 sps:$4 sm:$0xff]  }
 0x280   : > { %6906 = vmatpush1.bf16.msra.mxu0 %v10181_v43  ;;  %7562 = vmatpush1.bf16.msra.mxu1 %v10184_v44  ;;  %v10272_v43 = vld [vmem:[%s14122_s1 + $0x15a0] ss:$16 sps:$4 sm:$0xff]   ;;  %v10275_v44 = vld [vmem:[%s14122_s1 + $0x15a8] ss:$16 sps:$4 sm:$0xff]  }
 0x281   : > { %6907 = vmatprep.subr.bf16.mxu0 %v10189_v45  ;;  %7563 = vmatprep.subr.bf16.mxu1 %v10192_v34  ;;  %v10280_v45 = vld [vmem:[%s14122_s1 + $0x15c4] ss:$16 sps:$4 sm:$0xff]   ;;  %v10283_v34 = vld [vmem:[%s14122_s1 + $0x15cc] ss:$16 sps:$4 sm:$0xff]  }
 0x284   : > { %6908 = vmatpush1.bf16.msra.mxu0 %v10187_v47  ;;  %7564 = vmatpush1.bf16.msra.mxu1 %v10190_v48  ;;  %v10278_v47 = vld [vmem:[%s14122_s1 + $0x15c0] ss:$16 sps:$4 sm:$0xff]   ;;  %v10281_v48 = vld [vmem:[%s14122_s1 + $0x15c8] ss:$16 sps:$4 sm:$0xff]  }
 0x285   : > { %6918 = vmatprep.subr.bf16.mxu0 %v10196_v50  ;;  %7574 = vmatprep.subr.bf16.mxu1 %v10199_v38  ;;  %v10286_v50 = vld [vmem:[%s14122_s1 + $0x15e4] ss:$16 sps:$4 sm:$0xff]   ;;  %v10289_v38 = vld [vmem:[%s14122_s1 + $0x15ec] ss:$16 sps:$4 sm:$0xff]  }
 0x287   : > { %6910 = vmatmul.mubr.bf16.vlgmr.msra.gmra.mrb[0].mxu0 %v12668_v46  ;;  %7566 = vmatmul.mubr.bf16.vlgmr.msra.gmra.mrb[0].mxu1 %v12668_v46  ;;  %v10211_v46 = vld [vmem:[%s14122_s1 + $0x144c] ss:$16 sps:$4 sm:$0xff]  }
 0x288   : > { %6919 = vmatpush1.bf16.msra.mxu0 %v10194_v52  ;;  %7575 = vmatpush1.bf16.msra.mxu1 %v10197_v53  ;;  %v1305_v52 = vcombine.high %v12855_v23, %v12855_v23  ;;  %v10284_v53 = vld [vmem:[%s14122_s1 + $0x15e0] ss:$16 sps:$4 sm:$0xff]   ;;  %v10295_v23 = vld [vmem:[%s14122_s1 + $0x160c] ss:$16 sps:$4 sm:$0xff]  }
 0x289   : > { %6920 = vmatprep.subr.bf16.mxu0 %v10202_v54  ;;  %7576 = vmatprep.subr.bf16.mxu1 %v10205_v42  ;;  %v10287_v54 = vld [vmem:[%s14122_s1 + $0x15e8] ss:$16 sps:$4 sm:$0xff]   ;;  %v10292_v42 = vld [vmem:[%s14122_s1 + $0x1604] ss:$16 sps:$4 sm:$0xff]  }
 0x28a   : > { %6950 = vmatprep.mubr.bf16.mxu0 %v1320_v55  ;;  %7606 = vmatprep.mubr.bf16.mxu1 %v1320_v55  ;;  %v13072_v55 = vrot.slane %v1305_v52, %v10983_v49  ;;  %v10374_v52 = vld [vmem:[%s14122_s1 + $0x17c0] ss:$16 sps:$4 sm:$0xff]  }
 0x28c   : > { %6921 = vmatpush1.bf16.msra.mxu0 %v10200_v56  ;;  %7577 = vmatpush1.bf16.msra.mxu1 %v10203_v57  ;;  %v10290_v56 = vld [vmem:[%s14122_s1 + $0x1600] ss:$16 sps:$4 sm:$0xff]   ;;  %v10293_v57 = vld [vmem:[%s14122_s1 + $0x1608] ss:$16 sps:$4 sm:$0xff]  }
 0x28d   : > { %6922 = vmatprep.subr.bf16.mxu0 %v10208_v58  ;;  %7578 = vmatprep.subr.bf16.mxu1 %v10211_v46  ;;  %v10298_v58 = vld [vmem:[%s14122_s1 + $0x1624] ss:$16 sps:$4 sm:$0xff]   ;;  %v10301_v46 = vld [vmem:[%s14122_s1 + $0x162c] ss:$16 sps:$4 sm:$0xff]  }
 0x290   : > { %6923 = vmatpush1.bf16.msra.mxu0 %v10206_v59  ;;  %7579 = vmatpush1.bf16.msra.mxu1 %v10209_v60  ;;  %v1321_v59 = vcombine.high %v13072_v55, %v13072_v55  ;;  %v10296_v60 = vld [vmem:[%s14122_s1 + $0x1620] ss:$16 sps:$4 sm:$0xff]  }
 0x291   : > { %6924 = vmatprep.subr.bf16.mxu0 %v10214_v61  ;;  %7580 = vmatprep.subr.bf16.mxu1 %v10217_v62  ;;  %v10299_v61 = vld [vmem:[%s14122_s1 + $0x1628] ss:$16 sps:$4 sm:$0xff]   ;;  %v10304_v62 = vld [vmem:[%s14122_s1 + $0x1644] ss:$16 sps:$4 sm:$0xff]  }
 0x294   : > { %6925 = vmatpush1.bf16.msra.mxu0 %v10212_v63  ;;  %7581 = vmatpush1.bf16.msra.mxu1 %v10215_v0  ;;  %v10302_v63 = vld [vmem:[%s14122_s1 + $0x1640] ss:$16 sps:$4 sm:$0xff]   ;;  %v10305_v0 = vld [vmem:[%s14122_s1 + $0x1648] ss:$16 sps:$4 sm:$0xff]  }
 0x295   : > { %6926 = vmatprep.subr.bf16.mxu0 %v10220_v1  ;;  %7582 = vmatprep.subr.bf16.mxu1 %v10223_v2  ;;  %v10310_v1 = vld [vmem:[%s14122_s1 + $0x1664] ss:$16 sps:$4 sm:$0xff]   ;;  %v10313_v2 = vld [vmem:[%s14122_s1 + $0x166c] ss:$16 sps:$4 sm:$0xff]  }
 0x298   : > { %6927 = vmatpush1.bf16.msra.mxu0 %v10218_v3  ;;  %7583 = vmatpush1.bf16.msra.mxu1 %v10221_v4  ;;  %v10308_v3 = vld [vmem:[%s14122_s1 + $0x1660] ss:$16 sps:$4 sm:$0xff]   ;;  %v10311_v4 = vld [vmem:[%s14122_s1 + $0x1668] ss:$16 sps:$4 sm:$0xff]  }
 0x299   : > { %6928 = vmatprep.subr.bf16.mxu0 %v10226_v5  ;;  %7584 = vmatprep.subr.bf16.mxu1 %v10229_v6  ;;  %v10316_v5 = vld [vmem:[%s14122_s1 + $0x1684] ss:$16 sps:$4 sm:$0xff]   ;;  %v10319_v6 = vld [vmem:[%s14122_s1 + $0x168c] ss:$16 sps:$4 sm:$0xff]  }
 0x29c   : > { %6929 = vmatpush1.bf16.msra.mxu0 %v10224_v7  ;;  %7585 = vmatpush1.bf16.msra.mxu1 %v10227_v8  ;;  %v10314_v7 = vld [vmem:[%s14122_s1 + $0x1680] ss:$16 sps:$4 sm:$0xff]   ;;  %v10317_v8 = vld [vmem:[%s14122_s1 + $0x1688] ss:$16 sps:$4 sm:$0xff]  }
 0x29d   : > { %6930 = vmatprep.subr.bf16.mxu0 %v10232_v9  ;;  %7586 = vmatprep.subr.bf16.mxu1 %v10235_v10  ;;  %v10322_v9 = vld [vmem:[%s14122_s1 + $0x16a4] ss:$16 sps:$4 sm:$0xff]   ;;  %v10325_v10 = vld [vmem:[%s14122_s1 + $0x16ac] ss:$16 sps:$4 sm:$0xff]  }
 0x2a0   : > { %6931 = vmatpush1.bf16.msra.mxu0 %v10230_v11  ;;  %7587 = vmatpush1.bf16.msra.mxu1 %v10233_v13  ;;  %v10320_v11 = vld [vmem:[%s14122_s1 + $0x16a0] ss:$16 sps:$4 sm:$0xff]   ;;  %v10323_v13 = vld [vmem:[%s14122_s1 + $0x16a8] ss:$16 sps:$4 sm:$0xff]  }
 0x2a1   : > { %6932 = vmatprep.subr.bf16.mxu0 %v10238_v14  ;;  %7588 = vmatprep.subr.bf16.mxu1 %v10241_v15  ;;  %v10328_v14 = vld [vmem:[%s14122_s1 + $0x16c4] ss:$16 sps:$4 sm:$0xff]   ;;  %v10331_v15 = vld [vmem:[%s14122_s1 + $0x16cc] ss:$16 sps:$4 sm:$0xff]  }
 0x2a4   : > { %6933 = vmatpush1.bf16.msra.mxu0 %v10236_v16  ;;  %7589 = vmatpush1.bf16.msra.mxu1 %v10239_v17  ;;  %v10326_v16 = vld [vmem:[%s14122_s1 + $0x16c0] ss:$16 sps:$4 sm:$0xff]   ;;  %v10329_v17 = vld [vmem:[%s14122_s1 + $0x16c8] ss:$16 sps:$4 sm:$0xff]  }
 0x2a5   : > { %6934 = vmatprep.subr.bf16.mxu0 %v10244_v19  ;;  %7590 = vmatprep.subr.bf16.mxu1 %v10247_v20  ;;  %v10334_v19 = vld [vmem:[%s14122_s1 + $0x16e4] ss:$16 sps:$4 sm:$0xff]   ;;  %v10337_v20 = vld [vmem:[%s14122_s1 + $0x16ec] ss:$16 sps:$4 sm:$0xff]  }
 0x2a8   : > { %6935 = vmatpush1.bf16.msra.mxu0 %v10242_v18  ;;  %7591 = vmatpush1.bf16.msra.mxu1 %v10245_v24  ;;  %v10332_v18 = vld [vmem:[%s14122_s1 + $0x16e0] ss:$16 sps:$4 sm:$0xff]   ;;  %v10335_v24 = vld [vmem:[%s14122_s1 + $0x16e8] ss:$16 sps:$4 sm:$0xff]  }
 0x2a9   : > { %6936 = vmatprep.subr.bf16.mxu0 %v10250_v25  ;;  %7592 = vmatprep.subr.bf16.mxu1 %v10253_v12  ;;  %v10340_v25 = vld [vmem:[%s14122_s1 + $0x1704] ss:$16 sps:$4 sm:$0xff]   ;;  %v10343_v12 = vld [vmem:[%s14122_s1 + $0x170c] ss:$16 sps:$4 sm:$0xff]  }
 0x2ac   : > { %6937 = vmatpush1.bf16.msra.mxu0 %v10248_v27  ;;  %7593 = vmatpush1.bf16.msra.mxu1 %v10251_v28  ;;  %v10338_v27 = vld [vmem:[%s14122_s1 + $0x1700] ss:$16 sps:$4 sm:$0xff]   ;;  %v10341_v28 = vld [vmem:[%s14122_s1 + $0x1708] ss:$16 sps:$4 sm:$0xff]  }
 0x2ad   : > { %6938 = vmatprep.subr.bf16.mxu0 %v10256_v29  ;;  %7594 = vmatprep.subr.bf16.mxu1 %v10259_v21  ;;  %v10346_v29 = vld [vmem:[%s14122_s1 + $0x1724] ss:$16 sps:$4 sm:$0xff]   ;;  %v10349_v21 = vld [vmem:[%s14122_s1 + $0x172c] ss:$16 sps:$4 sm:$0xff]  }
 0x2b0   : > { %6939 = vmatpush1.bf16.msra.mxu0 %v10254_v31  ;;  %7595 = vmatpush1.bf16.msra.mxu1 %v10257_v32  ;;  %v10344_v31 = vld [vmem:[%s14122_s1 + $0x1720] ss:$16 sps:$4 sm:$0xff]   ;;  %v10347_v32 = vld [vmem:[%s14122_s1 + $0x1728] ss:$16 sps:$4 sm:$0xff]  }
 0x2b1   : > { %6940 = vmatprep.subr.bf16.mxu0 %v10262_v33  ;;  %7596 = vmatprep.subr.bf16.mxu1 %v10265_v22  ;;  %v10352_v33 = vld [vmem:[%s14122_s1 + $0x1744] ss:$16 sps:$4 sm:$0xff]   ;;  %v10355_v22 = vld [vmem:[%s14122_s1 + $0x174c] ss:$16 sps:$4 sm:$0xff]  }
 0x2b4   : > { %6941 = vmatpush1.bf16.msra.mxu0 %v10260_v35  ;;  %7597 = vmatpush1.bf16.msra.mxu1 %v10263_v36  ;;  %v10350_v35 = vld [vmem:[%s14122_s1 + $0x1740] ss:$16 sps:$4 sm:$0xff]   ;;  %v10353_v36 = vld [vmem:[%s14122_s1 + $0x1748] ss:$16 sps:$4 sm:$0xff]  }
 0x2b5   : > { %6942 = vmatprep.subr.bf16.mxu0 %v10268_v37  ;;  %7598 = vmatprep.subr.bf16.mxu1 %v10271_v26  ;;  %v10358_v37 = vld [vmem:[%s14122_s1 + $0x1764] ss:$16 sps:$4 sm:$0xff]   ;;  %v10361_v26 = vld [vmem:[%s14122_s1 + $0x176c] ss:$16 sps:$4 sm:$0xff]  }
 0x2b8   : > { %6943 = vmatpush1.bf16.msra.mxu0 %v10266_v39  ;;  %7599 = vmatpush1.bf16.msra.mxu1 %v10269_v40  ;;  %v10356_v39 = vld [vmem:[%s14122_s1 + $0x1760] ss:$16 sps:$4 sm:$0xff]   ;;  %v10359_v40 = vld [vmem:[%s14122_s1 + $0x1768] ss:$16 sps:$4 sm:$0xff]  }
 0x2b9   : > { %6944 = vmatprep.subr.bf16.mxu0 %v10274_v41  ;;  %7600 = vmatprep.subr.bf16.mxu1 %v10277_v30  ;;  %v10364_v41 = vld [vmem:[%s14122_s1 + $0x1784] ss:$16 sps:$4 sm:$0xff]   ;;  %v10367_v30 = vld [vmem:[%s14122_s1 + $0x178c] ss:$16 sps:$4 sm:$0xff]  }
 0x2bc   : > { %6945 = vmatpush1.bf16.msra.mxu0 %v10272_v43  ;;  %7601 = vmatpush1.bf16.msra.mxu1 %v10275_v44  ;;  %v10362_v43 = vld [vmem:[%s14122_s1 + $0x1780] ss:$16 sps:$4 sm:$0xff]   ;;  %v10365_v44 = vld [vmem:[%s14122_s1 + $0x1788] ss:$16 sps:$4 sm:$0xff]  }
 0x2bd   : > { %6946 = vmatprep.subr.bf16.mxu0 %v10280_v45  ;;  %7602 = vmatprep.subr.bf16.mxu1 %v10283_v34  ;;  %v10370_v45 = vld [vmem:[%s14122_s1 + $0x17a4] ss:$16 sps:$4 sm:$0xff]   ;;  %v10373_v34 = vld [vmem:[%s14122_s1 + $0x17ac] ss:$16 sps:$4 sm:$0xff]  }
 0x2c0   : > { %6947 = vmatpush1.bf16.msra.mxu0 %v10278_v47  ;;  %7603 = vmatpush1.bf16.msra.mxu1 %v10281_v48  ;;  %v10368_v47 = vld [vmem:[%s14122_s1 + $0x17a0] ss:$16 sps:$4 sm:$0xff]   ;;  %v10371_v48 = vld [vmem:[%s14122_s1 + $0x17a8] ss:$16 sps:$4 sm:$0xff]  }
 0x2c1   : > { %6948 = vmatprep.subr.bf16.mxu0 %v10286_v50  ;;  %7604 = vmatprep.subr.bf16.mxu1 %v10289_v38  ;;  %v10376_v50 = vld [vmem:[%s14122_s1 + $0x17c4] ss:$16 sps:$4 sm:$0xff]   ;;  %v10379_v38 = vld [vmem:[%s14122_s1 + $0x17cc] ss:$16 sps:$4 sm:$0xff]  }
 0x2c4   : > { %6949 = vmatpush1.bf16.msra.mxu0 %v10284_v53  ;;  %7605 = vmatpush1.bf16.msra.mxu1 %v10287_v54  ;;  %v10377_v53 = vld [vmem:[%s14122_s1 + $0x17c8] ss:$16 sps:$4 sm:$0xff]   ;;  %v10382_v54 = vld [vmem:[%s14122_s1 + $0x17e4] ss:$16 sps:$4 sm:$0xff]  }
 0x2c5   : > { %6959 = vmatprep.subr.bf16.mxu0 %v10292_v42  ;;  %7615 = vmatprep.subr.bf16.mxu1 %v10295_v23  ;;  %v10385_v42 = vld [vmem:[%s14122_s1 + $0x17ec] ss:$16 sps:$4 sm:$0xff]   ;;  %v13259_v23 = vld [vmem:[%s10981_s4 + $0x30] sm:$0xff] }
 0x2c7   : > { %6951 = vmatmul.mubr.bf16.vlgmr.msra.gmra.mrb[0].mxu0 %v12871_v51  ;;  %7607 = vmatmul.mubr.bf16.vlgmr.msra.gmra.mrb[0].mxu1 %v12871_v51  ;;  %v10307_v51 = vld [vmem:[%s14122_s1 + $0x164c] ss:$16 sps:$4 sm:$0xff]  }
 0x2c8   : > { %6960 = vmatpush1.bf16.msra.mxu0 %v10290_v56  ;;  %7616 = vmatpush1.bf16.msra.mxu1 %v10293_v57  ;;  %v10380_v56 = vld [vmem:[%s14122_s1 + $0x17e0] ss:$16 sps:$4 sm:$0xff]   ;;  %v10383_v57 = vld [vmem:[%s14122_s1 + $0x17e8] ss:$16 sps:$4 sm:$0xff]  }
 0x2c9   : > { %6961 = vmatprep.subr.bf16.mxu0 %v10298_v58  ;;  %7617 = vmatprep.subr.bf16.mxu1 %v10301_v46  ;;  %v10389_v58 = vld [vmem:[%s14122_s1 + $0x1804] ss:$16 sps:$4 sm:$0xff]   ;;  %v10392_v46 = vld [vmem:[%s14122_s1 + $0x180c] ss:$16 sps:$4 sm:$0xff]  }
 0x2ca   : > { %6991 = vmatprep.mubr.bf16.mxu0 %v1321_v59  ;;  %7647 = vmatprep.mubr.bf16.mxu1 %v1321_v59  ;;  %v13275_v59 = vrot.slane %v13259_v23, %v10983_v49 }
 0x2cc   : > { %6962 = vmatpush1.bf16.msra.mxu0 %v10296_v60  ;;  %7618 = vmatpush1.bf16.msra.mxu1 %v10299_v61  ;;  %v10387_v60 = vld [vmem:[%s14122_s1 + $0x1800] ss:$16 sps:$4 sm:$0xff]   ;;  %v10390_v61 = vld [vmem:[%s14122_s1 + $0x1808] ss:$16 sps:$4 sm:$0xff]  }
 0x2cd   : > { %6963 = vmatprep.subr.bf16.mxu0 %v10304_v62  ;;  %7619 = vmatprep.subr.bf16.mxu1 %v10307_v51  ;;  %v10395_v62 = vld [vmem:[%s14122_s1 + $0x1824] ss:$16 sps:$4 sm:$0xff]   ;;  %v10398_v51 = vld [vmem:[%s14122_s1 + $0x182c] ss:$16 sps:$4 sm:$0xff]  }
 0x2d0   : > { %6964 = vmatpush1.bf16.msra.mxu0 %v10302_v63  ;;  %7620 = vmatpush1.bf16.msra.mxu1 %v10305_v0  ;;  %v1337_v63 = vcombine.high %v13275_v59, %v13275_v59  ;;  %v10393_v0 = vld [vmem:[%s14122_s1 + $0x1820] ss:$16 sps:$4 sm:$0xff]  }
 0x2d1   : > { %6965 = vmatprep.subr.bf16.mxu0 %v10310_v1  ;;  %7621 = vmatprep.subr.bf16.mxu1 %v10313_v2  ;;  %v10396_v1 = vld [vmem:[%s14122_s1 + $0x1828] ss:$16 sps:$4 sm:$0xff]   ;;  %v10401_v2 = vld [vmem:[%s14122_s1 + $0x1844] ss:$16 sps:$4 sm:$0xff]  }
 0x2d4   : > { %6966 = vmatpush1.bf16.msra.mxu0 %v10308_v3  ;;  %7622 = vmatpush1.bf16.msra.mxu1 %v10311_v4  ;;  %v10399_v3 = vld [vmem:[%s14122_s1 + $0x1840] ss:$16 sps:$4 sm:$0xff]   ;;  %v10402_v4 = vld [vmem:[%s14122_s1 + $0x1848] ss:$16 sps:$4 sm:$0xff]  }
 0x2d5   : > { %6967 = vmatprep.subr.bf16.mxu0 %v10316_v5  ;;  %7623 = vmatprep.subr.bf16.mxu1 %v10319_v6  ;;  %v10407_v5 = vld [vmem:[%s14122_s1 + $0x1864] ss:$16 sps:$4 sm:$0xff]   ;;  %v10410_v6 = vld [vmem:[%s14122_s1 + $0x186c] ss:$16 sps:$4 sm:$0xff]  }
 0x2d8   : > { %6968 = vmatpush1.bf16.msra.mxu0 %v10314_v7  ;;  %7624 = vmatpush1.bf16.msra.mxu1 %v10317_v8  ;;  %v10405_v7 = vld [vmem:[%s14122_s1 + $0x1860] ss:$16 sps:$4 sm:$0xff]   ;;  %v10408_v8 = vld [vmem:[%s14122_s1 + $0x1868] ss:$16 sps:$4 sm:$0xff]  }
 0x2d9   : > { %6969 = vmatprep.subr.bf16.mxu0 %v10322_v9  ;;  %7625 = vmatprep.subr.bf16.mxu1 %v10325_v10  ;;  %v10413_v9 = vld [vmem:[%s14122_s1 + $0x1884] ss:$16 sps:$4 sm:$0xff]   ;;  %v10416_v10 = vld [vmem:[%s14122_s1 + $0x188c] ss:$16 sps:$4 sm:$0xff]  }
 0x2dc   : > { %6970 = vmatpush1.bf16.msra.mxu0 %v10320_v11  ;;  %7626 = vmatpush1.bf16.msra.mxu1 %v10323_v13  ;;  %v10411_v11 = vld [vmem:[%s14122_s1 + $0x1880] ss:$16 sps:$4 sm:$0xff]   ;;  %v10414_v13 = vld [vmem:[%s14122_s1 + $0x1888] ss:$16 sps:$4 sm:$0xff]  }
 0x2dd   : > { %6971 = vmatprep.subr.bf16.mxu0 %v10328_v14  ;;  %7627 = vmatprep.subr.bf16.mxu1 %v10331_v15  ;;  %v10419_v14 = vld [vmem:[%s14122_s1 + $0x18a4] ss:$16 sps:$4 sm:$0xff]   ;;  %v10422_v15 = vld [vmem:[%s14122_s1 + $0x18ac] ss:$16 sps:$4 sm:$0xff]  }
 0x2e0   : > { %6972 = vmatpush1.bf16.msra.mxu0 %v10326_v16  ;;  %7628 = vmatpush1.bf16.msra.mxu1 %v10329_v17  ;;  %v10417_v16 = vld [vmem:[%s14122_s1 + $0x18a0] ss:$16 sps:$4 sm:$0xff]   ;;  %v10420_v17 = vld [vmem:[%s14122_s1 + $0x18a8] ss:$16 sps:$4 sm:$0xff]  }
 0x2e1   : > { %6973 = vmatprep.subr.bf16.mxu0 %v10334_v19  ;;  %7629 = vmatprep.subr.bf16.mxu1 %v10337_v20  ;;  %v10425_v19 = vld [vmem:[%s14122_s1 + $0x18c4] ss:$16 sps:$4 sm:$0xff]   ;;  %v10428_v20 = vld [vmem:[%s14122_s1 + $0x18cc] ss:$16 sps:$4 sm:$0xff]  }
 0x2e4   : > { %6974 = vmatpush1.bf16.msra.mxu0 %v10332_v18  ;;  %7630 = vmatpush1.bf16.msra.mxu1 %v10335_v24  ;;  %v10423_v18 = vld [vmem:[%s14122_s1 + $0x18c0] ss:$16 sps:$4 sm:$0xff]   ;;  %v10426_v24 = vld [vmem:[%s14122_s1 + $0x18c8] ss:$16 sps:$4 sm:$0xff]  }
 0x2e5   : > { %6975 = vmatprep.subr.bf16.mxu0 %v10340_v25  ;;  %7631 = vmatprep.subr.bf16.mxu1 %v10343_v12  ;;  %v10431_v25 = vld [vmem:[%s14122_s1 + $0x18e4] ss:$16 sps:$4 sm:$0xff]   ;;  %v10434_v12 = vld [vmem:[%s14122_s1 + $0x18ec] ss:$16 sps:$4 sm:$0xff]  }
 0x2e8   : > { %6976 = vmatpush1.bf16.msra.mxu0 %v10338_v27  ;;  %7632 = vmatpush1.bf16.msra.mxu1 %v10341_v28  ;;  %v10429_v27 = vld [vmem:[%s14122_s1 + $0x18e0] ss:$16 sps:$4 sm:$0xff]   ;;  %v10432_v28 = vld [vmem:[%s14122_s1 + $0x18e8] ss:$16 sps:$4 sm:$0xff]  }
 0x2e9   : > { %6977 = vmatprep.subr.bf16.mxu0 %v10346_v29  ;;  %7633 = vmatprep.subr.bf16.mxu1 %v10349_v21  ;;  %v10437_v29 = vld [vmem:[%s14122_s1 + $0x1904] ss:$16 sps:$4 sm:$0xff]   ;;  %v10440_v21 = vld [vmem:[%s14122_s1 + $0x190c] ss:$16 sps:$4 sm:$0xff]  }
 0x2ec   : > { %6978 = vmatpush1.bf16.msra.mxu0 %v10344_v31  ;;  %7634 = vmatpush1.bf16.msra.mxu1 %v10347_v32  ;;  %v10435_v31 = vld [vmem:[%s14122_s1 + $0x1900] ss:$16 sps:$4 sm:$0xff]   ;;  %v10438_v32 = vld [vmem:[%s14122_s1 + $0x1908] ss:$16 sps:$4 sm:$0xff]  }
 0x2ed   : > { %6979 = vmatprep.subr.bf16.mxu0 %v10352_v33  ;;  %7635 = vmatprep.subr.bf16.mxu1 %v10355_v22  ;;  %v10443_v33 = vld [vmem:[%s14122_s1 + $0x1924] ss:$16 sps:$4 sm:$0xff]   ;;  %v10446_v22 = vld [vmem:[%s14122_s1 + $0x192c] ss:$16 sps:$4 sm:$0xff]  }
 0x2f0   : > { %6980 = vmatpush1.bf16.msra.mxu0 %v10350_v35  ;;  %7636 = vmatpush1.bf16.msra.mxu1 %v10353_v36  ;;  %v10441_v35 = vld [vmem:[%s14122_s1 + $0x1920] ss:$16 sps:$4 sm:$0xff]   ;;  %v10444_v36 = vld [vmem:[%s14122_s1 + $0x1928] ss:$16 sps:$4 sm:$0xff]  }
 0x2f1   : > { %6981 = vmatprep.subr.bf16.mxu0 %v10358_v37  ;;  %7637 = vmatprep.subr.bf16.mxu1 %v10361_v26  ;;  %v10449_v37 = vld [vmem:[%s14122_s1 + $0x1944] ss:$16 sps:$4 sm:$0xff]   ;;  %v10452_v26 = vld [vmem:[%s14122_s1 + $0x194c] ss:$16 sps:$4 sm:$0xff]  }
 0x2f4   : > { %6982 = vmatpush1.bf16.msra.mxu0 %v10356_v39  ;;  %7638 = vmatpush1.bf16.msra.mxu1 %v10359_v40  ;;  %v10447_v39 = vld [vmem:[%s14122_s1 + $0x1940] ss:$16 sps:$4 sm:$0xff]   ;;  %v10450_v40 = vld [vmem:[%s14122_s1 + $0x1948] ss:$16 sps:$4 sm:$0xff]  }
 0x2f5   : > { %6983 = vmatprep.subr.bf16.mxu0 %v10364_v41  ;;  %7639 = vmatprep.subr.bf16.mxu1 %v10367_v30  ;;  %v10455_v41 = vld [vmem:[%s14122_s1 + $0x1964] ss:$16 sps:$4 sm:$0xff]   ;;  %v10458_v30 = vld [vmem:[%s14122_s1 + $0x196c] ss:$16 sps:$4 sm:$0xff]  }
 0x2f8   : > { %6984 = vmatpush1.bf16.msra.mxu0 %v10362_v43  ;;  %7640 = vmatpush1.bf16.msra.mxu1 %v10365_v44  ;;  %v10453_v43 = vld [vmem:[%s14122_s1 + $0x1960] ss:$16 sps:$4 sm:$0xff]   ;;  %v10456_v44 = vld [vmem:[%s14122_s1 + $0x1968] ss:$16 sps:$4 sm:$0xff]  }
 0x2f9   : > { %6985 = vmatprep.subr.bf16.mxu0 %v10370_v45  ;;  %7641 = vmatprep.subr.bf16.mxu1 %v10373_v34  ;;  %v10461_v45 = vld [vmem:[%s14122_s1 + $0x1984] ss:$16 sps:$4 sm:$0xff]   ;;  %v10464_v34 = vld [vmem:[%s14122_s1 + $0x198c] ss:$16 sps:$4 sm:$0xff]  }
 0x2fc   : > { %6986 = vmatpush1.bf16.msra.mxu0 %v10368_v47  ;;  %7642 = vmatpush1.bf16.msra.mxu1 %v10371_v48  ;;  %v10459_v47 = vld [vmem:[%s14122_s1 + $0x1980] ss:$16 sps:$4 sm:$0xff]   ;;  %v10462_v48 = vld [vmem:[%s14122_s1 + $0x1988] ss:$16 sps:$4 sm:$0xff]  }
 0x2fd   : > { %6987 = vmatprep.subr.bf16.mxu0 %v10376_v50  ;;  %7643 = vmatprep.subr.bf16.mxu1 %v10379_v38  ;;  %v10467_v50 = vld [vmem:[%s14122_s1 + $0x19a4] ss:$16 sps:$4 sm:$0xff]   ;;  %v10470_v38 = vld [vmem:[%s14122_s1 + $0x19ac] ss:$16 sps:$4 sm:$0xff]  }
 0x300   : > { %6988 = vmatpush1.bf16.msra.mxu0 %v10374_v52  ;;  %7644 = vmatpush1.bf16.msra.mxu1 %v10377_v53  ;;  %v10465_v52 = vld [vmem:[%s14122_s1 + $0x19a0] ss:$16 sps:$4 sm:$0xff]   ;;  %v10468_v53 = vld [vmem:[%s14122_s1 + $0x19a8] ss:$16 sps:$4 sm:$0xff]  }
 0x301   : > { %6989 = vmatprep.subr.bf16.mxu0 %v10382_v54  ;;  %7645 = vmatprep.subr.bf16.mxu1 %v10385_v42  ;;  %v10473_v54 = vld [vmem:[%s14122_s1 + $0x19c4] ss:$16 sps:$4 sm:$0xff]   ;;  %v10476_v42 = vld [vmem:[%s14122_s1 + $0x19cc] ss:$16 sps:$4 sm:$0xff]  }
 0x304   : > { %6990 = vmatpush1.bf16.msra.mxu0 %v10380_v56  ;;  %7646 = vmatpush1.bf16.msra.mxu1 %v10383_v57  ;;  %v10471_v56 = vld [vmem:[%s14122_s1 + $0x19c0] ss:$16 sps:$4 sm:$0xff]   ;;  %v10474_v57 = vld [vmem:[%s14122_s1 + $0x19c8] ss:$16 sps:$4 sm:$0xff]  }
 0x305   : > { %7000 = vmatprep.subr.bf16.mxu0 %v10389_v58  ;;  %7656 = vmatprep.subr.bf16.mxu1 %v10392_v46  ;;  %v10479_v58 = vld [vmem:[%s14122_s1 + $0x19e4] ss:$16 sps:$4 sm:$0xff]   ;;  %v10482_v46 = vld [vmem:[%s14122_s1 + $0x19ec] ss:$16 sps:$4 sm:$0xff]  }
 0x307   : > { %6992 = vmatmul.mubr.bf16.vlgmr.msra.gmra.mrb[0].mxu0 %v13072_v55  ;;  %7648 = vmatmul.mubr.bf16.vlgmr.msra.gmra.mrb[0].mxu1 %v13072_v55  ;;  %v10404_v55 = vld [vmem:[%s14122_s1 + $0x184c] ss:$16 sps:$4 sm:$0xff]  }
 0x308   : > { %7001 = vmatpush1.bf16.msra.mxu0 %v10387_v60  ;;  %7657 = vmatpush1.bf16.msra.mxu1 %v10390_v61  ;;  %v1322_v60 = vcombine.high %v13259_v23, %v13259_v23  ;;  %v10477_v61 = vld [vmem:[%s14122_s1 + $0x19e0] ss:$16 sps:$4 sm:$0xff]   ;;  %v10488_v23 = vld [vmem:[%s14122_s1 + $0x1a0c] ss:$16 sps:$4 sm:$0xff]  }
 0x309   : > { %7002 = vmatprep.subr.bf16.mxu0 %v10395_v62  ;;  %7658 = vmatprep.subr.bf16.mxu1 %v10398_v51  ;;  %v10480_v62 = vld [vmem:[%s14122_s1 + $0x19e8] ss:$16 sps:$4 sm:$0xff]   ;;  %v10485_v51 = vld [vmem:[%s14122_s1 + $0x1a04] ss:$16 sps:$4 sm:$0xff]  }
 0x30a   : > { %7032 = vmatprep.mubr.bf16.mxu0 %v1337_v63  ;;  %7688 = vmatprep.mubr.bf16.mxu1 %v1337_v63  ;;  %v13476_v63 = vrot.slane %v1322_v60, %v10983_v49  ;;  %v10567_v60 = vld [vmem:[%s14122_s1 + $0x1bc0] ss:$16 sps:$4 sm:$0xff]  }
 0x30c   : > { %7003 = vmatpush1.bf16.msra.mxu0 %v10393_v0  ;;  %7659 = vmatpush1.bf16.msra.mxu1 %v10396_v1  ;;  %v10483_v0 = vld [vmem:[%s14122_s1 + $0x1a00] ss:$16 sps:$4 sm:$0xff]   ;;  %v10486_v1 = vld [vmem:[%s14122_s1 + $0x1a08] ss:$16 sps:$4 sm:$0xff]  }
 0x30d   : > { %7004 = vmatprep.subr.bf16.mxu0 %v10401_v2  ;;  %7660 = vmatprep.subr.bf16.mxu1 %v10404_v55  ;;  %v10491_v2 = vld [vmem:[%s14122_s1 + $0x1a24] ss:$16 sps:$4 sm:$0xff]   ;;  %v10494_v55 = vld [vmem:[%s14122_s1 + $0x1a2c] ss:$16 sps:$4 sm:$0xff]  }
 0x310   : > { %7005 = vmatpush1.bf16.msra.mxu0 %v10399_v3  ;;  %7661 = vmatpush1.bf16.msra.mxu1 %v10402_v4  ;;  %v1338_v3 = vcombine.high %v13476_v63, %v13476_v63  ;;  %v10489_v4 = vld [vmem:[%s14122_s1 + $0x1a20] ss:$16 sps:$4 sm:$0xff]  }
 0x311   : > { %7006 = vmatprep.subr.bf16.mxu0 %v10407_v5  ;;  %7662 = vmatprep.subr.bf16.mxu1 %v10410_v6  ;;  %v10492_v5 = vld [vmem:[%s14122_s1 + $0x1a28] ss:$16 sps:$4 sm:$0xff]   ;;  %v10497_v6 = vld [vmem:[%s14122_s1 + $0x1a44] ss:$16 sps:$4 sm:$0xff]  }
 0x314   : > { %7007 = vmatpush1.bf16.msra.mxu0 %v10405_v7  ;;  %7663 = vmatpush1.bf16.msra.mxu1 %v10408_v8  ;;  %v10495_v7 = vld [vmem:[%s14122_s1 + $0x1a40] ss:$16 sps:$4 sm:$0xff]   ;;  %v10498_v8 = vld [vmem:[%s14122_s1 + $0x1a48] ss:$16 sps:$4 sm:$0xff]  }
 0x315   : > { %7008 = vmatprep.subr.bf16.mxu0 %v10413_v9  ;;  %7664 = vmatprep.subr.bf16.mxu1 %v10416_v10  ;;  %v10503_v9 = vld [vmem:[%s14122_s1 + $0x1a64] ss:$16 sps:$4 sm:$0xff]   ;;  %v10506_v10 = vld [vmem:[%s14122_s1 + $0x1a6c] ss:$16 sps:$4 sm:$0xff]  }
 0x318   : > { %7009 = vmatpush1.bf16.msra.mxu0 %v10411_v11  ;;  %7665 = vmatpush1.bf16.msra.mxu1 %v10414_v13  ;;  %v10501_v11 = vld [vmem:[%s14122_s1 + $0x1a60] ss:$16 sps:$4 sm:$0xff]   ;;  %v10504_v13 = vld [vmem:[%s14122_s1 + $0x1a68] ss:$16 sps:$4 sm:$0xff]  }
 0x319   : > { %7010 = vmatprep.subr.bf16.mxu0 %v10419_v14  ;;  %7666 = vmatprep.subr.bf16.mxu1 %v10422_v15  ;;  %v10509_v14 = vld [vmem:[%s14122_s1 + $0x1a84] ss:$16 sps:$4 sm:$0xff]   ;;  %v10512_v15 = vld [vmem:[%s14122_s1 + $0x1a8c] ss:$16 sps:$4 sm:$0xff]  }
 0x31c   : > { %7011 = vmatpush1.bf16.msra.mxu0 %v10417_v16  ;;  %7667 = vmatpush1.bf16.msra.mxu1 %v10420_v17  ;;  %v10507_v16 = vld [vmem:[%s14122_s1 + $0x1a80] ss:$16 sps:$4 sm:$0xff]   ;;  %v10510_v17 = vld [vmem:[%s14122_s1 + $0x1a88] ss:$16 sps:$4 sm:$0xff]  }
 0x31d   : > { %7012 = vmatprep.subr.bf16.mxu0 %v10425_v19  ;;  %7668 = vmatprep.subr.bf16.mxu1 %v10428_v20  ;;  %v10515_v19 = vld [vmem:[%s14122_s1 + $0x1aa4] ss:$16 sps:$4 sm:$0xff]   ;;  %v10518_v20 = vld [vmem:[%s14122_s1 + $0x1aac] ss:$16 sps:$4 sm:$0xff]  }
 0x320   : > { %7013 = vmatpush1.bf16.msra.mxu0 %v10423_v18  ;;  %7669 = vmatpush1.bf16.msra.mxu1 %v10426_v24  ;;  %v10513_v18 = vld [vmem:[%s14122_s1 + $0x1aa0] ss:$16 sps:$4 sm:$0xff]   ;;  %v10516_v24 = vld [vmem:[%s14122_s1 + $0x1aa8] ss:$16 sps:$4 sm:$0xff]  }
 0x321   : > { %7014 = vmatprep.subr.bf16.mxu0 %v10431_v25  ;;  %7670 = vmatprep.subr.bf16.mxu1 %v10434_v12  ;;  %v10521_v25 = vld [vmem:[%s14122_s1 + $0x1ac4] ss:$16 sps:$4 sm:$0xff]   ;;  %v10524_v12 = vld [vmem:[%s14122_s1 + $0x1acc] ss:$16 sps:$4 sm:$0xff]  }
 0x324   : > { %7015 = vmatpush1.bf16.msra.mxu0 %v10429_v27  ;;  %7671 = vmatpush1.bf16.msra.mxu1 %v10432_v28  ;;  %v10519_v27 = vld [vmem:[%s14122_s1 + $0x1ac0] ss:$16 sps:$4 sm:$0xff]   ;;  %v10522_v28 = vld [vmem:[%s14122_s1 + $0x1ac8] ss:$16 sps:$4 sm:$0xff]  }
 0x325   : > { %7016 = vmatprep.subr.bf16.mxu0 %v10437_v29  ;;  %7672 = vmatprep.subr.bf16.mxu1 %v10440_v21  ;;  %v10527_v29 = vld [vmem:[%s14122_s1 + $0x1ae4] ss:$16 sps:$4 sm:$0xff]   ;;  %v10530_v21 = vld [vmem:[%s14122_s1 + $0x1aec] ss:$16 sps:$4 sm:$0xff]  }
 0x328   : > { %7017 = vmatpush1.bf16.msra.mxu0 %v10435_v31  ;;  %7673 = vmatpush1.bf16.msra.mxu1 %v10438_v32  ;;  %v10525_v31 = vld [vmem:[%s14122_s1 + $0x1ae0] ss:$16 sps:$4 sm:$0xff]   ;;  %v10528_v32 = vld [vmem:[%s14122_s1 + $0x1ae8] ss:$16 sps:$4 sm:$0xff]  }
 0x329   : > { %7018 = vmatprep.subr.bf16.mxu0 %v10443_v33  ;;  %7674 = vmatprep.subr.bf16.mxu1 %v10446_v22  ;;  %v10533_v33 = vld [vmem:[%s14122_s1 + $0x1b04] ss:$16 sps:$4 sm:$0xff]   ;;  %v10536_v22 = vld [vmem:[%s14122_s1 + $0x1b0c] ss:$16 sps:$4 sm:$0xff]  }
 0x32c   : > { %7019 = vmatpush1.bf16.msra.mxu0 %v10441_v35  ;;  %7675 = vmatpush1.bf16.msra.mxu1 %v10444_v36  ;;  %v10531_v35 = vld [vmem:[%s14122_s1 + $0x1b00] ss:$16 sps:$4 sm:$0xff]   ;;  %v10534_v36 = vld [vmem:[%s14122_s1 + $0x1b08] ss:$16 sps:$4 sm:$0xff]  }
 0x32d   : > { %7020 = vmatprep.subr.bf16.mxu0 %v10449_v37  ;;  %7676 = vmatprep.subr.bf16.mxu1 %v10452_v26  ;;  %v10539_v37 = vld [vmem:[%s14122_s1 + $0x1b24] ss:$16 sps:$4 sm:$0xff]   ;;  %v10542_v26 = vld [vmem:[%s14122_s1 + $0x1b2c] ss:$16 sps:$4 sm:$0xff]  }
 0x330   : > { %7021 = vmatpush1.bf16.msra.mxu0 %v10447_v39  ;;  %7677 = vmatpush1.bf16.msra.mxu1 %v10450_v40  ;;  %v10537_v39 = vld [vmem:[%s14122_s1 + $0x1b20] ss:$16 sps:$4 sm:$0xff]   ;;  %v10540_v40 = vld [vmem:[%s14122_s1 + $0x1b28] ss:$16 sps:$4 sm:$0xff]  }
 0x331   : > { %7022 = vmatprep.subr.bf16.mxu0 %v10455_v41  ;;  %7678 = vmatprep.subr.bf16.mxu1 %v10458_v30  ;;  %v10545_v41 = vld [vmem:[%s14122_s1 + $0x1b44] ss:$16 sps:$4 sm:$0xff]   ;;  %v10548_v30 = vld [vmem:[%s14122_s1 + $0x1b4c] ss:$16 sps:$4 sm:$0xff]  }
 0x334   : > { %7023 = vmatpush1.bf16.msra.mxu0 %v10453_v43  ;;  %7679 = vmatpush1.bf16.msra.mxu1 %v10456_v44  ;;  %v10543_v43 = vld [vmem:[%s14122_s1 + $0x1b40] ss:$16 sps:$4 sm:$0xff]   ;;  %v10546_v44 = vld [vmem:[%s14122_s1 + $0x1b48] ss:$16 sps:$4 sm:$0xff]  }
 0x335   : > { %7024 = vmatprep.subr.bf16.mxu0 %v10461_v45  ;;  %7680 = vmatprep.subr.bf16.mxu1 %v10464_v34  ;;  %v10551_v45 = vld [vmem:[%s14122_s1 + $0x1b64] ss:$16 sps:$4 sm:$0xff]   ;;  %v10554_v34 = vld [vmem:[%s14122_s1 + $0x1b6c] ss:$16 sps:$4 sm:$0xff]  }
 0x338   : > { %7025 = vmatpush1.bf16.msra.mxu0 %v10459_v47  ;;  %7681 = vmatpush1.bf16.msra.mxu1 %v10462_v48  ;;  %v10549_v47 = vld [vmem:[%s14122_s1 + $0x1b60] ss:$16 sps:$4 sm:$0xff]   ;;  %v10552_v48 = vld [vmem:[%s14122_s1 + $0x1b68] ss:$16 sps:$4 sm:$0xff]  }
 0x339   : > { %7026 = vmatprep.subr.bf16.mxu0 %v10467_v50  ;;  %7682 = vmatprep.subr.bf16.mxu1 %v10470_v38  ;;  %v10557_v50 = vld [vmem:[%s14122_s1 + $0x1b84] ss:$16 sps:$4 sm:$0xff]   ;;  %v10560_v38 = vld [vmem:[%s14122_s1 + $0x1b8c] ss:$16 sps:$4 sm:$0xff]  }
 0x33c   : > { %7027 = vmatpush1.bf16.msra.mxu0 %v10465_v52  ;;  %7683 = vmatpush1.bf16.msra.mxu1 %v10468_v53  ;;  %v10555_v52 = vld [vmem:[%s14122_s1 + $0x1b80] ss:$16 sps:$4 sm:$0xff]   ;;  %v10558_v53 = vld [vmem:[%s14122_s1 + $0x1b88] ss:$16 sps:$4 sm:$0xff]  }
 0x33d   : > { %7028 = vmatprep.subr.bf16.mxu0 %v10473_v54  ;;  %7684 = vmatprep.subr.bf16.mxu1 %v10476_v42  ;;  %v10563_v54 = vld [vmem:[%s14122_s1 + $0x1ba4] ss:$16 sps:$4 sm:$0xff]   ;;  %v10566_v42 = vld [vmem:[%s14122_s1 + $0x1bac] ss:$16 sps:$4 sm:$0xff]  }
 0x340   : > { %7029 = vmatpush1.bf16.msra.mxu0 %v10471_v56  ;;  %7685 = vmatpush1.bf16.msra.mxu1 %v10474_v57  ;;  %v10561_v56 = vld [vmem:[%s14122_s1 + $0x1ba0] ss:$16 sps:$4 sm:$0xff]   ;;  %v10564_v57 = vld [vmem:[%s14122_s1 + $0x1ba8] ss:$16 sps:$4 sm:$0xff]  }
 0x341   : > { %7030 = vmatprep.subr.bf16.mxu0 %v10479_v58  ;;  %7686 = vmatprep.subr.bf16.mxu1 %v10482_v46  ;;  %v10569_v58 = vld [vmem:[%s14122_s1 + $0x1bc4] ss:$16 sps:$4 sm:$0xff]   ;;  %v10572_v46 = vld [vmem:[%s14122_s1 + $0x1bcc] ss:$16 sps:$4 sm:$0xff]  }
 0x344   : > { %7031 = vmatpush1.bf16.msra.mxu0 %v10477_v61  ;;  %7687 = vmatpush1.bf16.msra.mxu1 %v10480_v62  ;;  %v10570_v61 = vld [vmem:[%s14122_s1 + $0x1bc8] ss:$16 sps:$4 sm:$0xff]   ;;  %v10575_v62 = vld [vmem:[%s14122_s1 + $0x1be4] ss:$16 sps:$4 sm:$0xff]  }
 0x345   : > { %7041 = vmatprep.subr.bf16.mxu0 %v10485_v51  ;;  %7697 = vmatprep.subr.bf16.mxu1 %v10488_v23  ;;  %v10578_v51 = vld [vmem:[%s14122_s1 + $0x1bec] ss:$16 sps:$4 sm:$0xff]  }
 0x346   : > { %v13663_v23 = vld [vmem:[%s10981_s4 + $0x38] sm:$0xff] }
 0x347   : > { %7033 = vmatmul.mubr.bf16.vlgmr.msra.gmra.mrb[0].mxu0 %v13275_v59  ;;  %7689 = vmatmul.mubr.bf16.vlgmr.msra.gmra.mrb[0].mxu1 %v13275_v59  ;;  %v10500_v59 = vld [vmem:[%s14122_s1 + $0x1a4c] ss:$16 sps:$4 sm:$0xff]  }
 0x348   : > { %7042 = vmatpush1.bf16.msra.mxu0 %v10483_v0  ;;  %7698 = vmatpush1.bf16.msra.mxu1 %v10486_v1  ;;  %v10573_v0 = vld [vmem:[%s14122_s1 + $0x1be0] ss:$16 sps:$4 sm:$0xff]   ;;  %v10576_v1 = vld [vmem:[%s14122_s1 + $0x1be8] ss:$16 sps:$4 sm:$0xff]  }
 0x349   : > { %7043 = vmatprep.subr.bf16.mxu0 %v10491_v2  ;;  %7699 = vmatprep.subr.bf16.mxu1 %v10494_v55  ;;  %v10582_v2 = vld [vmem:[%s14122_s1 + $0x1c04] ss:$16 sps:$4 sm:$0xff]   ;;  %v10585_v55 = vld [vmem:[%s14122_s1 + $0x1c0c] ss:$16 sps:$4 sm:$0xff]  }
 0x34a   : > { %7073 = vmatprep.mubr.bf16.mxu0 %v1338_v3  ;;  %7729 = vmatprep.mubr.bf16.mxu1 %v1338_v3  ;;  %v13679_v3 = vrot.slane %v13663_v23, %v10983_v49 }
 0x34c   : > { %7044 = vmatpush1.bf16.msra.mxu0 %v10489_v4  ;;  %7700 = vmatpush1.bf16.msra.mxu1 %v10492_v5  ;;  %v10580_v4 = vld [vmem:[%s14122_s1 + $0x1c00] ss:$16 sps:$4 sm:$0xff]   ;;  %v10583_v5 = vld [vmem:[%s14122_s1 + $0x1c08] ss:$16 sps:$4 sm:$0xff]  }
 0x34d   : > { %7045 = vmatprep.subr.bf16.mxu0 %v10497_v6  ;;  %7701 = vmatprep.subr.bf16.mxu1 %v10500_v59  ;;  %v10588_v6 = vld [vmem:[%s14122_s1 + $0x1c24] ss:$16 sps:$4 sm:$0xff]   ;;  %v10591_v59 = vld [vmem:[%s14122_s1 + $0x1c2c] ss:$16 sps:$4 sm:$0xff]  }
 0x350   : > { %7046 = vmatpush1.bf16.msra.mxu0 %v10495_v7  ;;  %7702 = vmatpush1.bf16.msra.mxu1 %v10498_v8  ;;  %v1354_v7 = vcombine.high %v13679_v3, %v13679_v3  ;;  %v10586_v8 = vld [vmem:[%s14122_s1 + $0x1c20] ss:$16 sps:$4 sm:$0xff]  }
 0x351   : > { %7047 = vmatprep.subr.bf16.mxu0 %v10503_v9  ;;  %7703 = vmatprep.subr.bf16.mxu1 %v10506_v10  ;;  %v10589_v9 = vld [vmem:[%s14122_s1 + $0x1c28] ss:$16 sps:$4 sm:$0xff]   ;;  %v10594_v10 = vld [vmem:[%s14122_s1 + $0x1c44] ss:$16 sps:$4 sm:$0xff]  }
 0x354   : > { %7048 = vmatpush1.bf16.msra.mxu0 %v10501_v11  ;;  %7704 = vmatpush1.bf16.msra.mxu1 %v10504_v13  ;;  %v10592_v11 = vld [vmem:[%s14122_s1 + $0x1c40] ss:$16 sps:$4 sm:$0xff]   ;;  %v10595_v13 = vld [vmem:[%s14122_s1 + $0x1c48] ss:$16 sps:$4 sm:$0xff]  }
 0x355   : > { %7049 = vmatprep.subr.bf16.mxu0 %v10509_v14  ;;  %7705 = vmatprep.subr.bf16.mxu1 %v10512_v15  ;;  %v10600_v14 = vld [vmem:[%s14122_s1 + $0x1c64] ss:$16 sps:$4 sm:$0xff]   ;;  %v10603_v15 = vld [vmem:[%s14122_s1 + $0x1c6c] ss:$16 sps:$4 sm:$0xff]  }
 0x358   : > { %7050 = vmatpush1.bf16.msra.mxu0 %v10507_v16  ;;  %7706 = vmatpush1.bf16.msra.mxu1 %v10510_v17  ;;  %v10598_v16 = vld [vmem:[%s14122_s1 + $0x1c60] ss:$16 sps:$4 sm:$0xff]   ;;  %v10601_v17 = vld [vmem:[%s14122_s1 + $0x1c68] ss:$16 sps:$4 sm:$0xff]  }
 0x359   : > { %7051 = vmatprep.subr.bf16.mxu0 %v10515_v19  ;;  %7707 = vmatprep.subr.bf16.mxu1 %v10518_v20  ;;  %v10606_v19 = vld [vmem:[%s14122_s1 + $0x1c84] ss:$16 sps:$4 sm:$0xff]   ;;  %v10609_v20 = vld [vmem:[%s14122_s1 + $0x1c8c] ss:$16 sps:$4 sm:$0xff]  }
 0x35c   : > { %7052 = vmatpush1.bf16.msra.mxu0 %v10513_v18  ;;  %7708 = vmatpush1.bf16.msra.mxu1 %v10516_v24  ;;  %v10604_v18 = vld [vmem:[%s14122_s1 + $0x1c80] ss:$16 sps:$4 sm:$0xff]   ;;  %v10607_v24 = vld [vmem:[%s14122_s1 + $0x1c88] ss:$16 sps:$4 sm:$0xff]  }
 0x35d   : > { %7053 = vmatprep.subr.bf16.mxu0 %v10521_v25  ;;  %7709 = vmatprep.subr.bf16.mxu1 %v10524_v12  ;;  %v10612_v25 = vld [vmem:[%s14122_s1 + $0x1ca4] ss:$16 sps:$4 sm:$0xff]   ;;  %v10615_v12 = vld [vmem:[%s14122_s1 + $0x1cac] ss:$16 sps:$4 sm:$0xff]  }
 0x360   : > { %7054 = vmatpush1.bf16.msra.mxu0 %v10519_v27  ;;  %7710 = vmatpush1.bf16.msra.mxu1 %v10522_v28  ;;  %v10610_v27 = vld [vmem:[%s14122_s1 + $0x1ca0] ss:$16 sps:$4 sm:$0xff]   ;;  %v10613_v28 = vld [vmem:[%s14122_s1 + $0x1ca8] ss:$16 sps:$4 sm:$0xff]  }
 0x361   : > { %7055 = vmatprep.subr.bf16.mxu0 %v10527_v29  ;;  %7711 = vmatprep.subr.bf16.mxu1 %v10530_v21  ;;  %v10618_v29 = vld [vmem:[%s14122_s1 + $0x1cc4] ss:$16 sps:$4 sm:$0xff]   ;;  %v10621_v21 = vld [vmem:[%s14122_s1 + $0x1ccc] ss:$16 sps:$4 sm:$0xff]  }
 0x364   : > { %7056 = vmatpush1.bf16.msra.mxu0 %v10525_v31  ;;  %7712 = vmatpush1.bf16.msra.mxu1 %v10528_v32  ;;  %v10616_v31 = vld [vmem:[%s14122_s1 + $0x1cc0] ss:$16 sps:$4 sm:$0xff]   ;;  %v10619_v32 = vld [vmem:[%s14122_s1 + $0x1cc8] ss:$16 sps:$4 sm:$0xff]  }
 0x365   : > { %7057 = vmatprep.subr.bf16.mxu0 %v10533_v33  ;;  %7713 = vmatprep.subr.bf16.mxu1 %v10536_v22  ;;  %v10624_v33 = vld [vmem:[%s14122_s1 + $0x1ce4] ss:$16 sps:$4 sm:$0xff]   ;;  %v10627_v22 = vld [vmem:[%s14122_s1 + $0x1cec] ss:$16 sps:$4 sm:$0xff]  }
 0x368   : > { %7058 = vmatpush1.bf16.msra.mxu0 %v10531_v35  ;;  %7714 = vmatpush1.bf16.msra.mxu1 %v10534_v36  ;;  %v10622_v35 = vld [vmem:[%s14122_s1 + $0x1ce0] ss:$16 sps:$4 sm:$0xff]   ;;  %v10625_v36 = vld [vmem:[%s14122_s1 + $0x1ce8] ss:$16 sps:$4 sm:$0xff]  }
 0x369   : > { %7059 = vmatprep.subr.bf16.mxu0 %v10539_v37  ;;  %7715 = vmatprep.subr.bf16.mxu1 %v10542_v26  ;;  %v10630_v37 = vld [vmem:[%s14122_s1 + $0x1d04] ss:$16 sps:$4 sm:$0xff]   ;;  %v10633_v26 = vld [vmem:[%s14122_s1 + $0x1d0c] ss:$16 sps:$4 sm:$0xff]  }
 0x36c   : > { %7060 = vmatpush1.bf16.msra.mxu0 %v10537_v39  ;;  %7716 = vmatpush1.bf16.msra.mxu1 %v10540_v40  ;;  %v10628_v39 = vld [vmem:[%s14122_s1 + $0x1d00] ss:$16 sps:$4 sm:$0xff]   ;;  %v10631_v40 = vld [vmem:[%s14122_s1 + $0x1d08] ss:$16 sps:$4 sm:$0xff]  }
 0x36d   : > { %7061 = vmatprep.subr.bf16.mxu0 %v10545_v41  ;;  %7717 = vmatprep.subr.bf16.mxu1 %v10548_v30  ;;  %v10636_v41 = vld [vmem:[%s14122_s1 + $0x1d24] ss:$16 sps:$4 sm:$0xff]   ;;  %v10639_v30 = vld [vmem:[%s14122_s1 + $0x1d2c] ss:$16 sps:$4 sm:$0xff]  }
 0x370   : > { %7062 = vmatpush1.bf16.msra.mxu0 %v10543_v43  ;;  %7718 = vmatpush1.bf16.msra.mxu1 %v10546_v44  ;;  %v10634_v43 = vld [vmem:[%s14122_s1 + $0x1d20] ss:$16 sps:$4 sm:$0xff]   ;;  %v10637_v44 = vld [vmem:[%s14122_s1 + $0x1d28] ss:$16 sps:$4 sm:$0xff]  }
 0x371   : > { %7063 = vmatprep.subr.bf16.mxu0 %v10551_v45  ;;  %7719 = vmatprep.subr.bf16.mxu1 %v10554_v34  ;;  %v10642_v45 = vld [vmem:[%s14122_s1 + $0x1d44] ss:$16 sps:$4 sm:$0xff]   ;;  %v10645_v34 = vld [vmem:[%s14122_s1 + $0x1d4c] ss:$16 sps:$4 sm:$0xff]  }
 0x374   : > { %7064 = vmatpush1.bf16.msra.mxu0 %v10549_v47  ;;  %7720 = vmatpush1.bf16.msra.mxu1 %v10552_v48  ;;  %v10640_v47 = vld [vmem:[%s14122_s1 + $0x1d40] ss:$16 sps:$4 sm:$0xff]   ;;  %v10643_v48 = vld [vmem:[%s14122_s1 + $0x1d48] ss:$16 sps:$4 sm:$0xff]  }
 0x375   : > { %7065 = vmatprep.subr.bf16.mxu0 %v10557_v50  ;;  %7721 = vmatprep.subr.bf16.mxu1 %v10560_v38  ;;  %v10648_v50 = vld [vmem:[%s14122_s1 + $0x1d64] ss:$16 sps:$4 sm:$0xff]   ;;  %v10651_v38 = vld [vmem:[%s14122_s1 + $0x1d6c] ss:$16 sps:$4 sm:$0xff]  }
 0x378   : > { %7066 = vmatpush1.bf16.msra.mxu0 %v10555_v52  ;;  %7722 = vmatpush1.bf16.msra.mxu1 %v10558_v53  ;;  %v10646_v52 = vld [vmem:[%s14122_s1 + $0x1d60] ss:$16 sps:$4 sm:$0xff]   ;;  %v10649_v53 = vld [vmem:[%s14122_s1 + $0x1d68] ss:$16 sps:$4 sm:$0xff]  }
 0x379   : > { %7067 = vmatprep.subr.bf16.mxu0 %v10563_v54  ;;  %7723 = vmatprep.subr.bf16.mxu1 %v10566_v42  ;;  %v10654_v54 = vld [vmem:[%s14122_s1 + $0x1d84] ss:$16 sps:$4 sm:$0xff]   ;;  %v10657_v42 = vld [vmem:[%s14122_s1 + $0x1d8c] ss:$16 sps:$4 sm:$0xff]  }
 0x37c   : > { %7068 = vmatpush1.bf16.msra.mxu0 %v10561_v56  ;;  %7724 = vmatpush1.bf16.msra.mxu1 %v10564_v57  ;;  %v10652_v56 = vld [vmem:[%s14122_s1 + $0x1d80] ss:$16 sps:$4 sm:$0xff]   ;;  %v10655_v57 = vld [vmem:[%s14122_s1 + $0x1d88] ss:$16 sps:$4 sm:$0xff]  }
 0x37d   : > { %7069 = vmatprep.subr.bf16.mxu0 %v10569_v58  ;;  %7725 = vmatprep.subr.bf16.mxu1 %v10572_v46  ;;  %v10660_v58 = vld [vmem:[%s14122_s1 + $0x1da4] ss:$16 sps:$4 sm:$0xff]   ;;  %v10663_v46 = vld [vmem:[%s14122_s1 + $0x1dac] ss:$16 sps:$4 sm:$0xff]  }
 0x380   : > { %7070 = vmatpush1.bf16.msra.mxu0 %v10567_v60  ;;  %7726 = vmatpush1.bf16.msra.mxu1 %v10570_v61  ;;  %v10658_v60 = vld [vmem:[%s14122_s1 + $0x1da0] ss:$16 sps:$4 sm:$0xff]   ;;  %v10661_v61 = vld [vmem:[%s14122_s1 + $0x1da8] ss:$16 sps:$4 sm:$0xff]  }
 0x381   : > { %7071 = vmatprep.subr.bf16.mxu0 %v10575_v62  ;;  %7727 = vmatprep.subr.bf16.mxu1 %v10578_v51  ;;  %v10666_v62 = vld [vmem:[%s14122_s1 + $0x1dc4] ss:$16 sps:$4 sm:$0xff]   ;;  %v10669_v51 = vld [vmem:[%s14122_s1 + $0x1dcc] ss:$16 sps:$4 sm:$0xff]  }
 0x384   : > { %7072 = vmatpush1.bf16.msra.mxu0 %v10573_v0  ;;  %7728 = vmatpush1.bf16.msra.mxu1 %v10576_v1  ;;  %v10664_v0 = vld [vmem:[%s14122_s1 + $0x1dc0] ss:$16 sps:$4 sm:$0xff]   ;;  %v10667_v1 = vld [vmem:[%s14122_s1 + $0x1dc8] ss:$16 sps:$4 sm:$0xff]  }
 0x385   : > { %7082 = vmatprep.subr.bf16.mxu0 %v10582_v2  ;;  %7738 = vmatprep.subr.bf16.mxu1 %v10585_v55  ;;  %v10672_v2 = vld [vmem:[%s14122_s1 + $0x1de4] ss:$16 sps:$4 sm:$0xff]   ;;  %v10675_v55 = vld [vmem:[%s14122_s1 + $0x1dec] ss:$16 sps:$4 sm:$0xff]  }
 0x387   : > { %7074 = vmatmul.mubr.bf16.vlgmr.msra.gmra.mrb[0].mxu0 %v13476_v63  ;;  %7730 = vmatmul.mubr.bf16.vlgmr.msra.gmra.mrb[0].mxu1 %v13476_v63  ;;  %v10597_v63 = vld [vmem:[%s14122_s1 + $0x1c4c] ss:$16 sps:$4 sm:$0xff]  }
 0x388   : > { %7083 = vmatpush1.bf16.msra.mxu0 %v10580_v4  ;;  %7739 = vmatpush1.bf16.msra.mxu1 %v10583_v5  ;;  %v1339_v4 = vcombine.high %v13663_v23, %v13663_v23  ;;  %v10670_v5 = vld [vmem:[%s14122_s1 + $0x1de0] ss:$16 sps:$4 sm:$0xff]   ;;  %v10681_v23 = vld [vmem:[%s14122_s1 + $0x1e0c] ss:$16 sps:$4 sm:$0xff]  }
 0x389   : > { %7084 = vmatprep.subr.bf16.mxu0 %v10588_v6  ;;  %7740 = vmatprep.subr.bf16.mxu1 %v10591_v59  ;;  %v10673_v6 = vld [vmem:[%s14122_s1 + $0x1de8] ss:$16 sps:$4 sm:$0xff]   ;;  %v10678_v59 = vld [vmem:[%s14122_s1 + $0x1e04] ss:$16 sps:$4 sm:$0xff]  }
 0x38a   : > { %7114 = vmatprep.mubr.bf16.mxu0 %v1354_v7  ;;  %7770 = vmatprep.mubr.bf16.mxu1 %v1354_v7  ;;  %v13880_v7 = vrot.slane %v1339_v4, %v10983_v49  ;;  %v10760_v4 = vld [vmem:[%s14122_s1 + $0x1fc0] ss:$16 sps:$4 sm:$0xff]  }
 0x38c   : > { %7085 = vmatpush1.bf16.msra.mxu0 %v10586_v8  ;;  %7741 = vmatpush1.bf16.msra.mxu1 %v10589_v9  ;;  %v10676_v8 = vld [vmem:[%s14122_s1 + $0x1e00] ss:$16 sps:$4 sm:$0xff]   ;;  %v10679_v9 = vld [vmem:[%s14122_s1 + $0x1e08] ss:$16 sps:$4 sm:$0xff]  }
 0x38d   : > { %7086 = vmatprep.subr.bf16.mxu0 %v10594_v10  ;;  %7742 = vmatprep.subr.bf16.mxu1 %v10597_v63  ;;  %v10684_v10 = vld [vmem:[%s14122_s1 + $0x1e24] ss:$16 sps:$4 sm:$0xff]   ;;  %v10687_v63 = vld [vmem:[%s14122_s1 + $0x1e2c] ss:$16 sps:$4 sm:$0xff]  }
 0x390   : > { %7087 = vmatpush1.bf16.msra.mxu0 %v10592_v11  ;;  %7743 = vmatpush1.bf16.msra.mxu1 %v10595_v13  ;;  %v1355_v11 = vcombine.high %v13880_v7, %v13880_v7  ;;  %v10682_v13 = vld [vmem:[%s14122_s1 + $0x1e20] ss:$16 sps:$4 sm:$0xff]  }
 0x391   : > { %7088 = vmatprep.subr.bf16.mxu0 %v10600_v14  ;;  %7744 = vmatprep.subr.bf16.mxu1 %v10603_v15  ;;  %v10685_v14 = vld [vmem:[%s14122_s1 + $0x1e28] ss:$16 sps:$4 sm:$0xff]   ;;  %v10690_v15 = vld [vmem:[%s14122_s1 + $0x1e44] ss:$16 sps:$4 sm:$0xff]  }
 0x394   : > { %7089 = vmatpush1.bf16.msra.mxu0 %v10598_v16  ;;  %7745 = vmatpush1.bf16.msra.mxu1 %v10601_v17  ;;  %v10688_v16 = vld [vmem:[%s14122_s1 + $0x1e40] ss:$16 sps:$4 sm:$0xff]   ;;  %v10691_v17 = vld [vmem:[%s14122_s1 + $0x1e48] ss:$16 sps:$4 sm:$0xff]  }
 0x395   : > { %7090 = vmatprep.subr.bf16.mxu0 %v10606_v19  ;;  %7746 = vmatprep.subr.bf16.mxu1 %v10609_v20  ;;  %v10696_v19 = vld [vmem:[%s14122_s1 + $0x1e64] ss:$16 sps:$4 sm:$0xff]   ;;  %v10699_v20 = vld [vmem:[%s14122_s1 + $0x1e6c] ss:$16 sps:$4 sm:$0xff]  }
 0x398   : > { %7091 = vmatpush1.bf16.msra.mxu0 %v10604_v18  ;;  %7747 = vmatpush1.bf16.msra.mxu1 %v10607_v24  ;;  %v10694_v18 = vld [vmem:[%s14122_s1 + $0x1e60] ss:$16 sps:$4 sm:$0xff]   ;;  %v10697_v24 = vld [vmem:[%s14122_s1 + $0x1e68] ss:$16 sps:$4 sm:$0xff]  }
 0x399   : > { %7092 = vmatprep.subr.bf16.mxu0 %v10612_v25  ;;  %7748 = vmatprep.subr.bf16.mxu1 %v10615_v12  ;;  %v10702_v25 = vld [vmem:[%s14122_s1 + $0x1e84] ss:$16 sps:$4 sm:$0xff]   ;;  %v10705_v12 = vld [vmem:[%s14122_s1 + $0x1e8c] ss:$16 sps:$4 sm:$0xff]  }
 0x39c   : > { %7093 = vmatpush1.bf16.msra.mxu0 %v10610_v27  ;;  %7749 = vmatpush1.bf16.msra.mxu1 %v10613_v28  ;;  %v10700_v27 = vld [vmem:[%s14122_s1 + $0x1e80] ss:$16 sps:$4 sm:$0xff]   ;;  %v10703_v28 = vld [vmem:[%s14122_s1 + $0x1e88] ss:$16 sps:$4 sm:$0xff]  }
 0x39d   : > { %7094 = vmatprep.subr.bf16.mxu0 %v10618_v29  ;;  %7750 = vmatprep.subr.bf16.mxu1 %v10621_v21  ;;  %v10708_v29 = vld [vmem:[%s14122_s1 + $0x1ea4] ss:$16 sps:$4 sm:$0xff]   ;;  %v10711_v21 = vld [vmem:[%s14122_s1 + $0x1eac] ss:$16 sps:$4 sm:$0xff]  }
 0x3a0   : > { %7095 = vmatpush1.bf16.msra.mxu0 %v10616_v31  ;;  %7751 = vmatpush1.bf16.msra.mxu1 %v10619_v32  ;;  %v10706_v31 = vld [vmem:[%s14122_s1 + $0x1ea0] ss:$16 sps:$4 sm:$0xff]   ;;  %v10709_v32 = vld [vmem:[%s14122_s1 + $0x1ea8] ss:$16 sps:$4 sm:$0xff]  }
 0x3a1   : > { %7096 = vmatprep.subr.bf16.mxu0 %v10624_v33  ;;  %7752 = vmatprep.subr.bf16.mxu1 %v10627_v22  ;;  %v10714_v33 = vld [vmem:[%s14122_s1 + $0x1ec4] ss:$16 sps:$4 sm:$0xff]   ;;  %v10717_v22 = vld [vmem:[%s14122_s1 + $0x1ecc] ss:$16 sps:$4 sm:$0xff]  }
 0x3a4   : > { %7097 = vmatpush1.bf16.msra.mxu0 %v10622_v35  ;;  %7753 = vmatpush1.bf16.msra.mxu1 %v10625_v36  ;;  %v10712_v35 = vld [vmem:[%s14122_s1 + $0x1ec0] ss:$16 sps:$4 sm:$0xff]   ;;  %v10715_v36 = vld [vmem:[%s14122_s1 + $0x1ec8] ss:$16 sps:$4 sm:$0xff]  }
 0x3a5   : > { %7098 = vmatprep.subr.bf16.mxu0 %v10630_v37  ;;  %7754 = vmatprep.subr.bf16.mxu1 %v10633_v26  ;;  %v10720_v37 = vld [vmem:[%s14122_s1 + $0x1ee4] ss:$16 sps:$4 sm:$0xff]   ;;  %v10723_v26 = vld [vmem:[%s14122_s1 + $0x1eec] ss:$16 sps:$4 sm:$0xff]  }
 0x3a8   : > { %7099 = vmatpush1.bf16.msra.mxu0 %v10628_v39  ;;  %7755 = vmatpush1.bf16.msra.mxu1 %v10631_v40  ;;  %v10718_v39 = vld [vmem:[%s14122_s1 + $0x1ee0] ss:$16 sps:$4 sm:$0xff]   ;;  %v10721_v40 = vld [vmem:[%s14122_s1 + $0x1ee8] ss:$16 sps:$4 sm:$0xff]  }
 0x3a9   : > { %7100 = vmatprep.subr.bf16.mxu0 %v10636_v41  ;;  %7756 = vmatprep.subr.bf16.mxu1 %v10639_v30  ;;  %v10726_v41 = vld [vmem:[%s14122_s1 + $0x1f04] ss:$16 sps:$4 sm:$0xff]   ;;  %v10729_v30 = vld [vmem:[%s14122_s1 + $0x1f0c] ss:$16 sps:$4 sm:$0xff]  }
 0x3ac   : > { %7101 = vmatpush1.bf16.msra.mxu0 %v10634_v43  ;;  %7757 = vmatpush1.bf16.msra.mxu1 %v10637_v44  ;;  %v10724_v43 = vld [vmem:[%s14122_s1 + $0x1f00] ss:$16 sps:$4 sm:$0xff]   ;;  %v10727_v44 = vld [vmem:[%s14122_s1 + $0x1f08] ss:$16 sps:$4 sm:$0xff]  }
 0x3ad   : > { %7102 = vmatprep.subr.bf16.mxu0 %v10642_v45  ;;  %7758 = vmatprep.subr.bf16.mxu1 %v10645_v34  ;;  %v10732_v45 = vld [vmem:[%s14122_s1 + $0x1f24] ss:$16 sps:$4 sm:$0xff]   ;;  %v10735_v34 = vld [vmem:[%s14122_s1 + $0x1f2c] ss:$16 sps:$4 sm:$0xff]  }
 0x3b0   : > { %7103 = vmatpush1.bf16.msra.mxu0 %v10640_v47  ;;  %7759 = vmatpush1.bf16.msra.mxu1 %v10643_v48  ;;  %v10730_v47 = vld [vmem:[%s14122_s1 + $0x1f20] ss:$16 sps:$4 sm:$0xff]   ;;  %v10733_v48 = vld [vmem:[%s14122_s1 + $0x1f28] ss:$16 sps:$4 sm:$0xff]  }
 0x3b1   : > { %7104 = vmatprep.subr.bf16.mxu0 %v10648_v50  ;;  %7760 = vmatprep.subr.bf16.mxu1 %v10651_v38  ;;  %v10738_v50 = vld [vmem:[%s14122_s1 + $0x1f44] ss:$16 sps:$4 sm:$0xff]   ;;  %v10741_v38 = vld [vmem:[%s14122_s1 + $0x1f4c] ss:$16 sps:$4 sm:$0xff]  }
 0x3b4   : > { %7105 = vmatpush1.bf16.msra.mxu0 %v10646_v52  ;;  %7761 = vmatpush1.bf16.msra.mxu1 %v10649_v53  ;;  %v10736_v52 = vld [vmem:[%s14122_s1 + $0x1f40] ss:$16 sps:$4 sm:$0xff]   ;;  %v10739_v53 = vld [vmem:[%s14122_s1 + $0x1f48] ss:$16 sps:$4 sm:$0xff]  }
 0x3b5   : > { %7106 = vmatprep.subr.bf16.mxu0 %v10654_v54  ;;  %7762 = vmatprep.subr.bf16.mxu1 %v10657_v42  ;;  %v10744_v54 = vld [vmem:[%s14122_s1 + $0x1f64] ss:$16 sps:$4 sm:$0xff]   ;;  %v10747_v42 = vld [vmem:[%s14122_s1 + $0x1f6c] ss:$16 sps:$4 sm:$0xff]  }
 0x3b8   : > { %7107 = vmatpush1.bf16.msra.mxu0 %v10652_v56  ;;  %7763 = vmatpush1.bf16.msra.mxu1 %v10655_v57  ;;  %v10742_v56 = vld [vmem:[%s14122_s1 + $0x1f60] ss:$16 sps:$4 sm:$0xff]   ;;  %v10745_v57 = vld [vmem:[%s14122_s1 + $0x1f68] ss:$16 sps:$4 sm:$0xff]  }
 0x3b9   : > { %7108 = vmatprep.subr.bf16.mxu0 %v10660_v58  ;;  %7764 = vmatprep.subr.bf16.mxu1 %v10663_v46  ;;  %v10750_v58 = vld [vmem:[%s14122_s1 + $0x1f84] ss:$16 sps:$4 sm:$0xff]   ;;  %v10753_v46 = vld [vmem:[%s14122_s1 + $0x1f8c] ss:$16 sps:$4 sm:$0xff]  }
 0x3bc   : > { %7109 = vmatpush1.bf16.msra.mxu0 %v10658_v60  ;;  %7765 = vmatpush1.bf16.msra.mxu1 %v10661_v61  ;;  %v10748_v60 = vld [vmem:[%s14122_s1 + $0x1f80] ss:$16 sps:$4 sm:$0xff]   ;;  %v10751_v61 = vld [vmem:[%s14122_s1 + $0x1f88] ss:$16 sps:$4 sm:$0xff]  }
 0x3bd   : > { %7110 = vmatprep.subr.bf16.mxu0 %v10666_v62  ;;  %7766 = vmatprep.subr.bf16.mxu1 %v10669_v51  ;;  %v10756_v62 = vld [vmem:[%s14122_s1 + $0x1fa4] ss:$16 sps:$4 sm:$0xff]   ;;  %v10759_v51 = vld [vmem:[%s14122_s1 + $0x1fac] ss:$16 sps:$4 sm:$0xff]  }
 0x3c0   : > { %7111 = vmatpush1.bf16.msra.mxu0 %v10664_v0  ;;  %7767 = vmatpush1.bf16.msra.mxu1 %v10667_v1  ;;  %v10754_v0 = vld [vmem:[%s14122_s1 + $0x1fa0] ss:$16 sps:$4 sm:$0xff]   ;;  %v10757_v1 = vld [vmem:[%s14122_s1 + $0x1fa8] ss:$16 sps:$4 sm:$0xff]  }
 0x3c1   : > { %7112 = vmatprep.subr.bf16.mxu0 %v10672_v2  ;;  %7768 = vmatprep.subr.bf16.mxu1 %v10675_v55  ;;  %v10762_v2 = vld [vmem:[%s14122_s1 + $0x1fc4] ss:$16 sps:$4 sm:$0xff]   ;;  %v10765_v55 = vld [vmem:[%s14122_s1 + $0x1fcc] ss:$16 sps:$4 sm:$0xff]  }
 0x3c4   : > { %7113 = vmatpush1.bf16.msra.mxu0 %v10670_v5  ;;  %7769 = vmatpush1.bf16.msra.mxu1 %v10673_v6  ;;  %v10763_v5 = vld [vmem:[%s14122_s1 + $0x1fc8] ss:$16 sps:$4 sm:$0xff]   ;;  %v10768_v6 = vld [vmem:[%s14122_s1 + $0x1fe4] ss:$16 sps:$4 sm:$0xff]  }
 0x3c5   : > { %7123 = vmatprep.subr.bf16.mxu0 %v10678_v59  ;;  %7779 = vmatprep.subr.bf16.mxu1 %v10681_v23  ;;  %v10771_v59 = vld [vmem:[%s14122_s1 + $0x1fec] ss:$16 sps:$4 sm:$0xff]   ;;  %v10766_v23 = vld [vmem:[%s14122_s1 + $0x1fe0] ss:$16 sps:$4 sm:$0xff]  }
 0x3c7   : > { %7115 = vmatmul.mubr.bf16.vlgmr.msra.gmra.mrb[0].mxu0 %v13679_v3  ;;  %7771 = vmatmul.mubr.bf16.vlgmr.msra.gmra.mrb[0].mxu1 %v13679_v3  ;;  %v10693_v3 = vld [vmem:[%s14122_s1 + $0x1e4c] ss:$16 sps:$4 sm:$0xff]  }
 0x3c8   : > { %7124 = vmatpush1.bf16.msra.mxu0 %v10676_v8  ;;  %7780 = vmatpush1.bf16.msra.mxu1 %v10679_v9  ;;  %v10769_v8 = vld [vmem:[%s14122_s1 + $0x1fe8] ss:$16 sps:$4 sm:$0xff]  }
 0x3c9   : > { %7125 = vmatprep.subr.bf16.mxu0 %v10684_v10  ;;  %7781 = vmatprep.subr.bf16.mxu1 %v10687_v63 }
 0x3ca   : > { %7155 = vmatprep.mubr.bf16.mxu0 %v1355_v11  ;;  %7811 = vmatprep.mubr.bf16.mxu1 %v1355_v11 }
 0x3cc   : > { %7126 = vmatpush1.bf16.msra.mxu0 %v10682_v13  ;;  %7782 = vmatpush1.bf16.msra.mxu1 %v10685_v14 }
 0x3cd   : > { %7127 = vmatprep.subr.bf16.mxu0 %v10690_v15  ;;  %7783 = vmatprep.subr.bf16.mxu1 %v10693_v3 }
 0x3d0   : > { %7128 = vmatpush1.bf16.msra.mxu0 %v10688_v16  ;;  %7784 = vmatpush1.bf16.msra.mxu1 %v10691_v17 }
 0x3d1   : > { %7129 = vmatprep.subr.bf16.mxu0 %v10696_v19  ;;  %7785 = vmatprep.subr.bf16.mxu1 %v10699_v20 }
 0x3d4   : > { %7130 = vmatpush1.bf16.msra.mxu0 %v10694_v18  ;;  %7786 = vmatpush1.bf16.msra.mxu1 %v10697_v24 }
 0x3d5   : > { %7131 = vmatprep.subr.bf16.mxu0 %v10702_v25  ;;  %7787 = vmatprep.subr.bf16.mxu1 %v10705_v12 }
 0x3d8   : > { %7132 = vmatpush1.bf16.msra.mxu0 %v10700_v27  ;;  %7788 = vmatpush1.bf16.msra.mxu1 %v10703_v28 }
 0x3d9   : > { %7133 = vmatprep.subr.bf16.mxu0 %v10708_v29  ;;  %7789 = vmatprep.subr.bf16.mxu1 %v10711_v21 }
 0x3dc   : > { %7134 = vmatpush1.bf16.msra.mxu0 %v10706_v31  ;;  %7790 = vmatpush1.bf16.msra.mxu1 %v10709_v32 }
 0x3dd   : > { %7135 = vmatprep.subr.bf16.mxu0 %v10714_v33  ;;  %7791 = vmatprep.subr.bf16.mxu1 %v10717_v22 }
 0x3e0   : > { %7136 = vmatpush1.bf16.msra.mxu0 %v10712_v35  ;;  %7792 = vmatpush1.bf16.msra.mxu1 %v10715_v36 }
 0x3e1   : > { %7137 = vmatprep.subr.bf16.mxu0 %v10720_v37  ;;  %7793 = vmatprep.subr.bf16.mxu1 %v10723_v26 }
 0x3e4   : > { %7138 = vmatpush1.bf16.msra.mxu0 %v10718_v39  ;;  %7794 = vmatpush1.bf16.msra.mxu1 %v10721_v40 }
 0x3e5   : > { %7139 = vmatprep.subr.bf16.mxu0 %v10726_v41  ;;  %7795 = vmatprep.subr.bf16.mxu1 %v10729_v30 }
 0x3e8   : > { %7140 = vmatpush1.bf16.msra.mxu0 %v10724_v43  ;;  %7796 = vmatpush1.bf16.msra.mxu1 %v10727_v44 }
 0x3e9   : > { %7141 = vmatprep.subr.bf16.mxu0 %v10732_v45  ;;  %7797 = vmatprep.subr.bf16.mxu1 %v10735_v34 }
 0x3ec   : > { %7142 = vmatpush1.bf16.msra.mxu0 %v10730_v47  ;;  %7798 = vmatpush1.bf16.msra.mxu1 %v10733_v48 }
 0x3ed   : > { %7143 = vmatprep.subr.bf16.mxu0 %v10738_v50  ;;  %7799 = vmatprep.subr.bf16.mxu1 %v10741_v38 }
 0x3f0   : > { %7144 = vmatpush1.bf16.msra.mxu0 %v10736_v52  ;;  %7800 = vmatpush1.bf16.msra.mxu1 %v10739_v53 }
 0x3f1   : > { %7145 = vmatprep.subr.bf16.mxu0 %v10744_v54  ;;  %7801 = vmatprep.subr.bf16.mxu1 %v10747_v42 }
 0x3f4   : > { %7146 = vmatpush1.bf16.msra.mxu0 %v10742_v56  ;;  %7802 = vmatpush1.bf16.msra.mxu1 %v10745_v57 }
 0x3f5   : > { %7147 = vmatprep.subr.bf16.mxu0 %v10750_v58  ;;  %7803 = vmatprep.subr.bf16.mxu1 %v10753_v46 }
 0x3f8   : > { %7148 = vmatpush1.bf16.msra.mxu0 %v10748_v60  ;;  %7804 = vmatpush1.bf16.msra.mxu1 %v10751_v61 }
 0x3f9   : > { %7149 = vmatprep.subr.bf16.mxu0 %v10756_v62  ;;  %7805 = vmatprep.subr.bf16.mxu1 %v10759_v51 }
 0x3fc   : > { %7150 = vmatpush1.bf16.msra.mxu0 %v10754_v0  ;;  %7806 = vmatpush1.bf16.msra.mxu1 %v10757_v1 }
 0x3fd   : > { %7151 = vmatprep.subr.bf16.mxu0 %v10762_v2  ;;  %7807 = vmatprep.subr.bf16.mxu1 %v10765_v55 }
 0x400   : > { %7152 = vmatpush1.bf16.msra.mxu0 %v10760_v4  ;;  %7808 = vmatpush1.bf16.msra.mxu1 %v10763_v5 }
 0x401   : > { %7153 = vmatprep.subr.bf16.mxu0 %v10768_v6  ;;  %7809 = vmatprep.subr.bf16.mxu1 %v10771_v59 }
 0x404   : > { %7154 = vmatpush1.bf16.msra.mxu0 %v10766_v23  ;;  %7810 = vmatpush1.bf16.msra.mxu1 %v10769_v8 }
 0x407   : > { %7156 = vmatmul.mubr.bf16.vlgmr.msra.gmra.mrb[0].mxu0 %v13880_v7  ;;  %7812 = vmatmul.mubr.bf16.vlgmr.msra.gmra.mrb[0].mxu1 %v13880_v7 }
 0x4da   : > { %v14074_v9 = vpop.f32.mrb[0].mxu0  ;;  %v14076_v10 = vpop.f32.mrb[0].mxu1 }
 0x4db   : > { %v7821_v63 = vsel %vm7820_vm0, %v14074_v9, 0.0  ;;  %v7854_v11 = vmul.f32 %v14074_v9, %v14074_v9  ;;  %v7835_v13 = vsel %vm7820_vm0, %v14076_v10, 0.0  ;;  %v7856_v14 = vmul.f32 %v14076_v10, %v14076_v10  ;;  %v14086_v15 = vpop.f32.mrb[1].mxu0  ;;  %v14088_v7 = vpop.f32.mrb[1].mxu1 }
 0x4dc   : > { %v7822_v3 = vrot.slane %v7821_v63, 4  ;;  %v7836_v16 = vrot.slane %v7835_v13, 4  ;;  %v7828_v17 = vsel %vm7820_vm0, %v14086_v15, 0.0  ;;  %v7855_v19 = vmul.f32 %v14086_v15, %v14086_v15  ;;  %v7161_v20 = vpop.f32.mrb[2].mxu0  ;;  %v7817_v18 = vpop.f32.mrb[2].mxu1 }
 0x4dd   : > { %v7858_v24 = vsel %vm7820_vm0, %v7854_v11, 0.0  ;;  %v7872_v25 = vsel %vm7820_vm0, %v7856_v14, 0.0  ;;  %v7829_v12 = vrot.slane %v7828_v17, 4  ;;  %v7842_v27 = vsel %vm7820_vm0, %v14088_v7, 0.0  ;;  %v7162_v28 = vpop.f32.mrb[3].mxu0  ;;  %v7818_v29 = vpop.f32.mrb[3].mxu1 }
 0x4de   : > { %v7823_v21 = vadd.f32 %v7822_v3, %v7821_v63  ;;  %v7859_v31 = vrot.slane %v7858_v24, 4  ;;  %v7837_v32 = vadd.f32 %v7836_v16, %v7835_v13  ;;  %v7873_v33 = vrot.slane %v7872_v25, 4 }
 0x4df   : > { %v7830_v22 = vadd.f32 %v7829_v12, %v7828_v17  ;;  %v7865_v35 = vsel %vm7820_vm0, %v7855_v19, 0.0  ;;  %v7843_v36 = vrot.slane %v7842_v27, 4  ;;  %v7857_v37 = vmul.f32 %v14088_v7, %v14088_v7 }
 0x4e0   : > { %v7824_v26 = vrot.slane %v7823_v21, 2  ;;  %v7860_v39 = vadd.f32 %v7859_v31, %v7858_v24  ;;  %v7838_v40 = vrot.slane %v7837_v32, 2  ;;  %v7874_v41 = vadd.f32 %v7873_v33, %v7872_v25 }
 0x4e1   : > { %v7831_v30 = vrot.slane %v7830_v22, 2  ;;  %v7866_v43 = vrot.slane %v7865_v35, 4  ;;  %v7844_v44 = vadd.f32 %v7843_v36, %v7842_v27  ;;  %v7879_v45 = vsel %vm7820_vm0, %v7857_v37, 0.0 }
 0x4e2   : > { %v7825_v34 = vadd.f32 %v7824_v26, %v7823_v21  ;;  %v7861_v47 = vrot.slane %v7860_v39, 2  ;;  %v7839_v48 = vadd.f32 %v7838_v40, %v7837_v32  ;;  %v7875_v50 = vrot.slane %v7874_v41, 2 }
 0x4e3   : > { %v7832_v38 = vadd.f32 %v7831_v30, %v7830_v22  ;;  %v7867_v52 = vadd.f32 %v7866_v43, %v7865_v35  ;;  %v7845_v53 = vrot.slane %v7844_v44, 2  ;;  %v7880_v54 = vrot.slane %v7879_v45, 4 }
 0x4e4   : > { %v7826_v42 = vrot.slane %v7825_v34, 1  ;;  %v7862_v56 = vadd.f32 %v7861_v47, %v7860_v39  ;;  %v7840_v57 = vrot.slane %v7839_v48, 1  ;;  %v7876_v58 = vadd.f32 %v7875_v50, %v7874_v41 }
 0x4e5   : > { %v7833_v46 = vrot.slane %v7832_v38, 1  ;;  %v7868_v60 = vrot.slane %v7867_v52, 2  ;;  %v7846_v61 = vadd.f32 %v7845_v53, %v7844_v44  ;;  %v7881_v62 = vadd.f32 %v7880_v54, %v7879_v45 }
 0x4e6   : > { %v7827_v51 = vadd.f32 %v7826_v42, %v7825_v34  ;;  %v7863_v0 = vrot.slane %v7862_v56, 1  ;;  %v7841_v1 = vadd.f32 %v7840_v57, %v7839_v48  ;;  %v7877_v2 = vrot.slane %v7876_v58, 1 }
 0x4e7   : > { %v7834_v55 = vadd.f32 %v7833_v46, %v7832_v38  ;;  %v7869_v4 = vadd.f32 %v7868_v60, %v7867_v52  ;;  %v7847_v5 = vrot.slane %v7846_v61, 1  ;;  %v7882_v6 = vrot.slane %v7881_v62, 2 }
 0x4e8   : > { %v7850_v59 = vmul.f32 0.25, %v7827_v51  ;;  %v7864_v23 = vadd.f32 %v7863_v0, %v7862_v56  ;;  %v7852_v8 = vmul.f32 0.25, %v7841_v1  ;;  %v7878_v63 = vadd.f32 %v7877_v2, %v7876_v58 }
 0x4e9   : > { %v7851_v11 = vmul.f32 0.25, %v7834_v55  ;;  %v7870_v13 = vrot.slane %v7869_v4, 1  ;;  %v7848_v14 = vadd.f32 %v7847_v5, %v7846_v61  ;;  %v7883_v3 = vadd.f32 %v7882_v6, %v7881_v62 }
 0x4ea   : > { %v7886_v16 = vmul.f32 0.25, %v7864_v23  ;;  %v7890_v17 = vmul.f32 %v7850_v59, %v7850_v59  ;;  %v7888_v19 = vmul.f32 0.25, %v7878_v63  ;;  %v7892_v20 = vmul.f32 %v7852_v8, %v7852_v8 }
 0x4eb   : > { %v7871_v18 = vadd.f32 %v7870_v13, %v7869_v4  ;;  %v7891_v24 = vmul.f32 %v7851_v11, %v7851_v11  ;;  %v7853_v12 = vmul.f32 0.25, %v7848_v14  ;;  %v7884_v27 = vrot.slane %v7883_v3, 1 }
 0x4ec   : > { %v7894_v25 = vsub.f32 %v7886_v16, %v7890_v17  ;;  %v7896_v28 = vsub.f32 %v7888_v19, %v7892_v20  ;;  %v7898_v39 = vsub.f32 %v14074_v9, %v7850_v59  ;;  %v7900_v41 = vsub.f32 %v14076_v10, %v7852_v8 }
 0x4ed   : > { %v7887_v29 = vmul.f32 0.25, %v7871_v18  ;;  %v7885_v31 = vadd.f32 %v7884_v27, %v7883_v3  ;;  %v7893_v32 = vmul.f32 %v7853_v12, %v7853_v12  ;;  %v7899_v45 = vsub.f32 %v14086_v15, %v7851_v11 }
 0x4ee   : > { %v7902_v21 = vadd.f32 1e-05, %v7894_v25  ;;  %v7904_v33 = vadd.f32 1e-05, %v7896_v28  ;;  %v7901_v38 = vsub.f32 %v14088_v7, %v7853_v12 }
 0x4ef   : > { %v7895_v22 = vsub.f32 %v7887_v29, %v7891_v24  ;;  %v7889_v35 = vmul.f32 0.25, %v7885_v31 }
 0x4f0   : > { %10773 = vrsqrt.f32 %v7902_v21 }
 0x4f1   : > { %10775 = vrsqrt.f32 %v7904_v33  ;;  %v7903_v36 = vadd.f32 1e-05, %v7895_v22  ;;  %v7897_v37 = vsub.f32 %v7889_v35, %v7893_v32 }
 0x4f3   : > { %10777 = vrsqrt.f32 %v7903_v36  ;;  %v7905_v26 = vadd.f32 1e-05, %v7897_v37 }
 0x4f5   : > { %10779 = vrsqrt.f32 %v7905_v26 }
 0x4fa   : > { %v10774_v40 = vpop.eup %10773 }
 0x4fb   : > { %v10776_v30 = vpop.eup %10775  ;;  %v7910_v43 = vmul.f32 %v10774_v40, %v7898_v39 }
 0x4fc   : > { %v7912_v44 = vmul.f32 %v10776_v30, %v7900_v41 }
 0x4fd   : > { %v10778_v34 = vpop.eup %10777  ;;  %vm7914_vm1 = vcmp.ge.f32.partialorder %v7910_v43, 0.0  ;;  %v7918_v47 = vmul.f32 0.2, %v7910_v43 }
 0x4fe   : > { %v7911_v48 = vmul.f32 %v10778_v34, %v7899_v45  ;;  %v7920_v50 = vmul.f32 0.2, %v7912_v44  ;;  %vm7916_vm2 = vcmp.ge.f32.partialorder %v7912_v44, 0.0 }
 0x4ff   : > { %v10780_v52 = vpop.eup %10779  ;;  %v7922_v53 = vsel %vm7914_vm1, %v7910_v43, %v7918_v47 }
 0x500   : > { %vm7915_vm3 = vcmp.ge.f32.partialorder %v7911_v48, 0.0  ;;  %v7919_v9 = vmul.f32 0.2, %v7911_v48  ;;  %v7913_v54 = vmul.f32 %v10780_v52, %v7901_v38  ;;  %v7924_v42 = vsel %vm7916_vm2, %v7912_v44, %v7920_v50 }
 0x502   : > { %v7923_v10 = vsel %vm7915_vm3, %v7911_v48, %v7919_v9  ;;  %vm7917_vm4 = vcmp.ge.f32.partialorder %v7913_v54, 0.0  ;;  %v7921_v57 = vmul.f32 0.2, %v7913_v54 }
 0x503   : > { %v9078_v56 = vpack.c.bf16 %v7923_v10, %v7922_v53 }
 0x504   : > { %v7925_v15 = vsel %vm7917_vm4, %v7913_v54, %v7921_v57 }
 0x505   : > { %v7942_v58 = vrot.slane %v9078_v56, %v10983_v49  ;;  %v9079_v46 = vpack.c.bf16 %v7925_v15, %v7924_v42 }
 0x507   : > { %v7949_v60 = vrot.slane %v9079_v46, %v10983_v49 }
 0x509   : > { %v7950_v7 = vcombine.low %v7942_v58, %v7949_v60 }
 0x50b   : > { %7952 = vst [vmem:[%s179_s29] sm:$0xff] %v7950_v7 }
 0x50c PF: > { %s12_s11 = sadd.s32 1, %s10803_s11   ;;  %s14124_s9 = smov %s10799_s10 }
 0x50d   : > { %p9_p5 = scmp.ge.s32.totalorder %s12_s11, 4   ;;  %s14125_s10 = smov %s14127_s12 }
 0x50f   :  { %11 = sbr.rel (!%p9_p5) target bundleno = 2 (0x2), region = 58 }

// kernel: discriminator_forward.9
= control target key start
LH: loop header
LB: loop body
LE: loop exit
PB: predicated region body
PF: predicated region fallthrough
CT: control target
= control target key end

     0   :  { %s7823_s9 = smov 0   ;;  %s7825_s10 = smov 0   ;;  %s9476_s0 = inlined_call_operand.vmem [shape: bf16[2,4,8192], index: 0, kind: input, shape index: {}]   ;;  %s9477_s1 = inlined_call_operand.vmem [shape: bf16[8192,1], index: 1, kind: input, shape index: {}]   ;;  %s9478_s2 = inlined_call_operand.vmem [shape: f32[2,4,1], index: 2, kind: output, shape index: {}]  }
   0x1   :  { %s7827_s11 = smov 0  }
   0x2 LB: > { %s24_s12 = sadd.s32 1, %s7801_s10  ;;  %p6007_p0 = scmp.ge.s32.totalorder %s7805_s11, 1  ;;  %s7805_s11 = sphi %s7827_s11, %s12_s11   ;;  %s7801_s10 = sphi %s7825_s10, %s9480_s10   ;;  %s7797_s9 = sphi %s7823_s9, %s9479_s9  }
   0x3   : > { %p26_p1 = scmp.ge.s32.totalorder %s24_s12, 2  ;;  %p132_p2 = scmp.lt.s32.totalorder %s7805_s11, 3 }
   0x5   : > { %s9482_s12 = smov (%p26_p1, %s24_s12), 0  ;;  %p133_p3 = pnand %p6007_p0, %p132_p2 }
   0x6   : > { %v7255_v0 = vld [vmem:[%s9477_s1 + $0x40] sm:$0xff] (!%p133_p3)   ;;  %v7259_v4 = vld [vmem:[%s9477_s1 + $0x48] sm:$0xff] (!%p133_p3)   ;;  %v7263_v8 = vld [vmem:[%s9477_s1 + $0x50] sm:$0xff] (!%p133_p3)   ;;  %p160_p4 = scmp.lt.s32.totalorder (!%p133_p3), %s7797_s9, 1  ;;  %v1237_v28 = vlaneseq (!%p133_p3)  ;;  %v7807_v36 = vmov (!%p133_p3), 1983009808  }
   0x7   : > { %136 = sbr.rel (%p133_p3) target bundleno = 740 (0x2e4), region = 28  ;;  %v7256_v1 = vld [vmem:[%s9477_s1 + $0xc0] sm:$0xff] (!%p133_p3)   ;;  %6526 = vmatprep.subr.bf16.mxu0 (!%p133_p3), %v7255_v0  ;;  %v7260_v5 = vld [vmem:[%s9477_s1 + $0xc8] sm:$0xff] (!%p133_p3)   ;;  %v7264_v9 = vld [vmem:[%s9477_s1 + $0xd0] sm:$0xff] (!%p133_p3)   ;;  %v1235_v37 = vunpack.c.l.s4 (!%p133_p3), %v7807_v36  ;;  %vm5921_vm0 = vcmask (!%p133_p3), 3072  }
   0x8   : > { %v7257_v2 = vld [vmem:[%s9477_s1] sm:$0xff] (!%p133_p3)   ;;  %6548 = vmatprep.subr.bf16.mxu1 (!%p133_p3), %v7256_v1  ;;  %v7261_v6 = vld [vmem:[%s9477_s1 + $0x8] sm:$0xff] (!%p133_p3)   ;;  %v7265_v10 = vld [vmem:[%s9477_s1 + $0x10] sm:$0xff] (!%p133_p3)   ;;  %v1238_v33 = vshrl.u32 (!%p133_p3), %v1237_v28, 7 }
   0x9   : > { %v7258_v3 = vld [vmem:[%s9477_s1 + $0x80] sm:$0xff] (!%p133_p3)   ;;  %6527 = vmatpush3.bf16.msra.mxu0 (!%p133_p3), %v7257_v2  ;;  %v7262_v7 = vld [vmem:[%s9477_s1 + $0x88] sm:$0xff] (!%p133_p3)   ;;  %v7266_v11 = vld [vmem:[%s9477_s1 + $0x90] sm:$0xff] (!%p133_p3)   ;;  %v1236_v39 = vunpack.c.0.s8 (!%p133_p3), %v1235_v37 }
   0xa   : > { %6549 = vmatpush3.bf16.msra.mxu1 (!%p133_p3), %v7258_v3  ;;  %6528 = vmatprep.subr.bf16.mxu0 (!%p133_p3), %v7259_v4  ;;  %v7267_v12 = vld [vmem:[%s9477_s1 + $0x58] sm:$0xff] (!%p133_p3)   ;;  %v7271_v16 = vld [vmem:[%s9477_s1 + $0x60] sm:$0xff] (!%p133_p3)   ;;  %v7275_v20 = vld [vmem:[%s9477_s1 + $0x68] sm:$0xff] (!%p133_p3)  }
   0xb   : > { %6550 = vmatprep.subr.bf16.mxu1 (!%p133_p3), %v7260_v5  ;;  %v7268_v13 = vld [vmem:[%s9477_s1 + $0xd8] sm:$0xff] (!%p133_p3)   ;;  %v7272_v17 = vld [vmem:[%s9477_s1 + $0xe0] sm:$0xff] (!%p133_p3)   ;;  %v7276_v21 = vld [vmem:[%s9477_s1 + $0xe8] sm:$0xff] (!%p133_p3)   ;;  %v7956_v41 = vsub.s32 (!%p133_p3), %v1236_v39, %v1238_v33 }
   0xc   : > { %v7269_v14 = vld [vmem:[%s9477_s1 + $0x18] sm:$0xff] (!%p133_p3)   ;;  %v7273_v18 = vld [vmem:[%s9477_s1 + $0x20] sm:$0xff] (!%p133_p3)   ;;  %v7277_v22 = vld [vmem:[%s9477_s1 + $0x28] sm:$0xff] (!%p133_p3)  }
   0xd   : > { %6529 = vmatpush3.bf16.msra.mxu0 (!%p133_p3), %v7261_v6  ;;  %v7270_v15 = vld [vmem:[%s9477_s1 + $0x98] sm:$0xff] (!%p133_p3)   ;;  %v7274_v19 = vld [vmem:[%s9477_s1 + $0xa0] sm:$0xff] (!%p133_p3)   ;;  %v7278_v23 = vld [vmem:[%s9477_s1 + $0xa8] sm:$0xff] (!%p133_p3)  }
   0xe   : > { %6551 = vmatpush3.bf16.msra.mxu1 %v7262_v7  ;;  %6530 = vmatprep.subr.bf16.mxu0 %v7263_v8  ;;  %s9484_s9 = smov (!%p160_p4, %s7797_s9), 1  ;;  %v7279_v24 = vld [vmem:[%s9477_s1 + $0x70] sm:$0xff]   ;;  %v7283_v29 = vld [vmem:[%s9477_s1 + $0x78] sm:$0xff]   ;;  %v7288_v35 = vld [vmem:[%s9477_s1 + $0x140] sm:$0xff]  }
   0xf   : > { %6552 = vmatprep.subr.bf16.mxu1 %v7264_v9  ;;  %v7280_v25 = vld [vmem:[%s9477_s1 + $0xf0] sm:$0xff]   ;;  %s6525_s19 = sshll.u32 %s9484_s9, 7  ;;  %v7284_v30 = vld [vmem:[%s9477_s1 + $0xf8] sm:$0xff]   ;;  %v7289_v38 = vld [vmem:[%s9477_s1 + $0x1c0] sm:$0xff]  }
  0x10   : > { %v7281_v26 = vld [vmem:[%s9477_s1 + $0x30] sm:$0xff]   ;;  %s7941_s28 = scalar_lea.vmem %s9476_s0, %s6525_s19  ;;  %v7285_v31 = vld [vmem:[%s9477_s1 + $0x38] sm:$0xff]   ;;  %v7290_v44 = vld [vmem:[%s9477_s1 + $0x100] sm:$0xff]  }
  0x11   : > { %6531 = vmatpush3.bf16.msra.mxu0 %v7265_v10  ;;  %v7282_v27 = vld [vmem:[%s9477_s1 + $0xb0] sm:$0xff]   ;;  %v7286_v32 = vld [vmem:[%s9477_s1 + $0xb8] sm:$0xff]   ;;  %v177_v34 = vld [vmem:[%s7941_s28] sm:$0xff] }
  0x12   : > { %6553 = vmatpush3.bf16.msra.mxu1 %v7266_v11  ;;  %6532 = vmatprep.subr.bf16.mxu0 %v7267_v12  ;;  %v1233_v40 = vcombine.high %v177_v34, %v177_v34  ;;  %v1240_v42 = vrot.slane %v177_v34, %v7956_v41  ;;  %v7291_v45 = vld [vmem:[%s9477_s1 + $0x180] sm:$0xff]   ;;  %v7292_v48 = vld [vmem:[%s9477_s1 + $0x148] sm:$0xff]   ;;  %v7296_v52 = vld [vmem:[%s9477_s1 + $0x150] sm:$0xff]  }
  0x13   : > { %6554 = vmatprep.subr.bf16.mxu1 %v7268_v13  ;;  %v7293_v49 = vld [vmem:[%s9477_s1 + $0x1c8] sm:$0xff]   ;;  %v7297_v53 = vld [vmem:[%s9477_s1 + $0x1d0] sm:$0xff]   ;;  %v7300_v56 = vld [vmem:[%s9477_s1 + $0x158] sm:$0xff]  }
  0x14   : > { %v1247_v43 = vrot.slane %v1233_v40, %v7956_v41  ;;  %v1248_v46 = vcombine.high %v1240_v42, %v1240_v42  ;;  %v7294_v50 = vld [vmem:[%s9477_s1 + $0x108] sm:$0xff]   ;;  %v7298_v54 = vld [vmem:[%s9477_s1 + $0x110] sm:$0xff]   ;;  %v7301_v57 = vld [vmem:[%s9477_s1 + $0x1d8] sm:$0xff]  }
  0x15   : > { %6533 = vmatpush3.bf16.msra.mxu0 %v7269_v14  ;;  %v7295_v51 = vld [vmem:[%s9477_s1 + $0x188] sm:$0xff]   ;;  %v7299_v55 = vld [vmem:[%s9477_s1 + $0x190] sm:$0xff]   ;;  %v7302_v58 = vld [vmem:[%s9477_s1 + $0x118] sm:$0xff]  }
  0x16   : > { %6555 = vmatpush3.bf16.msra.mxu1 %v7270_v15  ;;  %6534 = vmatprep.subr.bf16.mxu0 %v7271_v16  ;;  %v1249_v47 = vcombine.high %v1247_v43, %v1247_v43  ;;  %v7303_v59 = vld [vmem:[%s9477_s1 + $0x198] sm:$0xff]   ;;  %v7304_v60 = vld [vmem:[%s9477_s1 + $0x160] sm:$0xff]   ;;  %v7308_v0 = vld [vmem:[%s9477_s1 + $0x168] sm:$0xff]  }
  0x17   : > { %6556 = vmatprep.subr.bf16.mxu1 %v7272_v17  ;;  %4673 = vmatprep.mubr.bf16.mxu0 %v1248_v46  ;;  %v7305_v61 = vld [vmem:[%s9477_s1 + $0x1e0] sm:$0xff]   ;;  %v7309_v1 = vld [vmem:[%s9477_s1 + $0x1e8] sm:$0xff]   ;;  %v7312_v4 = vld [vmem:[%s9477_s1 + $0x170] sm:$0xff]  }
  0x18   : > { %4713 = vmatprep.mubr.bf16.mxu1 %v1249_v47  ;;  %v7306_v62 = vld [vmem:[%s9477_s1 + $0x120] sm:$0xff]   ;;  %v7310_v2 = vld [vmem:[%s9477_s1 + $0x128] sm:$0xff]   ;;  %v7313_v5 = vld [vmem:[%s9477_s1 + $0x1f0] sm:$0xff]  }
  0x19   : > { %6535 = vmatpush3.bf16.msra.mxu0 %v7273_v18  ;;  %v7307_v63 = vld [vmem:[%s9477_s1 + $0x1a0] sm:$0xff]   ;;  %v7311_v3 = vld [vmem:[%s9477_s1 + $0x1a8] sm:$0xff]   ;;  %v7314_v6 = vld [vmem:[%s9477_s1 + $0x130] sm:$0xff]  }
  0x1a   : > { %6557 = vmatpush3.bf16.msra.mxu1 %v7274_v19  ;;  %6536 = vmatprep.subr.bf16.mxu0 %v7275_v20  ;;  %v7315_v7 = vld [vmem:[%s9477_s1 + $0x1b0] sm:$0xff]   ;;  %v178_v8 = vld [vmem:[%s7941_s28 + $0x8] sm:$0xff]  ;;  %v7316_v9 = vld [vmem:[%s9477_s1 + $0x178] sm:$0xff]  }
  0x1b   : > { %6558 = vmatprep.subr.bf16.mxu1 %v7276_v21  ;;  %v1257_v10 = vrot.slane %v178_v8, %v7956_v41  ;;  %v1250_v11 = vcombine.high %v178_v8, %v178_v8  ;;  %v7317_v12 = vld [vmem:[%s9477_s1 + $0x1f8] sm:$0xff]   ;;  %v7321_v18 = vld [vmem:[%s9477_s1 + $0x240] sm:$0xff]   ;;  %v7331_v28 = vld [vmem:[%s9477_s1 + $0x210] sm:$0xff]  }
  0x1c   : > { %v7318_v13 = vld [vmem:[%s9477_s1 + $0x138] sm:$0xff]   ;;  %v7322_v19 = vld [vmem:[%s9477_s1 + $0x2c0] sm:$0xff]   ;;  %v7342_v39 = vld [vmem:[%s9477_s1 + $0x2e8] sm:$0xff]  }
  0x1d   : > { %6537 = vmatpush3.bf16.msra.mxu0 %v7277_v22  ;;  %v1265_v14 = vcombine.high %v1257_v10, %v1257_v10  ;;  %v1264_v15 = vrot.slane %v1250_v11, %v7956_v41  ;;  %v7319_v16 = vld [vmem:[%s9477_s1 + $0x1b8] sm:$0xff]   ;;  %v7323_v20 = vld [vmem:[%s9477_s1 + $0x200] sm:$0xff]   ;;  %v7325_v22 = vld [vmem:[%s9477_s1 + $0x248] sm:$0xff]  }
  0x1e   : > { %6559 = vmatpush3.bf16.msra.mxu1 %v7278_v23  ;;  %6538 = vmatprep.subr.bf16.mxu0 %v7279_v24  ;;  %v7324_v21 = vld [vmem:[%s9477_s1 + $0x280] sm:$0xff]   ;;  %v7326_v23 = vld [vmem:[%s9477_s1 + $0x2c8] sm:$0xff]   ;;  %v7336_v33 = vld [vmem:[%s9477_s1 + $0x298] sm:$0xff]  }
  0x1f   : > { %6560 = vmatprep.subr.bf16.mxu1 %v7280_v25  ;;  %v1266_v17 = vcombine.high %v1264_v15, %v1264_v15  ;;  %v7327_v24 = vld [vmem:[%s9477_s1 + $0x208] sm:$0xff]   ;;  %v7337_v34 = vld [vmem:[%s9477_s1 + $0x260] sm:$0xff]   ;;  %v7348_v46 = vld [vmem:[%s9477_s1 + $0x2b0] sm:$0xff]  }
  0x20   : > { %v7328_v25 = vld [vmem:[%s9477_s1 + $0x288] sm:$0xff]   ;;  %v7339_v36 = vld [vmem:[%s9477_s1 + $0x220] sm:$0xff]   ;;  %v179_v47 = vld [vmem:[%s7941_s28 + $0x10] sm:$0xff] }
  0x21   : > { %6539 = vmatpush3.bf16.msra.mxu0 %v7281_v26  ;;  %v7329_v26 = vld [vmem:[%s9477_s1 + $0x250] sm:$0xff]   ;;  %v7340_v37 = vld [vmem:[%s9477_s1 + $0x2a0] sm:$0xff]   ;;  %v7343_v40 = vld [vmem:[%s9477_s1 + $0x228] sm:$0xff]  }
  0x22   : > { %6561 = vmatpush3.bf16.msra.mxu1 %v7282_v27  ;;  %6540 = vmatprep.subr.bf16.mxu0 %v7283_v29  ;;  %v7330_v27 = vld [vmem:[%s9477_s1 + $0x2d0] sm:$0xff]   ;;  %v7369_v8 = vld [vmem:[%s9477_s1 + $0x398] sm:$0xff]   ;;  %v7372_v11 = vld [vmem:[%s9477_s1 + $0x320] sm:$0xff]  }
  0x23   : > { %6562 = vmatprep.subr.bf16.mxu1 %v7284_v30  ;;  %v7332_v29 = vld [vmem:[%s9477_s1 + $0x290] sm:$0xff]   ;;  %v7333_v30 = vld [vmem:[%s9477_s1 + $0x258] sm:$0xff]  }
  0x25   : > { %6541 = vmatpush3.bf16.msra.mxu0 %v7285_v31  ;;  %v7334_v31 = vld [vmem:[%s9477_s1 + $0x2d8] sm:$0xff]  }
  0x26   : > { %6563 = vmatpush3.bf16.msra.mxu1 %v7286_v32  ;;  %6570 = vmatprep.subr.bf16.mxu0 %v7288_v35  ;;  %v7335_v32 = vld [vmem:[%s9477_s1 + $0x218] sm:$0xff]   ;;  %v7338_v35 = vld [vmem:[%s9477_s1 + $0x2e0] sm:$0xff]  }
  0x27   : > { %6592 = vmatprep.subr.bf16.mxu1 %v7289_v38  ;;  %v7341_v38 = vld [vmem:[%s9477_s1 + $0x268] sm:$0xff]  }
  0x28   : > { %4674 = vmatmul.mubr.bf16.vlgmr.msra.gmra.mrb[0].mxu0 %v1240_v42  ;;  %v7344_v42 = vld [vmem:[%s9477_s1 + $0x2a8] sm:$0xff]  }
  0x29   : > { %4714 = vmatmul.mubr.bf16.vlgmr.msra.gmra.mrb[0].mxu1 %v1247_v43  ;;  %6571 = vmatpush3.bf16.msra.mxu0 %v7290_v44  ;;  %v7345_v43 = vld [vmem:[%s9477_s1 + $0x270] sm:$0xff]  }
  0x2a   : > { %6593 = vmatpush3.bf16.msra.mxu1 %v7291_v45  ;;  %6572 = vmatprep.subr.bf16.mxu0 %v7292_v48  ;;  %v7346_v44 = vld [vmem:[%s9477_s1 + $0x2f0] sm:$0xff]   ;;  %v7349_v48 = vld [vmem:[%s9477_s1 + $0x278] sm:$0xff]  }
  0x2b   : > { %6594 = vmatprep.subr.bf16.mxu1 %v7293_v49  ;;  %4753 = vmatprep.mubr.bf16.mxu0 %v1265_v14  ;;  %v7347_v45 = vld [vmem:[%s9477_s1 + $0x230] sm:$0xff]   ;;  %v1274_v49 = vrot.slane %v179_v47, %v7956_v41  ;;  %v7375_v14 = vld [vmem:[%s9477_s1 + $0x3e8] sm:$0xff]  }
  0x2c   : > { %4793 = vmatprep.mubr.bf16.mxu1 %v1266_v17  ;;  %v7378_v17 = vld [vmem:[%s9477_s1 + $0x370] sm:$0xff]  }
  0x2d   : > { %6573 = vmatpush3.bf16.msra.mxu0 %v7294_v50  ;;  %v1267_v50 = vcombine.high %v179_v47, %v179_v47  ;;  %v7402_v47 = vld [vmem:[%s9477_s1 + $0x498] sm:$0xff]  }
  0x2e   : > { %6595 = vmatpush3.bf16.msra.mxu1 %v7295_v51  ;;  %6574 = vmatprep.subr.bf16.mxu0 %v7296_v52  ;;  %v7350_v51 = vld [vmem:[%s9477_s1 + $0x2f8] sm:$0xff]  }
  0x2f   : > { %6596 = vmatprep.subr.bf16.mxu1 %v7297_v53  ;;  %v7351_v52 = vld [vmem:[%s9477_s1 + $0x238] sm:$0xff]   ;;  %v1282_v53 = vcombine.high %v1274_v49, %v1274_v49 }
  0x31   : > { %6575 = vmatpush3.bf16.msra.mxu0 %v7298_v54  ;;  %v1281_v54 = vrot.slane %v1267_v50, %v7956_v41  ;;  %v7405_v50 = vld [vmem:[%s9477_s1 + $0x420] sm:$0xff]  }
  0x32   : > { %6597 = vmatpush3.bf16.msra.mxu1 %v7299_v55  ;;  %6576 = vmatprep.subr.bf16.mxu0 %v7300_v56  ;;  %v7352_v55 = vld [vmem:[%s9477_s1 + $0x2b8] sm:$0xff]  }
  0x33   : > { %6598 = vmatprep.subr.bf16.mxu1 %v7301_v57  ;;  %v1283_v56 = vcombine.high %v1281_v54, %v1281_v54  ;;  %v7354_v57 = vld [vmem:[%s9477_s1 + $0x340] sm:$0xff]  }
  0x35   : > { %6577 = vmatpush3.bf16.msra.mxu0 %v7302_v58  ;;  %v7355_v58 = vld [vmem:[%s9477_s1 + $0x3c0] sm:$0xff]  }
  0x36   : > { %6599 = vmatpush3.bf16.msra.mxu1 %v7303_v59  ;;  %6578 = vmatprep.subr.bf16.mxu0 %v7304_v60  ;;  %v7356_v59 = vld [vmem:[%s9477_s1 + $0x300] sm:$0xff]  }
  0x37   : > { %6600 = vmatprep.subr.bf16.mxu1 %v7305_v61  ;;  %v7357_v60 = vld [vmem:[%s9477_s1 + $0x380] sm:$0xff]   ;;  %v7358_v61 = vld [vmem:[%s9477_s1 + $0x348] sm:$0xff]  }
  0x39   : > { %6579 = vmatpush3.bf16.msra.mxu0 %v7306_v62  ;;  %v7359_v62 = vld [vmem:[%s9477_s1 + $0x3c8] sm:$0xff]  }
  0x3a   : > { %6601 = vmatpush3.bf16.msra.mxu1 %v7307_v63  ;;  %6580 = vmatprep.subr.bf16.mxu0 %v7308_v0  ;;  %v7360_v63 = vld [vmem:[%s9477_s1 + $0x308] sm:$0xff]  }
  0x3b   : > { %6602 = vmatprep.subr.bf16.mxu1 %v7309_v1  ;;  %v7361_v0 = vld [vmem:[%s9477_s1 + $0x388] sm:$0xff]   ;;  %v7362_v1 = vld [vmem:[%s9477_s1 + $0x350] sm:$0xff]  }
  0x3d   : > { %6581 = vmatpush3.bf16.msra.mxu0 %v7310_v2  ;;  %v7363_v2 = vld [vmem:[%s9477_s1 + $0x3d0] sm:$0xff]  }
  0x3e   : > { %6603 = vmatpush3.bf16.msra.mxu1 %v7311_v3  ;;  %6582 = vmatprep.subr.bf16.mxu0 %v7312_v4  ;;  %v7364_v3 = vld [vmem:[%s9477_s1 + $0x310] sm:$0xff]  }
  0x3f   : > { %6604 = vmatprep.subr.bf16.mxu1 %v7313_v5  ;;  %v7365_v4 = vld [vmem:[%s9477_s1 + $0x390] sm:$0xff]   ;;  %v7366_v5 = vld [vmem:[%s9477_s1 + $0x358] sm:$0xff]  }
  0x41   : > { %6583 = vmatpush3.bf16.msra.mxu0 %v7314_v6  ;;  %v7367_v6 = vld [vmem:[%s9477_s1 + $0x3d8] sm:$0xff]  }
  0x42   : > { %6605 = vmatpush3.bf16.msra.mxu1 %v7315_v7  ;;  %6584 = vmatprep.subr.bf16.mxu0 %v7316_v9  ;;  %v7368_v7 = vld [vmem:[%s9477_s1 + $0x318] sm:$0xff]   ;;  %v7370_v9 = vld [vmem:[%s9477_s1 + $0x360] sm:$0xff]  }
  0x43   : > { %6606 = vmatprep.subr.bf16.mxu1 %v7317_v12  ;;  %v7373_v12 = vld [vmem:[%s9477_s1 + $0x3a0] sm:$0xff]  }
  0x45   : > { %6585 = vmatpush3.bf16.msra.mxu0 %v7318_v13  ;;  %v7374_v13 = vld [vmem:[%s9477_s1 + $0x368] sm:$0xff]  }
  0x46   : > { %6607 = vmatpush3.bf16.msra.mxu1 %v7319_v16  ;;  %6614 = vmatprep.subr.bf16.mxu0 %v7321_v18  ;;  %v7377_v16 = vld [vmem:[%s9477_s1 + $0x3a8] sm:$0xff]   ;;  %v7379_v18 = vld [vmem:[%s9477_s1 + $0x3f0] sm:$0xff]  }
  0x47   : > { %6636 = vmatprep.subr.bf16.mxu1 %v7322_v19  ;;  %v7380_v19 = vld [vmem:[%s9477_s1 + $0x330] sm:$0xff]  }
  0x48   : > { %4754 = vmatmul.mubr.bf16.vlgmr.msra.gmra.mrb[4].mxu0 %v1257_v10  ;;  %v7371_v10 = vld [vmem:[%s9477_s1 + $0x3e0] sm:$0xff]  }
  0x49   : > { %4794 = vmatmul.mubr.bf16.vlgmr.msra.gmra.mrb[4].mxu1 %v1264_v15  ;;  %6615 = vmatpush3.bf16.msra.mxu0 %v7323_v20  ;;  %v7376_v15 = vld [vmem:[%s9477_s1 + $0x328] sm:$0xff]   ;;  %v7381_v20 = vld [vmem:[%s9477_s1 + $0x3b0] sm:$0xff]  }
  0x4a   : > { %6637 = vmatpush3.bf16.msra.mxu1 %v7324_v21  ;;  %6616 = vmatprep.subr.bf16.mxu0 %v7325_v22  ;;  %v7382_v21 = vld [vmem:[%s9477_s1 + $0x378] sm:$0xff]  }
  0x4b   : > { %6638 = vmatprep.subr.bf16.mxu1 %v7326_v23  ;;  %4833 = vmatprep.mubr.bf16.mxu0 %v1282_v53  ;;  %v180_v22 = vld [vmem:[%s7941_s28 + $0x18] sm:$0xff]  ;;  %v7408_v53 = vld [vmem:[%s9477_s1 + $0x4e8] sm:$0xff]  }
  0x4c   : > { %4873 = vmatprep.mubr.bf16.mxu1 %v1283_v56  ;;  %v7383_v23 = vld [vmem:[%s9477_s1 + $0x3f8] sm:$0xff]   ;;  %v7411_v56 = vld [vmem:[%s9477_s1 + $0x470] sm:$0xff]  }
  0x4d   : > { %6617 = vmatpush3.bf16.msra.mxu0 %v7327_v24  ;;  %v1291_v24 = vrot.slane %v180_v22, %v7956_v41 }
  0x4e   : > { %6639 = vmatpush3.bf16.msra.mxu1 %v7328_v25  ;;  %6618 = vmatprep.subr.bf16.mxu0 %v7329_v26  ;;  %v1284_v25 = vcombine.high %v180_v22, %v180_v22  ;;  %v7384_v26 = vld [vmem:[%s9477_s1 + $0x338] sm:$0xff]   ;;  %v7436_v22 = vld [vmem:[%s9477_s1 + $0x560] sm:$0xff]  }
  0x4f   : > { %6640 = vmatprep.subr.bf16.mxu1 %v7330_v27  ;;  %v7385_v27 = vld [vmem:[%s9477_s1 + $0x3b8] sm:$0xff]  }
  0x51   : > { %6619 = vmatpush3.bf16.msra.mxu0 %v7331_v28  ;;  %v1299_v28 = vcombine.high %v1291_v24, %v1291_v24 }
  0x52   : > { %6641 = vmatpush3.bf16.msra.mxu1 %v7332_v29  ;;  %6620 = vmatprep.subr.bf16.mxu0 %v7333_v30  ;;  %v1298_v29 = vrot.slane %v1284_v25, %v7956_v41  ;;  %v7387_v30 = vld [vmem:[%s9477_s1 + $0x440] sm:$0xff]  }
  0x53   : > { %6642 = vmatprep.subr.bf16.mxu1 %v7334_v31  ;;  %v7439_v25 = vld [vmem:[%s9477_s1 + $0x5a0] sm:$0xff]  }
  0x54   : > { %v1300_v31 = vcombine.high %v1298_v29, %v1298_v29 }
  0x55   : > { %6621 = vmatpush3.bf16.msra.mxu0 %v7335_v32  ;;  %v7388_v32 = vld [vmem:[%s9477_s1 + $0x4c0] sm:$0xff]  }
  0x56   : > { %6643 = vmatpush3.bf16.msra.mxu1 %v7336_v33  ;;  %6622 = vmatprep.subr.bf16.mxu0 %v7337_v34  ;;  %v7389_v33 = vld [vmem:[%s9477_s1 + $0x400] sm:$0xff]  }
  0x57   : > { %6644 = vmatprep.subr.bf16.mxu1 %v7338_v35  ;;  %v7390_v34 = vld [vmem:[%s9477_s1 + $0x480] sm:$0xff]   ;;  %v7391_v35 = vld [vmem:[%s9477_s1 + $0x448] sm:$0xff]  }
  0x59   : > { %6623 = vmatpush3.bf16.msra.mxu0 %v7339_v36  ;;  %v7392_v36 = vld [vmem:[%s9477_s1 + $0x4c8] sm:$0xff]  }
  0x5a   : > { %6645 = vmatpush3.bf16.msra.mxu1 %v7340_v37  ;;  %6624 = vmatprep.subr.bf16.mxu0 %v7341_v38  ;;  %v7393_v37 = vld [vmem:[%s9477_s1 + $0x408] sm:$0xff]  }
  0x5b   : > { %6646 = vmatprep.subr.bf16.mxu1 %v7342_v39  ;;  %v7394_v38 = vld [vmem:[%s9477_s1 + $0x488] sm:$0xff]   ;;  %v7395_v39 = vld [vmem:[%s9477_s1 + $0x450] sm:$0xff]  }
  0x5d   : > { %6625 = vmatpush3.bf16.msra.mxu0 %v7343_v40  ;;  %v7396_v40 = vld [vmem:[%s9477_s1 + $0x4d0] sm:$0xff]  }
  0x5e   : > { %6647 = vmatpush3.bf16.msra.mxu1 %v7344_v42  ;;  %6626 = vmatprep.subr.bf16.mxu0 %v7345_v43  ;;  %v7397_v42 = vld [vmem:[%s9477_s1 + $0x410] sm:$0xff]  }
  0x5f   : > { %6648 = vmatprep.subr.bf16.mxu1 %v7346_v44  ;;  %v7398_v43 = vld [vmem:[%s9477_s1 + $0x490] sm:$0xff]   ;;  %v7399_v44 = vld [vmem:[%s9477_s1 + $0x458] sm:$0xff]  }
  0x61   : > { %6627 = vmatpush3.bf16.msra.mxu0 %v7347_v45  ;;  %v7400_v45 = vld [vmem:[%s9477_s1 + $0x4d8] sm:$0xff]  }
  0x62   : > { %6649 = vmatpush3.bf16.msra.mxu1 %v7348_v46  ;;  %6628 = vmatprep.subr.bf16.mxu0 %v7349_v48  ;;  %v7401_v46 = vld [vmem:[%s9477_s1 + $0x418] sm:$0xff]   ;;  %v7403_v48 = vld [vmem:[%s9477_s1 + $0x460] sm:$0xff]  }
  0x63   : > { %6650 = vmatprep.subr.bf16.mxu1 %v7350_v51  ;;  %v7406_v51 = vld [vmem:[%s9477_s1 + $0x4a0] sm:$0xff]  }
  0x65   : > { %6629 = vmatpush3.bf16.msra.mxu0 %v7351_v52  ;;  %v7407_v52 = vld [vmem:[%s9477_s1 + $0x468] sm:$0xff]  }
  0x66   : > { %6651 = vmatpush3.bf16.msra.mxu1 %v7352_v55  ;;  %6658 = vmatprep.subr.bf16.mxu0 %v7354_v57  ;;  %v7410_v55 = vld [vmem:[%s9477_s1 + $0x4a8] sm:$0xff]   ;;  %v7412_v57 = vld [vmem:[%s9477_s1 + $0x4f0] sm:$0xff]  }
  0x67   : > { %6680 = vmatprep.subr.bf16.mxu1 %v7355_v58  ;;  %v7413_v58 = vld [vmem:[%s9477_s1 + $0x430] sm:$0xff]  }
  0x68   : > { %4834 = vmatmul.mubr.bf16.vlgmr.msra.gmra.mrb[8].mxu0 %v1274_v49  ;;  %v7404_v49 = vld [vmem:[%s9477_s1 + $0x4e0] sm:$0xff]  }
  0x69   : > { %4874 = vmatmul.mubr.bf16.vlgmr.msra.gmra.mrb[8].mxu1 %v1281_v54  ;;  %6659 = vmatpush3.bf16.msra.mxu0 %v7356_v59  ;;  %v7409_v54 = vld [vmem:[%s9477_s1 + $0x428] sm:$0xff]   ;;  %v7414_v59 = vld [vmem:[%s9477_s1 + $0x4b0] sm:$0xff]  }
  0x6a   : > { %6681 = vmatpush3.bf16.msra.mxu1 %v7357_v60  ;;  %6660 = vmatprep.subr.bf16.mxu0 %v7358_v61  ;;  %v7415_v60 = vld [vmem:[%s9477_s1 + $0x478] sm:$0xff]   ;;  %v181_v61 = vld [vmem:[%s7941_s28 + $0x20] sm:$0xff] }
  0x6b   : > { %6682 = vmatprep.subr.bf16.mxu1 %v7359_v62  ;;  %4913 = vmatprep.mubr.bf16.mxu0 %v1299_v28  ;;  %v7416_v62 = vld [vmem:[%s9477_s1 + $0x4f8] sm:$0xff]   ;;  %v7442_v28 = vld [vmem:[%s9477_s1 + $0x528] sm:$0xff]  }
  0x6c   : > { %4953 = vmatprep.mubr.bf16.mxu1 %v1300_v31  ;;  %v7445_v31 = vld [vmem:[%s9477_s1 + $0x5f0] sm:$0xff]  }
  0x6d   : > { %6661 = vmatpush3.bf16.msra.mxu0 %v7360_v63  ;;  %v1308_v63 = vrot.slane %v181_v61, %v7956_v41 }
  0x6e   : > { %6683 = vmatpush3.bf16.msra.mxu1 %v7361_v0  ;;  %6662 = vmatprep.subr.bf16.mxu0 %v7362_v1  ;;  %v1301_v0 = vcombine.high %v181_v61, %v181_v61  ;;  %v7417_v1 = vld [vmem:[%s9477_s1 + $0x438] sm:$0xff]   ;;  %v7469_v61 = vld [vmem:[%s9477_s1 + $0x660] sm:$0xff]  }
  0x6f   : > { %6684 = vmatprep.subr.bf16.mxu1 %v7363_v2  ;;  %v7418_v2 = vld [vmem:[%s9477_s1 + $0x4b8] sm:$0xff]  }
  0x71   : > { %6663 = vmatpush3.bf16.msra.mxu0 %v7364_v3  ;;  %v1316_v3 = vcombine.high %v1308_v63, %v1308_v63 }
  0x72   : > { %6685 = vmatpush3.bf16.msra.mxu1 %v7365_v4  ;;  %6664 = vmatprep.subr.bf16.mxu0 %v7366_v5  ;;  %v1315_v4 = vrot.slane %v1301_v0, %v7956_v41  ;;  %v7420_v5 = vld [vmem:[%s9477_s1 + $0x540] sm:$0xff]  }
  0x73   : > { %6686 = vmatprep.subr.bf16.mxu1 %v7367_v6  ;;  %v7472_v0 = vld [vmem:[%s9477_s1 + $0x6a0] sm:$0xff]  }
  0x74   : > { %v1317_v6 = vcombine.high %v1315_v4, %v1315_v4 }
  0x75   : > { %6665 = vmatpush3.bf16.msra.mxu0 %v7368_v7  ;;  %v7421_v7 = vld [vmem:[%s9477_s1 + $0x5c0] sm:$0xff]  }
  0x76   : > { %6687 = vmatpush3.bf16.msra.mxu1 %v7369_v8  ;;  %6666 = vmatprep.subr.bf16.mxu0 %v7370_v9  ;;  %v7422_v8 = vld [vmem:[%s9477_s1 + $0x500] sm:$0xff]  }
  0x77   : > { %6688 = vmatprep.subr.bf16.mxu1 %v7371_v10  ;;  %v7423_v9 = vld [vmem:[%s9477_s1 + $0x580] sm:$0xff]   ;;  %v7424_v10 = vld [vmem:[%s9477_s1 + $0x548] sm:$0xff]  }
  0x79   : > { %6667 = vmatpush3.bf16.msra.mxu0 %v7372_v11  ;;  %v7425_v11 = vld [vmem:[%s9477_s1 + $0x5c8] sm:$0xff]  }
  0x7a   : > { %6689 = vmatpush3.bf16.msra.mxu1 %v7373_v12  ;;  %6668 = vmatprep.subr.bf16.mxu0 %v7374_v13  ;;  %v7426_v12 = vld [vmem:[%s9477_s1 + $0x508] sm:$0xff]  }
  0x7b   : > { %6690 = vmatprep.subr.bf16.mxu1 %v7375_v14  ;;  %v7427_v13 = vld [vmem:[%s9477_s1 + $0x588] sm:$0xff]   ;;  %v7428_v14 = vld [vmem:[%s9477_s1 + $0x550] sm:$0xff]  }
  0x7d   : > { %6669 = vmatpush3.bf16.msra.mxu0 %v7376_v15  ;;  %v7429_v15 = vld [vmem:[%s9477_s1 + $0x5d0] sm:$0xff]  }
  0x7e   : > { %6691 = vmatpush3.bf16.msra.mxu1 %v7377_v16  ;;  %6670 = vmatprep.subr.bf16.mxu0 %v7378_v17  ;;  %v7430_v16 = vld [vmem:[%s9477_s1 + $0x510] sm:$0xff]  }
  0x7f   : > { %6692 = vmatprep.subr.bf16.mxu1 %v7379_v18  ;;  %v7431_v17 = vld [vmem:[%s9477_s1 + $0x590] sm:$0xff]   ;;  %v7432_v18 = vld [vmem:[%s9477_s1 + $0x558] sm:$0xff]  }
  0x81   : > { %6671 = vmatpush3.bf16.msra.mxu0 %v7380_v19  ;;  %v7433_v19 = vld [vmem:[%s9477_s1 + $0x5d8] sm:$0xff]  }
  0x82   : > { %6693 = vmatpush3.bf16.msra.mxu1 %v7381_v20  ;;  %6672 = vmatprep.subr.bf16.mxu0 %v7382_v21  ;;  %v7434_v20 = vld [vmem:[%s9477_s1 + $0x518] sm:$0xff]  }
  0x83   : > { %6694 = vmatprep.subr.bf16.mxu1 %v7383_v23  ;;  %v7435_v21 = vld [vmem:[%s9477_s1 + $0x598] sm:$0xff]   ;;  %v7437_v23 = vld [vmem:[%s9477_s1 + $0x5e0] sm:$0xff]  }
  0x85   : > { %6673 = vmatpush3.bf16.msra.mxu0 %v7384_v26  ;;  %v7440_v26 = vld [vmem:[%s9477_s1 + $0x568] sm:$0xff]  }
  0x86   : > { %6695 = vmatpush3.bf16.msra.mxu1 %v7385_v27  ;;  %6702 = vmatprep.subr.bf16.mxu0 %v7387_v30  ;;  %v7441_v27 = vld [vmem:[%s9477_s1 + $0x5e8] sm:$0xff]   ;;  %v7444_v30 = vld [vmem:[%s9477_s1 + $0x570] sm:$0xff]  }
  0x87   : > { %6724 = vmatprep.subr.bf16.mxu1 %v7388_v32  ;;  %v7446_v32 = vld [vmem:[%s9477_s1 + $0x530] sm:$0xff]  }
  0x88   : > { %4914 = vmatmul.mubr.bf16.vlgmr.msra.gmra.mrb[12].mxu0 %v1291_v24  ;;  %v7438_v24 = vld [vmem:[%s9477_s1 + $0x520] sm:$0xff]  }
  0x89   : > { %4954 = vmatmul.mubr.bf16.vlgmr.msra.gmra.mrb[12].mxu1 %v1298_v29  ;;  %6703 = vmatpush3.bf16.msra.mxu0 %v7389_v33  ;;  %v7443_v29 = vld [vmem:[%s9477_s1 + $0x5a8] sm:$0xff]   ;;  %v7447_v33 = vld [vmem:[%s9477_s1 + $0x5b0] sm:$0xff]  }
  0x8a   : > { %6725 = vmatpush3.bf16.msra.mxu1 %v7390_v34  ;;  %6704 = vmatprep.subr.bf16.mxu0 %v7391_v35  ;;  %v7448_v34 = vld [vmem:[%s9477_s1 + $0x578] sm:$0xff]   ;;  %v182_v35 = vld [vmem:[%s7941_s28 + $0x28] sm:$0xff] }
  0x8b   : > { %6726 = vmatprep.subr.bf16.mxu1 %v7392_v36  ;;  %4993 = vmatprep.mubr.bf16.mxu0 %v1316_v3  ;;  %v7449_v36 = vld [vmem:[%s9477_s1 + $0x5f8] sm:$0xff]   ;;  %v7475_v3 = vld [vmem:[%s9477_s1 + $0x628] sm:$0xff]  }
  0x8c   : > { %5033 = vmatprep.mubr.bf16.mxu1 %v1317_v6  ;;  %v7478_v6 = vld [vmem:[%s9477_s1 + $0x6f0] sm:$0xff]  }
  0x8d   : > { %6705 = vmatpush3.bf16.msra.mxu0 %v7393_v37  ;;  %v1325_v37 = vrot.slane %v182_v35, %v7956_v41 }
  0x8e   : > { %6727 = vmatpush3.bf16.msra.mxu1 %v7394_v38  ;;  %6706 = vmatprep.subr.bf16.mxu0 %v7395_v39  ;;  %v1318_v38 = vcombine.high %v182_v35, %v182_v35  ;;  %v7450_v39 = vld [vmem:[%s9477_s1 + $0x538] sm:$0xff]   ;;  %v7502_v35 = vld [vmem:[%s9477_s1 + $0x760] sm:$0xff]  }
  0x8f   : > { %6728 = vmatprep.subr.bf16.mxu1 %v7396_v40  ;;  %v7451_v40 = vld [vmem:[%s9477_s1 + $0x5b8] sm:$0xff]  }
  0x91   : > { %6707 = vmatpush3.bf16.msra.mxu0 %v7397_v42  ;;  %v1333_v42 = vcombine.high %v1325_v37, %v1325_v37 }
  0x92   : > { %6729 = vmatpush3.bf16.msra.mxu1 %v7398_v43  ;;  %6708 = vmatprep.subr.bf16.mxu0 %v7399_v44  ;;  %v1332_v43 = vrot.slane %v1318_v38, %v7956_v41  ;;  %v7453_v44 = vld [vmem:[%s9477_s1 + $0x640] sm:$0xff]  }
  0x93   : > { %6730 = vmatprep.subr.bf16.mxu1 %v7400_v45  ;;  %v7505_v38 = vld [vmem:[%s9477_s1 + $0x7a0] sm:$0xff]  }
  0x94   : > { %v1334_v45 = vcombine.high %v1332_v43, %v1332_v43 }
  0x95   : > { %6709 = vmatpush3.bf16.msra.mxu0 %v7401_v46  ;;  %v7454_v46 = vld [vmem:[%s9477_s1 + $0x6c0] sm:$0xff]  }
  0x96   : > { %6731 = vmatpush3.bf16.msra.mxu1 %v7402_v47  ;;  %6710 = vmatprep.subr.bf16.mxu0 %v7403_v48  ;;  %v7455_v47 = vld [vmem:[%s9477_s1 + $0x600] sm:$0xff]  }
  0x97   : > { %6732 = vmatprep.subr.bf16.mxu1 %v7404_v49  ;;  %v7456_v48 = vld [vmem:[%s9477_s1 + $0x680] sm:$0xff]   ;;  %v7457_v49 = vld [vmem:[%s9477_s1 + $0x648] sm:$0xff]  }
  0x99   : > { %6711 = vmatpush3.bf16.msra.mxu0 %v7405_v50  ;;  %v7458_v50 = vld [vmem:[%s9477_s1 + $0x6c8] sm:$0xff]  }
  0x9a   : > { %6733 = vmatpush3.bf16.msra.mxu1 %v7406_v51  ;;  %6712 = vmatprep.subr.bf16.mxu0 %v7407_v52  ;;  %v7459_v51 = vld [vmem:[%s9477_s1 + $0x608] sm:$0xff]  }
  0x9b   : > { %6734 = vmatprep.subr.bf16.mxu1 %v7408_v53  ;;  %v7460_v52 = vld [vmem:[%s9477_s1 + $0x688] sm:$0xff]   ;;  %v7461_v53 = vld [vmem:[%s9477_s1 + $0x650] sm:$0xff]  }
  0x9d   : > { %6713 = vmatpush3.bf16.msra.mxu0 %v7409_v54  ;;  %v7462_v54 = vld [vmem:[%s9477_s1 + $0x6d0] sm:$0xff]  }
  0x9e   : > { %6735 = vmatpush3.bf16.msra.mxu1 %v7410_v55  ;;  %6714 = vmatprep.subr.bf16.mxu0 %v7411_v56  ;;  %v7463_v55 = vld [vmem:[%s9477_s1 + $0x610] sm:$0xff]  }
  0x9f   : > { %6736 = vmatprep.subr.bf16.mxu1 %v7412_v57  ;;  %v7464_v56 = vld [vmem:[%s9477_s1 + $0x690] sm:$0xff]   ;;  %v7465_v57 = vld [vmem:[%s9477_s1 + $0x658] sm:$0xff]  }
  0xa1   : > { %6715 = vmatpush3.bf16.msra.mxu0 %v7413_v58  ;;  %v7466_v58 = vld [vmem:[%s9477_s1 + $0x6d8] sm:$0xff]  }
  0xa2   : > { %6737 = vmatpush3.bf16.msra.mxu1 %v7414_v59  ;;  %6716 = vmatprep.subr.bf16.mxu0 %v7415_v60  ;;  %v7467_v59 = vld [vmem:[%s9477_s1 + $0x618] sm:$0xff]  }
  0xa3   : > { %6738 = vmatprep.subr.bf16.mxu1 %v7416_v62  ;;  %v7468_v60 = vld [vmem:[%s9477_s1 + $0x698] sm:$0xff]   ;;  %v7470_v62 = vld [vmem:[%s9477_s1 + $0x6e0] sm:$0xff]  }
  0xa5   : > { %6717 = vmatpush3.bf16.msra.mxu0 %v7417_v1  ;;  %v7473_v1 = vld [vmem:[%s9477_s1 + $0x668] sm:$0xff]  }
  0xa6   : > { %6739 = vmatpush3.bf16.msra.mxu1 %v7418_v2  ;;  %6746 = vmatprep.subr.bf16.mxu0 %v7420_v5  ;;  %v7474_v2 = vld [vmem:[%s9477_s1 + $0x6e8] sm:$0xff]   ;;  %v7477_v5 = vld [vmem:[%s9477_s1 + $0x670] sm:$0xff]  }
  0xa7   : > { %6768 = vmatprep.subr.bf16.mxu1 %v7421_v7  ;;  %v7479_v7 = vld [vmem:[%s9477_s1 + $0x630] sm:$0xff]  }
  0xa8   : > { %4994 = vmatmul.mubr.bf16.vlgmr.msra.gmra.mrb[16].mxu0 %v1308_v63  ;;  %v7471_v63 = vld [vmem:[%s9477_s1 + $0x620] sm:$0xff]  }
  0xa9   : > { %5034 = vmatmul.mubr.bf16.vlgmr.msra.gmra.mrb[16].mxu1 %v1315_v4  ;;  %6747 = vmatpush3.bf16.msra.mxu0 %v7422_v8  ;;  %v7476_v4 = vld [vmem:[%s9477_s1 + $0x6a8] sm:$0xff]   ;;  %v7480_v8 = vld [vmem:[%s9477_s1 + $0x6b0] sm:$0xff]  }
  0xaa   : > { %6769 = vmatpush3.bf16.msra.mxu1 %v7423_v9  ;;  %6748 = vmatprep.subr.bf16.mxu0 %v7424_v10  ;;  %v7481_v9 = vld [vmem:[%s9477_s1 + $0x678] sm:$0xff]  }
  0xab   : > { %6770 = vmatprep.subr.bf16.mxu1 %v7425_v11  ;;  %5073 = vmatprep.mubr.bf16.mxu0 %v1333_v42  ;;  %v7482_v10 = vld [vmem:[%s9477_s1 + $0x6f8] sm:$0xff]   ;;  %v183_v11 = vld [vmem:[%s7941_s28 + $0x30] sm:$0xff]  ;;  %v7508_v42 = vld [vmem:[%s9477_s1 + $0x728] sm:$0xff]  }
  0xac   : > { %5113 = vmatprep.mubr.bf16.mxu1 %v1334_v45  ;;  %v7511_v45 = vld [vmem:[%s9477_s1 + $0x7f0] sm:$0xff]  }
  0xad   : > { %6749 = vmatpush3.bf16.msra.mxu0 %v7426_v12  ;;  %v7483_v12 = vld [vmem:[%s9477_s1 + $0x638] sm:$0xff]  }
  0xae   : > { %6771 = vmatpush3.bf16.msra.mxu1 %v7427_v13  ;;  %6750 = vmatprep.subr.bf16.mxu0 %v7428_v14  ;;  %v1342_v13 = vrot.slane %v183_v11, %v7956_v41  ;;  %v1335_v14 = vcombine.high %v183_v11, %v183_v11  ;;  %v7525_v11 = vld [vmem:[%s9477_s1 + $0x808] sm:$0xff]  }
  0xaf   : > { %6772 = vmatprep.subr.bf16.mxu1 %v7429_v15  ;;  %v7484_v15 = vld [vmem:[%s9477_s1 + $0x6b8] sm:$0xff]  }
  0xb1   : > { %6751 = vmatpush3.bf16.msra.mxu0 %v7430_v16  ;;  %v1350_v16 = vcombine.high %v1342_v13, %v1342_v13 }
  0xb2   : > { %6773 = vmatpush3.bf16.msra.mxu1 %v7431_v17  ;;  %6752 = vmatprep.subr.bf16.mxu0 %v7432_v18  ;;  %v1349_v17 = vrot.slane %v1335_v14, %v7956_v41  ;;  %v7486_v18 = vld [vmem:[%s9477_s1 + $0x740] sm:$0xff]   ;;  %v7528_v14 = vld [vmem:[%s9477_s1 + $0x8d0] sm:$0xff]  }
  0xb3   : > { %6774 = vmatprep.subr.bf16.mxu1 %v7433_v19  ;;  %v7487_v19 = vld [vmem:[%s9477_s1 + $0x7c0] sm:$0xff]  }
  0xb5   : > { %6753 = vmatpush3.bf16.msra.mxu0 %v7434_v20  ;;  %v1351_v20 = vcombine.high %v1349_v17, %v1349_v17 }
  0xb6   : > { %6775 = vmatpush3.bf16.msra.mxu1 %v7435_v21  ;;  %6754 = vmatprep.subr.bf16.mxu0 %v7436_v22  ;;  %v7488_v21 = vld [vmem:[%s9477_s1 + $0x700] sm:$0xff]  }
  0xb7   : > { %6776 = vmatprep.subr.bf16.mxu1 %v7437_v23  ;;  %v7489_v22 = vld [vmem:[%s9477_s1 + $0x780] sm:$0xff]   ;;  %v7490_v23 = vld [vmem:[%s9477_s1 + $0x748] sm:$0xff]  }
  0xb9   : > { %6755 = vmatpush3.bf16.msra.mxu0 %v7438_v24  ;;  %v7491_v24 = vld [vmem:[%s9477_s1 + $0x7c8] sm:$0xff]  }
  0xba   : > { %6777 = vmatpush3.bf16.msra.mxu1 %v7439_v25  ;;  %6756 = vmatprep.subr.bf16.mxu0 %v7440_v26  ;;  %v7492_v25 = vld [vmem:[%s9477_s1 + $0x708] sm:$0xff]  }
  0xbb   : > { %6778 = vmatprep.subr.bf16.mxu1 %v7441_v27  ;;  %v7493_v26 = vld [vmem:[%s9477_s1 + $0x788] sm:$0xff]   ;;  %v7494_v27 = vld [vmem:[%s9477_s1 + $0x750] sm:$0xff]  }
  0xbd   : > { %6757 = vmatpush3.bf16.msra.mxu0 %v7442_v28  ;;  %v7495_v28 = vld [vmem:[%s9477_s1 + $0x7d0] sm:$0xff]  }
  0xbe   : > { %6779 = vmatpush3.bf16.msra.mxu1 %v7443_v29  ;;  %6758 = vmatprep.subr.bf16.mxu0 %v7444_v30  ;;  %v7496_v29 = vld [vmem:[%s9477_s1 + $0x710] sm:$0xff]  }
  0xbf   : > { %6780 = vmatprep.subr.bf16.mxu1 %v7445_v31  ;;  %v7497_v30 = vld [vmem:[%s9477_s1 + $0x790] sm:$0xff]   ;;  %v7498_v31 = vld [vmem:[%s9477_s1 + $0x758] sm:$0xff]  }
  0xc1   : > { %6759 = vmatpush3.bf16.msra.mxu0 %v7446_v32  ;;  %v7499_v32 = vld [vmem:[%s9477_s1 + $0x7d8] sm:$0xff]  }
  0xc2   : > { %6781 = vmatpush3.bf16.msra.mxu1 %v7447_v33  ;;  %6760 = vmatprep.subr.bf16.mxu0 %v7448_v34  ;;  %v7500_v33 = vld [vmem:[%s9477_s1 + $0x718] sm:$0xff]  }
  0xc3   : > { %6782 = vmatprep.subr.bf16.mxu1 %v7449_v36  ;;  %v7501_v34 = vld [vmem:[%s9477_s1 + $0x798] sm:$0xff]   ;;  %v7503_v36 = vld [vmem:[%s9477_s1 + $0x7e0] sm:$0xff]  }
  0xc5   : > { %6761 = vmatpush3.bf16.msra.mxu0 %v7450_v39  ;;  %v7506_v39 = vld [vmem:[%s9477_s1 + $0x768] sm:$0xff]  }
  0xc6   : > { %6783 = vmatpush3.bf16.msra.mxu1 %v7451_v40  ;;  %6790 = vmatprep.subr.bf16.mxu0 %v7453_v44  ;;  %v7507_v40 = vld [vmem:[%s9477_s1 + $0x7e8] sm:$0xff]   ;;  %v7510_v44 = vld [vmem:[%s9477_s1 + $0x770] sm:$0xff]  }
  0xc7   : > { %6812 = vmatprep.subr.bf16.mxu1 %v7454_v46 }
  0xc8   : > { %5074 = vmatmul.mubr.bf16.vlgmr.msra.gmra.mrb[20].mxu0 %v1325_v37  ;;  %v7504_v37 = vld [vmem:[%s9477_s1 + $0x720] sm:$0xff]  }
  0xc9   : > { %5114 = vmatmul.mubr.bf16.vlgmr.msra.gmra.mrb[20].mxu1 %v1332_v43  ;;  %6791 = vmatpush3.bf16.msra.mxu0 %v7455_v47  ;;  %v7509_v43 = vld [vmem:[%s9477_s1 + $0x7a8] sm:$0xff]  }
  0xca   : > { %6813 = vmatpush3.bf16.msra.mxu1 %v7456_v48  ;;  %6792 = vmatprep.subr.bf16.mxu0 %v7457_v49  ;;  %v7512_v48 = vld [vmem:[%s9477_s1 + $0x730] sm:$0xff]  }
  0xcb   : > { %6814 = vmatprep.subr.bf16.mxu1 %v7458_v50  ;;  %5153 = vmatprep.mubr.bf16.mxu0 %v1350_v16  ;;  %v7513_v49 = vld [vmem:[%s9477_s1 + $0x7b0] sm:$0xff]  }
  0xcc   : > { %5193 = vmatprep.mubr.bf16.mxu1 %v1351_v20  ;;  %v7530_v16 = vld [vmem:[%s9477_s1 + $0x890] sm:$0xff]   ;;  %v7534_v20 = vld [vmem:[%s9477_s1 + $0x898] sm:$0xff]  }
  0xcd   : > { %6793 = vmatpush3.bf16.msra.mxu0 %v7459_v51 }
  0xce   : > { %6815 = vmatpush3.bf16.msra.mxu1 %v7460_v52  ;;  %6794 = vmatprep.subr.bf16.mxu0 %v7461_v53 }
  0xcf   : > { %6816 = vmatprep.subr.bf16.mxu1 %v7462_v54 }
  0xd1   : > { %6795 = vmatpush3.bf16.msra.mxu0 %v7463_v55 }
  0xd2   : > { %6817 = vmatpush3.bf16.msra.mxu1 %v7464_v56  ;;  %6796 = vmatprep.subr.bf16.mxu0 %v7465_v57  ;;  %v7514_v56 = vld [vmem:[%s9477_s1 + $0x778] sm:$0xff]  }
  0xd3   : > { %6818 = vmatprep.subr.bf16.mxu1 %v7466_v58  ;;  %v7515_v57 = vld [vmem:[%s9477_s1 + $0x7f8] sm:$0xff]  }
  0xd5   : > { %6797 = vmatpush3.bf16.msra.mxu0 %v7467_v59 }
  0xd6   : > { %6819 = vmatpush3.bf16.msra.mxu1 %v7468_v60  ;;  %6798 = vmatprep.subr.bf16.mxu0 %v7469_v61  ;;  %v7516_v61 = vld [vmem:[%s9477_s1 + $0x738] sm:$0xff]  }
  0xd7   : > { %6820 = vmatprep.subr.bf16.mxu1 %v7470_v62  ;;  %v184_v62 = vld [vmem:[%s7941_s28 + $0x38] sm:$0xff] }
  0xd9   : > { %6799 = vmatpush3.bf16.msra.mxu0 %v7471_v63  ;;  %v7517_v63 = vld [vmem:[%s9477_s1 + $0x7b8] sm:$0xff]  }
  0xda   : > { %6821 = vmatpush3.bf16.msra.mxu1 %v7472_v0  ;;  %6800 = vmatprep.subr.bf16.mxu0 %v7473_v1  ;;  %v1359_v0 = vrot.slane %v184_v62, %v7956_v41  ;;  %v1352_v1 = vcombine.high %v184_v62, %v184_v62  ;;  %v7558_v62 = vld [vmem:[%s9477_s1 + $0x908] sm:$0xff]  }
  0xdb   : > { %6822 = vmatprep.subr.bf16.mxu1 %v7474_v2  ;;  %v7519_v2 = vld [vmem:[%s9477_s1 + $0x840] sm:$0xff]  }
  0xdd   : > { %6801 = vmatpush3.bf16.msra.mxu0 %v7475_v3  ;;  %v1367_v3 = vcombine.high %v1359_v0, %v1359_v0 }
  0xde   : > { %6823 = vmatpush3.bf16.msra.mxu1 %v7476_v4  ;;  %6802 = vmatprep.subr.bf16.mxu0 %v7477_v5  ;;  %v1366_v4 = vrot.slane %v1352_v1, %v7956_v41  ;;  %v7520_v5 = vld [vmem:[%s9477_s1 + $0x8c0] sm:$0xff]   ;;  %v7561_v1 = vld [vmem:[%s9477_s1 + $0x9d0] sm:$0xff]  }
  0xdf   : > { %6824 = vmatprep.subr.bf16.mxu1 %v7478_v6  ;;  %v7521_v6 = vld [vmem:[%s9477_s1 + $0x800] sm:$0xff]  }
  0xe1   : > { %6803 = vmatpush3.bf16.msra.mxu0 %v7479_v7  ;;  %v1368_v7 = vcombine.high %v1366_v4, %v1366_v4 }
  0xe2   : > { %6825 = vmatpush3.bf16.msra.mxu1 %v7480_v8  ;;  %6804 = vmatprep.subr.bf16.mxu0 %v7481_v9  ;;  %v7522_v8 = vld [vmem:[%s9477_s1 + $0x880] sm:$0xff]   ;;  %v7523_v9 = vld [vmem:[%s9477_s1 + $0x848] sm:$0xff]  }
  0xe3   : > { %6826 = vmatprep.subr.bf16.mxu1 %v7482_v10  ;;  %v7524_v10 = vld [vmem:[%s9477_s1 + $0x8c8] sm:$0xff]  }
  0xe5   : > { %6805 = vmatpush3.bf16.msra.mxu0 %v7483_v12  ;;  %v7526_v12 = vld [vmem:[%s9477_s1 + $0x888] sm:$0xff]  }
  0xe6   : > { %6827 = vmatpush3.bf16.msra.mxu1 %v7484_v15  ;;  %6834 = vmatprep.subr.bf16.mxu0 %v7486_v18  ;;  %v7529_v15 = vld [vmem:[%s9477_s1 + $0x810] sm:$0xff]   ;;  %v7532_v18 = vld [vmem:[%s9477_s1 + $0x8d8] sm:$0xff]  }
  0xe7   : > { %6856 = vmatprep.subr.bf16.mxu1 %v7487_v19  ;;  %v7533_v19 = vld [vmem:[%s9477_s1 + $0x818] sm:$0xff]  }
  0xe8   : > { %5154 = vmatmul.mubr.bf16.vlgmr.msra.gmra.mrb[24].mxu0 %v1342_v13  ;;  %v7527_v13 = vld [vmem:[%s9477_s1 + $0x850] sm:$0xff]  }
  0xe9   : > { %5194 = vmatmul.mubr.bf16.vlgmr.msra.gmra.mrb[24].mxu1 %v1349_v17  ;;  %6835 = vmatpush3.bf16.msra.mxu0 %v7488_v21  ;;  %v7531_v17 = vld [vmem:[%s9477_s1 + $0x858] sm:$0xff]   ;;  %v7535_v21 = vld [vmem:[%s9477_s1 + $0x860] sm:$0xff]  }
  0xea   : > { %6857 = vmatpush3.bf16.msra.mxu1 %v7489_v22  ;;  %6836 = vmatprep.subr.bf16.mxu0 %v7490_v23  ;;  %v7536_v22 = vld [vmem:[%s9477_s1 + $0x8e0] sm:$0xff]  }
  0xeb   : > { %6858 = vmatprep.subr.bf16.mxu1 %v7491_v24  ;;  %5233 = vmatprep.mubr.bf16.mxu0 %v1367_v3  ;;  %v7537_v23 = vld [vmem:[%s9477_s1 + $0x820] sm:$0xff]   ;;  %v7563_v3 = vld [vmem:[%s9477_s1 + $0x990] sm:$0xff]  }
  0xec   : > { %5273 = vmatprep.mubr.bf16.mxu1 %v1368_v7  ;;  %v7538_v24 = vld [vmem:[%s9477_s1 + $0x8a0] sm:$0xff]   ;;  %v7567_v7 = vld [vmem:[%s9477_s1 + $0x998] sm:$0xff]  }
  0xed   : > { %6837 = vmatpush3.bf16.msra.mxu0 %v7492_v25  ;;  %v7539_v25 = vld [vmem:[%s9477_s1 + $0x868] sm:$0xff]  }
  0xee   : > { %6859 = vmatpush3.bf16.msra.mxu1 %v7493_v26  ;;  %6838 = vmatprep.subr.bf16.mxu0 %v7494_v27  ;;  %v7540_v26 = vld [vmem:[%s9477_s1 + $0x8e8] sm:$0xff]  }
  0xef   : > { %6860 = vmatprep.subr.bf16.mxu1 %v7495_v28  ;;  %v7541_v27 = vld [vmem:[%s9477_s1 + $0x828] sm:$0xff]  }
  0xf0   : > { %v7542_v28 = vld [vmem:[%s9477_s1 + $0x8a8] sm:$0xff]  }
  0xf1   : > { %6839 = vmatpush3.bf16.msra.mxu0 %v7496_v29  ;;  %v7543_v29 = vld [vmem:[%s9477_s1 + $0x870] sm:$0xff]  }
  0xf2   : > { %6861 = vmatpush3.bf16.msra.mxu1 %v7497_v30  ;;  %6840 = vmatprep.subr.bf16.mxu0 %v7498_v31  ;;  %v7544_v30 = vld [vmem:[%s9477_s1 + $0x8f0] sm:$0xff]  }
  0xf3   : > { %6862 = vmatprep.subr.bf16.mxu1 %v7499_v32 }
  0xf5   : > { %6841 = vmatpush3.bf16.msra.mxu0 %v7500_v33  ;;  %v7545_v33 = vld [vmem:[%s9477_s1 + $0x830] sm:$0xff]  }
  0xf6   : > { %6863 = vmatpush3.bf16.msra.mxu1 %v7501_v34  ;;  %6842 = vmatprep.subr.bf16.mxu0 %v7502_v35  ;;  %v7546_v34 = vld [vmem:[%s9477_s1 + $0x8b0] sm:$0xff]  }
  0xf7   : > { %6864 = vmatprep.subr.bf16.mxu1 %v7503_v36 }
  0xf9   : > { %6843 = vmatpush3.bf16.msra.mxu0 %v7504_v37 }
  0xfa   : > { %6865 = vmatpush3.bf16.msra.mxu1 %v7505_v38  ;;  %6844 = vmatprep.subr.bf16.mxu0 %v7506_v39 }
  0xfb   : > { %6866 = vmatprep.subr.bf16.mxu1 %v7507_v40  ;;  %v6542_v46 = vpop.f32.mrb[0].mxu0 }
  0xfc   : > { %v6564_v47 = vpop.f32.mrb[0].mxu1  ;;  %v6543_v50 = vpop.f32.mrb[1].mxu0 }
  0xfd   : > { %v6565_v51 = vpop.f32.mrb[1].mxu1  ;;  %v6544_v52 = vadd.f32 %v6543_v50, %v6542_v46  ;;  %v6545_v54 = vpop.f32.mrb[2].mxu0  ;;  %6845 = vmatpush3.bf16.msra.mxu0 %v7508_v42  ;;  %v7547_v42 = vld [vmem:[%s9477_s1 + $0x878] sm:$0xff]  }
  0xfe   : > { %v6566_v53 = vadd.f32 %v6565_v51, %v6564_v47  ;;  %v6567_v55 = vpop.f32.mrb[2].mxu1  ;;  %6867 = vmatpush3.bf16.msra.mxu1 %v7509_v43  ;;  %v6546_v58 = vpop.f32.mrb[3].mxu0  ;;  %6846 = vmatprep.subr.bf16.mxu0 %v7510_v44  ;;  %v7548_v43 = vld [vmem:[%s9477_s1 + $0x8f8] sm:$0xff]   ;;  %v7553_v54 = vld [vmem:[%s9477_s1 + $0x9c0] sm:$0xff]  }
  0xff   : > { %v6568_v59 = vpop.f32.mrb[3].mxu1  ;;  %6868 = vmatprep.subr.bf16.mxu1 %v7511_v45  ;;  %v7549_v47 = vld [vmem:[%s9477_s1 + $0x838] sm:$0xff]   ;;  %v7555_v58 = vld [vmem:[%s9477_s1 + $0x980] sm:$0xff]  }
 0x100   : > { %v8638_v60 = vadd.f32 %v6566_v53, %v6544_v52  ;;  %v7552_v53 = vld [vmem:[%s9477_s1 + $0x940] sm:$0xff]  }
 0x101   : > { %6847 = vmatpush3.bf16.msra.mxu0 %v7512_v48  ;;  %v7550_v48 = vld [vmem:[%s9477_s1 + $0x8b8] sm:$0xff]  }
 0x102   : > { %6869 = vmatpush3.bf16.msra.mxu1 %v7513_v49  ;;  %6848 = vmatprep.subr.bf16.mxu0 %v7514_v56  ;;  %v185_v49 = vld [vmem:[%s7941_s28 + $0x40] sm:$0xff] }
 0x103   : > { %6870 = vmatprep.subr.bf16.mxu1 %v7515_v57  ;;  %v1376_v51 = vrot.slane %v185_v49, %v7956_v41  ;;  %v1369_v52 = vcombine.high %v185_v49, %v185_v49  ;;  %v7554_v57 = vld [vmem:[%s9477_s1 + $0x900] sm:$0xff]   ;;  %v7591_v49 = vld [vmem:[%s9477_s1 + $0xa08] sm:$0xff]  }
 0x105   : > { %6849 = vmatpush3.bf16.msra.mxu0 %v7516_v61  ;;  %v1384_v55 = vcombine.high %v1376_v51, %v1376_v51  ;;  %v1383_v56 = vrot.slane %v1369_v52, %v7956_v41  ;;  %v7557_v61 = vld [vmem:[%s9477_s1 + $0x9c8] sm:$0xff]   ;;  %v7594_v52 = vld [vmem:[%s9477_s1 + $0xad0] sm:$0xff]  }
 0x106   : > { %6871 = vmatpush3.bf16.msra.mxu1 %v7517_v63  ;;  %6878 = vmatprep.subr.bf16.mxu0 %v7519_v2  ;;  %v7559_v63 = vld [vmem:[%s9477_s1 + $0x988] sm:$0xff]   ;;  %v7562_v2 = vld [vmem:[%s9477_s1 + $0x910] sm:$0xff]  }
 0x107   : > { %6900 = vmatprep.subr.bf16.mxu1 %v7520_v5  ;;  %v1385_v59 = vcombine.high %v1383_v56, %v1383_v56  ;;  %v7565_v5 = vld [vmem:[%s9477_s1 + $0x9d8] sm:$0xff]  }
 0x108   : > { %5234 = vmatmul.mubr.bf16.vlgmr.msra.gmra.mrb[28].mxu0 %v1359_v0  ;;  %v7560_v0 = vld [vmem:[%s9477_s1 + $0x950] sm:$0xff]  }
 0x109   : > { %5274 = vmatmul.mubr.bf16.vlgmr.msra.gmra.mrb[28].mxu1 %v1366_v4  ;;  %6879 = vmatpush3.bf16.msra.mxu0 %v7521_v6  ;;  %v7564_v4 = vld [vmem:[%s9477_s1 + $0x958] sm:$0xff]  }
 0x10a   : > { %6901 = vmatpush3.bf16.msra.mxu1 %v7522_v8  ;;  %6880 = vmatprep.subr.bf16.mxu0 %v7523_v9  ;;  %v7566_v6 = vld [vmem:[%s9477_s1 + $0x918] sm:$0xff]   ;;  %v7568_v8 = vld [vmem:[%s9477_s1 + $0x960] sm:$0xff]  }
 0x10b   : > { %6902 = vmatprep.subr.bf16.mxu1 %v7524_v10  ;;  %5313 = vmatprep.mubr.bf16.mxu0 %v1384_v55  ;;  %v7569_v9 = vld [vmem:[%s9477_s1 + $0x9e0] sm:$0xff]   ;;  %v7597_v55 = vld [vmem:[%s9477_s1 + $0xa58] sm:$0xff]  }
 0x10c   : > { %5353 = vmatprep.mubr.bf16.mxu1 %v1385_v59  ;;  %v7570_v10 = vld [vmem:[%s9477_s1 + $0x920] sm:$0xff]  }
 0x10d   : > { %6881 = vmatpush3.bf16.msra.mxu0 %v7525_v11  ;;  %v7571_v11 = vld [vmem:[%s9477_s1 + $0x9a0] sm:$0xff]  }
 0x10e   : > { %6903 = vmatpush3.bf16.msra.mxu1 %v7526_v12  ;;  %6882 = vmatprep.subr.bf16.mxu0 %v7527_v13  ;;  %v7572_v12 = vld [vmem:[%s9477_s1 + $0x968] sm:$0xff]   ;;  %v7601_v59 = vld [vmem:[%s9477_s1 + $0xa60] sm:$0xff]  }
 0x10f   : > { %6904 = vmatprep.subr.bf16.mxu1 %v7528_v14  ;;  %v7573_v13 = vld [vmem:[%s9477_s1 + $0x9e8] sm:$0xff]  }
 0x110   : > { %v7574_v14 = vld [vmem:[%s9477_s1 + $0x928] sm:$0xff]  }
 0x111   : > { %6883 = vmatpush3.bf16.msra.mxu0 %v7529_v15  ;;  %v7575_v15 = vld [vmem:[%s9477_s1 + $0x9a8] sm:$0xff]  }
 0x112   : > { %6905 = vmatpush3.bf16.msra.mxu1 %v7530_v16  ;;  %6884 = vmatprep.subr.bf16.mxu0 %v7531_v17  ;;  %v7576_v16 = vld [vmem:[%s9477_s1 + $0x970] sm:$0xff]  }
 0x113   : > { %6906 = vmatprep.subr.bf16.mxu1 %v7532_v18  ;;  %v7577_v17 = vld [vmem:[%s9477_s1 + $0x9f0] sm:$0xff]  }
 0x115   : > { %6885 = vmatpush3.bf16.msra.mxu0 %v7533_v19 }
 0x116   : > { %6907 = vmatpush3.bf16.msra.mxu1 %v7534_v20  ;;  %6886 = vmatprep.subr.bf16.mxu0 %v7535_v21  ;;  %v7578_v20 = vld [vmem:[%s9477_s1 + $0x930] sm:$0xff]  }
 0x117   : > { %6908 = vmatprep.subr.bf16.mxu1 %v7536_v22  ;;  %v7579_v21 = vld [vmem:[%s9477_s1 + $0x9b0] sm:$0xff]  }
 0x119   : > { %6887 = vmatpush3.bf16.msra.mxu0 %v7537_v23 }
 0x11a   : > { %6909 = vmatpush3.bf16.msra.mxu1 %v7538_v24  ;;  %6888 = vmatprep.subr.bf16.mxu0 %v7539_v25 }
 0x11b   : > { %6910 = vmatprep.subr.bf16.mxu1 %v7540_v26  ;;  %v6586_v31 = vpop.f32.mrb[4].mxu0 }
 0x11c   : > { %v6608_v32 = vpop.f32.mrb[4].mxu1  ;;  %v6587_v35 = vpop.f32.mrb[5].mxu0 }
 0x11d   : > { %v6609_v36 = vpop.f32.mrb[5].mxu1  ;;  %v6588_v37 = vadd.f32 %v6587_v35, %v6586_v31  ;;  %v6589_v39 = vpop.f32.mrb[6].mxu0  ;;  %6889 = vmatpush3.bf16.msra.mxu0 %v7541_v27 }
 0x11e   : > { %v6610_v38 = vadd.f32 %v6609_v36, %v6608_v32  ;;  %v6611_v40 = vpop.f32.mrb[6].mxu1  ;;  %6911 = vmatpush3.bf16.msra.mxu1 %v7542_v28  ;;  %v6590_v44 = vpop.f32.mrb[7].mxu0  ;;  %6890 = vmatprep.subr.bf16.mxu0 %v7543_v29  ;;  %v7580_v28 = vld [vmem:[%s9477_s1 + $0x978] sm:$0xff]   ;;  %v186_v36 = vld [vmem:[%s7941_s28 + $0x48] sm:$0xff]  ;;  %v7585_v39 = vld [vmem:[%s9477_s1 + $0xa40] sm:$0xff]  }
 0x11f   : > { %v6612_v45 = vpop.f32.mrb[7].mxu1  ;;  %6912 = vmatprep.subr.bf16.mxu1 %v7544_v30  ;;  %v4756_v46 = vadd.f32 %v6588_v37, %v8638_v60  ;;  %v7556_v60 = vld [vmem:[%s9477_s1 + $0x948] sm:$0xff]   ;;  %v7581_v29 = vld [vmem:[%s9477_s1 + $0x9f8] sm:$0xff]   ;;  %v1393_v37 = vrot.slane %v186_v36, %v7956_v41  ;;  %v7586_v40 = vld [vmem:[%s9477_s1 + $0xac0] sm:$0xff]  }
 0x120   : > { %v7587_v44 = vld [vmem:[%s9477_s1 + $0xa00] sm:$0xff]  }
 0x121   : > { %v8747_v50 = vadd.f32 %v6610_v38, %v4756_v46  ;;  %6891 = vmatpush3.bf16.msra.mxu0 %v7545_v33  ;;  %v7582_v33 = vld [vmem:[%s9477_s1 + $0x938] sm:$0xff]   ;;  %v1386_v38 = vcombine.high %v186_v36, %v186_v36  ;;  %v7588_v45 = vld [vmem:[%s9477_s1 + $0xa80] sm:$0xff]   ;;  %v7625_v36 = vld [vmem:[%s9477_s1 + $0xb88] sm:$0xff]  }
 0x122   : > { %6913 = vmatpush3.bf16.msra.mxu1 %v7546_v34  ;;  %6892 = vmatprep.subr.bf16.mxu0 %v7547_v42  ;;  %v7583_v34 = vld [vmem:[%s9477_s1 + $0x9b8] sm:$0xff]   ;;  %v1401_v42 = vcombine.high %v1393_v37, %v1393_v37 }
 0x123   : > { %6914 = vmatprep.subr.bf16.mxu1 %v7548_v43  ;;  %v1400_v43 = vrot.slane %v1386_v38, %v7956_v41  ;;  %v7627_v38 = vld [vmem:[%s9477_s1 + $0xbd0] sm:$0xff]  }
 0x125   : > { %6893 = vmatpush3.bf16.msra.mxu0 %v7549_v47  ;;  %v1402_v46 = vcombine.high %v1400_v43, %v1400_v43  ;;  %v7589_v47 = vld [vmem:[%s9477_s1 + $0xa48] sm:$0xff]  }
 0x126   : > { %6915 = vmatpush3.bf16.msra.mxu1 %v7550_v48  ;;  %6922 = vmatprep.subr.bf16.mxu0 %v7552_v53  ;;  %v7590_v48 = vld [vmem:[%s9477_s1 + $0xac8] sm:$0xff]   ;;  %v7595_v53 = vld [vmem:[%s9477_s1 + $0xa10] sm:$0xff]  }
 0x127   : > { %6944 = vmatprep.subr.bf16.mxu1 %v7553_v54  ;;  %v7596_v54 = vld [vmem:[%s9477_s1 + $0xa90] sm:$0xff]  }
 0x128   : > { %5314 = vmatmul.mubr.bf16.vlgmr.msra.gmra.mrb[32].mxu0 %v1376_v51  ;;  %v7593_v51 = vld [vmem:[%s9477_s1 + $0xa50] sm:$0xff]  }
 0x129   : > { %5354 = vmatmul.mubr.bf16.vlgmr.msra.gmra.mrb[32].mxu1 %v1383_v56  ;;  %6923 = vmatpush3.bf16.msra.mxu0 %v7554_v57  ;;  %v7598_v56 = vld [vmem:[%s9477_s1 + $0xad8] sm:$0xff]  }
 0x12a   : > { %6945 = vmatpush3.bf16.msra.mxu1 %v7555_v58  ;;  %6924 = vmatprep.subr.bf16.mxu0 %v7556_v60  ;;  %v7599_v57 = vld [vmem:[%s9477_s1 + $0xa18] sm:$0xff]   ;;  %v7602_v60 = vld [vmem:[%s9477_s1 + $0xae0] sm:$0xff]  }
 0x12b   : > { %6946 = vmatprep.subr.bf16.mxu1 %v7557_v61  ;;  %5393 = vmatprep.mubr.bf16.mxu0 %v1401_v42  ;;  %v7600_v58 = vld [vmem:[%s9477_s1 + $0xa98] sm:$0xff]   ;;  %v7603_v61 = vld [vmem:[%s9477_s1 + $0xa20] sm:$0xff]  }
 0x12c   : > { %5433 = vmatprep.mubr.bf16.mxu1 %v1402_v46  ;;  %v7630_v42 = vld [vmem:[%s9477_s1 + $0xb58] sm:$0xff]   ;;  %v7634_v46 = vld [vmem:[%s9477_s1 + $0xb60] sm:$0xff]  }
 0x12d   : > { %6925 = vmatpush3.bf16.msra.mxu0 %v7558_v62  ;;  %v7604_v62 = vld [vmem:[%s9477_s1 + $0xaa0] sm:$0xff]  }
 0x12e   : > { %6947 = vmatpush3.bf16.msra.mxu1 %v7559_v63  ;;  %6926 = vmatprep.subr.bf16.mxu0 %v7560_v0  ;;  %v7605_v63 = vld [vmem:[%s9477_s1 + $0xa68] sm:$0xff]  }
 0x12f   : > { %6948 = vmatprep.subr.bf16.mxu1 %v7561_v1  ;;  %v7606_v0 = vld [vmem:[%s9477_s1 + $0xae8] sm:$0xff]  }
 0x130   : > { %v7607_v1 = vld [vmem:[%s9477_s1 + $0xa28] sm:$0xff]  }
 0x131   : > { %6927 = vmatpush3.bf16.msra.mxu0 %v7562_v2  ;;  %v7608_v2 = vld [vmem:[%s9477_s1 + $0xaa8] sm:$0xff]  }
 0x132   : > { %6949 = vmatpush3.bf16.msra.mxu1 %v7563_v3  ;;  %6928 = vmatprep.subr.bf16.mxu0 %v7564_v4  ;;  %v7609_v3 = vld [vmem:[%s9477_s1 + $0xa70] sm:$0xff]  }
 0x133   : > { %6950 = vmatprep.subr.bf16.mxu1 %v7565_v5 }
 0x135   : > { %6929 = vmatpush3.bf16.msra.mxu0 %v7566_v6  ;;  %v7610_v6 = vld [vmem:[%s9477_s1 + $0xaf0] sm:$0xff]  }
 0x136   : > { %6951 = vmatpush3.bf16.msra.mxu1 %v7567_v7  ;;  %6930 = vmatprep.subr.bf16.mxu0 %v7568_v8  ;;  %v7611_v7 = vld [vmem:[%s9477_s1 + $0xa30] sm:$0xff]  }
 0x137   : > { %6952 = vmatprep.subr.bf16.mxu1 %v7569_v9 }
 0x139   : > { %6931 = vmatpush3.bf16.msra.mxu0 %v7570_v10 }
 0x13a   : > { %6953 = vmatpush3.bf16.msra.mxu1 %v7571_v11  ;;  %6932 = vmatprep.subr.bf16.mxu0 %v7572_v12 }
 0x13b   : > { %6954 = vmatprep.subr.bf16.mxu1 %v7573_v13  ;;  %v6630_v18 = vpop.f32.mrb[8].mxu0 }
 0x13c   : > { %v6652_v19 = vpop.f32.mrb[8].mxu1  ;;  %v6631_v22 = vpop.f32.mrb[9].mxu0 }
 0x13d   : > { %v6653_v23 = vpop.f32.mrb[9].mxu1  ;;  %v6632_v24 = vadd.f32 %v6631_v22, %v6630_v18  ;;  %v6633_v26 = vpop.f32.mrb[10].mxu0  ;;  %6933 = vmatpush3.bf16.msra.mxu0 %v7574_v14  ;;  %v7612_v14 = vld [vmem:[%s9477_s1 + $0xab0] sm:$0xff]   ;;  %v7616_v22 = vld [vmem:[%s9477_s1 + $0xab8] sm:$0xff]  }
 0x13e   : > { %v6654_v25 = vadd.f32 %v6653_v23, %v6652_v19  ;;  %v6655_v27 = vpop.f32.mrb[10].mxu1  ;;  %6955 = vmatpush3.bf16.msra.mxu1 %v7575_v15  ;;  %v6634_v30 = vpop.f32.mrb[11].mxu0  ;;  %6934 = vmatprep.subr.bf16.mxu0 %v7576_v16  ;;  %v7613_v15 = vld [vmem:[%s9477_s1 + $0xa78] sm:$0xff]   ;;  %v187_v23 = vld [vmem:[%s7941_s28 + $0x50] sm:$0xff]  ;;  %v7618_v26 = vld [vmem:[%s9477_s1 + $0xb40] sm:$0xff]  }
 0x13f   : > { %v6656_v31 = vpop.f32.mrb[11].mxu1  ;;  %6956 = vmatprep.subr.bf16.mxu1 %v7577_v17  ;;  %v4836_v32 = vadd.f32 %v6632_v24, %v8747_v50  ;;  %v7592_v50 = vld [vmem:[%s9477_s1 + $0xa88] sm:$0xff]   ;;  %v7614_v19 = vld [vmem:[%s9477_s1 + $0xaf8] sm:$0xff]   ;;  %v1410_v24 = vrot.slane %v187_v23, %v7956_v41  ;;  %v7619_v27 = vld [vmem:[%s9477_s1 + $0xbc0] sm:$0xff]  }
 0x140   : > { %v7620_v30 = vld [vmem:[%s9477_s1 + $0xb00] sm:$0xff]  }
 0x141   : > { %v8848_v35 = vadd.f32 %v6654_v25, %v4836_v32  ;;  %6935 = vmatpush3.bf16.msra.mxu0 %v7578_v20  ;;  %v7615_v20 = vld [vmem:[%s9477_s1 + $0xa38] sm:$0xff]   ;;  %v1403_v25 = vcombine.high %v187_v23, %v187_v23  ;;  %v7621_v31 = vld [vmem:[%s9477_s1 + $0xb80] sm:$0xff]   ;;  %v7658_v23 = vld [vmem:[%s9477_s1 + $0xc88] sm:$0xff]  }
 0x142   : > { %6957 = vmatpush3.bf16.msra.mxu1 %v7579_v21  ;;  %6936 = vmatprep.subr.bf16.mxu0 %v7580_v28  ;;  %v1418_v28 = vcombine.high %v1410_v24, %v1410_v24 }
 0x143   : > { %6958 = vmatprep.subr.bf16.mxu1 %v7581_v29  ;;  %v1417_v29 = vrot.slane %v1403_v25, %v7956_v41  ;;  %v7660_v25 = vld [vmem:[%s9477_s1 + $0xcd0] sm:$0xff]  }
 0x145   : > { %6937 = vmatpush3.bf16.msra.mxu0 %v7582_v33  ;;  %v1419_v32 = vcombine.high %v1417_v29, %v1417_v29  ;;  %v7622_v33 = vld [vmem:[%s9477_s1 + $0xb48] sm:$0xff]  }
 0x146   : > { %6959 = vmatpush3.bf16.msra.mxu1 %v7583_v34  ;;  %6966 = vmatprep.subr.bf16.mxu0 %v7585_v39  ;;  %v7623_v34 = vld [vmem:[%s9477_s1 + $0xbc8] sm:$0xff]   ;;  %v7628_v39 = vld [vmem:[%s9477_s1 + $0xb10] sm:$0xff]  }
 0x147   : > { %6988 = vmatprep.subr.bf16.mxu1 %v7586_v40  ;;  %v7629_v40 = vld [vmem:[%s9477_s1 + $0xb90] sm:$0xff]  }
 0x148   : > { %5394 = vmatmul.mubr.bf16.vlgmr.msra.gmra.mrb[36].mxu0 %v1393_v37  ;;  %v7626_v37 = vld [vmem:[%s9477_s1 + $0xb50] sm:$0xff]  }
 0x149   : > { %5434 = vmatmul.mubr.bf16.vlgmr.msra.gmra.mrb[36].mxu1 %v1400_v43  ;;  %6967 = vmatpush3.bf16.msra.mxu0 %v7587_v44  ;;  %v7631_v43 = vld [vmem:[%s9477_s1 + $0xbd8] sm:$0xff]  }
 0x14a   : > { %6989 = vmatpush3.bf16.msra.mxu1 %v7588_v45  ;;  %6968 = vmatprep.subr.bf16.mxu0 %v7589_v47  ;;  %v7632_v44 = vld [vmem:[%s9477_s1 + $0xb18] sm:$0xff]   ;;  %v7635_v47 = vld [vmem:[%s9477_s1 + $0xbe0] sm:$0xff]  }
 0x14b   : > { %6990 = vmatprep.subr.bf16.mxu1 %v7590_v48  ;;  %5473 = vmatprep.mubr.bf16.mxu0 %v1418_v28  ;;  %v7633_v45 = vld [vmem:[%s9477_s1 + $0xb98] sm:$0xff]   ;;  %v7636_v48 = vld [vmem:[%s9477_s1 + $0xb20] sm:$0xff]  }
 0x14c   : > { %5513 = vmatprep.mubr.bf16.mxu1 %v1419_v32  ;;  %v7663_v28 = vld [vmem:[%s9477_s1 + $0xc58] sm:$0xff]   ;;  %v7667_v32 = vld [vmem:[%s9477_s1 + $0xc60] sm:$0xff]  }
 0x14d   : > { %6969 = vmatpush3.bf16.msra.mxu0 %v7591_v49  ;;  %v7637_v49 = vld [vmem:[%s9477_s1 + $0xba0] sm:$0xff]  }
 0x14e   : > { %6991 = vmatpush3.bf16.msra.mxu1 %v7592_v50  ;;  %6970 = vmatprep.subr.bf16.mxu0 %v7593_v51  ;;  %v7638_v50 = vld [vmem:[%s9477_s1 + $0xb68] sm:$0xff]  }
 0x14f   : > { %6992 = vmatprep.subr.bf16.mxu1 %v7594_v52  ;;  %v7639_v51 = vld [vmem:[%s9477_s1 + $0xbe8] sm:$0xff]  }
 0x150   : > { %v7640_v52 = vld [vmem:[%s9477_s1 + $0xb28] sm:$0xff]  }
 0x151   : > { %6971 = vmatpush3.bf16.msra.mxu0 %v7595_v53  ;;  %v7641_v53 = vld [vmem:[%s9477_s1 + $0xba8] sm:$0xff]  }
 0x152   : > { %6993 = vmatpush3.bf16.msra.mxu1 %v7596_v54  ;;  %6972 = vmatprep.subr.bf16.mxu0 %v7597_v55 }
 0x153   : > { %6994 = vmatprep.subr.bf16.mxu1 %v7598_v56  ;;  %v7642_v56 = vld [vmem:[%s9477_s1 + $0xb70] sm:$0xff]  }
 0x155   : > { %6973 = vmatpush3.bf16.msra.mxu0 %v7599_v57  ;;  %v7643_v57 = vld [vmem:[%s9477_s1 + $0xbf0] sm:$0xff]  }
 0x156   : > { %6995 = vmatpush3.bf16.msra.mxu1 %v7600_v58  ;;  %6974 = vmatprep.subr.bf16.mxu0 %v7601_v59 }
 0x157   : > { %6996 = vmatprep.subr.bf16.mxu1 %v7602_v60 }
 0x159   : > { %6975 = vmatpush3.bf16.msra.mxu0 %v7603_v61 }
 0x15a   : > { %6997 = vmatpush3.bf16.msra.mxu1 %v7604_v62  ;;  %6976 = vmatprep.subr.bf16.mxu0 %v7605_v63 }
 0x15b   : > { %v6674_v4 = vpop.f32.mrb[12].mxu0  ;;  %6998 = vmatprep.subr.bf16.mxu1 %v7606_v0  ;;  %v7644_v0 = vld [vmem:[%s9477_s1 + $0xb30] sm:$0xff]  }
 0x15c   : > { %v6696_v5 = vpop.f32.mrb[12].mxu1  ;;  %v6675_v8 = vpop.f32.mrb[13].mxu0 }
 0x15d   : > { %v6697_v9 = vpop.f32.mrb[13].mxu1  ;;  %v6676_v10 = vadd.f32 %v6675_v8, %v6674_v4  ;;  %v6677_v12 = vpop.f32.mrb[14].mxu0  ;;  %6977 = vmatpush3.bf16.msra.mxu0 %v7607_v1  ;;  %v7645_v1 = vld [vmem:[%s9477_s1 + $0xbb0] sm:$0xff]   ;;  %v7648_v8 = vld [vmem:[%s9477_s1 + $0xb38] sm:$0xff]  }
 0x15e   : > { %v6698_v11 = vadd.f32 %v6697_v9, %v6696_v5  ;;  %v6699_v13 = vpop.f32.mrb[14].mxu1  ;;  %6999 = vmatpush3.bf16.msra.mxu1 %v7608_v2  ;;  %v6678_v16 = vpop.f32.mrb[15].mxu0  ;;  %6978 = vmatprep.subr.bf16.mxu0 %v7609_v3  ;;  %v7646_v5 = vld [vmem:[%s9477_s1 + $0xb78] sm:$0xff]  }
 0x15f   : > { %v6700_v17 = vpop.f32.mrb[15].mxu1  ;;  %v4916_v18 = vadd.f32 %v6676_v10, %v8848_v35  ;;  %7000 = vmatprep.subr.bf16.mxu1 %v7610_v6  ;;  %v7624_v35 = vld [vmem:[%s9477_s1 + $0xb08] sm:$0xff]   ;;  %v7647_v6 = vld [vmem:[%s9477_s1 + $0xbf8] sm:$0xff]   ;;  %v7651_v13 = vld [vmem:[%s9477_s1 + $0xc40] sm:$0xff]  }
 0x160   : > { %v7649_v9 = vld [vmem:[%s9477_s1 + $0xbb8] sm:$0xff]   ;;  %v7653_v17 = vld [vmem:[%s9477_s1 + $0xc00] sm:$0xff]  }
 0x161   : > { %v8947_v21 = vadd.f32 %v6698_v11, %v4916_v18  ;;  %6979 = vmatpush3.bf16.msra.mxu0 %v7611_v7  ;;  %v188_v10 = vld [vmem:[%s7941_s28 + $0x58] sm:$0xff]  ;;  %v7654_v18 = vld [vmem:[%s9477_s1 + $0xc80] sm:$0xff]  }
 0x162   : > { %7001 = vmatpush3.bf16.msra.mxu1 %v7612_v14  ;;  %6980 = vmatprep.subr.bf16.mxu0 %v7613_v15  ;;  %v1427_v11 = vrot.slane %v188_v10, %v7956_v41  ;;  %v1420_v12 = vcombine.high %v188_v10, %v188_v10  ;;  %v7652_v14 = vld [vmem:[%s9477_s1 + $0xcc0] sm:$0xff]   ;;  %v7691_v10 = vld [vmem:[%s9477_s1 + $0xd88] sm:$0xff]  }
 0x163   : > { %7002 = vmatprep.subr.bf16.mxu1 %v7614_v19 }
 0x164   : > { %v1435_v15 = vcombine.high %v1427_v11, %v1427_v11  ;;  %v1434_v16 = vrot.slane %v1420_v12, %v7956_v41  ;;  %v7693_v12 = vld [vmem:[%s9477_s1 + $0xdd0] sm:$0xff]  }
 0x165   : > { %6981 = vmatpush3.bf16.msra.mxu0 %v7615_v20  ;;  %v7655_v20 = vld [vmem:[%s9477_s1 + $0xc48] sm:$0xff]  }
 0x166   : > { %7003 = vmatpush3.bf16.msra.mxu1 %v7616_v22  ;;  %7010 = vmatprep.subr.bf16.mxu0 %v7618_v26  ;;  %v1436_v19 = vcombine.high %v1434_v16, %v1434_v16  ;;  %v7657_v22 = vld [vmem:[%s9477_s1 + $0xc08] sm:$0xff]   ;;  %v7661_v26 = vld [vmem:[%s9477_s1 + $0xc10] sm:$0xff]  }
 0x167   : > { %7032 = vmatprep.subr.bf16.mxu1 %v7619_v27  ;;  %v7662_v27 = vld [vmem:[%s9477_s1 + $0xc90] sm:$0xff]  }
 0x168   : > { %5474 = vmatmul.mubr.bf16.vlgmr.msra.gmra.mrb[40].mxu0 %v1410_v24  ;;  %v7659_v24 = vld [vmem:[%s9477_s1 + $0xc50] sm:$0xff]  }
 0x169   : > { %7011 = vmatpush3.bf16.msra.mxu0 %v7620_v30  ;;  %5514 = vmatmul.mubr.bf16.vlgmr.msra.gmra.mrb[40].mxu1 %v1417_v29  ;;  %v7664_v29 = vld [vmem:[%s9477_s1 + $0xcd8] sm:$0xff]  }
 0x16a   : > { %7012 = vmatprep.subr.bf16.mxu0 %v7622_v33  ;;  %7033 = vmatpush3.bf16.msra.mxu1 %v7621_v31  ;;  %v7665_v30 = vld [vmem:[%s9477_s1 + $0xc18] sm:$0xff]   ;;  %v7668_v33 = vld [vmem:[%s9477_s1 + $0xce0] sm:$0xff]  }
 0x16b   : > { %7034 = vmatprep.subr.bf16.mxu1 %v7623_v34  ;;  %5553 = vmatprep.mubr.bf16.mxu0 %v1435_v15  ;;  %v7666_v31 = vld [vmem:[%s9477_s1 + $0xc98] sm:$0xff]   ;;  %v7669_v34 = vld [vmem:[%s9477_s1 + $0xc20] sm:$0xff]  }
 0x16c   : > { %5593 = vmatprep.mubr.bf16.mxu1 %v1436_v19  ;;  %v7696_v15 = vld [vmem:[%s9477_s1 + $0xd58] sm:$0xff]   ;;  %v7700_v19 = vld [vmem:[%s9477_s1 + $0xd60] sm:$0xff]  }
 0x16d   : > { %7013 = vmatpush3.bf16.msra.mxu0 %v7624_v35  ;;  %v7670_v35 = vld [vmem:[%s9477_s1 + $0xca0] sm:$0xff]  }
 0x16e   : > { %7014 = vmatprep.subr.bf16.mxu0 %v7626_v37  ;;  %7035 = vmatpush3.bf16.msra.mxu1 %v7625_v36  ;;  %v7671_v36 = vld [vmem:[%s9477_s1 + $0xc68] sm:$0xff]  }
 0x16f   : > { %7036 = vmatprep.subr.bf16.mxu1 %v7627_v38  ;;  %v7672_v37 = vld [vmem:[%s9477_s1 + $0xce8] sm:$0xff]  }
 0x170   : > { %v7673_v38 = vld [vmem:[%s9477_s1 + $0xc28] sm:$0xff]  }
 0x171   : > { %7015 = vmatpush3.bf16.msra.mxu0 %v7628_v39 }
 0x172   : > { %7016 = vmatprep.subr.bf16.mxu0 %v7630_v42  ;;  %7037 = vmatpush3.bf16.msra.mxu1 %v7629_v40  ;;  %v7674_v42 = vld [vmem:[%s9477_s1 + $0xca8] sm:$0xff]  }
 0x173   : > { %7038 = vmatprep.subr.bf16.mxu1 %v7631_v43  ;;  %v7675_v43 = vld [vmem:[%s9477_s1 + $0xc70] sm:$0xff]  }
 0x175   : > { %7017 = vmatpush3.bf16.msra.mxu0 %v7632_v44 }
 0x176   : > { %7018 = vmatprep.subr.bf16.mxu0 %v7634_v46  ;;  %7039 = vmatpush3.bf16.msra.mxu1 %v7633_v45 }
 0x177   : > { %7040 = vmatprep.subr.bf16.mxu1 %v7635_v47 }
 0x179   : > { %7019 = vmatpush3.bf16.msra.mxu0 %v7636_v48 }
 0x17a   : > { %7020 = vmatprep.subr.bf16.mxu0 %v7638_v50  ;;  %7041 = vmatpush3.bf16.msra.mxu1 %v7637_v49  ;;  %v7676_v50 = vld [vmem:[%s9477_s1 + $0xcf0] sm:$0xff]  }
 0x17b   : > { %v6718_v54 = vpop.f32.mrb[16].mxu0  ;;  %7042 = vmatprep.subr.bf16.mxu1 %v7639_v51  ;;  %v7677_v51 = vld [vmem:[%s9477_s1 + $0xc30] sm:$0xff]  }
 0x17c   : > { %v6740_v55 = vpop.f32.mrb[16].mxu1  ;;  %v6719_v58 = vpop.f32.mrb[17].mxu0 }
 0x17d   : > { %v6741_v59 = vpop.f32.mrb[17].mxu1  ;;  %v6720_v60 = vadd.f32 %v6719_v58, %v6718_v54  ;;  %v6721_v62 = vpop.f32.mrb[18].mxu0  ;;  %7021 = vmatpush3.bf16.msra.mxu0 %v7640_v52  ;;  %v7680_v58 = vld [vmem:[%s9477_s1 + $0xcf8] sm:$0xff]  }
 0x17e   : > { %v6742_v61 = vadd.f32 %v6741_v59, %v6740_v55  ;;  %v6743_v63 = vpop.f32.mrb[18].mxu1  ;;  %v6722_v2 = vpop.f32.mrb[19].mxu0  ;;  %7022 = vmatprep.subr.bf16.mxu0 %v7642_v56  ;;  %7043 = vmatpush3.bf16.msra.mxu1 %v7641_v53  ;;  %v7678_v55 = vld [vmem:[%s9477_s1 + $0xcb0] sm:$0xff]   ;;  %v7679_v56 = vld [vmem:[%s9477_s1 + $0xc78] sm:$0xff]  }
 0x17f   : > { %v6744_v3 = vpop.f32.mrb[19].mxu1  ;;  %v4996_v4 = vadd.f32 %v6720_v60, %v8947_v21  ;;  %7044 = vmatprep.subr.bf16.mxu1 %v7643_v57  ;;  %v7656_v21 = vld [vmem:[%s9477_s1 + $0xcc8] sm:$0xff]   ;;  %v7681_v59 = vld [vmem:[%s9477_s1 + $0xc38] sm:$0xff]  }
 0x180   : > { %v7682_v60 = vld [vmem:[%s9477_s1 + $0xcb8] sm:$0xff]  }
 0x181   : > { %v9046_v7 = vadd.f32 %v6742_v61, %v4996_v4  ;;  %7023 = vmatpush3.bf16.msra.mxu0 %v7644_v0  ;;  %v189_v61 = vld [vmem:[%s7941_s28 + $0x60] sm:$0xff] }
 0x182   : > { %7024 = vmatprep.subr.bf16.mxu0 %v7646_v5  ;;  %7045 = vmatpush3.bf16.msra.mxu1 %v7645_v1  ;;  %v1444_v62 = vrot.slane %v189_v61, %v7956_v41  ;;  %v1437_v63 = vcombine.high %v189_v61, %v189_v61  ;;  %v7684_v0 = vld [vmem:[%s9477_s1 + $0xd40] sm:$0xff]   ;;  %v7724_v61 = vld [vmem:[%s9477_s1 + $0xe88] sm:$0xff]  }
 0x183   : > { %7046 = vmatprep.subr.bf16.mxu1 %v7647_v6  ;;  %v7685_v1 = vld [vmem:[%s9477_s1 + $0xdc0] sm:$0xff]  }
 0x184   : > { %v1452_v2 = vcombine.high %v1444_v62, %v1444_v62  ;;  %v1451_v3 = vrot.slane %v1437_v63, %v7956_v41  ;;  %v7686_v4 = vld [vmem:[%s9477_s1 + $0xd00] sm:$0xff]   ;;  %v7726_v63 = vld [vmem:[%s9477_s1 + $0xed0] sm:$0xff]  }
 0x185   : > { %7025 = vmatpush3.bf16.msra.mxu0 %v7648_v8  ;;  %v7687_v5 = vld [vmem:[%s9477_s1 + $0xd80] sm:$0xff]   ;;  %v7689_v8 = vld [vmem:[%s9477_s1 + $0xdc8] sm:$0xff]  }
 0x186   : > { %7054 = vmatprep.subr.bf16.mxu0 %v7651_v13  ;;  %7047 = vmatpush3.bf16.msra.mxu1 %v7649_v9  ;;  %v1453_v6 = vcombine.high %v1451_v3, %v1451_v3  ;;  %v7690_v9 = vld [vmem:[%s9477_s1 + $0xd08] sm:$0xff]   ;;  %v7694_v13 = vld [vmem:[%s9477_s1 + $0xd10] sm:$0xff]  }
 0x187   : > { %7076 = vmatprep.subr.bf16.mxu1 %v7652_v14  ;;  %v7695_v14 = vld [vmem:[%s9477_s1 + $0xd90] sm:$0xff]  }
 0x188   : > { %5554 = vmatmul.mubr.bf16.vlgmr.msra.gmra.mrb[44].mxu0 %v1427_v11  ;;  %v7692_v11 = vld [vmem:[%s9477_s1 + $0xd50] sm:$0xff]  }
 0x189   : > { %7055 = vmatpush3.bf16.msra.mxu0 %v7653_v17  ;;  %5594 = vmatmul.mubr.bf16.vlgmr.msra.gmra.mrb[44].mxu1 %v1434_v16  ;;  %v7697_v16 = vld [vmem:[%s9477_s1 + $0xdd8] sm:$0xff]  }
 0x18a   : > { %7056 = vmatprep.subr.bf16.mxu0 %v7655_v20  ;;  %7077 = vmatpush3.bf16.msra.mxu1 %v7654_v18  ;;  %v7698_v17 = vld [vmem:[%s9477_s1 + $0xd18] sm:$0xff]   ;;  %v7701_v20 = vld [vmem:[%s9477_s1 + $0xde0] sm:$0xff]  }
 0x18b   : > { %7078 = vmatprep.subr.bf16.mxu1 %v7656_v21  ;;  %5633 = vmatprep.mubr.bf16.mxu0 %v1452_v2  ;;  %v7699_v18 = vld [vmem:[%s9477_s1 + $0xd98] sm:$0xff]   ;;  %v7702_v21 = vld [vmem:[%s9477_s1 + $0xd20] sm:$0xff]  }
 0x18c   : > { %5673 = vmatprep.mubr.bf16.mxu1 %v1453_v6  ;;  %v7729_v2 = vld [vmem:[%s9477_s1 + $0xe58] sm:$0xff]   ;;  %v7733_v6 = vld [vmem:[%s9477_s1 + $0xe60] sm:$0xff]  }
 0x18d   : > { %7057 = vmatpush3.bf16.msra.mxu0 %v7657_v22  ;;  %v7703_v22 = vld [vmem:[%s9477_s1 + $0xda0] sm:$0xff]  }
 0x18e   : > { %7058 = vmatprep.subr.bf16.mxu0 %v7659_v24  ;;  %7079 = vmatpush3.bf16.msra.mxu1 %v7658_v23  ;;  %v7704_v23 = vld [vmem:[%s9477_s1 + $0xd68] sm:$0xff]  }
 0x18f   : > { %7080 = vmatprep.subr.bf16.mxu1 %v7660_v25  ;;  %v7705_v24 = vld [vmem:[%s9477_s1 + $0xde8] sm:$0xff]  }
 0x191   : > { %7059 = vmatpush3.bf16.msra.mxu0 %v7661_v26 }
 0x192   : > { %7060 = vmatprep.subr.bf16.mxu0 %v7663_v28  ;;  %7081 = vmatpush3.bf16.msra.mxu1 %v7662_v27  ;;  %v7706_v27 = vld [vmem:[%s9477_s1 + $0xd28] sm:$0xff]  }
 0x193   : > { %7082 = vmatprep.subr.bf16.mxu1 %v7664_v29  ;;  %v7707_v28 = vld [vmem:[%s9477_s1 + $0xda8] sm:$0xff]  }
 0x195   : > { %7061 = vmatpush3.bf16.msra.mxu0 %v7665_v30 }
 0x196   : > { %7062 = vmatprep.subr.bf16.mxu0 %v7667_v32  ;;  %7083 = vmatpush3.bf16.msra.mxu1 %v7666_v31 }
 0x197   : > { %7084 = vmatprep.subr.bf16.mxu1 %v7668_v33 }
 0x199   : > { %7063 = vmatpush3.bf16.msra.mxu0 %v7669_v34 }
 0x19a   : > { %7064 = vmatprep.subr.bf16.mxu0 %v7671_v36  ;;  %7085 = vmatpush3.bf16.msra.mxu1 %v7670_v35  ;;  %v7708_v35 = vld [vmem:[%s9477_s1 + $0xd70] sm:$0xff]  }
 0x19b   : > { %v6762_v39 = vpop.f32.mrb[20].mxu0  ;;  %7086 = vmatprep.subr.bf16.mxu1 %v7672_v37  ;;  %v7709_v36 = vld [vmem:[%s9477_s1 + $0xdf0] sm:$0xff]  }
 0x19c   : > { %v6784_v40 = vpop.f32.mrb[20].mxu1  ;;  %v6763_v44 = vpop.f32.mrb[21].mxu0 }
 0x19d   : > { %v6785_v45 = vpop.f32.mrb[21].mxu1  ;;  %v6764_v46 = vadd.f32 %v6763_v44, %v6762_v39  ;;  %v6765_v48 = vpop.f32.mrb[22].mxu0  ;;  %7065 = vmatpush3.bf16.msra.mxu0 %v7673_v38  ;;  %v7712_v44 = vld [vmem:[%s9477_s1 + $0xd78] sm:$0xff]  }
 0x19e   : > { %v6786_v47 = vadd.f32 %v6785_v45, %v6784_v40  ;;  %v6787_v49 = vpop.f32.mrb[22].mxu1  ;;  %v6766_v52 = vpop.f32.mrb[23].mxu0  ;;  %7066 = vmatprep.subr.bf16.mxu0 %v7675_v43  ;;  %7087 = vmatpush3.bf16.msra.mxu1 %v7674_v42  ;;  %v7710_v40 = vld [vmem:[%s9477_s1 + $0xd30] sm:$0xff]   ;;  %v7713_v45 = vld [vmem:[%s9477_s1 + $0xdf8] sm:$0xff]   ;;  %v190_v48 = vld [vmem:[%s7941_s28 + $0x68] sm:$0xff] }
 0x19f   : > { %v6788_v53 = vpop.f32.mrb[23].mxu1  ;;  %v5076_v54 = vadd.f32 %v6764_v46, %v9046_v7  ;;  %7088 = vmatprep.subr.bf16.mxu1 %v7676_v50  ;;  %v7688_v7 = vld [vmem:[%s9477_s1 + $0xd48] sm:$0xff]   ;;  %v7711_v42 = vld [vmem:[%s9477_s1 + $0xdb0] sm:$0xff]   ;;  %v7714_v46 = vld [vmem:[%s9477_s1 + $0xd38] sm:$0xff]   ;;  %v1461_v49 = vrot.slane %v190_v48, %v7956_v41  ;;  %v1454_v50 = vcombine.high %v190_v48, %v190_v48 }
 0x1a0   : > { %v7718_v52 = vld [vmem:[%s9477_s1 + $0xec0] sm:$0xff]   ;;  %v7757_v48 = vld [vmem:[%s9477_s1 + $0xf88] sm:$0xff]  }
 0x1a1   : > { %v9145_v57 = vadd.f32 %v6786_v47, %v5076_v54  ;;  %7067 = vmatpush3.bf16.msra.mxu0 %v7677_v51  ;;  %v7715_v47 = vld [vmem:[%s9477_s1 + $0xdb8] sm:$0xff]   ;;  %v7717_v51 = vld [vmem:[%s9477_s1 + $0xe40] sm:$0xff]   ;;  %v1469_v53 = vcombine.high %v1461_v49, %v1461_v49  ;;  %v1468_v54 = vrot.slane %v1454_v50, %v7956_v41  ;;  %v7759_v50 = vld [vmem:[%s9477_s1 + $0xfd0] sm:$0xff]  }
 0x1a2   : > { %7068 = vmatprep.subr.bf16.mxu0 %v7679_v56  ;;  %7089 = vmatpush3.bf16.msra.mxu1 %v7678_v55  ;;  %v7719_v55 = vld [vmem:[%s9477_s1 + $0xe00] sm:$0xff]  }
 0x1a3   : > { %7090 = vmatprep.subr.bf16.mxu1 %v7680_v58  ;;  %v7720_v56 = vld [vmem:[%s9477_s1 + $0xe80] sm:$0xff]   ;;  %v7721_v58 = vld [vmem:[%s9477_s1 + $0xe48] sm:$0xff]  }
 0x1a5   : > { %7069 = vmatpush3.bf16.msra.mxu0 %v7681_v59  ;;  %v7722_v59 = vld [vmem:[%s9477_s1 + $0xec8] sm:$0xff]  }
 0x1a6   : > { %7098 = vmatprep.subr.bf16.mxu0 %v7684_v0  ;;  %7091 = vmatpush3.bf16.msra.mxu1 %v7682_v60  ;;  %v7723_v60 = vld [vmem:[%s9477_s1 + $0xe08] sm:$0xff]   ;;  %v7727_v0 = vld [vmem:[%s9477_s1 + $0xe10] sm:$0xff]  }
 0x1a7   : > { %7120 = vmatprep.subr.bf16.mxu1 %v7685_v1  ;;  %v7728_v1 = vld [vmem:[%s9477_s1 + $0xe90] sm:$0xff]  }
 0x1a8   : > { %5634 = vmatmul.mubr.bf16.vlgmr.msra.gmra.mrb[48].mxu0 %v1444_v62  ;;  %v7725_v62 = vld [vmem:[%s9477_s1 + $0xe50] sm:$0xff]  }
 0x1a9   : > { %7099 = vmatpush3.bf16.msra.mxu0 %v7686_v4  ;;  %5674 = vmatmul.mubr.bf16.vlgmr.msra.gmra.mrb[48].mxu1 %v1451_v3  ;;  %v7730_v3 = vld [vmem:[%s9477_s1 + $0xed8] sm:$0xff]  }
 0x1aa   : > { %7100 = vmatprep.subr.bf16.mxu0 %v7688_v7  ;;  %7121 = vmatpush3.bf16.msra.mxu1 %v7687_v5  ;;  %v7731_v4 = vld [vmem:[%s9477_s1 + $0xe18] sm:$0xff]   ;;  %v7734_v7 = vld [vmem:[%s9477_s1 + $0xee0] sm:$0xff]  }
 0x1ab   : > { %7122 = vmatprep.subr.bf16.mxu1 %v7689_v8  ;;  %5713 = vmatprep.mubr.bf16.mxu0 %v1469_v53  ;;  %v7732_v5 = vld [vmem:[%s9477_s1 + $0xe98] sm:$0xff]   ;;  %v7735_v8 = vld [vmem:[%s9477_s1 + $0xe20] sm:$0xff]  }
 0x1ac   : > { %v7762_v53 = vld [vmem:[%s9477_s1 + $0xf58] sm:$0xff]  }
 0x1ad   : > { %7101 = vmatpush3.bf16.msra.mxu0 %v7690_v9  ;;  %v7736_v9 = vld [vmem:[%s9477_s1 + $0xea0] sm:$0xff]  }
 0x1ae   : > { %7102 = vmatprep.subr.bf16.mxu0 %v7692_v11  ;;  %7123 = vmatpush3.bf16.msra.mxu1 %v7691_v10  ;;  %v7737_v10 = vld [vmem:[%s9477_s1 + $0xe68] sm:$0xff]  }
 0x1af   : > { %7124 = vmatprep.subr.bf16.mxu1 %v7693_v12 }
 0x1b1   : > { %7103 = vmatpush3.bf16.msra.mxu0 %v7694_v13  ;;  %v7738_v13 = vld [vmem:[%s9477_s1 + $0xee8] sm:$0xff]  }
 0x1b2   : > { %7104 = vmatprep.subr.bf16.mxu0 %v7696_v15  ;;  %7125 = vmatpush3.bf16.msra.mxu1 %v7695_v14  ;;  %v7739_v14 = vld [vmem:[%s9477_s1 + $0xe28] sm:$0xff]  }
 0x1b3   : > { %7126 = vmatprep.subr.bf16.mxu1 %v7697_v16 }
 0x1b5   : > { %7105 = vmatpush3.bf16.msra.mxu0 %v7698_v17 }
 0x1b6   : > { %7106 = vmatprep.subr.bf16.mxu0 %v7700_v19  ;;  %7127 = vmatpush3.bf16.msra.mxu1 %v7699_v18 }
 0x1b7   : > { %7128 = vmatprep.subr.bf16.mxu1 %v7701_v20 }
 0x1b9   : > { %7107 = vmatpush3.bf16.msra.mxu0 %v7702_v21  ;;  %v7740_v21 = vld [vmem:[%s9477_s1 + $0xea8] sm:$0xff]  }
 0x1ba   : > { %7108 = vmatprep.subr.bf16.mxu0 %v7704_v23  ;;  %7129 = vmatpush3.bf16.msra.mxu1 %v7703_v22  ;;  %v7741_v22 = vld [vmem:[%s9477_s1 + $0xe70] sm:$0xff]  }
 0x1bb   : > { %v6806_v25 = vpop.f32.mrb[24].mxu0  ;;  %7130 = vmatprep.subr.bf16.mxu1 %v7705_v24 }
 0x1bc   : > { %v6828_v26 = vpop.f32.mrb[24].mxu1  ;;  %v6807_v29 = vpop.f32.mrb[25].mxu0 }
 0x1bd   : > { %v6829_v30 = vpop.f32.mrb[25].mxu1  ;;  %v6808_v31 = vadd.f32 %v6807_v29, %v6806_v25  ;;  %v6809_v33 = vpop.f32.mrb[26].mxu0  ;;  %7109 = vmatpush3.bf16.msra.mxu0 %v7706_v27  ;;  %v7743_v27 = vld [vmem:[%s9477_s1 + $0xe30] sm:$0xff]  }
 0x1be   : > { %v6830_v32 = vadd.f32 %v6829_v30, %v6828_v26  ;;  %v6831_v34 = vpop.f32.mrb[26].mxu1  ;;  %v6810_v37 = vpop.f32.mrb[27].mxu0  ;;  %7110 = vmatprep.subr.bf16.mxu0 %v7708_v35  ;;  %7131 = vmatpush3.bf16.msra.mxu1 %v7707_v28  ;;  %v7742_v26 = vld [vmem:[%s9477_s1 + $0xef0] sm:$0xff]   ;;  %v7745_v30 = vld [vmem:[%s9477_s1 + $0xe78] sm:$0xff]  }
 0x1bf   : > { %v6832_v38 = vpop.f32.mrb[27].mxu1  ;;  %v5156_v39 = vadd.f32 %v6808_v31, %v9145_v57  ;;  %7132 = vmatprep.subr.bf16.mxu1 %v7709_v36  ;;  %v1470_v57 = vcombine.high %v1468_v54, %v1468_v54  ;;  %v7744_v29 = vld [vmem:[%s9477_s1 + $0xeb0] sm:$0xff]   ;;  %v7746_v31 = vld [vmem:[%s9477_s1 + $0xef8] sm:$0xff]   ;;  %v7750_v37 = vld [vmem:[%s9477_s1 + $0xf40] sm:$0xff]  }
 0x1c0   : > { %v7748_v33 = vld [vmem:[%s9477_s1 + $0xeb8] sm:$0xff]   ;;  %v191_v34 = vld [vmem:[%s7941_s28 + $0x70] sm:$0xff]  ;;  %v7751_v38 = vld [vmem:[%s9477_s1 + $0xfc0] sm:$0xff]  }
 0x1c1   : > { %v9244_v43 = vadd.f32 %v6830_v32, %v5156_v39  ;;  %7111 = vmatpush3.bf16.msra.mxu0 %v7710_v40  ;;  %5753 = vmatprep.mubr.bf16.mxu1 %v1470_v57  ;;  %v7747_v32 = vld [vmem:[%s9477_s1 + $0xe38] sm:$0xff]   ;;  %v1478_v35 = vrot.slane %v191_v34, %v7956_v41  ;;  %v1471_v36 = vcombine.high %v191_v34, %v191_v34  ;;  %v7766_v57 = vld [vmem:[%s9477_s1 + $0xf60] sm:$0xff]  }
 0x1c2   : > { %7112 = vmatprep.subr.bf16.mxu0 %v7712_v44  ;;  %7133 = vmatpush3.bf16.msra.mxu1 %v7711_v42  ;;  %v7752_v42 = vld [vmem:[%s9477_s1 + $0xf00] sm:$0xff]  }
 0x1c3   : > { %7134 = vmatprep.subr.bf16.mxu1 %v7713_v45  ;;  %v1486_v39 = vcombine.high %v1478_v35, %v1478_v35  ;;  %v1485_v40 = vrot.slane %v1471_v36, %v7956_v41  ;;  %v7754_v45 = vld [vmem:[%s9477_s1 + $0xf48] sm:$0xff]  }
 0x1c5   : > { %7113 = vmatpush3.bf16.msra.mxu0 %v7714_v46  ;;  %v1487_v44 = vcombine.high %v1485_v40, %v1485_v40  ;;  %v7755_v46 = vld [vmem:[%s9477_s1 + $0xfc8] sm:$0xff]  }
 0x1c6   : > { %7142 = vmatprep.subr.bf16.mxu0 %v7717_v51  ;;  %7135 = vmatpush3.bf16.msra.mxu1 %v7715_v47  ;;  %v7756_v47 = vld [vmem:[%s9477_s1 + $0xf08] sm:$0xff]   ;;  %v7760_v51 = vld [vmem:[%s9477_s1 + $0xf10] sm:$0xff]  }
 0x1c7   : > { %7164 = vmatprep.subr.bf16.mxu1 %v7718_v52  ;;  %v7761_v52 = vld [vmem:[%s9477_s1 + $0xf90] sm:$0xff]  }
 0x1c8   : > { %5714 = vmatmul.mubr.bf16.vlgmr.msra.gmra.mrb[52].mxu0 %v1461_v49  ;;  %v7758_v49 = vld [vmem:[%s9477_s1 + $0xf50] sm:$0xff]  }
 0x1c9   : > { %7143 = vmatpush3.bf16.msra.mxu0 %v7719_v55  ;;  %5754 = vmatmul.mubr.bf16.vlgmr.msra.gmra.mrb[52].mxu1 %v1468_v54  ;;  %v7763_v54 = vld [vmem:[%s9477_s1 + $0xfd8] sm:$0xff]  }
 0x1ca   : > { %7144 = vmatprep.subr.bf16.mxu0 %v7721_v58  ;;  %7165 = vmatpush3.bf16.msra.mxu1 %v7720_v56  ;;  %v7764_v55 = vld [vmem:[%s9477_s1 + $0xf18] sm:$0xff]   ;;  %v7767_v58 = vld [vmem:[%s9477_s1 + $0xfe0] sm:$0xff]  }
 0x1cb   : > { %7166 = vmatprep.subr.bf16.mxu1 %v7722_v59  ;;  %5793 = vmatprep.mubr.bf16.mxu0 %v1486_v39  ;;  %v7765_v56 = vld [vmem:[%s9477_s1 + $0xf98] sm:$0xff]   ;;  %v7768_v59 = vld [vmem:[%s9477_s1 + $0xf20] sm:$0xff]  }
 0x1cc   : > { %5833 = vmatprep.mubr.bf16.mxu1 %v1487_v44 }
 0x1cd   : > { %7145 = vmatpush3.bf16.msra.mxu0 %v7723_v60  ;;  %v7769_v60 = vld [vmem:[%s9477_s1 + $0xfa0] sm:$0xff]  }
 0x1ce   : > { %7146 = vmatprep.subr.bf16.mxu0 %v7725_v62  ;;  %7167 = vmatpush3.bf16.msra.mxu1 %v7724_v61 }
 0x1cf   : > { %7168 = vmatprep.subr.bf16.mxu1 %v7726_v63  ;;  %v7770_v63 = vld [vmem:[%s9477_s1 + $0xf68] sm:$0xff]  }
 0x1d1   : > { %7147 = vmatpush3.bf16.msra.mxu0 %v7727_v0  ;;  %v7771_v0 = vld [vmem:[%s9477_s1 + $0xfe8] sm:$0xff]  }
 0x1d2   : > { %7148 = vmatprep.subr.bf16.mxu0 %v7729_v2  ;;  %7169 = vmatpush3.bf16.msra.mxu1 %v7728_v1 }
 0x1d3   : > { %7170 = vmatprep.subr.bf16.mxu1 %v7730_v3 }
 0x1d5   : > { %7149 = vmatpush3.bf16.msra.mxu0 %v7731_v4 }
 0x1d6   : > { %7150 = vmatprep.subr.bf16.mxu0 %v7733_v6  ;;  %7171 = vmatpush3.bf16.msra.mxu1 %v7732_v5 }
 0x1d7   : > { %7172 = vmatprep.subr.bf16.mxu1 %v7734_v7  ;;  %v7772_v7 = vld [vmem:[%s9477_s1 + $0xf28] sm:$0xff]  }
 0x1d9   : > { %7151 = vmatpush3.bf16.msra.mxu0 %v7735_v8  ;;  %v7773_v8 = vld [vmem:[%s9477_s1 + $0xfa8] sm:$0xff]  }
 0x1da   : > { %7152 = vmatprep.subr.bf16.mxu0 %v7737_v10  ;;  %7173 = vmatpush3.bf16.msra.mxu1 %v7736_v9 }
 0x1db   : > { %v6850_v11 = vpop.f32.mrb[28].mxu0  ;;  %7174 = vmatprep.subr.bf16.mxu1 %v7738_v13  ;;  %v7775_v13 = vld [vmem:[%s9477_s1 + $0xff0] sm:$0xff]  }
 0x1dc   : > { %v6872_v12 = vpop.f32.mrb[28].mxu1  ;;  %v6851_v15 = vpop.f32.mrb[29].mxu0 }
 0x1dd   : > { %v6873_v16 = vpop.f32.mrb[29].mxu1  ;;  %v6852_v17 = vadd.f32 %v6851_v15, %v6850_v11  ;;  %v6853_v19 = vpop.f32.mrb[30].mxu0  ;;  %7153 = vmatpush3.bf16.msra.mxu0 %v7739_v14  ;;  %v7776_v15 = vld [vmem:[%s9477_s1 + $0xf30] sm:$0xff]  }
 0x1de   : > { %v6874_v18 = vadd.f32 %v6873_v16, %v6872_v12  ;;  %v6875_v20 = vpop.f32.mrb[30].mxu1  ;;  %v6854_v23 = vpop.f32.mrb[31].mxu0  ;;  %7154 = vmatprep.subr.bf16.mxu0 %v7741_v22  ;;  %7175 = vmatpush3.bf16.msra.mxu1 %v7740_v21  ;;  %v7774_v12 = vld [vmem:[%s9477_s1 + $0xf70] sm:$0xff]   ;;  %v7780_v19 = vld [vmem:[%s9477_s1 + $0xf38] sm:$0xff]  }
 0x1df   : > { %v6876_v24 = vpop.f32.mrb[31].mxu1  ;;  %v5236_v25 = vadd.f32 %v6852_v17, %v9244_v43  ;;  %7176 = vmatprep.subr.bf16.mxu1 %v7742_v26  ;;  %v7753_v43 = vld [vmem:[%s9477_s1 + $0xf80] sm:$0xff]   ;;  %v7777_v16 = vld [vmem:[%s9477_s1 + $0xfb0] sm:$0xff]   ;;  %v7778_v17 = vld [vmem:[%s9477_s1 + $0xf78] sm:$0xff]  }
 0x1e0   : > { %v7781_v20 = vld [vmem:[%s9477_s1 + $0xfb8] sm:$0xff]  }
 0x1e1   : > { %v9343_v28 = vadd.f32 %v6874_v18, %v5236_v25  ;;  %7155 = vmatpush3.bf16.msra.mxu0 %v7743_v27  ;;  %v7779_v18 = vld [vmem:[%s9477_s1 + $0xff8] sm:$0xff]  }
 0x1e2   : > { %7156 = vmatprep.subr.bf16.mxu0 %v7745_v30  ;;  %7177 = vmatpush3.bf16.msra.mxu1 %v7744_v29  ;;  %v192_v21 = vld [vmem:[%s7941_s28 + $0x78] sm:$0xff]  ;;  %s6010_s28 = sshll.u32 %s9484_s9, 2 }
 0x1e3   : > { %7178 = vmatprep.subr.bf16.mxu1 %v7746_v31  ;;  %v1495_v22 = vrot.slane %v192_v21, %v7956_v41  ;;  %v1488_v23 = vcombine.high %v192_v21, %v192_v21  ;;  %s175_s29 = scalar_lea.vmem %s9478_s2, %s6010_s28 }
 0x1e5   : > { %7157 = vmatpush3.bf16.msra.mxu0 %v7747_v32  ;;  %v1503_v24 = vcombine.high %v1495_v22, %v1495_v22  ;;  %v1502_v25 = vrot.slane %v1488_v23, %v7956_v41 }
 0x1e6   : > { %7186 = vmatprep.subr.bf16.mxu0 %v7750_v37  ;;  %7179 = vmatpush3.bf16.msra.mxu1 %v7748_v33 }
 0x1e7   : > { %7208 = vmatprep.subr.bf16.mxu1 %v7751_v38  ;;  %v1504_v26 = vcombine.high %v1502_v25, %v1502_v25 }
 0x1e8   : > { %5794 = vmatmul.mubr.bf16.vlgmr.msra.gmra.mrb[56].mxu0 %v1478_v35 }
 0x1e9   : > { %7187 = vmatpush3.bf16.msra.mxu0 %v7752_v42  ;;  %5834 = vmatmul.mubr.bf16.vlgmr.msra.gmra.mrb[56].mxu1 %v1485_v40 }
 0x1ea   : > { %7188 = vmatprep.subr.bf16.mxu0 %v7754_v45  ;;  %7209 = vmatpush3.bf16.msra.mxu1 %v7753_v43 }
 0x1eb   : > { %7210 = vmatprep.subr.bf16.mxu1 %v7755_v46  ;;  %5873 = vmatprep.mubr.bf16.mxu0 %v1503_v24 }
 0x1ec   : > { %5913 = vmatprep.mubr.bf16.mxu1 %v1504_v26 }
 0x1ed   : > { %7189 = vmatpush3.bf16.msra.mxu0 %v7756_v47 }
 0x1ee   : > { %7190 = vmatprep.subr.bf16.mxu0 %v7758_v49  ;;  %7211 = vmatpush3.bf16.msra.mxu1 %v7757_v48 }
 0x1ef   : > { %7212 = vmatprep.subr.bf16.mxu1 %v7759_v50 }
 0x1f1   : > { %7191 = vmatpush3.bf16.msra.mxu0 %v7760_v51 }
 0x1f2   : > { %7192 = vmatprep.subr.bf16.mxu0 %v7762_v53  ;;  %7213 = vmatpush3.bf16.msra.mxu1 %v7761_v52 }
 0x1f3   : > { %7214 = vmatprep.subr.bf16.mxu1 %v7763_v54 }
 0x1f5   : > { %7193 = vmatpush3.bf16.msra.mxu0 %v7764_v55 }
 0x1f6   : > { %7194 = vmatprep.subr.bf16.mxu0 %v7766_v57  ;;  %7215 = vmatpush3.bf16.msra.mxu1 %v7765_v56 }
 0x1f7   : > { %7216 = vmatprep.subr.bf16.mxu1 %v7767_v58 }
 0x1f9   : > { %7195 = vmatpush3.bf16.msra.mxu0 %v7768_v59 }
 0x1fa   : > { %7196 = vmatprep.subr.bf16.mxu0 %v7770_v63  ;;  %7217 = vmatpush3.bf16.msra.mxu1 %v7769_v60 }
 0x1fb   : > { %v6894_v61 = vpop.f32.mrb[32].mxu0  ;;  %7218 = vmatprep.subr.bf16.mxu1 %v7771_v0 }
 0x1fc   : > { %v6916_v62 = vpop.f32.mrb[32].mxu1  ;;  %v6895_v1 = vpop.f32.mrb[33].mxu0 }
 0x1fd   : > { %v6917_v2 = vpop.f32.mrb[33].mxu1  ;;  %v6896_v3 = vadd.f32 %v6895_v1, %v6894_v61  ;;  %v6897_v5 = vpop.f32.mrb[34].mxu0  ;;  %7197 = vmatpush3.bf16.msra.mxu0 %v7772_v7 }
 0x1fe   : > { %v6918_v4 = vadd.f32 %v6917_v2, %v6916_v62  ;;  %v6919_v6 = vpop.f32.mrb[34].mxu1  ;;  %v6898_v9 = vpop.f32.mrb[35].mxu0  ;;  %7198 = vmatprep.subr.bf16.mxu0 %v7774_v12  ;;  %7219 = vmatpush3.bf16.msra.mxu1 %v7773_v8 }
 0x1ff   : > { %v6920_v10 = vpop.f32.mrb[35].mxu1  ;;  %v5316_v11 = vadd.f32 %v6896_v3, %v9343_v28  ;;  %7220 = vmatprep.subr.bf16.mxu1 %v7775_v13 }
 0x201   : > { %v5356_v14 = vadd.f32 %v6918_v4, %v5316_v11  ;;  %7199 = vmatpush3.bf16.msra.mxu0 %v7776_v15 }
 0x202   : > { %7200 = vmatprep.subr.bf16.mxu0 %v7778_v17  ;;  %7221 = vmatpush3.bf16.msra.mxu1 %v7777_v16 }
 0x203   : > { %7222 = vmatprep.subr.bf16.mxu1 %v7779_v18 }
 0x205   : > { %7201 = vmatpush3.bf16.msra.mxu0 %v7780_v19 }
 0x206   : > { %7223 = vmatpush3.bf16.msra.mxu1 %v7781_v20 }
 0x208   : > { %5874 = vmatmul.mubr.bf16.vlgmr.msra.gmra.mrb[60].mxu0 %v1495_v22 }
 0x209   : > { %5914 = vmatmul.mubr.bf16.vlgmr.msra.gmra.mrb[60].mxu1 %v1502_v25 }
 0x21b   : > { %v6938_v27 = vpop.f32.mrb[36].mxu0 }
 0x21c   : > { %v6960_v28 = vpop.f32.mrb[36].mxu1  ;;  %v6939_v29 = vpop.f32.mrb[37].mxu0 }
 0x21d   : > { %v6940_v30 = vadd.f32 %v6939_v29, %v6938_v27  ;;  %v6961_v31 = vpop.f32.mrb[37].mxu1  ;;  %v6941_v32 = vpop.f32.mrb[38].mxu0 }
 0x21e   : > { %v6962_v33 = vadd.f32 %v6961_v31, %v6960_v28  ;;  %v6963_v34 = vpop.f32.mrb[38].mxu1  ;;  %v6942_v35 = vpop.f32.mrb[39].mxu0 }
 0x21f   : > { %v5396_v36 = vadd.f32 %v6940_v30, %v5356_v14  ;;  %v6964_v37 = vpop.f32.mrb[39].mxu1 }
 0x221   : > { %v5436_v38 = vadd.f32 %v6962_v33, %v5396_v36 }
 0x23b   : > { %v6982_v39 = vpop.f32.mrb[40].mxu0 }
 0x23c   : > { %v6983_v41 = vpop.f32.mrb[41].mxu0  ;;  %v7004_v40 = vpop.f32.mrb[40].mxu1 }
 0x23d   : > { %v6984_v42 = vadd.f32 %v6983_v41, %v6982_v39  ;;  %v6985_v43 = vpop.f32.mrb[42].mxu0  ;;  %v7005_v44 = vpop.f32.mrb[41].mxu1 }
 0x23e   : > { %v6986_v45 = vpop.f32.mrb[43].mxu0  ;;  %v7006_v47 = vadd.f32 %v7005_v44, %v7004_v40  ;;  %v7007_v48 = vpop.f32.mrb[42].mxu1 }
 0x23f   : > { %v5476_v46 = vadd.f32 %v6984_v42, %v5436_v38  ;;  %v7008_v49 = vpop.f32.mrb[43].mxu1 }
 0x241   : > { %v5516_v50 = vadd.f32 %v7006_v47, %v5476_v46 }
 0x25b   : > { %v7026_v51 = vpop.f32.mrb[44].mxu0 }
 0x25c   : > { %v7027_v52 = vpop.f32.mrb[45].mxu0  ;;  %v7048_v53 = vpop.f32.mrb[44].mxu1 }
 0x25d   : > { %v7028_v54 = vadd.f32 %v7027_v52, %v7026_v51  ;;  %v7029_v55 = vpop.f32.mrb[46].mxu0  ;;  %v7049_v56 = vpop.f32.mrb[45].mxu1 }
 0x25e   : > { %v7030_v57 = vpop.f32.mrb[47].mxu0  ;;  %v7050_v59 = vadd.f32 %v7049_v56, %v7048_v53  ;;  %v7051_v60 = vpop.f32.mrb[46].mxu1 }
 0x25f   : > { %v5556_v58 = vadd.f32 %v7028_v54, %v5516_v50  ;;  %v7052_v61 = vpop.f32.mrb[47].mxu1 }
 0x261   : > { %v5596_v62 = vadd.f32 %v7050_v59, %v5556_v58 }
 0x27b   : > { %v7070_v63 = vpop.f32.mrb[48].mxu0 }
 0x27c   : > { %v7071_v0 = vpop.f32.mrb[49].mxu0  ;;  %v7092_v1 = vpop.f32.mrb[48].mxu1 }
 0x27d   : > { %v7072_v2 = vadd.f32 %v7071_v0, %v7070_v63  ;;  %v7073_v3 = vpop.f32.mrb[50].mxu0  ;;  %v7093_v4 = vpop.f32.mrb[49].mxu1 }
 0x27e   : > { %v7074_v5 = vpop.f32.mrb[51].mxu0  ;;  %v7094_v7 = vadd.f32 %v7093_v4, %v7092_v1  ;;  %v7095_v8 = vpop.f32.mrb[50].mxu1 }
 0x27f   : > { %v5636_v6 = vadd.f32 %v7072_v2, %v5596_v62  ;;  %v7096_v9 = vpop.f32.mrb[51].mxu1 }
 0x281   : > { %v5676_v10 = vadd.f32 %v7094_v7, %v5636_v6 }
 0x29b   : > { %v7114_v11 = vpop.f32.mrb[52].mxu0 }
 0x29c   : > { %v7115_v12 = vpop.f32.mrb[53].mxu0  ;;  %v7136_v13 = vpop.f32.mrb[52].mxu1 }
 0x29d   : > { %v7116_v14 = vadd.f32 %v7115_v12, %v7114_v11  ;;  %v7117_v15 = vpop.f32.mrb[54].mxu0  ;;  %v7137_v16 = vpop.f32.mrb[53].mxu1 }
 0x29e   : > { %v7118_v17 = vpop.f32.mrb[55].mxu0  ;;  %v7138_v19 = vadd.f32 %v7137_v16, %v7136_v13  ;;  %v7139_v20 = vpop.f32.mrb[54].mxu1 }
 0x29f   : > { %v5716_v18 = vadd.f32 %v7116_v14, %v5676_v10  ;;  %v7140_v21 = vpop.f32.mrb[55].mxu1 }
 0x2a1   : > { %v5756_v22 = vadd.f32 %v7138_v19, %v5716_v18 }
 0x2bb   : > { %v7158_v23 = vpop.f32.mrb[56].mxu0 }
 0x2bc   : > { %v7159_v24 = vpop.f32.mrb[57].mxu0  ;;  %v7180_v25 = vpop.f32.mrb[56].mxu1 }
 0x2bd   : > { %v7160_v26 = vadd.f32 %v7159_v24, %v7158_v23  ;;  %v7161_v27 = vpop.f32.mrb[58].mxu0  ;;  %v7181_v28 = vpop.f32.mrb[57].mxu1 }
 0x2be   : > { %v7162_v29 = vpop.f32.mrb[59].mxu0  ;;  %v7182_v31 = vadd.f32 %v7181_v28, %v7180_v25  ;;  %v7183_v32 = vpop.f32.mrb[58].mxu1 }
 0x2bf   : > { %v5796_v30 = vadd.f32 %v7160_v26, %v5756_v22  ;;  %v7184_v33 = vpop.f32.mrb[59].mxu1 }
 0x2c1   : > { %v5836_v34 = vadd.f32 %v7182_v31, %v5796_v30 }
 0x2db   : > { %v7202_v35 = vpop.f32.mrb[60].mxu0 }
 0x2dc   : > { %v7203_v36 = vpop.f32.mrb[61].mxu0  ;;  %v7224_v37 = vpop.f32.mrb[60].mxu1 }
 0x2dd   : > { %v7204_v38 = vadd.f32 %v7203_v36, %v7202_v35  ;;  %v7205_v39 = vpop.f32.mrb[62].mxu0  ;;  %v7225_v41 = vpop.f32.mrb[61].mxu1 }
 0x2de   : > { %v7206_v40 = vpop.f32.mrb[63].mxu0  ;;  %v7226_v43 = vadd.f32 %v7225_v41, %v7224_v37  ;;  %v7227_v44 = vpop.f32.mrb[62].mxu1 }
 0x2df   : > { %v5876_v42 = vadd.f32 %v7204_v38, %v5836_v34  ;;  %v7228_v45 = vpop.f32.mrb[63].mxu1 }
 0x2e1   : > { %v5916_v46 = vadd.f32 %v7226_v43, %v5876_v42 }
 0x2e3   : > { %5922 = vst.msk [vmem:[%s175_s29] sm:$0xf] %vm5921_vm0, %v5916_v46 }
 0x2e4 PF: > { %s12_s11 = sadd.s32 1, %s7805_s11   ;;  %s9479_s9 = smov %s7801_s10 }
 0x2e5   : > { %p9_p5 = scmp.ge.s32.totalorder %s12_s11, 4   ;;  %s9480_s10 = smov %s9482_s12 }
 0x2e7   :  { %11 = sbr.rel (!%p9_p5) target bundleno = 2 (0x2), region = 58 }

</bundles_post_ra>
